<compile_context>
chip_gen: v6e
topology: v6e:2x2x1
jax: 0.10.0
libtpu: 0.0.40
codegen_flags: <defaults>
</compile_context>

<pallas_src>
import jax
import jax.numpy as jnp
from jax.experimental import pallas as pl
from jax.experimental.pallas import tpu as pltpu

# ---------------- model config (small, consistent with the module) ----------
B = 2                    # batch
IMG = 16                 # image H == W
C_IN = 3                 # input channels
PATCH = 4                # patch size
D = 32                   # embed dim (backbone_feat_dim)
HEADS = 4
DH = D // HEADS
MLP = 4 * D
HP = IMG // PATCH
N_PATCH = HP * HP                  # 16 patches
TOKENS = N_PATCH + 1               # 17 tokens (cls + patches)
DEPTH = 2                          # total ViT blocks
GRAD_FROM_BLOCK = 1                # bottom = blocks[:1], top = blocks[1:] (fwd identical)
NUM_ATTR = 6                       # number of attribute heads

# ---------------- small in-kernel math helpers --------------------------------
_ERF_A = (0.254829592, -0.284496736, 1.421413741, -1.453152027, 1.061405429)


def _erf_approx(z):
    # Abramowitz & Stegun 7.1.26, |err| < 1.5e-7.
    # TODO(synk): exact lax.erf may not lower in Mosaic; polynomial used instead.
    sign = jnp.where(z >= 0.0, 1.0, -1.0)
    za = jnp.abs(z)
    t = 1.0 / (1.0 + 0.3275911 * za)
    a1, a2, a3, a4, a5 = _ERF_A
    poly = t * (a1 + t * (a2 + t * (a3 + t * (a4 + t * a5))))
    return sign * (1.0 - poly * jnp.exp(-za * za))


def _gelu(x):
    # torch nn.GELU() (exact erf form) via the polynomial erf above.
    return 0.5 * x * (1.0 + _erf_approx(x * 0.7071067811865476))


def _ln(x, w, b, eps):
    mu = jnp.mean(x, axis=-1, keepdims=True)
    var = jnp.mean((x - mu) ** 2, axis=-1, keepdims=True)
    return (x - mu) * jax.lax.rsqrt(var + eps) * w + b


def _l2n(x):
    # F.normalize(p=2, eps=1e-12)
    n = jnp.sqrt(jnp.sum(x * x, axis=-1, keepdims=True))
    return x / jnp.maximum(n, 1e-12)


# ---------------- the fused Pallas kernel --------------------------------------
def _fused_kernel(
        xp_ref, patch_w_ref, patch_b_ref, cls_ref, pos_ref,
        ln1_w_ref, ln1_b_ref, qkv_w_ref, qkv_b_ref, proj_w_ref, proj_b_ref,
        ln2_w_ref, ln2_b_ref, fc1_w_ref, fc1_b_ref, fc2_w_ref, fc2_b_ref,
        norm_w_ref, norm_b_ref,
        attr_w_ref, attr_b_ref, bn_w_ref, bn_b_ref, bn_m_ref, bn_v_ref,
        aln_w_ref, aln_b_ref,
        out_ref):
    f32 = jnp.float32

    # ---- patch embed: one lane-dense matmul over all batches ----------------
    tok = jnp.dot(xp_ref[...], patch_w_ref[...], preferred_element_type=f32)
    tok = tok + patch_b_ref[...]                       # (B*N_PATCH, D)

    pos = pos_ref[...]                                 # (TOKENS, D)
    cls_row = cls_ref[...] + pos[0:1, :]               # cls token + its pos embed
    pos_rest = pos[1:, :]                              # (N_PATCH, D)

    # per-batch token sequences kept as VMEM-resident values
    zs = []
    for b in range(B):
        patches = tok[b * N_PATCH:(b + 1) * N_PATCH, :] + pos_rest
        zs.append(jnp.concatenate([cls_row, patches], axis=0))   # (TOKENS, D)

    scale = 1.0 / (DH ** 0.5)

    # ---- ViT blocks (bottom blocks == vit_backbone, top == vit_branch) ------
    for l in range(DEPTH):
        ln1_w, ln1_b = ln1_w_ref[l], ln1_b_ref[l]
        qkv_w, qkv_b = qkv_w_ref[l], qkv_b_ref[l]
        proj_w, proj_b = proj_w_ref[l], proj_b_ref[l]
        ln2_w, ln2_b = ln2_w_ref[l], ln2_b_ref[l]
        fc1_w, fc1_b = fc1_w_ref[l], fc1_b_ref[l]
        fc2_w, fc2_b = fc2_w_ref[l], fc2_b_ref[l]
        for b in range(B):
            x = zs[b]                                            # (TOKENS, D)
            h = _ln(x, ln1_w, ln1_b, 1e-6)
            qkv = jnp.dot(h, qkv_w, preferred_element_type=f32) + qkv_b  # (T, 3D)
            # multi-head attention; the lane-concat of head outputs is folded
            # into the projection matmul (exactly equivalent).
            attn_proj = None
            for hh in range(HEADS):
                q = qkv[:, hh * DH:(hh + 1) * DH]
                k = qkv[:, D + hh * DH:D + (hh + 1) * DH]
                v = qkv[:, 2 * D + hh * DH:2 * D + (hh + 1) * DH]
                s = jnp.einsum('qd,kd->qk', q, k,
                               preferred_element_type=f32) * scale
                s = s - jnp.max(s, axis=-1, keepdims=True)
                p = jnp.exp(s)
                p = p * (1.0 / jnp.sum(p, axis=-1, keepdims=True))
                o_h = jnp.dot(p, v, preferred_element_type=f32)          # (T, DH)
                c = jnp.dot(o_h, proj_w[hh * DH:(hh + 1) * DH, :],
                            preferred_element_type=f32)                  # (T, D)
                attn_proj = c if attn_proj is None else attn_proj + c
            x = x + attn_proj + proj_b
            h = _ln(x, ln2_w, ln2_b, 1e-6)
            h = jnp.dot(h, fc1_w, preferred_element_type=f32) + fc1_b    # (T, MLP)
            h = _gelu(h)
            x = x + jnp.dot(h, fc2_w, preferred_element_type=f32) + fc2_b
            zs[b] = x

    # ---- contrastive head + fused attribute bank ----------------------------
    norm_w, norm_b = norm_w_ref[...], norm_b_ref[...]
    attr_w, attr_b = attr_w_ref[...], attr_b_ref[...]
    # eval-mode BatchNorm1d folded to a per-channel affine (channels-last).
    bn_scale = bn_w_ref[...] * jax.lax.rsqrt(bn_v_ref[...] + 1e-5)
    bn_shift = bn_b_ref[...] - bn_m_ref[...] * bn_scale
    aln_w, aln_b = aln_w_ref[...], aln_b_ref[...]

    rows = []
    for b in range(B):
        co = _ln(zs[b], norm_w, norm_b, 1e-6)        # (TOKENS, D)
        co_out = co[0:1, :]                          # (1, D)  cls embedding
        att = co[1:, :]                              # (L, D)  channels-last patches
        # all NUM_ATTR 1x1 convs merged into one lane-dense matmul (L, A*D)
        y = jnp.dot(att, attr_w, preferred_element_type=f32) + attr_b
        y = y * bn_scale + bn_shift                  # BatchNorm1d (eval stats)
        y = _gelu(y)
        pooled = jnp.max(y, axis=0, keepdims=True)   # AdaptiveMaxPool1d(1)+Flatten
        heads, logits = [], []
        for a in range(NUM_ATTR):
            seg = pooled[:, a * D:(a + 1) * D]
            seg = _ln(seg, aln_w[:, a * D:(a + 1) * D],
                      aln_b[:, a * D:(a + 1) * D], 1e-5)     # per-head LayerNorm
            seg = _l2n(seg)                                  # F.normalize per head
            heads.append(seg)
            logits.append(jnp.sum(seg * co_out, axis=-1, keepdims=True))  # (1,1)
        # softmax over the attribute dimension (torch dim=1)
        m = logits[0]
        for a in range(1, NUM_ATTR):
            m = jnp.maximum(m, logits[a])
        exps = [jnp.exp(lg - m) for lg in logits]
        den = exps[0]
        for a in range(1, NUM_ATTR):
            den = den + exps[a]
        inv = 1.0 / den
        a_t_ab = heads[0] * (exps[0] * inv)                  # == bmm(a^T, ab)
        for a in range(1, NUM_ATTR):
            a_t_ab = a_t_ab + heads[a] * (exps[a] * inv)
        rows.append(jnp.concatenate([_l2n(co_out), _l2n(a_t_ab)], axis=1))  # (1,2D)

    out_ref[...] = jnp.concatenate(rows, axis=0)             # (B, 2D)


# ---------------- forward wrapper ----------------------------------------------
@jax.jit
def attribute_transformer9_forward(x_nchw, params):
    """Eval-mode forward with concat=True -> (B, 2*D)."""
    b = x_nchw.shape[0]
    # Patchify (Conv2d(C_IN, D, PATCH, stride=PATCH) as unfold + matmul).
    # TODO(synk): the rank-6 unfold transpose stays outside the kernel (tiny op,
    # no clean Mosaic lowering for rank-6 transposes).
    xp = x_nchw.reshape(b, C_IN, HP, PATCH, HP, PATCH)
    xp = xp.transpose(0, 2, 4, 1, 3, 5).reshape(b * N_PATCH, C_IN * PATCH * PATCH)
    args = (
        xp, params['patch_w'], params['patch_b'], params['cls_token'],
        params['pos_embed'],
        params['ln1_w'], params['ln1_b'], params['qkv_w'], params['qkv_b'],
        params['proj_w'], params['proj_b'], params['ln2_w'], params['ln2_b'],
        params['fc1_w'], params['fc1_b'], params['fc2_w'], params['fc2_b'],
        params['norm_w'], params['norm_b'],
        params['attr_w'], params['attr_b'],
        params['attr_bn_w'], params['attr_bn_b'],
        params['attr_bn_mean'], params['attr_bn_var'],
        params['attr_ln_w'], params['attr_ln_b'],
    )
    # No grid: single kernel invocation, every operand fully VMEM-resident.
    return pl.pallas_call(
        _fused_kernel,
        out_shape=jax.ShapeDtypeStruct((b, 2 * D), jnp.float32),
        compiler_params=pltpu.CompilerParams(),
    )(*args)


# ---------------- deterministic parameter init ----------------------------------
def init_params(key):
    """Parameters stored in kernel/matmul-ready layouts:
    - linear / conv1x1 weights are (in, out)
    - per-ViT-block params are stacked along a leading DEPTH axis
    - the NUM_ATTR attribute heads are concatenated along the last (lane) axis:
      attr_w[i, a*D + o] == torch_conv1d_weight[head a][o, i, 0]
    """
    keys = iter(jax.random.split(key, 64))

    def nrm(shape, scale=0.02):
        return scale * jax.random.normal(next(keys), shape, dtype=jnp.float32)

    ad = NUM_ATTR * D
    return dict(
        patch_w=nrm((C_IN * PATCH * PATCH, D)),   # Conv2d patch embed, (in, out)
        patch_b=nrm((1, D)),
        cls_token=nrm((1, D)),
        pos_embed=nrm((TOKENS, D)),
        # per-block ViT params, stacked over DEPTH
        ln1_w=jnp.ones((DEPTH, 1, D), jnp.float32),
        ln1_b=jnp.zeros((DEPTH, 1, D), jnp.float32),
        qkv_w=nrm((DEPTH, D, 3 * D)), qkv_b=nrm((DEPTH, 1, 3 * D)),
        proj_w=nrm((DEPTH, D, D)), proj_b=nrm((DEPTH, 1, D)),
        ln2_w=jnp.ones((DEPTH, 1, D), jnp.float32),
        ln2_b=jnp.zeros((DEPTH, 1, D), jnp.float32),
        fc1_w=nrm((DEPTH, D, MLP)), fc1_b=nrm((DEPTH, 1, MLP)),
        fc2_w=nrm((DEPTH, MLP, D)), fc2_b=nrm((DEPTH, 1, D)),
        norm_w=jnp.ones((1, D), jnp.float32), norm_b=jnp.zeros((1, D), jnp.float32),
        # attribute_subnet bank, all heads concatenated along the lane axis
        attr_w=nrm((D, ad)),
        attr_b=nrm((1, ad)),
        attr_bn_w=jnp.ones((1, ad), jnp.float32),
        attr_bn_b=jnp.zeros((1, ad), jnp.float32),
        attr_bn_mean=jnp.zeros((1, ad), jnp.float32),   # eval running stats
        attr_bn_var=jnp.ones((1, ad), jnp.float32),
        attr_ln_w=jnp.ones((1, ad), jnp.float32),
        attr_ln_b=jnp.zeros((1, ad), jnp.float32),
    )


if __name__ == "__main__":
    key = jax.random.PRNGKey(0)
    pkey, xkey = jax.random.split(key)
    params = init_params(pkey)
    x = jax.random.normal(xkey, (B, C_IN, IMG, IMG), dtype=jnp.float32)
    out = attribute_transformer9_forward(x, params)
    out = jax.block_until_ready(out)
    assert out.shape == (B, 2 * D), out.shape
    assert bool(jnp.all(jnp.isfinite(out)))
    # first half is l2-normalized co_embedding_out -> unit norm
    nrm0 = jnp.sqrt(jnp.sum(out[:, :D] ** 2, axis=-1))
    assert bool(jnp.all(jnp.abs(nrm0 - 1.0) < 1e-3))
    print("KERNEL_OK")
</pallas_src>

<mosaic_0001>
module attributes {stable_mosaic.version = 11 : i64} {
  func.func @_fused_kernel(%arg0: memref<32x48xf32, #tpu.memory_space<vmem>>, %arg1: memref<48x32xf32, #tpu.memory_space<vmem>>, %arg2: memref<1x32xf32, #tpu.memory_space<vmem>>, %arg3: memref<1x32xf32, #tpu.memory_space<vmem>>, %arg4: memref<17x32xf32, #tpu.memory_space<vmem>>, %arg5: memref<2x1x32xf32, #tpu.memory_space<vmem>>, %arg6: memref<2x1x32xf32, #tpu.memory_space<vmem>>, %arg7: memref<2x32x96xf32, #tpu.memory_space<vmem>>, %arg8: memref<2x1x96xf32, #tpu.memory_space<vmem>>, %arg9: memref<2x32x32xf32, #tpu.memory_space<vmem>>, %arg10: memref<2x1x32xf32, #tpu.memory_space<vmem>>, %arg11: memref<2x1x32xf32, #tpu.memory_space<vmem>>, %arg12: memref<2x1x32xf32, #tpu.memory_space<vmem>>, %arg13: memref<2x32x128xf32, #tpu.memory_space<vmem>>, %arg14: memref<2x1x128xf32, #tpu.memory_space<vmem>>, %arg15: memref<2x128x32xf32, #tpu.memory_space<vmem>>, %arg16: memref<2x1x32xf32, #tpu.memory_space<vmem>>, %arg17: memref<1x32xf32, #tpu.memory_space<vmem>>, %arg18: memref<1x32xf32, #tpu.memory_space<vmem>>, %arg19: memref<32x192xf32, #tpu.memory_space<vmem>>, %arg20: memref<1x192xf32, #tpu.memory_space<vmem>>, %arg21: memref<1x192xf32, #tpu.memory_space<vmem>>, %arg22: memref<1x192xf32, #tpu.memory_space<vmem>>, %arg23: memref<1x192xf32, #tpu.memory_space<vmem>>, %arg24: memref<1x192xf32, #tpu.memory_space<vmem>>, %arg25: memref<1x192xf32, #tpu.memory_space<vmem>>, %arg26: memref<1x192xf32, #tpu.memory_space<vmem>>, %arg27: memref<2x64xf32, #tpu.memory_space<vmem>>) attributes {dimension_semantics = [], scalar_prefetch = 0 : i64, scratch_operands = 0 : i64, tpu.core_type = #tpu.core_type<tc>} {
    %c0 = arith.constant 0 : index
    %c0_0 = arith.constant 0 : index
    %0 = vector.load %arg0[%c0, %c0_0] : memref<32x48xf32, #tpu.memory_space<vmem>>, vector<32x48xf32>
    %c0_1 = arith.constant 0 : index
    %c0_2 = arith.constant 0 : index
    %1 = vector.load %arg1[%c0_1, %c0_2] : memref<48x32xf32, #tpu.memory_space<vmem>>, vector<48x32xf32>
    %cst = arith.constant dense<0.000000e+00> : vector<32x32xf32>
    %2 = tpu.matmul %0, %1, %cst {dimension_numbers = #tpu.dot_dimension_numbers<[1], [0], [0], [1], [0, 0, 1, 1], [], []>} : vector<32x48xf32>, vector<48x32xf32>, vector<32x32xf32> -> vector<32x32xf32>
    %c0_3 = arith.constant 0 : index
    %c0_4 = arith.constant 0 : index
    %3 = vector.load %arg2[%c0_3, %c0_4] : memref<1x32xf32, #tpu.memory_space<vmem>>, vector<1x32xf32>
    %4 = vector.broadcast %3 : vector<1x32xf32> to vector<32x32xf32>
    %5 = arith.addf %2, %4 : vector<32x32xf32>
    %c0_5 = arith.constant 0 : index
    %c0_6 = arith.constant 0 : index
    %6 = vector.load %arg4[%c0_5, %c0_6] : memref<17x32xf32, #tpu.memory_space<vmem>>, vector<17x32xf32>
    %c0_7 = arith.constant 0 : index
    %c0_8 = arith.constant 0 : index
    %7 = vector.load %arg3[%c0_7, %c0_8] : memref<1x32xf32, #tpu.memory_space<vmem>>, vector<1x32xf32>
    %8 = vector.extract_strided_slice %6 {offsets = [0, 0], sizes = [1, 32], strides = [1, 1]} : vector<17x32xf32> to vector<1x32xf32>
    %9 = arith.addf %7, %8 : vector<1x32xf32>
    %10 = vector.extract_strided_slice %6 {offsets = [1, 0], sizes = [16, 32], strides = [1, 1]} : vector<17x32xf32> to vector<16x32xf32>
    %11 = vector.extract_strided_slice %5 {offsets = [0, 0], sizes = [16, 32], strides = [1, 1]} : vector<32x32xf32> to vector<16x32xf32>
    %12 = arith.addf %11, %10 : vector<16x32xf32>
    %13 = tpu.concatenate %9, %12 in 0 : vector<1x32xf32>, vector<16x32xf32> -> vector<17x32xf32>
    %14 = vector.extract_strided_slice %5 {offsets = [16, 0], sizes = [16, 32], strides = [1, 1]} : vector<32x32xf32> to vector<16x32xf32>
    %15 = arith.addf %14, %10 : vector<16x32xf32>
    %16 = tpu.concatenate %9, %15 in 0 : vector<1x32xf32>, vector<16x32xf32> -> vector<17x32xf32>
    %c0_9 = arith.constant 0 : index
    %c0_10 = arith.constant 0 : index
    %c0_11 = arith.constant 0 : index
    %17 = vector.load %arg5[%c0_9, %c0_10, %c0_11] : memref<2x1x32xf32, #tpu.memory_space<vmem>>, vector<1x1x32xf32>
    %18 = vector.shape_cast %17 : vector<1x1x32xf32> to vector<1x32xf32>
    %c0_12 = arith.constant 0 : index
    %c0_13 = arith.constant 0 : index
    %c0_14 = arith.constant 0 : index
    %19 = vector.load %arg6[%c0_12, %c0_13, %c0_14] : memref<2x1x32xf32, #tpu.memory_space<vmem>>, vector<1x1x32xf32>
    %20 = vector.shape_cast %19 : vector<1x1x32xf32> to vector<1x32xf32>
    %c0_15 = arith.constant 0 : index
    %c0_16 = arith.constant 0 : index
    %c0_17 = arith.constant 0 : index
    %21 = vector.load %arg7[%c0_15, %c0_16, %c0_17] : memref<2x32x96xf32, #tpu.memory_space<vmem>>, vector<1x32x96xf32>
    %22 = vector.shape_cast %21 : vector<1x32x96xf32> to vector<32x96xf32>
    %c0_18 = arith.constant 0 : index
    %c0_19 = arith.constant 0 : index
    %c0_20 = arith.constant 0 : index
    %23 = vector.load %arg8[%c0_18, %c0_19, %c0_20] : memref<2x1x96xf32, #tpu.memory_space<vmem>>, vector<1x1x96xf32>
    %24 = vector.shape_cast %23 : vector<1x1x96xf32> to vector<1x96xf32>
    %c0_21 = arith.constant 0 : index
    %c0_22 = arith.constant 0 : index
    %c0_23 = arith.constant 0 : index
    %25 = vector.load %arg9[%c0_21, %c0_22, %c0_23] : memref<2x32x32xf32, #tpu.memory_space<vmem>>, vector<1x32x32xf32>
    %26 = vector.shape_cast %25 : vector<1x32x32xf32> to vector<32x32xf32>
    %c0_24 = arith.constant 0 : index
    %c0_25 = arith.constant 0 : index
    %c0_26 = arith.constant 0 : index
    %27 = vector.load %arg10[%c0_24, %c0_25, %c0_26] : memref<2x1x32xf32, #tpu.memory_space<vmem>>, vector<1x1x32xf32>
    %28 = vector.shape_cast %27 : vector<1x1x32xf32> to vector<1x32xf32>
    %c0_27 = arith.constant 0 : index
    %c0_28 = arith.constant 0 : index
    %c0_29 = arith.constant 0 : index
    %29 = vector.load %arg11[%c0_27, %c0_28, %c0_29] : memref<2x1x32xf32, #tpu.memory_space<vmem>>, vector<1x1x32xf32>
    %30 = vector.shape_cast %29 : vector<1x1x32xf32> to vector<1x32xf32>
    %c0_30 = arith.constant 0 : index
    %c0_31 = arith.constant 0 : index
    %c0_32 = arith.constant 0 : index
    %31 = vector.load %arg12[%c0_30, %c0_31, %c0_32] : memref<2x1x32xf32, #tpu.memory_space<vmem>>, vector<1x1x32xf32>
    %32 = vector.shape_cast %31 : vector<1x1x32xf32> to vector<1x32xf32>
    %c0_33 = arith.constant 0 : index
    %c0_34 = arith.constant 0 : index
    %c0_35 = arith.constant 0 : index
    %33 = vector.load %arg13[%c0_33, %c0_34, %c0_35] : memref<2x32x128xf32, #tpu.memory_space<vmem>>, vector<1x32x128xf32>
    %34 = vector.shape_cast %33 : vector<1x32x128xf32> to vector<32x128xf32>
    %c0_36 = arith.constant 0 : index
    %c0_37 = arith.constant 0 : index
    %c0_38 = arith.constant 0 : index
    %35 = vector.load %arg14[%c0_36, %c0_37, %c0_38] : memref<2x1x128xf32, #tpu.memory_space<vmem>>, vector<1x1x128xf32>
    %36 = vector.shape_cast %35 : vector<1x1x128xf32> to vector<1x128xf32>
    %c0_39 = arith.constant 0 : index
    %c0_40 = arith.constant 0 : index
    %c0_41 = arith.constant 0 : index
    %37 = vector.load %arg15[%c0_39, %c0_40, %c0_41] : memref<2x128x32xf32, #tpu.memory_space<vmem>>, vector<1x128x32xf32>
    %38 = vector.shape_cast %37 : vector<1x128x32xf32> to vector<128x32xf32>
    %c0_42 = arith.constant 0 : index
    %c0_43 = arith.constant 0 : index
    %c0_44 = arith.constant 0 : index
    %39 = vector.load %arg16[%c0_42, %c0_43, %c0_44] : memref<2x1x32xf32, #tpu.memory_space<vmem>>, vector<1x1x32xf32>
    %40 = vector.shape_cast %39 : vector<1x1x32xf32> to vector<1x32xf32>
    %cst_45 = arith.constant dense<0.000000e+00> : vector<17xf32>
    %41 = vector.multi_reduction <add>, %13, %cst_45 [1] : vector<17x32xf32> to vector<17xf32>
    %42 = vector.shape_cast %41 : vector<17xf32> to vector<17x1xf32>
    %cst_46 = arith.constant 3.200000e+01 : f32
    %43 = vector.broadcast %cst_46 : f32 to vector<17x1xf32>
    %44 = arith.divf %42, %43 : vector<17x1xf32>
    %45 = vector.broadcast %44 : vector<17x1xf32> to vector<17x32xf32>
    %46 = arith.subf %13, %45 : vector<17x32xf32>
    %47 = arith.mulf %46, %46 : vector<17x32xf32>
    %cst_47 = arith.constant dense<0.000000e+00> : vector<17xf32>
    %48 = vector.multi_reduction <add>, %47, %cst_47 [1] : vector<17x32xf32> to vector<17xf32>
    %49 = vector.shape_cast %48 : vector<17xf32> to vector<17x1xf32>
    %cst_48 = arith.constant 3.200000e+01 : f32
    %50 = vector.broadcast %cst_48 : f32 to vector<17x1xf32>
    %51 = arith.divf %49, %50 : vector<17x1xf32>
    %52 = vector.broadcast %44 : vector<17x1xf32> to vector<17x32xf32>
    %53 = arith.subf %13, %52 : vector<17x32xf32>
    %cst_49 = arith.constant 9.99999997E-7 : f32
    %54 = vector.broadcast %cst_49 : f32 to vector<17x1xf32>
    %55 = arith.addf %51, %54 : vector<17x1xf32>
    %56 = math.rsqrt %55 : vector<17x1xf32>
    %57 = vector.broadcast %56 : vector<17x1xf32> to vector<17x32xf32>
    %58 = arith.mulf %53, %57 : vector<17x32xf32>
    %59 = vector.broadcast %18 : vector<1x32xf32> to vector<17x32xf32>
    %60 = arith.mulf %58, %59 : vector<17x32xf32>
    %61 = vector.broadcast %20 : vector<1x32xf32> to vector<17x32xf32>
    %62 = arith.addf %60, %61 : vector<17x32xf32>
    %cst_50 = arith.constant dense<0.000000e+00> : vector<17x96xf32>
    %63 = tpu.matmul %62, %22, %cst_50 {dimension_numbers = #tpu.dot_dimension_numbers<[1], [0], [0], [1], [0, 0, 1, 1], [], []>} : vector<17x32xf32>, vector<32x96xf32>, vector<17x96xf32> -> vector<17x96xf32>
    %64 = vector.broadcast %24 : vector<1x96xf32> to vector<17x96xf32>
    %65 = arith.addf %63, %64 : vector<17x96xf32>
    %66 = vector.extract_strided_slice %65 {offsets = [0, 0], sizes = [17, 8], strides = [1, 1]} : vector<17x96xf32> to vector<17x8xf32>
    %67 = vector.extract_strided_slice %65 {offsets = [0, 32], sizes = [17, 8], strides = [1, 1]} : vector<17x96xf32> to vector<17x8xf32>
    %68 = vector.extract_strided_slice %65 {offsets = [0, 64], sizes = [17, 8], strides = [1, 1]} : vector<17x96xf32> to vector<17x8xf32>
    "tpu.trace_start"() <{level = 10 : i32, message = "qd,kd->qk"}> : () -> ()
    %cst_51 = arith.constant dense<0.000000e+00> : vector<17x17xf32>
    %69 = tpu.matmul %66, %67, %cst_51 {dimension_numbers = #tpu.dot_dimension_numbers<[1], [1], [0], [0], [0, 0, 1, 0], [], []>} : vector<17x8xf32>, vector<17x8xf32>, vector<17x17xf32> -> vector<17x17xf32>
    "tpu.trace_stop"() : () -> ()
    %cst_52 = arith.constant 0.353553385 : f32
    %70 = vector.broadcast %cst_52 : f32 to vector<17x17xf32>
    %71 = arith.mulf %69, %70 : vector<17x17xf32>
    %cst_53 = arith.constant dense<0xFF800000> : vector<17xf32>
    %72 = vector.multi_reduction <maximumf>, %71, %cst_53 [1] : vector<17x17xf32> to vector<17xf32>
    %73 = vector.shape_cast %72 : vector<17xf32> to vector<17x1xf32>
    %74 = vector.broadcast %73 : vector<17x1xf32> to vector<17x17xf32>
    %75 = arith.subf %71, %74 : vector<17x17xf32>
    %76 = math.exp %75 : vector<17x17xf32>
    %cst_54 = arith.constant dense<0.000000e+00> : vector<17xf32>
    %77 = vector.multi_reduction <add>, %76, %cst_54 [1] : vector<17x17xf32> to vector<17xf32>
    %78 = vector.shape_cast %77 : vector<17xf32> to vector<17x1xf32>
    %cst_55 = arith.constant 1.000000e+00 : f32
    %79 = vector.broadcast %cst_55 : f32 to vector<17x1xf32>
    %80 = arith.divf %79, %78 : vector<17x1xf32>
    %81 = vector.broadcast %80 : vector<17x1xf32> to vector<17x17xf32>
    %82 = arith.mulf %76, %81 : vector<17x17xf32>
    %cst_56 = arith.constant dense<0.000000e+00> : vector<17x8xf32>
    %83 = tpu.matmul %82, %68, %cst_56 {dimension_numbers = #tpu.dot_dimension_numbers<[1], [0], [0], [1], [0, 0, 1, 1], [], []>} : vector<17x17xf32>, vector<17x8xf32>, vector<17x8xf32> -> vector<17x8xf32>
    %84 = vector.extract_strided_slice %26 {offsets = [0, 0], sizes = [8, 32], strides = [1, 1]} : vector<32x32xf32> to vector<8x32xf32>
    %cst_57 = arith.constant dense<0.000000e+00> : vector<17x32xf32>
    %85 = tpu.matmul %83, %84, %cst_57 {dimension_numbers = #tpu.dot_dimension_numbers<[1], [0], [0], [1], [0, 0, 1, 1], [], []>} : vector<17x8xf32>, vector<8x32xf32>, vector<17x32xf32> -> vector<17x32xf32>
    %86 = vector.extract_strided_slice %65 {offsets = [0, 8], sizes = [17, 8], strides = [1, 1]} : vector<17x96xf32> to vector<17x8xf32>
    %87 = vector.extract_strided_slice %65 {offsets = [0, 40], sizes = [17, 8], strides = [1, 1]} : vector<17x96xf32> to vector<17x8xf32>
    %88 = vector.extract_strided_slice %65 {offsets = [0, 72], sizes = [17, 8], strides = [1, 1]} : vector<17x96xf32> to vector<17x8xf32>
    "tpu.trace_start"() <{level = 10 : i32, message = "qd,kd->qk"}> : () -> ()
    %cst_58 = arith.constant dense<0.000000e+00> : vector<17x17xf32>
    %89 = tpu.matmul %86, %87, %cst_58 {dimension_numbers = #tpu.dot_dimension_numbers<[1], [1], [0], [0], [0, 0, 1, 0], [], []>} : vector<17x8xf32>, vector<17x8xf32>, vector<17x17xf32> -> vector<17x17xf32>
    "tpu.trace_stop"() : () -> ()
    %cst_59 = arith.constant 0.353553385 : f32
    %90 = vector.broadcast %cst_59 : f32 to vector<17x17xf32>
    %91 = arith.mulf %89, %90 : vector<17x17xf32>
    %cst_60 = arith.constant dense<0xFF800000> : vector<17xf32>
    %92 = vector.multi_reduction <maximumf>, %91, %cst_60 [1] : vector<17x17xf32> to vector<17xf32>
    %93 = vector.shape_cast %92 : vector<17xf32> to vector<17x1xf32>
    %94 = vector.broadcast %93 : vector<17x1xf32> to vector<17x17xf32>
    %95 = arith.subf %91, %94 : vector<17x17xf32>
    %96 = math.exp %95 : vector<17x17xf32>
    %cst_61 = arith.constant dense<0.000000e+00> : vector<17xf32>
    %97 = vector.multi_reduction <add>, %96, %cst_61 [1] : vector<17x17xf32> to vector<17xf32>
    %98 = vector.shape_cast %97 : vector<17xf32> to vector<17x1xf32>
    %cst_62 = arith.constant 1.000000e+00 : f32
    %99 = vector.broadcast %cst_62 : f32 to vector<17x1xf32>
    %100 = arith.divf %99, %98 : vector<17x1xf32>
    %101 = vector.broadcast %100 : vector<17x1xf32> to vector<17x17xf32>
    %102 = arith.mulf %96, %101 : vector<17x17xf32>
    %cst_63 = arith.constant dense<0.000000e+00> : vector<17x8xf32>
    %103 = tpu.matmul %102, %88, %cst_63 {dimension_numbers = #tpu.dot_dimension_numbers<[1], [0], [0], [1], [0, 0, 1, 1], [], []>} : vector<17x17xf32>, vector<17x8xf32>, vector<17x8xf32> -> vector<17x8xf32>
    %104 = vector.extract_strided_slice %26 {offsets = [8, 0], sizes = [8, 32], strides = [1, 1]} : vector<32x32xf32> to vector<8x32xf32>
    %cst_64 = arith.constant dense<0.000000e+00> : vector<17x32xf32>
    %105 = tpu.matmul %103, %104, %cst_64 {dimension_numbers = #tpu.dot_dimension_numbers<[1], [0], [0], [1], [0, 0, 1, 1], [], []>} : vector<17x8xf32>, vector<8x32xf32>, vector<17x32xf32> -> vector<17x32xf32>
    %106 = arith.addf %85, %105 : vector<17x32xf32>
    %107 = vector.extract_strided_slice %65 {offsets = [0, 16], sizes = [17, 8], strides = [1, 1]} : vector<17x96xf32> to vector<17x8xf32>
    %108 = vector.extract_strided_slice %65 {offsets = [0, 48], sizes = [17, 8], strides = [1, 1]} : vector<17x96xf32> to vector<17x8xf32>
    %109 = vector.extract_strided_slice %65 {offsets = [0, 80], sizes = [17, 8], strides = [1, 1]} : vector<17x96xf32> to vector<17x8xf32>
    "tpu.trace_start"() <{level = 10 : i32, message = "qd,kd->qk"}> : () -> ()
    %cst_65 = arith.constant dense<0.000000e+00> : vector<17x17xf32>
    %110 = tpu.matmul %107, %108, %cst_65 {dimension_numbers = #tpu.dot_dimension_numbers<[1], [1], [0], [0], [0, 0, 1, 0], [], []>} : vector<17x8xf32>, vector<17x8xf32>, vector<17x17xf32> -> vector<17x17xf32>
    "tpu.trace_stop"() : () -> ()
    %cst_66 = arith.constant 0.353553385 : f32
    %111 = vector.broadcast %cst_66 : f32 to vector<17x17xf32>
    %112 = arith.mulf %110, %111 : vector<17x17xf32>
    %cst_67 = arith.constant dense<0xFF800000> : vector<17xf32>
    %113 = vector.multi_reduction <maximumf>, %112, %cst_67 [1] : vector<17x17xf32> to vector<17xf32>
    %114 = vector.shape_cast %113 : vector<17xf32> to vector<17x1xf32>
    %115 = vector.broadcast %114 : vector<17x1xf32> to vector<17x17xf32>
    %116 = arith.subf %112, %115 : vector<17x17xf32>
    %117 = math.exp %116 : vector<17x17xf32>
    %cst_68 = arith.constant dense<0.000000e+00> : vector<17xf32>
    %118 = vector.multi_reduction <add>, %117, %cst_68 [1] : vector<17x17xf32> to vector<17xf32>
    %119 = vector.shape_cast %118 : vector<17xf32> to vector<17x1xf32>
    %cst_69 = arith.constant 1.000000e+00 : f32
    %120 = vector.broadcast %cst_69 : f32 to vector<17x1xf32>
    %121 = arith.divf %120, %119 : vector<17x1xf32>
    %122 = vector.broadcast %121 : vector<17x1xf32> to vector<17x17xf32>
    %123 = arith.mulf %117, %122 : vector<17x17xf32>
    %cst_70 = arith.constant dense<0.000000e+00> : vector<17x8xf32>
    %124 = tpu.matmul %123, %109, %cst_70 {dimension_numbers = #tpu.dot_dimension_numbers<[1], [0], [0], [1], [0, 0, 1, 1], [], []>} : vector<17x17xf32>, vector<17x8xf32>, vector<17x8xf32> -> vector<17x8xf32>
    %125 = vector.extract_strided_slice %26 {offsets = [16, 0], sizes = [8, 32], strides = [1, 1]} : vector<32x32xf32> to vector<8x32xf32>
    %cst_71 = arith.constant dense<0.000000e+00> : vector<17x32xf32>
    %126 = tpu.matmul %124, %125, %cst_71 {dimension_numbers = #tpu.dot_dimension_numbers<[1], [0], [0], [1], [0, 0, 1, 1], [], []>} : vector<17x8xf32>, vector<8x32xf32>, vector<17x32xf32> -> vector<17x32xf32>
    %127 = arith.addf %106, %126 : vector<17x32xf32>
    %128 = vector.extract_strided_slice %65 {offsets = [0, 24], sizes = [17, 8], strides = [1, 1]} : vector<17x96xf32> to vector<17x8xf32>
    %129 = vector.extract_strided_slice %65 {offsets = [0, 56], sizes = [17, 8], strides = [1, 1]} : vector<17x96xf32> to vector<17x8xf32>
    %130 = vector.extract_strided_slice %65 {offsets = [0, 88], sizes = [17, 8], strides = [1, 1]} : vector<17x96xf32> to vector<17x8xf32>
    "tpu.trace_start"() <{level = 10 : i32, message = "qd,kd->qk"}> : () -> ()
    %cst_72 = arith.constant dense<0.000000e+00> : vector<17x17xf32>
    %131 = tpu.matmul %128, %129, %cst_72 {dimension_numbers = #tpu.dot_dimension_numbers<[1], [1], [0], [0], [0, 0, 1, 0], [], []>} : vector<17x8xf32>, vector<17x8xf32>, vector<17x17xf32> -> vector<17x17xf32>
    "tpu.trace_stop"() : () -> ()
    %cst_73 = arith.constant 0.353553385 : f32
    %132 = vector.broadcast %cst_73 : f32 to vector<17x17xf32>
    %133 = arith.mulf %131, %132 : vector<17x17xf32>
    %cst_74 = arith.constant dense<0xFF800000> : vector<17xf32>
    %134 = vector.multi_reduction <maximumf>, %133, %cst_74 [1] : vector<17x17xf32> to vector<17xf32>
    %135 = vector.shape_cast %134 : vector<17xf32> to vector<17x1xf32>
    %136 = vector.broadcast %135 : vector<17x1xf32> to vector<17x17xf32>
    %137 = arith.subf %133, %136 : vector<17x17xf32>
    %138 = math.exp %137 : vector<17x17xf32>
    %cst_75 = arith.constant dense<0.000000e+00> : vector<17xf32>
    %139 = vector.multi_reduction <add>, %138, %cst_75 [1] : vector<17x17xf32> to vector<17xf32>
    %140 = vector.shape_cast %139 : vector<17xf32> to vector<17x1xf32>
    %cst_76 = arith.constant 1.000000e+00 : f32
    %141 = vector.broadcast %cst_76 : f32 to vector<17x1xf32>
    %142 = arith.divf %141, %140 : vector<17x1xf32>
    %143 = vector.broadcast %142 : vector<17x1xf32> to vector<17x17xf32>
    %144 = arith.mulf %138, %143 : vector<17x17xf32>
    %cst_77 = arith.constant dense<0.000000e+00> : vector<17x8xf32>
    %145 = tpu.matmul %144, %130, %cst_77 {dimension_numbers = #tpu.dot_dimension_numbers<[1], [0], [0], [1], [0, 0, 1, 1], [], []>} : vector<17x17xf32>, vector<17x8xf32>, vector<17x8xf32> -> vector<17x8xf32>
    %146 = vector.extract_strided_slice %26 {offsets = [24, 0], sizes = [8, 32], strides = [1, 1]} : vector<32x32xf32> to vector<8x32xf32>
    %cst_78 = arith.constant dense<0.000000e+00> : vector<17x32xf32>
    %147 = tpu.matmul %145, %146, %cst_78 {dimension_numbers = #tpu.dot_dimension_numbers<[1], [0], [0], [1], [0, 0, 1, 1], [], []>} : vector<17x8xf32>, vector<8x32xf32>, vector<17x32xf32> -> vector<17x32xf32>
    %148 = arith.addf %127, %147 : vector<17x32xf32>
    %149 = arith.addf %13, %148 : vector<17x32xf32>
    %150 = vector.broadcast %28 : vector<1x32xf32> to vector<17x32xf32>
    %151 = arith.addf %149, %150 : vector<17x32xf32>
    %cst_79 = arith.constant dense<0.000000e+00> : vector<17xf32>
    %152 = vector.multi_reduction <add>, %151, %cst_79 [1] : vector<17x32xf32> to vector<17xf32>
    %153 = vector.shape_cast %152 : vector<17xf32> to vector<17x1xf32>
    %cst_80 = arith.constant 3.200000e+01 : f32
    %154 = vector.broadcast %cst_80 : f32 to vector<17x1xf32>
    %155 = arith.divf %153, %154 : vector<17x1xf32>
    %156 = vector.broadcast %155 : vector<17x1xf32> to vector<17x32xf32>
    %157 = arith.subf %151, %156 : vector<17x32xf32>
    %158 = arith.mulf %157, %157 : vector<17x32xf32>
    %cst_81 = arith.constant dense<0.000000e+00> : vector<17xf32>
    %159 = vector.multi_reduction <add>, %158, %cst_81 [1] : vector<17x32xf32> to vector<17xf32>
    %160 = vector.shape_cast %159 : vector<17xf32> to vector<17x1xf32>
    %cst_82 = arith.constant 3.200000e+01 : f32
    %161 = vector.broadcast %cst_82 : f32 to vector<17x1xf32>
    %162 = arith.divf %160, %161 : vector<17x1xf32>
    %163 = vector.broadcast %155 : vector<17x1xf32> to vector<17x32xf32>
    %164 = arith.subf %151, %163 : vector<17x32xf32>
    %cst_83 = arith.constant 9.99999997E-7 : f32
    %165 = vector.broadcast %cst_83 : f32 to vector<17x1xf32>
    %166 = arith.addf %162, %165 : vector<17x1xf32>
    %167 = math.rsqrt %166 : vector<17x1xf32>
    %168 = vector.broadcast %167 : vector<17x1xf32> to vector<17x32xf32>
    %169 = arith.mulf %164, %168 : vector<17x32xf32>
    %170 = vector.broadcast %30 : vector<1x32xf32> to vector<17x32xf32>
    %171 = arith.mulf %169, %170 : vector<17x32xf32>
    %172 = vector.broadcast %32 : vector<1x32xf32> to vector<17x32xf32>
    %173 = arith.addf %171, %172 : vector<17x32xf32>
    %cst_84 = arith.constant dense<0.000000e+00> : vector<17x128xf32>
    %174 = tpu.matmul %173, %34, %cst_84 {dimension_numbers = #tpu.dot_dimension_numbers<[1], [0], [0], [1], [0, 0, 1, 1], [], []>} : vector<17x32xf32>, vector<32x128xf32>, vector<17x128xf32> -> vector<17x128xf32>
    %175 = vector.broadcast %36 : vector<1x128xf32> to vector<17x128xf32>
    %176 = arith.addf %174, %175 : vector<17x128xf32>
    %cst_85 = arith.constant 5.000000e-01 : f32
    %177 = vector.broadcast %cst_85 : f32 to vector<17x128xf32>
    %178 = arith.mulf %177, %176 : vector<17x128xf32>
    %cst_86 = arith.constant 0.707106769 : f32
    %179 = vector.broadcast %cst_86 : f32 to vector<17x128xf32>
    %180 = arith.mulf %176, %179 : vector<17x128xf32>
    %cst_87 = arith.constant 0.000000e+00 : f32
    %181 = vector.broadcast %cst_87 : f32 to vector<17x128xf32>
    %182 = arith.cmpf oge, %180, %181 : vector<17x128xf32>
    %cst_88 = arith.constant 1.000000e+00 : f32
    %cst_89 = arith.constant -1.000000e+00 : f32
    %183 = vector.broadcast %cst_88 : f32 to vector<17x128xf32>
    %184 = vector.broadcast %cst_89 : f32 to vector<17x128xf32>
    %185 = arith.select %182, %183, %184 : vector<17x128xi1>, vector<17x128xf32>
    %186 = math.absf %180 : vector<17x128xf32>
    %cst_90 = arith.constant 0.327591091 : f32
    %187 = vector.broadcast %cst_90 : f32 to vector<17x128xf32>
    %188 = arith.mulf %187, %186 : vector<17x128xf32>
    %cst_91 = arith.constant 1.000000e+00 : f32
    %189 = vector.broadcast %cst_91 : f32 to vector<17x128xf32>
    %190 = arith.addf %189, %188 : vector<17x128xf32>
    %cst_92 = arith.constant 1.000000e+00 : f32
    %191 = vector.broadcast %cst_92 : f32 to vector<17x128xf32>
    %192 = arith.divf %191, %190 : vector<17x128xf32>
    %cst_93 = arith.constant 1.06140542 : f32
    %193 = vector.broadcast %cst_93 : f32 to vector<17x128xf32>
    %194 = arith.mulf %192, %193 : vector<17x128xf32>
    %cst_94 = arith.constant -1.45315206 : f32
    %195 = vector.broadcast %cst_94 : f32 to vector<17x128xf32>
    %196 = arith.addf %195, %194 : vector<17x128xf32>
    %197 = arith.mulf %192, %196 : vector<17x128xf32>
    %cst_95 = arith.constant 1.42141378 : f32
    %198 = vector.broadcast %cst_95 : f32 to vector<17x128xf32>
    %199 = arith.addf %198, %197 : vector<17x128xf32>
    %200 = arith.mulf %192, %199 : vector<17x128xf32>
    %cst_96 = arith.constant -0.284496725 : f32
    %201 = vector.broadcast %cst_96 : f32 to vector<17x128xf32>
    %202 = arith.addf %201, %200 : vector<17x128xf32>
    %203 = arith.mulf %192, %202 : vector<17x128xf32>
    %cst_97 = arith.constant 0.254829586 : f32
    %204 = vector.broadcast %cst_97 : f32 to vector<17x128xf32>
    %205 = arith.addf %204, %203 : vector<17x128xf32>
    %206 = arith.mulf %192, %205 : vector<17x128xf32>
    %cst_98 = arith.constant 0.000000e+00 : f32
    %207 = vector.broadcast %cst_98 : f32 to vector<17x128xf32>
    %208 = arith.subf %207, %186 : vector<17x128xf32>
    %209 = arith.mulf %208, %186 : vector<17x128xf32>
    %210 = math.exp %209 : vector<17x128xf32>
    %211 = arith.mulf %206, %210 : vector<17x128xf32>
    %cst_99 = arith.constant 1.000000e+00 : f32
    %212 = vector.broadcast %cst_99 : f32 to vector<17x128xf32>
    %213 = arith.subf %212, %211 : vector<17x128xf32>
    %214 = arith.mulf %185, %213 : vector<17x128xf32>
    %cst_100 = arith.constant 1.000000e+00 : f32
    %215 = vector.broadcast %cst_100 : f32 to vector<17x128xf32>
    %216 = arith.addf %215, %214 : vector<17x128xf32>
    %217 = arith.mulf %178, %216 : vector<17x128xf32>
    %cst_101 = arith.constant dense<0.000000e+00> : vector<17x32xf32>
    %218 = tpu.matmul %217, %38, %cst_101 {dimension_numbers = #tpu.dot_dimension_numbers<[1], [0], [0], [1], [0, 0, 1, 1], [], []>} : vector<17x128xf32>, vector<128x32xf32>, vector<17x32xf32> -> vector<17x32xf32>
    %219 = arith.addf %151, %218 : vector<17x32xf32>
    %220 = vector.broadcast %40 : vector<1x32xf32> to vector<17x32xf32>
    %221 = arith.addf %219, %220 : vector<17x32xf32>
    %cst_102 = arith.constant dense<0.000000e+00> : vector<17xf32>
    %222 = vector.multi_reduction <add>, %16, %cst_102 [1] : vector<17x32xf32> to vector<17xf32>
    %223 = vector.shape_cast %222 : vector<17xf32> to vector<17x1xf32>
    %cst_103 = arith.constant 3.200000e+01 : f32
    %224 = vector.broadcast %cst_103 : f32 to vector<17x1xf32>
    %225 = arith.divf %223, %224 : vector<17x1xf32>
    %226 = vector.broadcast %225 : vector<17x1xf32> to vector<17x32xf32>
    %227 = arith.subf %16, %226 : vector<17x32xf32>
    %228 = arith.mulf %227, %227 : vector<17x32xf32>
    %cst_104 = arith.constant dense<0.000000e+00> : vector<17xf32>
    %229 = vector.multi_reduction <add>, %228, %cst_104 [1] : vector<17x32xf32> to vector<17xf32>
    %230 = vector.shape_cast %229 : vector<17xf32> to vector<17x1xf32>
    %cst_105 = arith.constant 3.200000e+01 : f32
    %231 = vector.broadcast %cst_105 : f32 to vector<17x1xf32>
    %232 = arith.divf %230, %231 : vector<17x1xf32>
    %233 = vector.broadcast %225 : vector<17x1xf32> to vector<17x32xf32>
    %234 = arith.subf %16, %233 : vector<17x32xf32>
    %cst_106 = arith.constant 9.99999997E-7 : f32
    %235 = vector.broadcast %cst_106 : f32 to vector<17x1xf32>
    %236 = arith.addf %232, %235 : vector<17x1xf32>
    %237 = math.rsqrt %236 : vector<17x1xf32>
    %238 = vector.broadcast %237 : vector<17x1xf32> to vector<17x32xf32>
    %239 = arith.mulf %234, %238 : vector<17x32xf32>
    %240 = vector.broadcast %18 : vector<1x32xf32> to vector<17x32xf32>
    %241 = arith.mulf %239, %240 : vector<17x32xf32>
    %242 = vector.broadcast %20 : vector<1x32xf32> to vector<17x32xf32>
    %243 = arith.addf %241, %242 : vector<17x32xf32>
    %cst_107 = arith.constant dense<0.000000e+00> : vector<17x96xf32>
    %244 = tpu.matmul %243, %22, %cst_107 {dimension_numbers = #tpu.dot_dimension_numbers<[1], [0], [0], [1], [0, 0, 1, 1], [], []>} : vector<17x32xf32>, vector<32x96xf32>, vector<17x96xf32> -> vector<17x96xf32>
    %245 = vector.broadcast %24 : vector<1x96xf32> to vector<17x96xf32>
    %246 = arith.addf %244, %245 : vector<17x96xf32>
    %247 = vector.extract_strided_slice %246 {offsets = [0, 0], sizes = [17, 8], strides = [1, 1]} : vector<17x96xf32> to vector<17x8xf32>
    %248 = vector.extract_strided_slice %246 {offsets = [0, 32], sizes = [17, 8], strides = [1, 1]} : vector<17x96xf32> to vector<17x8xf32>
    %249 = vector.extract_strided_slice %246 {offsets = [0, 64], sizes = [17, 8], strides = [1, 1]} : vector<17x96xf32> to vector<17x8xf32>
    "tpu.trace_start"() <{level = 10 : i32, message = "qd,kd->qk"}> : () -> ()
    %cst_108 = arith.constant dense<0.000000e+00> : vector<17x17xf32>
    %250 = tpu.matmul %247, %248, %cst_108 {dimension_numbers = #tpu.dot_dimension_numbers<[1], [1], [0], [0], [0, 0, 1, 0], [], []>} : vector<17x8xf32>, vector<17x8xf32>, vector<17x17xf32> -> vector<17x17xf32>
    "tpu.trace_stop"() : () -> ()
    %cst_109 = arith.constant 0.353553385 : f32
    %251 = vector.broadcast %cst_109 : f32 to vector<17x17xf32>
    %252 = arith.mulf %250, %251 : vector<17x17xf32>
    %cst_110 = arith.constant dense<0xFF800000> : vector<17xf32>
    %253 = vector.multi_reduction <maximumf>, %252, %cst_110 [1] : vector<17x17xf32> to vector<17xf32>
    %254 = vector.shape_cast %253 : vector<17xf32> to vector<17x1xf32>
    %255 = vector.broadcast %254 : vector<17x1xf32> to vector<17x17xf32>
    %256 = arith.subf %252, %255 : vector<17x17xf32>
    %257 = math.exp %256 : vector<17x17xf32>
    %cst_111 = arith.constant dense<0.000000e+00> : vector<17xf32>
    %258 = vector.multi_reduction <add>, %257, %cst_111 [1] : vector<17x17xf32> to vector<17xf32>
    %259 = vector.shape_cast %258 : vector<17xf32> to vector<17x1xf32>
    %cst_112 = arith.constant 1.000000e+00 : f32
    %260 = vector.broadcast %cst_112 : f32 to vector<17x1xf32>
    %261 = arith.divf %260, %259 : vector<17x1xf32>
    %262 = vector.broadcast %261 : vector<17x1xf32> to vector<17x17xf32>
    %263 = arith.mulf %257, %262 : vector<17x17xf32>
    %cst_113 = arith.constant dense<0.000000e+00> : vector<17x8xf32>
    %264 = tpu.matmul %263, %249, %cst_113 {dimension_numbers = #tpu.dot_dimension_numbers<[1], [0], [0], [1], [0, 0, 1, 1], [], []>} : vector<17x17xf32>, vector<17x8xf32>, vector<17x8xf32> -> vector<17x8xf32>
    %265 = vector.extract_strided_slice %26 {offsets = [0, 0], sizes = [8, 32], strides = [1, 1]} : vector<32x32xf32> to vector<8x32xf32>
    %cst_114 = arith.constant dense<0.000000e+00> : vector<17x32xf32>
    %266 = tpu.matmul %264, %265, %cst_114 {dimension_numbers = #tpu.dot_dimension_numbers<[1], [0], [0], [1], [0, 0, 1, 1], [], []>} : vector<17x8xf32>, vector<8x32xf32>, vector<17x32xf32> -> vector<17x32xf32>
    %267 = vector.extract_strided_slice %246 {offsets = [0, 8], sizes = [17, 8], strides = [1, 1]} : vector<17x96xf32> to vector<17x8xf32>
    %268 = vector.extract_strided_slice %246 {offsets = [0, 40], sizes = [17, 8], strides = [1, 1]} : vector<17x96xf32> to vector<17x8xf32>
    %269 = vector.extract_strided_slice %246 {offsets = [0, 72], sizes = [17, 8], strides = [1, 1]} : vector<17x96xf32> to vector<17x8xf32>
    "tpu.trace_start"() <{level = 10 : i32, message = "qd,kd->qk"}> : () -> ()
    %cst_115 = arith.constant dense<0.000000e+00> : vector<17x17xf32>
    %270 = tpu.matmul %267, %268, %cst_115 {dimension_numbers = #tpu.dot_dimension_numbers<[1], [1], [0], [0], [0, 0, 1, 0], [], []>} : vector<17x8xf32>, vector<17x8xf32>, vector<17x17xf32> -> vector<17x17xf32>
    "tpu.trace_stop"() : () -> ()
    %cst_116 = arith.constant 0.353553385 : f32
    %271 = vector.broadcast %cst_116 : f32 to vector<17x17xf32>
    %272 = arith.mulf %270, %271 : vector<17x17xf32>
    %cst_117 = arith.constant dense<0xFF800000> : vector<17xf32>
    %273 = vector.multi_reduction <maximumf>, %272, %cst_117 [1] : vector<17x17xf32> to vector<17xf32>
    %274 = vector.shape_cast %273 : vector<17xf32> to vector<17x1xf32>
    %275 = vector.broadcast %274 : vector<17x1xf32> to vector<17x17xf32>
    %276 = arith.subf %272, %275 : vector<17x17xf32>
    %277 = math.exp %276 : vector<17x17xf32>
    %cst_118 = arith.constant dense<0.000000e+00> : vector<17xf32>
    %278 = vector.multi_reduction <add>, %277, %cst_118 [1] : vector<17x17xf32> to vector<17xf32>
    %279 = vector.shape_cast %278 : vector<17xf32> to vector<17x1xf32>
    %cst_119 = arith.constant 1.000000e+00 : f32
    %280 = vector.broadcast %cst_119 : f32 to vector<17x1xf32>
    %281 = arith.divf %280, %279 : vector<17x1xf32>
    %282 = vector.broadcast %281 : vector<17x1xf32> to vector<17x17xf32>
    %283 = arith.mulf %277, %282 : vector<17x17xf32>
    %cst_120 = arith.constant dense<0.000000e+00> : vector<17x8xf32>
    %284 = tpu.matmul %283, %269, %cst_120 {dimension_numbers = #tpu.dot_dimension_numbers<[1], [0], [0], [1], [0, 0, 1, 1], [], []>} : vector<17x17xf32>, vector<17x8xf32>, vector<17x8xf32> -> vector<17x8xf32>
    %285 = vector.extract_strided_slice %26 {offsets = [8, 0], sizes = [8, 32], strides = [1, 1]} : vector<32x32xf32> to vector<8x32xf32>
    %cst_121 = arith.constant dense<0.000000e+00> : vector<17x32xf32>
    %286 = tpu.matmul %284, %285, %cst_121 {dimension_numbers = #tpu.dot_dimension_numbers<[1], [0], [0], [1], [0, 0, 1, 1], [], []>} : vector<17x8xf32>, vector<8x32xf32>, vector<17x32xf32> -> vector<17x32xf32>
    %287 = arith.addf %266, %286 : vector<17x32xf32>
    %288 = vector.extract_strided_slice %246 {offsets = [0, 16], sizes = [17, 8], strides = [1, 1]} : vector<17x96xf32> to vector<17x8xf32>
    %289 = vector.extract_strided_slice %246 {offsets = [0, 48], sizes = [17, 8], strides = [1, 1]} : vector<17x96xf32> to vector<17x8xf32>
    %290 = vector.extract_strided_slice %246 {offsets = [0, 80], sizes = [17, 8], strides = [1, 1]} : vector<17x96xf32> to vector<17x8xf32>
    "tpu.trace_start"() <{level = 10 : i32, message = "qd,kd->qk"}> : () -> ()
    %cst_122 = arith.constant dense<0.000000e+00> : vector<17x17xf32>
    %291 = tpu.matmul %288, %289, %cst_122 {dimension_numbers = #tpu.dot_dimension_numbers<[1], [1], [0], [0], [0, 0, 1, 0], [], []>} : vector<17x8xf32>, vector<17x8xf32>, vector<17x17xf32> -> vector<17x17xf32>
    "tpu.trace_stop"() : () -> ()
    %cst_123 = arith.constant 0.353553385 : f32
    %292 = vector.broadcast %cst_123 : f32 to vector<17x17xf32>
    %293 = arith.mulf %291, %292 : vector<17x17xf32>
    %cst_124 = arith.constant dense<0xFF800000> : vector<17xf32>
    %294 = vector.multi_reduction <maximumf>, %293, %cst_124 [1] : vector<17x17xf32> to vector<17xf32>
    %295 = vector.shape_cast %294 : vector<17xf32> to vector<17x1xf32>
    %296 = vector.broadcast %295 : vector<17x1xf32> to vector<17x17xf32>
    %297 = arith.subf %293, %296 : vector<17x17xf32>
    %298 = math.exp %297 : vector<17x17xf32>
    %cst_125 = arith.constant dense<0.000000e+00> : vector<17xf32>
    %299 = vector.multi_reduction <add>, %298, %cst_125 [1] : vector<17x17xf32> to vector<17xf32>
    %300 = vector.shape_cast %299 : vector<17xf32> to vector<17x1xf32>
    %cst_126 = arith.constant 1.000000e+00 : f32
    %301 = vector.broadcast %cst_126 : f32 to vector<17x1xf32>
    %302 = arith.divf %301, %300 : vector<17x1xf32>
    %303 = vector.broadcast %302 : vector<17x1xf32> to vector<17x17xf32>
    %304 = arith.mulf %298, %303 : vector<17x17xf32>
    %cst_127 = arith.constant dense<0.000000e+00> : vector<17x8xf32>
    %305 = tpu.matmul %304, %290, %cst_127 {dimension_numbers = #tpu.dot_dimension_numbers<[1], [0], [0], [1], [0, 0, 1, 1], [], []>} : vector<17x17xf32>, vector<17x8xf32>, vector<17x8xf32> -> vector<17x8xf32>
    %306 = vector.extract_strided_slice %26 {offsets = [16, 0], sizes = [8, 32], strides = [1, 1]} : vector<32x32xf32> to vector<8x32xf32>
    %cst_128 = arith.constant dense<0.000000e+00> : vector<17x32xf32>
    %307 = tpu.matmul %305, %306, %cst_128 {dimension_numbers = #tpu.dot_dimension_numbers<[1], [0], [0], [1], [0, 0, 1, 1], [], []>} : vector<17x8xf32>, vector<8x32xf32>, vector<17x32xf32> -> vector<17x32xf32>
    %308 = arith.addf %287, %307 : vector<17x32xf32>
    %309 = vector.extract_strided_slice %246 {offsets = [0, 24], sizes = [17, 8], strides = [1, 1]} : vector<17x96xf32> to vector<17x8xf32>
    %310 = vector.extract_strided_slice %246 {offsets = [0, 56], sizes = [17, 8], strides = [1, 1]} : vector<17x96xf32> to vector<17x8xf32>
    %311 = vector.extract_strided_slice %246 {offsets = [0, 88], sizes = [17, 8], strides = [1, 1]} : vector<17x96xf32> to vector<17x8xf32>
    "tpu.trace_start"() <{level = 10 : i32, message = "qd,kd->qk"}> : () -> ()
    %cst_129 = arith.constant dense<0.000000e+00> : vector<17x17xf32>
    %312 = tpu.matmul %309, %310, %cst_129 {dimension_numbers = #tpu.dot_dimension_numbers<[1], [1], [0], [0], [0, 0, 1, 0], [], []>} : vector<17x8xf32>, vector<17x8xf32>, vector<17x17xf32> -> vector<17x17xf32>
    "tpu.trace_stop"() : () -> ()
    %cst_130 = arith.constant 0.353553385 : f32
    %313 = vector.broadcast %cst_130 : f32 to vector<17x17xf32>
    %314 = arith.mulf %312, %313 : vector<17x17xf32>
    %cst_131 = arith.constant dense<0xFF800000> : vector<17xf32>
    %315 = vector.multi_reduction <maximumf>, %314, %cst_131 [1] : vector<17x17xf32> to vector<17xf32>
    %316 = vector.shape_cast %315 : vector<17xf32> to vector<17x1xf32>
    %317 = vector.broadcast %316 : vector<17x1xf32> to vector<17x17xf32>
    %318 = arith.subf %314, %317 : vector<17x17xf32>
    %319 = math.exp %318 : vector<17x17xf32>
    %cst_132 = arith.constant dense<0.000000e+00> : vector<17xf32>
    %320 = vector.multi_reduction <add>, %319, %cst_132 [1] : vector<17x17xf32> to vector<17xf32>
    %321 = vector.shape_cast %320 : vector<17xf32> to vector<17x1xf32>
    %cst_133 = arith.constant 1.000000e+00 : f32
    %322 = vector.broadcast %cst_133 : f32 to vector<17x1xf32>
    %323 = arith.divf %322, %321 : vector<17x1xf32>
    %324 = vector.broadcast %323 : vector<17x1xf32> to vector<17x17xf32>
    %325 = arith.mulf %319, %324 : vector<17x17xf32>
    %cst_134 = arith.constant dense<0.000000e+00> : vector<17x8xf32>
    %326 = tpu.matmul %325, %311, %cst_134 {dimension_numbers = #tpu.dot_dimension_numbers<[1], [0], [0], [1], [0, 0, 1, 1], [], []>} : vector<17x17xf32>, vector<17x8xf32>, vector<17x8xf32> -> vector<17x8xf32>
    %327 = vector.extract_strided_slice %26 {offsets = [24, 0], sizes = [8, 32], strides = [1, 1]} : vector<32x32xf32> to vector<8x32xf32>
    %cst_135 = arith.constant dense<0.000000e+00> : vector<17x32xf32>
    %328 = tpu.matmul %326, %327, %cst_135 {dimension_numbers = #tpu.dot_dimension_numbers<[1], [0], [0], [1], [0, 0, 1, 1], [], []>} : vector<17x8xf32>, vector<8x32xf32>, vector<17x32xf32> -> vector<17x32xf32>
    %329 = arith.addf %308, %328 : vector<17x32xf32>
    %330 = arith.addf %16, %329 : vector<17x32xf32>
    %331 = vector.broadcast %28 : vector<1x32xf32> to vector<17x32xf32>
    %332 = arith.addf %330, %331 : vector<17x32xf32>
    %cst_136 = arith.constant dense<0.000000e+00> : vector<17xf32>
    %333 = vector.multi_reduction <add>, %332, %cst_136 [1] : vector<17x32xf32> to vector<17xf32>
    %334 = vector.shape_cast %333 : vector<17xf32> to vector<17x1xf32>
    %cst_137 = arith.constant 3.200000e+01 : f32
    %335 = vector.broadcast %cst_137 : f32 to vector<17x1xf32>
    %336 = arith.divf %334, %335 : vector<17x1xf32>
    %337 = vector.broadcast %336 : vector<17x1xf32> to vector<17x32xf32>
    %338 = arith.subf %332, %337 : vector<17x32xf32>
    %339 = arith.mulf %338, %338 : vector<17x32xf32>
    %cst_138 = arith.constant dense<0.000000e+00> : vector<17xf32>
    %340 = vector.multi_reduction <add>, %339, %cst_138 [1] : vector<17x32xf32> to vector<17xf32>
    %341 = vector.shape_cast %340 : vector<17xf32> to vector<17x1xf32>
    %cst_139 = arith.constant 3.200000e+01 : f32
    %342 = vector.broadcast %cst_139 : f32 to vector<17x1xf32>
    %343 = arith.divf %341, %342 : vector<17x1xf32>
    %344 = vector.broadcast %336 : vector<17x1xf32> to vector<17x32xf32>
    %345 = arith.subf %332, %344 : vector<17x32xf32>
    %cst_140 = arith.constant 9.99999997E-7 : f32
    %346 = vector.broadcast %cst_140 : f32 to vector<17x1xf32>
    %347 = arith.addf %343, %346 : vector<17x1xf32>
    %348 = math.rsqrt %347 : vector<17x1xf32>
    %349 = vector.broadcast %348 : vector<17x1xf32> to vector<17x32xf32>
    %350 = arith.mulf %345, %349 : vector<17x32xf32>
    %351 = vector.broadcast %30 : vector<1x32xf32> to vector<17x32xf32>
    %352 = arith.mulf %350, %351 : vector<17x32xf32>
    %353 = vector.broadcast %32 : vector<1x32xf32> to vector<17x32xf32>
    %354 = arith.addf %352, %353 : vector<17x32xf32>
    %cst_141 = arith.constant dense<0.000000e+00> : vector<17x128xf32>
    %355 = tpu.matmul %354, %34, %cst_141 {dimension_numbers = #tpu.dot_dimension_numbers<[1], [0], [0], [1], [0, 0, 1, 1], [], []>} : vector<17x32xf32>, vector<32x128xf32>, vector<17x128xf32> -> vector<17x128xf32>
    %356 = vector.broadcast %36 : vector<1x128xf32> to vector<17x128xf32>
    %357 = arith.addf %355, %356 : vector<17x128xf32>
    %cst_142 = arith.constant 5.000000e-01 : f32
    %358 = vector.broadcast %cst_142 : f32 to vector<17x128xf32>
    %359 = arith.mulf %358, %357 : vector<17x128xf32>
    %cst_143 = arith.constant 0.707106769 : f32
    %360 = vector.broadcast %cst_143 : f32 to vector<17x128xf32>
    %361 = arith.mulf %357, %360 : vector<17x128xf32>
    %cst_144 = arith.constant 0.000000e+00 : f32
    %362 = vector.broadcast %cst_144 : f32 to vector<17x128xf32>
    %363 = arith.cmpf oge, %361, %362 : vector<17x128xf32>
    %cst_145 = arith.constant 1.000000e+00 : f32
    %cst_146 = arith.constant -1.000000e+00 : f32
    %364 = vector.broadcast %cst_145 : f32 to vector<17x128xf32>
    %365 = vector.broadcast %cst_146 : f32 to vector<17x128xf32>
    %366 = arith.select %363, %364, %365 : vector<17x128xi1>, vector<17x128xf32>
    %367 = math.absf %361 : vector<17x128xf32>
    %cst_147 = arith.constant 0.327591091 : f32
    %368 = vector.broadcast %cst_147 : f32 to vector<17x128xf32>
    %369 = arith.mulf %368, %367 : vector<17x128xf32>
    %cst_148 = arith.constant 1.000000e+00 : f32
    %370 = vector.broadcast %cst_148 : f32 to vector<17x128xf32>
    %371 = arith.addf %370, %369 : vector<17x128xf32>
    %cst_149 = arith.constant 1.000000e+00 : f32
    %372 = vector.broadcast %cst_149 : f32 to vector<17x128xf32>
    %373 = arith.divf %372, %371 : vector<17x128xf32>
    %cst_150 = arith.constant 1.06140542 : f32
    %374 = vector.broadcast %cst_150 : f32 to vector<17x128xf32>
    %375 = arith.mulf %373, %374 : vector<17x128xf32>
    %cst_151 = arith.constant -1.45315206 : f32
    %376 = vector.broadcast %cst_151 : f32 to vector<17x128xf32>
    %377 = arith.addf %376, %375 : vector<17x128xf32>
    %378 = arith.mulf %373, %377 : vector<17x128xf32>
    %cst_152 = arith.constant 1.42141378 : f32
    %379 = vector.broadcast %cst_152 : f32 to vector<17x128xf32>
    %380 = arith.addf %379, %378 : vector<17x128xf32>
    %381 = arith.mulf %373, %380 : vector<17x128xf32>
    %cst_153 = arith.constant -0.284496725 : f32
    %382 = vector.broadcast %cst_153 : f32 to vector<17x128xf32>
    %383 = arith.addf %382, %381 : vector<17x128xf32>
    %384 = arith.mulf %373, %383 : vector<17x128xf32>
    %cst_154 = arith.constant 0.254829586 : f32
    %385 = vector.broadcast %cst_154 : f32 to vector<17x128xf32>
    %386 = arith.addf %385, %384 : vector<17x128xf32>
    %387 = arith.mulf %373, %386 : vector<17x128xf32>
    %cst_155 = arith.constant 0.000000e+00 : f32
    %388 = vector.broadcast %cst_155 : f32 to vector<17x128xf32>
    %389 = arith.subf %388, %367 : vector<17x128xf32>
    %390 = arith.mulf %389, %367 : vector<17x128xf32>
    %391 = math.exp %390 : vector<17x128xf32>
    %392 = arith.mulf %387, %391 : vector<17x128xf32>
    %cst_156 = arith.constant 1.000000e+00 : f32
    %393 = vector.broadcast %cst_156 : f32 to vector<17x128xf32>
    %394 = arith.subf %393, %392 : vector<17x128xf32>
    %395 = arith.mulf %366, %394 : vector<17x128xf32>
    %cst_157 = arith.constant 1.000000e+00 : f32
    %396 = vector.broadcast %cst_157 : f32 to vector<17x128xf32>
    %397 = arith.addf %396, %395 : vector<17x128xf32>
    %398 = arith.mulf %359, %397 : vector<17x128xf32>
    %cst_158 = arith.constant dense<0.000000e+00> : vector<17x32xf32>
    %399 = tpu.matmul %398, %38, %cst_158 {dimension_numbers = #tpu.dot_dimension_numbers<[1], [0], [0], [1], [0, 0, 1, 1], [], []>} : vector<17x128xf32>, vector<128x32xf32>, vector<17x32xf32> -> vector<17x32xf32>
    %400 = arith.addf %332, %399 : vector<17x32xf32>
    %401 = vector.broadcast %40 : vector<1x32xf32> to vector<17x32xf32>
    %402 = arith.addf %400, %401 : vector<17x32xf32>
    %c1 = arith.constant 1 : index
    %c0_159 = arith.constant 0 : index
    %c0_160 = arith.constant 0 : index
    %403 = vector.load %arg5[%c1, %c0_159, %c0_160] : memref<2x1x32xf32, #tpu.memory_space<vmem>>, vector<1x1x32xf32>
    %404 = vector.shape_cast %403 : vector<1x1x32xf32> to vector<1x32xf32>
    %c1_161 = arith.constant 1 : index
    %c0_162 = arith.constant 0 : index
    %c0_163 = arith.constant 0 : index
    %405 = vector.load %arg6[%c1_161, %c0_162, %c0_163] : memref<2x1x32xf32, #tpu.memory_space<vmem>>, vector<1x1x32xf32>
    %406 = vector.shape_cast %405 : vector<1x1x32xf32> to vector<1x32xf32>
    %c1_164 = arith.constant 1 : index
    %c0_165 = arith.constant 0 : index
    %c0_166 = arith.constant 0 : index
    %407 = vector.load %arg7[%c1_164, %c0_165, %c0_166] : memref<2x32x96xf32, #tpu.memory_space<vmem>>, vector<1x32x96xf32>
    %408 = vector.shape_cast %407 : vector<1x32x96xf32> to vector<32x96xf32>
    %c1_167 = arith.constant 1 : index
    %c0_168 = arith.constant 0 : index
    %c0_169 = arith.constant 0 : index
    %409 = vector.load %arg8[%c1_167, %c0_168, %c0_169] : memref<2x1x96xf32, #tpu.memory_space<vmem>>, vector<1x1x96xf32>
    %410 = vector.shape_cast %409 : vector<1x1x96xf32> to vector<1x96xf32>
    %c1_170 = arith.constant 1 : index
    %c0_171 = arith.constant 0 : index
    %c0_172 = arith.constant 0 : index
    %411 = vector.load %arg9[%c1_170, %c0_171, %c0_172] : memref<2x32x32xf32, #tpu.memory_space<vmem>>, vector<1x32x32xf32>
    %412 = vector.shape_cast %411 : vector<1x32x32xf32> to vector<32x32xf32>
    %c1_173 = arith.constant 1 : index
    %c0_174 = arith.constant 0 : index
    %c0_175 = arith.constant 0 : index
    %413 = vector.load %arg10[%c1_173, %c0_174, %c0_175] : memref<2x1x32xf32, #tpu.memory_space<vmem>>, vector<1x1x32xf32>
    %414 = vector.shape_cast %413 : vector<1x1x32xf32> to vector<1x32xf32>
    %c1_176 = arith.constant 1 : index
    %c0_177 = arith.constant 0 : index
    %c0_178 = arith.constant 0 : index
    %415 = vector.load %arg11[%c1_176, %c0_177, %c0_178] : memref<2x1x32xf32, #tpu.memory_space<vmem>>, vector<1x1x32xf32>
    %416 = vector.shape_cast %415 : vector<1x1x32xf32> to vector<1x32xf32>
    %c1_179 = arith.constant 1 : index
    %c0_180 = arith.constant 0 : index
    %c0_181 = arith.constant 0 : index
    %417 = vector.load %arg12[%c1_179, %c0_180, %c0_181] : memref<2x1x32xf32, #tpu.memory_space<vmem>>, vector<1x1x32xf32>
    %418 = vector.shape_cast %417 : vector<1x1x32xf32> to vector<1x32xf32>
    %c1_182 = arith.constant 1 : index
    %c0_183 = arith.constant 0 : index
    %c0_184 = arith.constant 0 : index
    %419 = vector.load %arg13[%c1_182, %c0_183, %c0_184] : memref<2x32x128xf32, #tpu.memory_space<vmem>>, vector<1x32x128xf32>
    %420 = vector.shape_cast %419 : vector<1x32x128xf32> to vector<32x128xf32>
    %c1_185 = arith.constant 1 : index
    %c0_186 = arith.constant 0 : index
    %c0_187 = arith.constant 0 : index
    %421 = vector.load %arg14[%c1_185, %c0_186, %c0_187] : memref<2x1x128xf32, #tpu.memory_space<vmem>>, vector<1x1x128xf32>
    %422 = vector.shape_cast %421 : vector<1x1x128xf32> to vector<1x128xf32>
    %c1_188 = arith.constant 1 : index
    %c0_189 = arith.constant 0 : index
    %c0_190 = arith.constant 0 : index
    %423 = vector.load %arg15[%c1_188, %c0_189, %c0_190] : memref<2x128x32xf32, #tpu.memory_space<vmem>>, vector<1x128x32xf32>
    %424 = vector.shape_cast %423 : vector<1x128x32xf32> to vector<128x32xf32>
    %c1_191 = arith.constant 1 : index
    %c0_192 = arith.constant 0 : index
    %c0_193 = arith.constant 0 : index
    %425 = vector.load %arg16[%c1_191, %c0_192, %c0_193] : memref<2x1x32xf32, #tpu.memory_space<vmem>>, vector<1x1x32xf32>
    %426 = vector.shape_cast %425 : vector<1x1x32xf32> to vector<1x32xf32>
    %cst_194 = arith.constant dense<0.000000e+00> : vector<17xf32>
    %427 = vector.multi_reduction <add>, %221, %cst_194 [1] : vector<17x32xf32> to vector<17xf32>
    %428 = vector.shape_cast %427 : vector<17xf32> to vector<17x1xf32>
    %cst_195 = arith.constant 3.200000e+01 : f32
    %429 = vector.broadcast %cst_195 : f32 to vector<17x1xf32>
    %430 = arith.divf %428, %429 : vector<17x1xf32>
    %431 = vector.broadcast %430 : vector<17x1xf32> to vector<17x32xf32>
    %432 = arith.subf %221, %431 : vector<17x32xf32>
    %433 = arith.mulf %432, %432 : vector<17x32xf32>
    %cst_196 = arith.constant dense<0.000000e+00> : vector<17xf32>
    %434 = vector.multi_reduction <add>, %433, %cst_196 [1] : vector<17x32xf32> to vector<17xf32>
    %435 = vector.shape_cast %434 : vector<17xf32> to vector<17x1xf32>
    %cst_197 = arith.constant 3.200000e+01 : f32
    %436 = vector.broadcast %cst_197 : f32 to vector<17x1xf32>
    %437 = arith.divf %435, %436 : vector<17x1xf32>
    %438 = vector.broadcast %430 : vector<17x1xf32> to vector<17x32xf32>
    %439 = arith.subf %221, %438 : vector<17x32xf32>
    %cst_198 = arith.constant 9.99999997E-7 : f32
    %440 = vector.broadcast %cst_198 : f32 to vector<17x1xf32>
    %441 = arith.addf %437, %440 : vector<17x1xf32>
    %442 = math.rsqrt %441 : vector<17x1xf32>
    %443 = vector.broadcast %442 : vector<17x1xf32> to vector<17x32xf32>
    %444 = arith.mulf %439, %443 : vector<17x32xf32>
    %445 = vector.broadcast %404 : vector<1x32xf32> to vector<17x32xf32>
    %446 = arith.mulf %444, %445 : vector<17x32xf32>
    %447 = vector.broadcast %406 : vector<1x32xf32> to vector<17x32xf32>
    %448 = arith.addf %446, %447 : vector<17x32xf32>
    %cst_199 = arith.constant dense<0.000000e+00> : vector<17x96xf32>
    %449 = tpu.matmul %448, %408, %cst_199 {dimension_numbers = #tpu.dot_dimension_numbers<[1], [0], [0], [1], [0, 0, 1, 1], [], []>} : vector<17x32xf32>, vector<32x96xf32>, vector<17x96xf32> -> vector<17x96xf32>
    %450 = vector.broadcast %410 : vector<1x96xf32> to vector<17x96xf32>
    %451 = arith.addf %449, %450 : vector<17x96xf32>
    %452 = vector.extract_strided_slice %451 {offsets = [0, 0], sizes = [17, 8], strides = [1, 1]} : vector<17x96xf32> to vector<17x8xf32>
    %453 = vector.extract_strided_slice %451 {offsets = [0, 32], sizes = [17, 8], strides = [1, 1]} : vector<17x96xf32> to vector<17x8xf32>
    %454 = vector.extract_strided_slice %451 {offsets = [0, 64], sizes = [17, 8], strides = [1, 1]} : vector<17x96xf32> to vector<17x8xf32>
    "tpu.trace_start"() <{level = 10 : i32, message = "qd,kd->qk"}> : () -> ()
    %cst_200 = arith.constant dense<0.000000e+00> : vector<17x17xf32>
    %455 = tpu.matmul %452, %453, %cst_200 {dimension_numbers = #tpu.dot_dimension_numbers<[1], [1], [0], [0], [0, 0, 1, 0], [], []>} : vector<17x8xf32>, vector<17x8xf32>, vector<17x17xf32> -> vector<17x17xf32>
    "tpu.trace_stop"() : () -> ()
    %cst_201 = arith.constant 0.353553385 : f32
    %456 = vector.broadcast %cst_201 : f32 to vector<17x17xf32>
    %457 = arith.mulf %455, %456 : vector<17x17xf32>
    %cst_202 = arith.constant dense<0xFF800000> : vector<17xf32>
    %458 = vector.multi_reduction <maximumf>, %457, %cst_202 [1] : vector<17x17xf32> to vector<17xf32>
    %459 = vector.shape_cast %458 : vector<17xf32> to vector<17x1xf32>
    %460 = vector.broadcast %459 : vector<17x1xf32> to vector<17x17xf32>
    %461 = arith.subf %457, %460 : vector<17x17xf32>
    %462 = math.exp %461 : vector<17x17xf32>
    %cst_203 = arith.constant dense<0.000000e+00> : vector<17xf32>
    %463 = vector.multi_reduction <add>, %462, %cst_203 [1] : vector<17x17xf32> to vector<17xf32>
    %464 = vector.shape_cast %463 : vector<17xf32> to vector<17x1xf32>
    %cst_204 = arith.constant 1.000000e+00 : f32
    %465 = vector.broadcast %cst_204 : f32 to vector<17x1xf32>
    %466 = arith.divf %465, %464 : vector<17x1xf32>
    %467 = vector.broadcast %466 : vector<17x1xf32> to vector<17x17xf32>
    %468 = arith.mulf %462, %467 : vector<17x17xf32>
    %cst_205 = arith.constant dense<0.000000e+00> : vector<17x8xf32>
    %469 = tpu.matmul %468, %454, %cst_205 {dimension_numbers = #tpu.dot_dimension_numbers<[1], [0], [0], [1], [0, 0, 1, 1], [], []>} : vector<17x17xf32>, vector<17x8xf32>, vector<17x8xf32> -> vector<17x8xf32>
    %470 = vector.extract_strided_slice %412 {offsets = [0, 0], sizes = [8, 32], strides = [1, 1]} : vector<32x32xf32> to vector<8x32xf32>
    %cst_206 = arith.constant dense<0.000000e+00> : vector<17x32xf32>
    %471 = tpu.matmul %469, %470, %cst_206 {dimension_numbers = #tpu.dot_dimension_numbers<[1], [0], [0], [1], [0, 0, 1, 1], [], []>} : vector<17x8xf32>, vector<8x32xf32>, vector<17x32xf32> -> vector<17x32xf32>
    %472 = vector.extract_strided_slice %451 {offsets = [0, 8], sizes = [17, 8], strides = [1, 1]} : vector<17x96xf32> to vector<17x8xf32>
    %473 = vector.extract_strided_slice %451 {offsets = [0, 40], sizes = [17, 8], strides = [1, 1]} : vector<17x96xf32> to vector<17x8xf32>
    %474 = vector.extract_strided_slice %451 {offsets = [0, 72], sizes = [17, 8], strides = [1, 1]} : vector<17x96xf32> to vector<17x8xf32>
    "tpu.trace_start"() <{level = 10 : i32, message = "qd,kd->qk"}> : () -> ()
    %cst_207 = arith.constant dense<0.000000e+00> : vector<17x17xf32>
    %475 = tpu.matmul %472, %473, %cst_207 {dimension_numbers = #tpu.dot_dimension_numbers<[1], [1], [0], [0], [0, 0, 1, 0], [], []>} : vector<17x8xf32>, vector<17x8xf32>, vector<17x17xf32> -> vector<17x17xf32>
    "tpu.trace_stop"() : () -> ()
    %cst_208 = arith.constant 0.353553385 : f32
    %476 = vector.broadcast %cst_208 : f32 to vector<17x17xf32>
    %477 = arith.mulf %475, %476 : vector<17x17xf32>
    %cst_209 = arith.constant dense<0xFF800000> : vector<17xf32>
    %478 = vector.multi_reduction <maximumf>, %477, %cst_209 [1] : vector<17x17xf32> to vector<17xf32>
    %479 = vector.shape_cast %478 : vector<17xf32> to vector<17x1xf32>
    %480 = vector.broadcast %479 : vector<17x1xf32> to vector<17x17xf32>
    %481 = arith.subf %477, %480 : vector<17x17xf32>
    %482 = math.exp %481 : vector<17x17xf32>
    %cst_210 = arith.constant dense<0.000000e+00> : vector<17xf32>
    %483 = vector.multi_reduction <add>, %482, %cst_210 [1] : vector<17x17xf32> to vector<17xf32>
    %484 = vector.shape_cast %483 : vector<17xf32> to vector<17x1xf32>
    %cst_211 = arith.constant 1.000000e+00 : f32
    %485 = vector.broadcast %cst_211 : f32 to vector<17x1xf32>
    %486 = arith.divf %485, %484 : vector<17x1xf32>
    %487 = vector.broadcast %486 : vector<17x1xf32> to vector<17x17xf32>
    %488 = arith.mulf %482, %487 : vector<17x17xf32>
    %cst_212 = arith.constant dense<0.000000e+00> : vector<17x8xf32>
    %489 = tpu.matmul %488, %474, %cst_212 {dimension_numbers = #tpu.dot_dimension_numbers<[1], [0], [0], [1], [0, 0, 1, 1], [], []>} : vector<17x17xf32>, vector<17x8xf32>, vector<17x8xf32> -> vector<17x8xf32>
    %490 = vector.extract_strided_slice %412 {offsets = [8, 0], sizes = [8, 32], strides = [1, 1]} : vector<32x32xf32> to vector<8x32xf32>
    %cst_213 = arith.constant dense<0.000000e+00> : vector<17x32xf32>
    %491 = tpu.matmul %489, %490, %cst_213 {dimension_numbers = #tpu.dot_dimension_numbers<[1], [0], [0], [1], [0, 0, 1, 1], [], []>} : vector<17x8xf32>, vector<8x32xf32>, vector<17x32xf32> -> vector<17x32xf32>
    %492 = arith.addf %471, %491 : vector<17x32xf32>
    %493 = vector.extract_strided_slice %451 {offsets = [0, 16], sizes = [17, 8], strides = [1, 1]} : vector<17x96xf32> to vector<17x8xf32>
    %494 = vector.extract_strided_slice %451 {offsets = [0, 48], sizes = [17, 8], strides = [1, 1]} : vector<17x96xf32> to vector<17x8xf32>
    %495 = vector.extract_strided_slice %451 {offsets = [0, 80], sizes = [17, 8], strides = [1, 1]} : vector<17x96xf32> to vector<17x8xf32>
    "tpu.trace_start"() <{level = 10 : i32, message = "qd,kd->qk"}> : () -> ()
    %cst_214 = arith.constant dense<0.000000e+00> : vector<17x17xf32>
    %496 = tpu.matmul %493, %494, %cst_214 {dimension_numbers = #tpu.dot_dimension_numbers<[1], [1], [0], [0], [0, 0, 1, 0], [], []>} : vector<17x8xf32>, vector<17x8xf32>, vector<17x17xf32> -> vector<17x17xf32>
    "tpu.trace_stop"() : () -> ()
    %cst_215 = arith.constant 0.353553385 : f32
    %497 = vector.broadcast %cst_215 : f32 to vector<17x17xf32>
    %498 = arith.mulf %496, %497 : vector<17x17xf32>
    %cst_216 = arith.constant dense<0xFF800000> : vector<17xf32>
    %499 = vector.multi_reduction <maximumf>, %498, %cst_216 [1] : vector<17x17xf32> to vector<17xf32>
    %500 = vector.shape_cast %499 : vector<17xf32> to vector<17x1xf32>
    %501 = vector.broadcast %500 : vector<17x1xf32> to vector<17x17xf32>
    %502 = arith.subf %498, %501 : vector<17x17xf32>
    %503 = math.exp %502 : vector<17x17xf32>
    %cst_217 = arith.constant dense<0.000000e+00> : vector<17xf32>
    %504 = vector.multi_reduction <add>, %503, %cst_217 [1] : vector<17x17xf32> to vector<17xf32>
    %505 = vector.shape_cast %504 : vector<17xf32> to vector<17x1xf32>
    %cst_218 = arith.constant 1.000000e+00 : f32
    %506 = vector.broadcast %cst_218 : f32 to vector<17x1xf32>
    %507 = arith.divf %506, %505 : vector<17x1xf32>
    %508 = vector.broadcast %507 : vector<17x1xf32> to vector<17x17xf32>
    %509 = arith.mulf %503, %508 : vector<17x17xf32>
    %cst_219 = arith.constant dense<0.000000e+00> : vector<17x8xf32>
    %510 = tpu.matmul %509, %495, %cst_219 {dimension_numbers = #tpu.dot_dimension_numbers<[1], [0], [0], [1], [0, 0, 1, 1], [], []>} : vector<17x17xf32>, vector<17x8xf32>, vector<17x8xf32> -> vector<17x8xf32>
    %511 = vector.extract_strided_slice %412 {offsets = [16, 0], sizes = [8, 32], strides = [1, 1]} : vector<32x32xf32> to vector<8x32xf32>
    %cst_220 = arith.constant dense<0.000000e+00> : vector<17x32xf32>
    %512 = tpu.matmul %510, %511, %cst_220 {dimension_numbers = #tpu.dot_dimension_numbers<[1], [0], [0], [1], [0, 0, 1, 1], [], []>} : vector<17x8xf32>, vector<8x32xf32>, vector<17x32xf32> -> vector<17x32xf32>
    %513 = arith.addf %492, %512 : vector<17x32xf32>
    %514 = vector.extract_strided_slice %451 {offsets = [0, 24], sizes = [17, 8], strides = [1, 1]} : vector<17x96xf32> to vector<17x8xf32>
    %515 = vector.extract_strided_slice %451 {offsets = [0, 56], sizes = [17, 8], strides = [1, 1]} : vector<17x96xf32> to vector<17x8xf32>
    %516 = vector.extract_strided_slice %451 {offsets = [0, 88], sizes = [17, 8], strides = [1, 1]} : vector<17x96xf32> to vector<17x8xf32>
    "tpu.trace_start"() <{level = 10 : i32, message = "qd,kd->qk"}> : () -> ()
    %cst_221 = arith.constant dense<0.000000e+00> : vector<17x17xf32>
    %517 = tpu.matmul %514, %515, %cst_221 {dimension_numbers = #tpu.dot_dimension_numbers<[1], [1], [0], [0], [0, 0, 1, 0], [], []>} : vector<17x8xf32>, vector<17x8xf32>, vector<17x17xf32> -> vector<17x17xf32>
    "tpu.trace_stop"() : () -> ()
    %cst_222 = arith.constant 0.353553385 : f32
    %518 = vector.broadcast %cst_222 : f32 to vector<17x17xf32>
    %519 = arith.mulf %517, %518 : vector<17x17xf32>
    %cst_223 = arith.constant dense<0xFF800000> : vector<17xf32>
    %520 = vector.multi_reduction <maximumf>, %519, %cst_223 [1] : vector<17x17xf32> to vector<17xf32>
    %521 = vector.shape_cast %520 : vector<17xf32> to vector<17x1xf32>
    %522 = vector.broadcast %521 : vector<17x1xf32> to vector<17x17xf32>
    %523 = arith.subf %519, %522 : vector<17x17xf32>
    %524 = math.exp %523 : vector<17x17xf32>
    %cst_224 = arith.constant dense<0.000000e+00> : vector<17xf32>
    %525 = vector.multi_reduction <add>, %524, %cst_224 [1] : vector<17x17xf32> to vector<17xf32>
    %526 = vector.shape_cast %525 : vector<17xf32> to vector<17x1xf32>
    %cst_225 = arith.constant 1.000000e+00 : f32
    %527 = vector.broadcast %cst_225 : f32 to vector<17x1xf32>
    %528 = arith.divf %527, %526 : vector<17x1xf32>
    %529 = vector.broadcast %528 : vector<17x1xf32> to vector<17x17xf32>
    %530 = arith.mulf %524, %529 : vector<17x17xf32>
    %cst_226 = arith.constant dense<0.000000e+00> : vector<17x8xf32>
    %531 = tpu.matmul %530, %516, %cst_226 {dimension_numbers = #tpu.dot_dimension_numbers<[1], [0], [0], [1], [0, 0, 1, 1], [], []>} : vector<17x17xf32>, vector<17x8xf32>, vector<17x8xf32> -> vector<17x8xf32>
    %532 = vector.extract_strided_slice %412 {offsets = [24, 0], sizes = [8, 32], strides = [1, 1]} : vector<32x32xf32> to vector<8x32xf32>
    %cst_227 = arith.constant dense<0.000000e+00> : vector<17x32xf32>
    %533 = tpu.matmul %531, %532, %cst_227 {dimension_numbers = #tpu.dot_dimension_numbers<[1], [0], [0], [1], [0, 0, 1, 1], [], []>} : vector<17x8xf32>, vector<8x32xf32>, vector<17x32xf32> -> vector<17x32xf32>
    %534 = arith.addf %513, %533 : vector<17x32xf32>
    %535 = arith.addf %221, %534 : vector<17x32xf32>
    %536 = vector.broadcast %414 : vector<1x32xf32> to vector<17x32xf32>
    %537 = arith.addf %535, %536 : vector<17x32xf32>
    %cst_228 = arith.constant dense<0.000000e+00> : vector<17xf32>
    %538 = vector.multi_reduction <add>, %537, %cst_228 [1] : vector<17x32xf32> to vector<17xf32>
    %539 = vector.shape_cast %538 : vector<17xf32> to vector<17x1xf32>
    %cst_229 = arith.constant 3.200000e+01 : f32
    %540 = vector.broadcast %cst_229 : f32 to vector<17x1xf32>
    %541 = arith.divf %539, %540 : vector<17x1xf32>
    %542 = vector.broadcast %541 : vector<17x1xf32> to vector<17x32xf32>
    %543 = arith.subf %537, %542 : vector<17x32xf32>
    %544 = arith.mulf %543, %543 : vector<17x32xf32>
    %cst_230 = arith.constant dense<0.000000e+00> : vector<17xf32>
    %545 = vector.multi_reduction <add>, %544, %cst_230 [1] : vector<17x32xf32> to vector<17xf32>
    %546 = vector.shape_cast %545 : vector<17xf32> to vector<17x1xf32>
    %cst_231 = arith.constant 3.200000e+01 : f32
    %547 = vector.broadcast %cst_231 : f32 to vector<17x1xf32>
    %548 = arith.divf %546, %547 : vector<17x1xf32>
    %549 = vector.broadcast %541 : vector<17x1xf32> to vector<17x32xf32>
    %550 = arith.subf %537, %549 : vector<17x32xf32>
    %cst_232 = arith.constant 9.99999997E-7 : f32
    %551 = vector.broadcast %cst_232 : f32 to vector<17x1xf32>
    %552 = arith.addf %548, %551 : vector<17x1xf32>
    %553 = math.rsqrt %552 : vector<17x1xf32>
    %554 = vector.broadcast %553 : vector<17x1xf32> to vector<17x32xf32>
    %555 = arith.mulf %550, %554 : vector<17x32xf32>
    %556 = vector.broadcast %416 : vector<1x32xf32> to vector<17x32xf32>
    %557 = arith.mulf %555, %556 : vector<17x32xf32>
    %558 = vector.broadcast %418 : vector<1x32xf32> to vector<17x32xf32>
    %559 = arith.addf %557, %558 : vector<17x32xf32>
    %cst_233 = arith.constant dense<0.000000e+00> : vector<17x128xf32>
    %560 = tpu.matmul %559, %420, %cst_233 {dimension_numbers = #tpu.dot_dimension_numbers<[1], [0], [0], [1], [0, 0, 1, 1], [], []>} : vector<17x32xf32>, vector<32x128xf32>, vector<17x128xf32> -> vector<17x128xf32>
    %561 = vector.broadcast %422 : vector<1x128xf32> to vector<17x128xf32>
    %562 = arith.addf %560, %561 : vector<17x128xf32>
    %cst_234 = arith.constant 5.000000e-01 : f32
    %563 = vector.broadcast %cst_234 : f32 to vector<17x128xf32>
    %564 = arith.mulf %563, %562 : vector<17x128xf32>
    %cst_235 = arith.constant 0.707106769 : f32
    %565 = vector.broadcast %cst_235 : f32 to vector<17x128xf32>
    %566 = arith.mulf %562, %565 : vector<17x128xf32>
    %cst_236 = arith.constant 0.000000e+00 : f32
    %567 = vector.broadcast %cst_236 : f32 to vector<17x128xf32>
    %568 = arith.cmpf oge, %566, %567 : vector<17x128xf32>
    %cst_237 = arith.constant 1.000000e+00 : f32
    %cst_238 = arith.constant -1.000000e+00 : f32
    %569 = vector.broadcast %cst_237 : f32 to vector<17x128xf32>
    %570 = vector.broadcast %cst_238 : f32 to vector<17x128xf32>
    %571 = arith.select %568, %569, %570 : vector<17x128xi1>, vector<17x128xf32>
    %572 = math.absf %566 : vector<17x128xf32>
    %cst_239 = arith.constant 0.327591091 : f32
    %573 = vector.broadcast %cst_239 : f32 to vector<17x128xf32>
    %574 = arith.mulf %573, %572 : vector<17x128xf32>
    %cst_240 = arith.constant 1.000000e+00 : f32
    %575 = vector.broadcast %cst_240 : f32 to vector<17x128xf32>
    %576 = arith.addf %575, %574 : vector<17x128xf32>
    %cst_241 = arith.constant 1.000000e+00 : f32
    %577 = vector.broadcast %cst_241 : f32 to vector<17x128xf32>
    %578 = arith.divf %577, %576 : vector<17x128xf32>
    %cst_242 = arith.constant 1.06140542 : f32
    %579 = vector.broadcast %cst_242 : f32 to vector<17x128xf32>
    %580 = arith.mulf %578, %579 : vector<17x128xf32>
    %cst_243 = arith.constant -1.45315206 : f32
    %581 = vector.broadcast %cst_243 : f32 to vector<17x128xf32>
    %582 = arith.addf %581, %580 : vector<17x128xf32>
    %583 = arith.mulf %578, %582 : vector<17x128xf32>
    %cst_244 = arith.constant 1.42141378 : f32
    %584 = vector.broadcast %cst_244 : f32 to vector<17x128xf32>
    %585 = arith.addf %584, %583 : vector<17x128xf32>
    %586 = arith.mulf %578, %585 : vector<17x128xf32>
    %cst_245 = arith.constant -0.284496725 : f32
    %587 = vector.broadcast %cst_245 : f32 to vector<17x128xf32>
    %588 = arith.addf %587, %586 : vector<17x128xf32>
    %589 = arith.mulf %578, %588 : vector<17x128xf32>
    %cst_246 = arith.constant 0.254829586 : f32
    %590 = vector.broadcast %cst_246 : f32 to vector<17x128xf32>
    %591 = arith.addf %590, %589 : vector<17x128xf32>
    %592 = arith.mulf %578, %591 : vector<17x128xf32>
    %cst_247 = arith.constant 0.000000e+00 : f32
    %593 = vector.broadcast %cst_247 : f32 to vector<17x128xf32>
    %594 = arith.subf %593, %572 : vector<17x128xf32>
    %595 = arith.mulf %594, %572 : vector<17x128xf32>
    %596 = math.exp %595 : vector<17x128xf32>
    %597 = arith.mulf %592, %596 : vector<17x128xf32>
    %cst_248 = arith.constant 1.000000e+00 : f32
    %598 = vector.broadcast %cst_248 : f32 to vector<17x128xf32>
    %599 = arith.subf %598, %597 : vector<17x128xf32>
    %600 = arith.mulf %571, %599 : vector<17x128xf32>
    %cst_249 = arith.constant 1.000000e+00 : f32
    %601 = vector.broadcast %cst_249 : f32 to vector<17x128xf32>
    %602 = arith.addf %601, %600 : vector<17x128xf32>
    %603 = arith.mulf %564, %602 : vector<17x128xf32>
    %cst_250 = arith.constant dense<0.000000e+00> : vector<17x32xf32>
    %604 = tpu.matmul %603, %424, %cst_250 {dimension_numbers = #tpu.dot_dimension_numbers<[1], [0], [0], [1], [0, 0, 1, 1], [], []>} : vector<17x128xf32>, vector<128x32xf32>, vector<17x32xf32> -> vector<17x32xf32>
    %605 = arith.addf %537, %604 : vector<17x32xf32>
    %606 = vector.broadcast %426 : vector<1x32xf32> to vector<17x32xf32>
    %607 = arith.addf %605, %606 : vector<17x32xf32>
    %cst_251 = arith.constant dense<0.000000e+00> : vector<17xf32>
    %608 = vector.multi_reduction <add>, %402, %cst_251 [1] : vector<17x32xf32> to vector<17xf32>
    %609 = vector.shape_cast %608 : vector<17xf32> to vector<17x1xf32>
    %cst_252 = arith.constant 3.200000e+01 : f32
    %610 = vector.broadcast %cst_252 : f32 to vector<17x1xf32>
    %611 = arith.divf %609, %610 : vector<17x1xf32>
    %612 = vector.broadcast %611 : vector<17x1xf32> to vector<17x32xf32>
    %613 = arith.subf %402, %612 : vector<17x32xf32>
    %614 = arith.mulf %613, %613 : vector<17x32xf32>
    %cst_253 = arith.constant dense<0.000000e+00> : vector<17xf32>
    %615 = vector.multi_reduction <add>, %614, %cst_253 [1] : vector<17x32xf32> to vector<17xf32>
    %616 = vector.shape_cast %615 : vector<17xf32> to vector<17x1xf32>
    %cst_254 = arith.constant 3.200000e+01 : f32
    %617 = vector.broadcast %cst_254 : f32 to vector<17x1xf32>
    %618 = arith.divf %616, %617 : vector<17x1xf32>
    %619 = vector.broadcast %611 : vector<17x1xf32> to vector<17x32xf32>
    %620 = arith.subf %402, %619 : vector<17x32xf32>
    %cst_255 = arith.constant 9.99999997E-7 : f32
    %621 = vector.broadcast %cst_255 : f32 to vector<17x1xf32>
    %622 = arith.addf %618, %621 : vector<17x1xf32>
    %623 = math.rsqrt %622 : vector<17x1xf32>
    %624 = vector.broadcast %623 : vector<17x1xf32> to vector<17x32xf32>
    %625 = arith.mulf %620, %624 : vector<17x32xf32>
    %626 = vector.broadcast %404 : vector<1x32xf32> to vector<17x32xf32>
    %627 = arith.mulf %625, %626 : vector<17x32xf32>
    %628 = vector.broadcast %406 : vector<1x32xf32> to vector<17x32xf32>
    %629 = arith.addf %627, %628 : vector<17x32xf32>
    %cst_256 = arith.constant dense<0.000000e+00> : vector<17x96xf32>
    %630 = tpu.matmul %629, %408, %cst_256 {dimension_numbers = #tpu.dot_dimension_numbers<[1], [0], [0], [1], [0, 0, 1, 1], [], []>} : vector<17x32xf32>, vector<32x96xf32>, vector<17x96xf32> -> vector<17x96xf32>
    %631 = vector.broadcast %410 : vector<1x96xf32> to vector<17x96xf32>
    %632 = arith.addf %630, %631 : vector<17x96xf32>
    %633 = vector.extract_strided_slice %632 {offsets = [0, 0], sizes = [17, 8], strides = [1, 1]} : vector<17x96xf32> to vector<17x8xf32>
    %634 = vector.extract_strided_slice %632 {offsets = [0, 32], sizes = [17, 8], strides = [1, 1]} : vector<17x96xf32> to vector<17x8xf32>
    %635 = vector.extract_strided_slice %632 {offsets = [0, 64], sizes = [17, 8], strides = [1, 1]} : vector<17x96xf32> to vector<17x8xf32>
    "tpu.trace_start"() <{level = 10 : i32, message = "qd,kd->qk"}> : () -> ()
    %cst_257 = arith.constant dense<0.000000e+00> : vector<17x17xf32>
    %636 = tpu.matmul %633, %634, %cst_257 {dimension_numbers = #tpu.dot_dimension_numbers<[1], [1], [0], [0], [0, 0, 1, 0], [], []>} : vector<17x8xf32>, vector<17x8xf32>, vector<17x17xf32> -> vector<17x17xf32>
    "tpu.trace_stop"() : () -> ()
    %cst_258 = arith.constant 0.353553385 : f32
    %637 = vector.broadcast %cst_258 : f32 to vector<17x17xf32>
    %638 = arith.mulf %636, %637 : vector<17x17xf32>
    %cst_259 = arith.constant dense<0xFF800000> : vector<17xf32>
    %639 = vector.multi_reduction <maximumf>, %638, %cst_259 [1] : vector<17x17xf32> to vector<17xf32>
    %640 = vector.shape_cast %639 : vector<17xf32> to vector<17x1xf32>
    %641 = vector.broadcast %640 : vector<17x1xf32> to vector<17x17xf32>
    %642 = arith.subf %638, %641 : vector<17x17xf32>
    %643 = math.exp %642 : vector<17x17xf32>
    %cst_260 = arith.constant dense<0.000000e+00> : vector<17xf32>
    %644 = vector.multi_reduction <add>, %643, %cst_260 [1] : vector<17x17xf32> to vector<17xf32>
    %645 = vector.shape_cast %644 : vector<17xf32> to vector<17x1xf32>
    %cst_261 = arith.constant 1.000000e+00 : f32
    %646 = vector.broadcast %cst_261 : f32 to vector<17x1xf32>
    %647 = arith.divf %646, %645 : vector<17x1xf32>
    %648 = vector.broadcast %647 : vector<17x1xf32> to vector<17x17xf32>
    %649 = arith.mulf %643, %648 : vector<17x17xf32>
    %cst_262 = arith.constant dense<0.000000e+00> : vector<17x8xf32>
    %650 = tpu.matmul %649, %635, %cst_262 {dimension_numbers = #tpu.dot_dimension_numbers<[1], [0], [0], [1], [0, 0, 1, 1], [], []>} : vector<17x17xf32>, vector<17x8xf32>, vector<17x8xf32> -> vector<17x8xf32>
    %651 = vector.extract_strided_slice %412 {offsets = [0, 0], sizes = [8, 32], strides = [1, 1]} : vector<32x32xf32> to vector<8x32xf32>
    %cst_263 = arith.constant dense<0.000000e+00> : vector<17x32xf32>
    %652 = tpu.matmul %650, %651, %cst_263 {dimension_numbers = #tpu.dot_dimension_numbers<[1], [0], [0], [1], [0, 0, 1, 1], [], []>} : vector<17x8xf32>, vector<8x32xf32>, vector<17x32xf32> -> vector<17x32xf32>
    %653 = vector.extract_strided_slice %632 {offsets = [0, 8], sizes = [17, 8], strides = [1, 1]} : vector<17x96xf32> to vector<17x8xf32>
    %654 = vector.extract_strided_slice %632 {offsets = [0, 40], sizes = [17, 8], strides = [1, 1]} : vector<17x96xf32> to vector<17x8xf32>
    %655 = vector.extract_strided_slice %632 {offsets = [0, 72], sizes = [17, 8], strides = [1, 1]} : vector<17x96xf32> to vector<17x8xf32>
    "tpu.trace_start"() <{level = 10 : i32, message = "qd,kd->qk"}> : () -> ()
    %cst_264 = arith.constant dense<0.000000e+00> : vector<17x17xf32>
    %656 = tpu.matmul %653, %654, %cst_264 {dimension_numbers = #tpu.dot_dimension_numbers<[1], [1], [0], [0], [0, 0, 1, 0], [], []>} : vector<17x8xf32>, vector<17x8xf32>, vector<17x17xf32> -> vector<17x17xf32>
    "tpu.trace_stop"() : () -> ()
    %cst_265 = arith.constant 0.353553385 : f32
    %657 = vector.broadcast %cst_265 : f32 to vector<17x17xf32>
    %658 = arith.mulf %656, %657 : vector<17x17xf32>
    %cst_266 = arith.constant dense<0xFF800000> : vector<17xf32>
    %659 = vector.multi_reduction <maximumf>, %658, %cst_266 [1] : vector<17x17xf32> to vector<17xf32>
    %660 = vector.shape_cast %659 : vector<17xf32> to vector<17x1xf32>
    %661 = vector.broadcast %660 : vector<17x1xf32> to vector<17x17xf32>
    %662 = arith.subf %658, %661 : vector<17x17xf32>
    %663 = math.exp %662 : vector<17x17xf32>
    %cst_267 = arith.constant dense<0.000000e+00> : vector<17xf32>
    %664 = vector.multi_reduction <add>, %663, %cst_267 [1] : vector<17x17xf32> to vector<17xf32>
    %665 = vector.shape_cast %664 : vector<17xf32> to vector<17x1xf32>
    %cst_268 = arith.constant 1.000000e+00 : f32
    %666 = vector.broadcast %cst_268 : f32 to vector<17x1xf32>
    %667 = arith.divf %666, %665 : vector<17x1xf32>
    %668 = vector.broadcast %667 : vector<17x1xf32> to vector<17x17xf32>
    %669 = arith.mulf %663, %668 : vector<17x17xf32>
    %cst_269 = arith.constant dense<0.000000e+00> : vector<17x8xf32>
    %670 = tpu.matmul %669, %655, %cst_269 {dimension_numbers = #tpu.dot_dimension_numbers<[1], [0], [0], [1], [0, 0, 1, 1], [], []>} : vector<17x17xf32>, vector<17x8xf32>, vector<17x8xf32> -> vector<17x8xf32>
    %671 = vector.extract_strided_slice %412 {offsets = [8, 0], sizes = [8, 32], strides = [1, 1]} : vector<32x32xf32> to vector<8x32xf32>
    %cst_270 = arith.constant dense<0.000000e+00> : vector<17x32xf32>
    %672 = tpu.matmul %670, %671, %cst_270 {dimension_numbers = #tpu.dot_dimension_numbers<[1], [0], [0], [1], [0, 0, 1, 1], [], []>} : vector<17x8xf32>, vector<8x32xf32>, vector<17x32xf32> -> vector<17x32xf32>
    %673 = arith.addf %652, %672 : vector<17x32xf32>
    %674 = vector.extract_strided_slice %632 {offsets = [0, 16], sizes = [17, 8], strides = [1, 1]} : vector<17x96xf32> to vector<17x8xf32>
    %675 = vector.extract_strided_slice %632 {offsets = [0, 48], sizes = [17, 8], strides = [1, 1]} : vector<17x96xf32> to vector<17x8xf32>
    %676 = vector.extract_strided_slice %632 {offsets = [0, 80], sizes = [17, 8], strides = [1, 1]} : vector<17x96xf32> to vector<17x8xf32>
    "tpu.trace_start"() <{level = 10 : i32, message = "qd,kd->qk"}> : () -> ()
    %cst_271 = arith.constant dense<0.000000e+00> : vector<17x17xf32>
    %677 = tpu.matmul %674, %675, %cst_271 {dimension_numbers = #tpu.dot_dimension_numbers<[1], [1], [0], [0], [0, 0, 1, 0], [], []>} : vector<17x8xf32>, vector<17x8xf32>, vector<17x17xf32> -> vector<17x17xf32>
    "tpu.trace_stop"() : () -> ()
    %cst_272 = arith.constant 0.353553385 : f32
    %678 = vector.broadcast %cst_272 : f32 to vector<17x17xf32>
    %679 = arith.mulf %677, %678 : vector<17x17xf32>
    %cst_273 = arith.constant dense<0xFF800000> : vector<17xf32>
    %680 = vector.multi_reduction <maximumf>, %679, %cst_273 [1] : vector<17x17xf32> to vector<17xf32>
    %681 = vector.shape_cast %680 : vector<17xf32> to vector<17x1xf32>
    %682 = vector.broadcast %681 : vector<17x1xf32> to vector<17x17xf32>
    %683 = arith.subf %679, %682 : vector<17x17xf32>
    %684 = math.exp %683 : vector<17x17xf32>
    %cst_274 = arith.constant dense<0.000000e+00> : vector<17xf32>
    %685 = vector.multi_reduction <add>, %684, %cst_274 [1] : vector<17x17xf32> to vector<17xf32>
    %686 = vector.shape_cast %685 : vector<17xf32> to vector<17x1xf32>
    %cst_275 = arith.constant 1.000000e+00 : f32
    %687 = vector.broadcast %cst_275 : f32 to vector<17x1xf32>
    %688 = arith.divf %687, %686 : vector<17x1xf32>
    %689 = vector.broadcast %688 : vector<17x1xf32> to vector<17x17xf32>
    %690 = arith.mulf %684, %689 : vector<17x17xf32>
    %cst_276 = arith.constant dense<0.000000e+00> : vector<17x8xf32>
    %691 = tpu.matmul %690, %676, %cst_276 {dimension_numbers = #tpu.dot_dimension_numbers<[1], [0], [0], [1], [0, 0, 1, 1], [], []>} : vector<17x17xf32>, vector<17x8xf32>, vector<17x8xf32> -> vector<17x8xf32>
    %692 = vector.extract_strided_slice %412 {offsets = [16, 0], sizes = [8, 32], strides = [1, 1]} : vector<32x32xf32> to vector<8x32xf32>
    %cst_277 = arith.constant dense<0.000000e+00> : vector<17x32xf32>
    %693 = tpu.matmul %691, %692, %cst_277 {dimension_numbers = #tpu.dot_dimension_numbers<[1], [0], [0], [1], [0, 0, 1, 1], [], []>} : vector<17x8xf32>, vector<8x32xf32>, vector<17x32xf32> -> vector<17x32xf32>
    %694 = arith.addf %673, %693 : vector<17x32xf32>
    %695 = vector.extract_strided_slice %632 {offsets = [0, 24], sizes = [17, 8], strides = [1, 1]} : vector<17x96xf32> to vector<17x8xf32>
    %696 = vector.extract_strided_slice %632 {offsets = [0, 56], sizes = [17, 8], strides = [1, 1]} : vector<17x96xf32> to vector<17x8xf32>
    %697 = vector.extract_strided_slice %632 {offsets = [0, 88], sizes = [17, 8], strides = [1, 1]} : vector<17x96xf32> to vector<17x8xf32>
    "tpu.trace_start"() <{level = 10 : i32, message = "qd,kd->qk"}> : () -> ()
    %cst_278 = arith.constant dense<0.000000e+00> : vector<17x17xf32>
    %698 = tpu.matmul %695, %696, %cst_278 {dimension_numbers = #tpu.dot_dimension_numbers<[1], [1], [0], [0], [0, 0, 1, 0], [], []>} : vector<17x8xf32>, vector<17x8xf32>, vector<17x17xf32> -> vector<17x17xf32>
    "tpu.trace_stop"() : () -> ()
    %cst_279 = arith.constant 0.353553385 : f32
    %699 = vector.broadcast %cst_279 : f32 to vector<17x17xf32>
    %700 = arith.mulf %698, %699 : vector<17x17xf32>
    %cst_280 = arith.constant dense<0xFF800000> : vector<17xf32>
    %701 = vector.multi_reduction <maximumf>, %700, %cst_280 [1] : vector<17x17xf32> to vector<17xf32>
    %702 = vector.shape_cast %701 : vector<17xf32> to vector<17x1xf32>
    %703 = vector.broadcast %702 : vector<17x1xf32> to vector<17x17xf32>
    %704 = arith.subf %700, %703 : vector<17x17xf32>
    %705 = math.exp %704 : vector<17x17xf32>
    %cst_281 = arith.constant dense<0.000000e+00> : vector<17xf32>
    %706 = vector.multi_reduction <add>, %705, %cst_281 [1] : vector<17x17xf32> to vector<17xf32>
    %707 = vector.shape_cast %706 : vector<17xf32> to vector<17x1xf32>
    %cst_282 = arith.constant 1.000000e+00 : f32
    %708 = vector.broadcast %cst_282 : f32 to vector<17x1xf32>
    %709 = arith.divf %708, %707 : vector<17x1xf32>
    %710 = vector.broadcast %709 : vector<17x1xf32> to vector<17x17xf32>
    %711 = arith.mulf %705, %710 : vector<17x17xf32>
    %cst_283 = arith.constant dense<0.000000e+00> : vector<17x8xf32>
    %712 = tpu.matmul %711, %697, %cst_283 {dimension_numbers = #tpu.dot_dimension_numbers<[1], [0], [0], [1], [0, 0, 1, 1], [], []>} : vector<17x17xf32>, vector<17x8xf32>, vector<17x8xf32> -> vector<17x8xf32>
    %713 = vector.extract_strided_slice %412 {offsets = [24, 0], sizes = [8, 32], strides = [1, 1]} : vector<32x32xf32> to vector<8x32xf32>
    %cst_284 = arith.constant dense<0.000000e+00> : vector<17x32xf32>
    %714 = tpu.matmul %712, %713, %cst_284 {dimension_numbers = #tpu.dot_dimension_numbers<[1], [0], [0], [1], [0, 0, 1, 1], [], []>} : vector<17x8xf32>, vector<8x32xf32>, vector<17x32xf32> -> vector<17x32xf32>
    %715 = arith.addf %694, %714 : vector<17x32xf32>
    %716 = arith.addf %402, %715 : vector<17x32xf32>
    %717 = vector.broadcast %414 : vector<1x32xf32> to vector<17x32xf32>
    %718 = arith.addf %716, %717 : vector<17x32xf32>
    %cst_285 = arith.constant dense<0.000000e+00> : vector<17xf32>
    %719 = vector.multi_reduction <add>, %718, %cst_285 [1] : vector<17x32xf32> to vector<17xf32>
    %720 = vector.shape_cast %719 : vector<17xf32> to vector<17x1xf32>
    %cst_286 = arith.constant 3.200000e+01 : f32
    %721 = vector.broadcast %cst_286 : f32 to vector<17x1xf32>
    %722 = arith.divf %720, %721 : vector<17x1xf32>
    %723 = vector.broadcast %722 : vector<17x1xf32> to vector<17x32xf32>
    %724 = arith.subf %718, %723 : vector<17x32xf32>
    %725 = arith.mulf %724, %724 : vector<17x32xf32>
    %cst_287 = arith.constant dense<0.000000e+00> : vector<17xf32>
    %726 = vector.multi_reduction <add>, %725, %cst_287 [1] : vector<17x32xf32> to vector<17xf32>
    %727 = vector.shape_cast %726 : vector<17xf32> to vector<17x1xf32>
    %cst_288 = arith.constant 3.200000e+01 : f32
    %728 = vector.broadcast %cst_288 : f32 to vector<17x1xf32>
    %729 = arith.divf %727, %728 : vector<17x1xf32>
    %730 = vector.broadcast %722 : vector<17x1xf32> to vector<17x32xf32>
    %731 = arith.subf %718, %730 : vector<17x32xf32>
    %cst_289 = arith.constant 9.99999997E-7 : f32
    %732 = vector.broadcast %cst_289 : f32 to vector<17x1xf32>
    %733 = arith.addf %729, %732 : vector<17x1xf32>
    %734 = math.rsqrt %733 : vector<17x1xf32>
    %735 = vector.broadcast %734 : vector<17x1xf32> to vector<17x32xf32>
    %736 = arith.mulf %731, %735 : vector<17x32xf32>
    %737 = vector.broadcast %416 : vector<1x32xf32> to vector<17x32xf32>
    %738 = arith.mulf %736, %737 : vector<17x32xf32>
    %739 = vector.broadcast %418 : vector<1x32xf32> to vector<17x32xf32>
    %740 = arith.addf %738, %739 : vector<17x32xf32>
    %cst_290 = arith.constant dense<0.000000e+00> : vector<17x128xf32>
    %741 = tpu.matmul %740, %420, %cst_290 {dimension_numbers = #tpu.dot_dimension_numbers<[1], [0], [0], [1], [0, 0, 1, 1], [], []>} : vector<17x32xf32>, vector<32x128xf32>, vector<17x128xf32> -> vector<17x128xf32>
    %742 = vector.broadcast %422 : vector<1x128xf32> to vector<17x128xf32>
    %743 = arith.addf %741, %742 : vector<17x128xf32>
    %cst_291 = arith.constant 5.000000e-01 : f32
    %744 = vector.broadcast %cst_291 : f32 to vector<17x128xf32>
    %745 = arith.mulf %744, %743 : vector<17x128xf32>
    %cst_292 = arith.constant 0.707106769 : f32
    %746 = vector.broadcast %cst_292 : f32 to vector<17x128xf32>
    %747 = arith.mulf %743, %746 : vector<17x128xf32>
    %cst_293 = arith.constant 0.000000e+00 : f32
    %748 = vector.broadcast %cst_293 : f32 to vector<17x128xf32>
    %749 = arith.cmpf oge, %747, %748 : vector<17x128xf32>
    %cst_294 = arith.constant 1.000000e+00 : f32
    %cst_295 = arith.constant -1.000000e+00 : f32
    %750 = vector.broadcast %cst_294 : f32 to vector<17x128xf32>
    %751 = vector.broadcast %cst_295 : f32 to vector<17x128xf32>
    %752 = arith.select %749, %750, %751 : vector<17x128xi1>, vector<17x128xf32>
    %753 = math.absf %747 : vector<17x128xf32>
    %cst_296 = arith.constant 0.327591091 : f32
    %754 = vector.broadcast %cst_296 : f32 to vector<17x128xf32>
    %755 = arith.mulf %754, %753 : vector<17x128xf32>
    %cst_297 = arith.constant 1.000000e+00 : f32
    %756 = vector.broadcast %cst_297 : f32 to vector<17x128xf32>
    %757 = arith.addf %756, %755 : vector<17x128xf32>
    %cst_298 = arith.constant 1.000000e+00 : f32
    %758 = vector.broadcast %cst_298 : f32 to vector<17x128xf32>
    %759 = arith.divf %758, %757 : vector<17x128xf32>
    %cst_299 = arith.constant 1.06140542 : f32
    %760 = vector.broadcast %cst_299 : f32 to vector<17x128xf32>
    %761 = arith.mulf %759, %760 : vector<17x128xf32>
    %cst_300 = arith.constant -1.45315206 : f32
    %762 = vector.broadcast %cst_300 : f32 to vector<17x128xf32>
    %763 = arith.addf %762, %761 : vector<17x128xf32>
    %764 = arith.mulf %759, %763 : vector<17x128xf32>
    %cst_301 = arith.constant 1.42141378 : f32
    %765 = vector.broadcast %cst_301 : f32 to vector<17x128xf32>
    %766 = arith.addf %765, %764 : vector<17x128xf32>
    %767 = arith.mulf %759, %766 : vector<17x128xf32>
    %cst_302 = arith.constant -0.284496725 : f32
    %768 = vector.broadcast %cst_302 : f32 to vector<17x128xf32>
    %769 = arith.addf %768, %767 : vector<17x128xf32>
    %770 = arith.mulf %759, %769 : vector<17x128xf32>
    %cst_303 = arith.constant 0.254829586 : f32
    %771 = vector.broadcast %cst_303 : f32 to vector<17x128xf32>
    %772 = arith.addf %771, %770 : vector<17x128xf32>
    %773 = arith.mulf %759, %772 : vector<17x128xf32>
    %cst_304 = arith.constant 0.000000e+00 : f32
    %774 = vector.broadcast %cst_304 : f32 to vector<17x128xf32>
    %775 = arith.subf %774, %753 : vector<17x128xf32>
    %776 = arith.mulf %775, %753 : vector<17x128xf32>
    %777 = math.exp %776 : vector<17x128xf32>
    %778 = arith.mulf %773, %777 : vector<17x128xf32>
    %cst_305 = arith.constant 1.000000e+00 : f32
    %779 = vector.broadcast %cst_305 : f32 to vector<17x128xf32>
    %780 = arith.subf %779, %778 : vector<17x128xf32>
    %781 = arith.mulf %752, %780 : vector<17x128xf32>
    %cst_306 = arith.constant 1.000000e+00 : f32
    %782 = vector.broadcast %cst_306 : f32 to vector<17x128xf32>
    %783 = arith.addf %782, %781 : vector<17x128xf32>
    %784 = arith.mulf %745, %783 : vector<17x128xf32>
    %cst_307 = arith.constant dense<0.000000e+00> : vector<17x32xf32>
    %785 = tpu.matmul %784, %424, %cst_307 {dimension_numbers = #tpu.dot_dimension_numbers<[1], [0], [0], [1], [0, 0, 1, 1], [], []>} : vector<17x128xf32>, vector<128x32xf32>, vector<17x32xf32> -> vector<17x32xf32>
    %786 = arith.addf %718, %785 : vector<17x32xf32>
    %787 = vector.broadcast %426 : vector<1x32xf32> to vector<17x32xf32>
    %788 = arith.addf %786, %787 : vector<17x32xf32>
    %c0_308 = arith.constant 0 : index
    %c0_309 = arith.constant 0 : index
    %789 = vector.load %arg17[%c0_308, %c0_309] : memref<1x32xf32, #tpu.memory_space<vmem>>, vector<1x32xf32>
    %c0_310 = arith.constant 0 : index
    %c0_311 = arith.constant 0 : index
    %790 = vector.load %arg18[%c0_310, %c0_311] : memref<1x32xf32, #tpu.memory_space<vmem>>, vector<1x32xf32>
    %c0_312 = arith.constant 0 : index
    %c0_313 = arith.constant 0 : index
    %791 = vector.load %arg19[%c0_312, %c0_313] : memref<32x192xf32, #tpu.memory_space<vmem>>, vector<32x192xf32>
    %c0_314 = arith.constant 0 : index
    %c0_315 = arith.constant 0 : index
    %792 = vector.load %arg20[%c0_314, %c0_315] : memref<1x192xf32, #tpu.memory_space<vmem>>, vector<1x192xf32>
    %c0_316 = arith.constant 0 : index
    %c0_317 = arith.constant 0 : index
    %793 = vector.load %arg21[%c0_316, %c0_317] : memref<1x192xf32, #tpu.memory_space<vmem>>, vector<1x192xf32>
    %c0_318 = arith.constant 0 : index
    %c0_319 = arith.constant 0 : index
    %794 = vector.load %arg24[%c0_318, %c0_319] : memref<1x192xf32, #tpu.memory_space<vmem>>, vector<1x192xf32>
    %cst_320 = arith.constant 9.99999974E-6 : f32
    %795 = vector.broadcast %cst_320 : f32 to vector<1x192xf32>
    %796 = arith.addf %794, %795 : vector<1x192xf32>
    %797 = math.rsqrt %796 : vector<1x192xf32>
    %798 = arith.mulf %793, %797 : vector<1x192xf32>
    %c0_321 = arith.constant 0 : index
    %c0_322 = arith.constant 0 : index
    %799 = vector.load %arg22[%c0_321, %c0_322] : memref<1x192xf32, #tpu.memory_space<vmem>>, vector<1x192xf32>
    %c0_323 = arith.constant 0 : index
    %c0_324 = arith.constant 0 : index
    %800 = vector.load %arg23[%c0_323, %c0_324] : memref<1x192xf32, #tpu.memory_space<vmem>>, vector<1x192xf32>
    %801 = arith.mulf %800, %798 : vector<1x192xf32>
    %802 = arith.subf %799, %801 : vector<1x192xf32>
    %c0_325 = arith.constant 0 : index
    %c0_326 = arith.constant 0 : index
    %803 = vector.load %arg25[%c0_325, %c0_326] : memref<1x192xf32, #tpu.memory_space<vmem>>, vector<1x192xf32>
    %c0_327 = arith.constant 0 : index
    %c0_328 = arith.constant 0 : index
    %804 = vector.load %arg26[%c0_327, %c0_328] : memref<1x192xf32, #tpu.memory_space<vmem>>, vector<1x192xf32>
    %cst_329 = arith.constant dense<0.000000e+00> : vector<17xf32>
    %805 = vector.multi_reduction <add>, %607, %cst_329 [1] : vector<17x32xf32> to vector<17xf32>
    %806 = vector.shape_cast %805 : vector<17xf32> to vector<17x1xf32>
    %cst_330 = arith.constant 3.200000e+01 : f32
    %807 = vector.broadcast %cst_330 : f32 to vector<17x1xf32>
    %808 = arith.divf %806, %807 : vector<17x1xf32>
    %809 = vector.broadcast %808 : vector<17x1xf32> to vector<17x32xf32>
    %810 = arith.subf %607, %809 : vector<17x32xf32>
    %811 = arith.mulf %810, %810 : vector<17x32xf32>
    %cst_331 = arith.constant dense<0.000000e+00> : vector<17xf32>
    %812 = vector.multi_reduction <add>, %811, %cst_331 [1] : vector<17x32xf32> to vector<17xf32>
    %813 = vector.shape_cast %812 : vector<17xf32> to vector<17x1xf32>
    %cst_332 = arith.constant 3.200000e+01 : f32
    %814 = vector.broadcast %cst_332 : f32 to vector<17x1xf32>
    %815 = arith.divf %813, %814 : vector<17x1xf32>
    %816 = vector.broadcast %808 : vector<17x1xf32> to vector<17x32xf32>
    %817 = arith.subf %607, %816 : vector<17x32xf32>
    %cst_333 = arith.constant 9.99999997E-7 : f32
    %818 = vector.broadcast %cst_333 : f32 to vector<17x1xf32>
    %819 = arith.addf %815, %818 : vector<17x1xf32>
    %820 = math.rsqrt %819 : vector<17x1xf32>
    %821 = vector.broadcast %820 : vector<17x1xf32> to vector<17x32xf32>
    %822 = arith.mulf %817, %821 : vector<17x32xf32>
    %823 = vector.broadcast %789 : vector<1x32xf32> to vector<17x32xf32>
    %824 = arith.mulf %822, %823 : vector<17x32xf32>
    %825 = vector.broadcast %790 : vector<1x32xf32> to vector<17x32xf32>
    %826 = arith.addf %824, %825 : vector<17x32xf32>
    %827 = vector.extract_strided_slice %826 {offsets = [0, 0], sizes = [1, 32], strides = [1, 1]} : vector<17x32xf32> to vector<1x32xf32>
    %828 = vector.extract_strided_slice %826 {offsets = [1, 0], sizes = [16, 32], strides = [1, 1]} : vector<17x32xf32> to vector<16x32xf32>
    %cst_334 = arith.constant dense<0.000000e+00> : vector<16x192xf32>
    %829 = tpu.matmul %828, %791, %cst_334 {dimension_numbers = #tpu.dot_dimension_numbers<[1], [0], [0], [1], [0, 0, 1, 1], [], []>} : vector<16x32xf32>, vector<32x192xf32>, vector<16x192xf32> -> vector<16x192xf32>
    %830 = vector.broadcast %792 : vector<1x192xf32> to vector<16x192xf32>
    %831 = arith.addf %829, %830 : vector<16x192xf32>
    %832 = vector.broadcast %798 : vector<1x192xf32> to vector<16x192xf32>
    %833 = arith.mulf %831, %832 : vector<16x192xf32>
    %834 = vector.broadcast %802 : vector<1x192xf32> to vector<16x192xf32>
    %835 = arith.addf %833, %834 : vector<16x192xf32>
    %cst_335 = arith.constant 5.000000e-01 : f32
    %836 = vector.broadcast %cst_335 : f32 to vector<16x192xf32>
    %837 = arith.mulf %836, %835 : vector<16x192xf32>
    %cst_336 = arith.constant 0.707106769 : f32
    %838 = vector.broadcast %cst_336 : f32 to vector<16x192xf32>
    %839 = arith.mulf %835, %838 : vector<16x192xf32>
    %cst_337 = arith.constant 0.000000e+00 : f32
    %840 = vector.broadcast %cst_337 : f32 to vector<16x192xf32>
    %841 = arith.cmpf oge, %839, %840 : vector<16x192xf32>
    %cst_338 = arith.constant 1.000000e+00 : f32
    %cst_339 = arith.constant -1.000000e+00 : f32
    %842 = vector.broadcast %cst_338 : f32 to vector<16x192xf32>
    %843 = vector.broadcast %cst_339 : f32 to vector<16x192xf32>
    %844 = arith.select %841, %842, %843 : vector<16x192xi1>, vector<16x192xf32>
    %845 = math.absf %839 : vector<16x192xf32>
    %cst_340 = arith.constant 0.327591091 : f32
    %846 = vector.broadcast %cst_340 : f32 to vector<16x192xf32>
    %847 = arith.mulf %846, %845 : vector<16x192xf32>
    %cst_341 = arith.constant 1.000000e+00 : f32
    %848 = vector.broadcast %cst_341 : f32 to vector<16x192xf32>
    %849 = arith.addf %848, %847 : vector<16x192xf32>
    %cst_342 = arith.constant 1.000000e+00 : f32
    %850 = vector.broadcast %cst_342 : f32 to vector<16x192xf32>
    %851 = arith.divf %850, %849 : vector<16x192xf32>
    %cst_343 = arith.constant 1.06140542 : f32
    %852 = vector.broadcast %cst_343 : f32 to vector<16x192xf32>
    %853 = arith.mulf %851, %852 : vector<16x192xf32>
    %cst_344 = arith.constant -1.45315206 : f32
    %854 = vector.broadcast %cst_344 : f32 to vector<16x192xf32>
    %855 = arith.addf %854, %853 : vector<16x192xf32>
    %856 = arith.mulf %851, %855 : vector<16x192xf32>
    %cst_345 = arith.constant 1.42141378 : f32
    %857 = vector.broadcast %cst_345 : f32 to vector<16x192xf32>
    %858 = arith.addf %857, %856 : vector<16x192xf32>
    %859 = arith.mulf %851, %858 : vector<16x192xf32>
    %cst_346 = arith.constant -0.284496725 : f32
    %860 = vector.broadcast %cst_346 : f32 to vector<16x192xf32>
    %861 = arith.addf %860, %859 : vector<16x192xf32>
    %862 = arith.mulf %851, %861 : vector<16x192xf32>
    %cst_347 = arith.constant 0.254829586 : f32
    %863 = vector.broadcast %cst_347 : f32 to vector<16x192xf32>
    %864 = arith.addf %863, %862 : vector<16x192xf32>
    %865 = arith.mulf %851, %864 : vector<16x192xf32>
    %cst_348 = arith.constant 0.000000e+00 : f32
    %866 = vector.broadcast %cst_348 : f32 to vector<16x192xf32>
    %867 = arith.subf %866, %845 : vector<16x192xf32>
    %868 = arith.mulf %867, %845 : vector<16x192xf32>
    %869 = math.exp %868 : vector<16x192xf32>
    %870 = arith.mulf %865, %869 : vector<16x192xf32>
    %cst_349 = arith.constant 1.000000e+00 : f32
    %871 = vector.broadcast %cst_349 : f32 to vector<16x192xf32>
    %872 = arith.subf %871, %870 : vector<16x192xf32>
    %873 = arith.mulf %844, %872 : vector<16x192xf32>
    %cst_350 = arith.constant 1.000000e+00 : f32
    %874 = vector.broadcast %cst_350 : f32 to vector<16x192xf32>
    %875 = arith.addf %874, %873 : vector<16x192xf32>
    %876 = arith.mulf %837, %875 : vector<16x192xf32>
    %cst_351 = arith.constant dense<0xFF800000> : vector<192xf32>
    %877 = vector.multi_reduction <maximumf>, %876, %cst_351 [0] : vector<16x192xf32> to vector<192xf32>
    %878 = vector.shape_cast %877 : vector<192xf32> to vector<1x192xf32>
    %879 = vector.extract_strided_slice %878 {offsets = [0, 0], sizes = [1, 32], strides = [1, 1]} : vector<1x192xf32> to vector<1x32xf32>
    %880 = vector.extract_strided_slice %803 {offsets = [0, 0], sizes = [1, 32], strides = [1, 1]} : vector<1x192xf32> to vector<1x32xf32>
    %881 = vector.extract_strided_slice %804 {offsets = [0, 0], sizes = [1, 32], strides = [1, 1]} : vector<1x192xf32> to vector<1x32xf32>
    %cst_352 = arith.constant dense<0.000000e+00> : vector<1xf32>
    %882 = vector.multi_reduction <add>, %879, %cst_352 [1] : vector<1x32xf32> to vector<1xf32>
    %883 = vector.shape_cast %882 : vector<1xf32> to vector<1x1xf32>
    %cst_353 = arith.constant 3.200000e+01 : f32
    %884 = vector.broadcast %cst_353 : f32 to vector<1x1xf32>
    %885 = arith.divf %883, %884 : vector<1x1xf32>
    %886 = vector.broadcast %885 : vector<1x1xf32> to vector<1x32xf32>
    %887 = arith.subf %879, %886 : vector<1x32xf32>
    %888 = arith.mulf %887, %887 : vector<1x32xf32>
    %cst_354 = arith.constant dense<0.000000e+00> : vector<1xf32>
    %889 = vector.multi_reduction <add>, %888, %cst_354 [1] : vector<1x32xf32> to vector<1xf32>
    %890 = vector.shape_cast %889 : vector<1xf32> to vector<1x1xf32>
    %cst_355 = arith.constant 3.200000e+01 : f32
    %891 = vector.broadcast %cst_355 : f32 to vector<1x1xf32>
    %892 = arith.divf %890, %891 : vector<1x1xf32>
    %893 = vector.broadcast %885 : vector<1x1xf32> to vector<1x32xf32>
    %894 = arith.subf %879, %893 : vector<1x32xf32>
    %cst_356 = arith.constant 9.99999974E-6 : f32
    %895 = vector.broadcast %cst_356 : f32 to vector<1x1xf32>
    %896 = arith.addf %892, %895 : vector<1x1xf32>
    %897 = math.rsqrt %896 : vector<1x1xf32>
    %898 = vector.broadcast %897 : vector<1x1xf32> to vector<1x32xf32>
    %899 = arith.mulf %894, %898 : vector<1x32xf32>
    %900 = arith.mulf %899, %880 : vector<1x32xf32>
    %901 = arith.addf %900, %881 : vector<1x32xf32>
    %902 = arith.mulf %901, %901 : vector<1x32xf32>
    %cst_357 = arith.constant dense<0.000000e+00> : vector<1xf32>
    %903 = vector.multi_reduction <add>, %902, %cst_357 [1] : vector<1x32xf32> to vector<1xf32>
    %904 = vector.shape_cast %903 : vector<1xf32> to vector<1x1xf32>
    %905 = math.sqrt %904 : vector<1x1xf32>
    %cst_358 = arith.constant 9.99999996E-13 : f32
    %906 = vector.broadcast %cst_358 : f32 to vector<1x1xf32>
    %907 = arith.maximumf %905, %906 : vector<1x1xf32>
    %908 = vector.broadcast %907 : vector<1x1xf32> to vector<1x32xf32>
    %909 = arith.divf %901, %908 : vector<1x32xf32>
    %910 = arith.mulf %909, %827 : vector<1x32xf32>
    %cst_359 = arith.constant dense<0.000000e+00> : vector<1xf32>
    %911 = vector.multi_reduction <add>, %910, %cst_359 [1] : vector<1x32xf32> to vector<1xf32>
    %912 = vector.shape_cast %911 : vector<1xf32> to vector<1x1xf32>
    %913 = vector.extract_strided_slice %878 {offsets = [0, 32], sizes = [1, 32], strides = [1, 1]} : vector<1x192xf32> to vector<1x32xf32>
    %914 = vector.extract_strided_slice %803 {offsets = [0, 32], sizes = [1, 32], strides = [1, 1]} : vector<1x192xf32> to vector<1x32xf32>
    %915 = vector.extract_strided_slice %804 {offsets = [0, 32], sizes = [1, 32], strides = [1, 1]} : vector<1x192xf32> to vector<1x32xf32>
    %cst_360 = arith.constant dense<0.000000e+00> : vector<1xf32>
    %916 = vector.multi_reduction <add>, %913, %cst_360 [1] : vector<1x32xf32> to vector<1xf32>
    %917 = vector.shape_cast %916 : vector<1xf32> to vector<1x1xf32>
    %cst_361 = arith.constant 3.200000e+01 : f32
    %918 = vector.broadcast %cst_361 : f32 to vector<1x1xf32>
    %919 = arith.divf %917, %918 : vector<1x1xf32>
    %920 = vector.broadcast %919 : vector<1x1xf32> to vector<1x32xf32>
    %921 = arith.subf %913, %920 : vector<1x32xf32>
    %922 = arith.mulf %921, %921 : vector<1x32xf32>
    %cst_362 = arith.constant dense<0.000000e+00> : vector<1xf32>
    %923 = vector.multi_reduction <add>, %922, %cst_362 [1] : vector<1x32xf32> to vector<1xf32>
    %924 = vector.shape_cast %923 : vector<1xf32> to vector<1x1xf32>
    %cst_363 = arith.constant 3.200000e+01 : f32
    %925 = vector.broadcast %cst_363 : f32 to vector<1x1xf32>
    %926 = arith.divf %924, %925 : vector<1x1xf32>
    %927 = vector.broadcast %919 : vector<1x1xf32> to vector<1x32xf32>
    %928 = arith.subf %913, %927 : vector<1x32xf32>
    %cst_364 = arith.constant 9.99999974E-6 : f32
    %929 = vector.broadcast %cst_364 : f32 to vector<1x1xf32>
    %930 = arith.addf %926, %929 : vector<1x1xf32>
    %931 = math.rsqrt %930 : vector<1x1xf32>
    %932 = vector.broadcast %931 : vector<1x1xf32> to vector<1x32xf32>
    %933 = arith.mulf %928, %932 : vector<1x32xf32>
    %934 = arith.mulf %933, %914 : vector<1x32xf32>
    %935 = arith.addf %934, %915 : vector<1x32xf32>
    %936 = arith.mulf %935, %935 : vector<1x32xf32>
    %cst_365 = arith.constant dense<0.000000e+00> : vector<1xf32>
    %937 = vector.multi_reduction <add>, %936, %cst_365 [1] : vector<1x32xf32> to vector<1xf32>
    %938 = vector.shape_cast %937 : vector<1xf32> to vector<1x1xf32>
    %939 = math.sqrt %938 : vector<1x1xf32>
    %cst_366 = arith.constant 9.99999996E-13 : f32
    %940 = vector.broadcast %cst_366 : f32 to vector<1x1xf32>
    %941 = arith.maximumf %939, %940 : vector<1x1xf32>
    %942 = vector.broadcast %941 : vector<1x1xf32> to vector<1x32xf32>
    %943 = arith.divf %935, %942 : vector<1x32xf32>
    %944 = arith.mulf %943, %827 : vector<1x32xf32>
    %cst_367 = arith.constant dense<0.000000e+00> : vector<1xf32>
    %945 = vector.multi_reduction <add>, %944, %cst_367 [1] : vector<1x32xf32> to vector<1xf32>
    %946 = vector.shape_cast %945 : vector<1xf32> to vector<1x1xf32>
    %947 = vector.extract_strided_slice %878 {offsets = [0, 64], sizes = [1, 32], strides = [1, 1]} : vector<1x192xf32> to vector<1x32xf32>
    %948 = vector.extract_strided_slice %803 {offsets = [0, 64], sizes = [1, 32], strides = [1, 1]} : vector<1x192xf32> to vector<1x32xf32>
    %949 = vector.extract_strided_slice %804 {offsets = [0, 64], sizes = [1, 32], strides = [1, 1]} : vector<1x192xf32> to vector<1x32xf32>
    %cst_368 = arith.constant dense<0.000000e+00> : vector<1xf32>
    %950 = vector.multi_reduction <add>, %947, %cst_368 [1] : vector<1x32xf32> to vector<1xf32>
    %951 = vector.shape_cast %950 : vector<1xf32> to vector<1x1xf32>
    %cst_369 = arith.constant 3.200000e+01 : f32
    %952 = vector.broadcast %cst_369 : f32 to vector<1x1xf32>
    %953 = arith.divf %951, %952 : vector<1x1xf32>
    %954 = vector.broadcast %953 : vector<1x1xf32> to vector<1x32xf32>
    %955 = arith.subf %947, %954 : vector<1x32xf32>
    %956 = arith.mulf %955, %955 : vector<1x32xf32>
    %cst_370 = arith.constant dense<0.000000e+00> : vector<1xf32>
    %957 = vector.multi_reduction <add>, %956, %cst_370 [1] : vector<1x32xf32> to vector<1xf32>
    %958 = vector.shape_cast %957 : vector<1xf32> to vector<1x1xf32>
    %cst_371 = arith.constant 3.200000e+01 : f32
    %959 = vector.broadcast %cst_371 : f32 to vector<1x1xf32>
    %960 = arith.divf %958, %959 : vector<1x1xf32>
    %961 = vector.broadcast %953 : vector<1x1xf32> to vector<1x32xf32>
    %962 = arith.subf %947, %961 : vector<1x32xf32>
    %cst_372 = arith.constant 9.99999974E-6 : f32
    %963 = vector.broadcast %cst_372 : f32 to vector<1x1xf32>
    %964 = arith.addf %960, %963 : vector<1x1xf32>
    %965 = math.rsqrt %964 : vector<1x1xf32>
    %966 = vector.broadcast %965 : vector<1x1xf32> to vector<1x32xf32>
    %967 = arith.mulf %962, %966 : vector<1x32xf32>
    %968 = arith.mulf %967, %948 : vector<1x32xf32>
    %969 = arith.addf %968, %949 : vector<1x32xf32>
    %970 = arith.mulf %969, %969 : vector<1x32xf32>
    %cst_373 = arith.constant dense<0.000000e+00> : vector<1xf32>
    %971 = vector.multi_reduction <add>, %970, %cst_373 [1] : vector<1x32xf32> to vector<1xf32>
    %972 = vector.shape_cast %971 : vector<1xf32> to vector<1x1xf32>
    %973 = math.sqrt %972 : vector<1x1xf32>
    %cst_374 = arith.constant 9.99999996E-13 : f32
    %974 = vector.broadcast %cst_374 : f32 to vector<1x1xf32>
    %975 = arith.maximumf %973, %974 : vector<1x1xf32>
    %976 = vector.broadcast %975 : vector<1x1xf32> to vector<1x32xf32>
    %977 = arith.divf %969, %976 : vector<1x32xf32>
    %978 = arith.mulf %977, %827 : vector<1x32xf32>
    %cst_375 = arith.constant dense<0.000000e+00> : vector<1xf32>
    %979 = vector.multi_reduction <add>, %978, %cst_375 [1] : vector<1x32xf32> to vector<1xf32>
    %980 = vector.shape_cast %979 : vector<1xf32> to vector<1x1xf32>
    %981 = vector.extract_strided_slice %878 {offsets = [0, 96], sizes = [1, 32], strides = [1, 1]} : vector<1x192xf32> to vector<1x32xf32>
    %982 = vector.extract_strided_slice %803 {offsets = [0, 96], sizes = [1, 32], strides = [1, 1]} : vector<1x192xf32> to vector<1x32xf32>
    %983 = vector.extract_strided_slice %804 {offsets = [0, 96], sizes = [1, 32], strides = [1, 1]} : vector<1x192xf32> to vector<1x32xf32>
    %cst_376 = arith.constant dense<0.000000e+00> : vector<1xf32>
    %984 = vector.multi_reduction <add>, %981, %cst_376 [1] : vector<1x32xf32> to vector<1xf32>
    %985 = vector.shape_cast %984 : vector<1xf32> to vector<1x1xf32>
    %cst_377 = arith.constant 3.200000e+01 : f32
    %986 = vector.broadcast %cst_377 : f32 to vector<1x1xf32>
    %987 = arith.divf %985, %986 : vector<1x1xf32>
    %988 = vector.broadcast %987 : vector<1x1xf32> to vector<1x32xf32>
    %989 = arith.subf %981, %988 : vector<1x32xf32>
    %990 = arith.mulf %989, %989 : vector<1x32xf32>
    %cst_378 = arith.constant dense<0.000000e+00> : vector<1xf32>
    %991 = vector.multi_reduction <add>, %990, %cst_378 [1] : vector<1x32xf32> to vector<1xf32>
    %992 = vector.shape_cast %991 : vector<1xf32> to vector<1x1xf32>
    %cst_379 = arith.constant 3.200000e+01 : f32
    %993 = vector.broadcast %cst_379 : f32 to vector<1x1xf32>
    %994 = arith.divf %992, %993 : vector<1x1xf32>
    %995 = vector.broadcast %987 : vector<1x1xf32> to vector<1x32xf32>
    %996 = arith.subf %981, %995 : vector<1x32xf32>
    %cst_380 = arith.constant 9.99999974E-6 : f32
    %997 = vector.broadcast %cst_380 : f32 to vector<1x1xf32>
    %998 = arith.addf %994, %997 : vector<1x1xf32>
    %999 = math.rsqrt %998 : vector<1x1xf32>
    %1000 = vector.broadcast %999 : vector<1x1xf32> to vector<1x32xf32>
    %1001 = arith.mulf %996, %1000 : vector<1x32xf32>
    %1002 = arith.mulf %1001, %982 : vector<1x32xf32>
    %1003 = arith.addf %1002, %983 : vector<1x32xf32>
    %1004 = arith.mulf %1003, %1003 : vector<1x32xf32>
    %cst_381 = arith.constant dense<0.000000e+00> : vector<1xf32>
    %1005 = vector.multi_reduction <add>, %1004, %cst_381 [1] : vector<1x32xf32> to vector<1xf32>
    %1006 = vector.shape_cast %1005 : vector<1xf32> to vector<1x1xf32>
    %1007 = math.sqrt %1006 : vector<1x1xf32>
    %cst_382 = arith.constant 9.99999996E-13 : f32
    %1008 = vector.broadcast %cst_382 : f32 to vector<1x1xf32>
    %1009 = arith.maximumf %1007, %1008 : vector<1x1xf32>
    %1010 = vector.broadcast %1009 : vector<1x1xf32> to vector<1x32xf32>
    %1011 = arith.divf %1003, %1010 : vector<1x32xf32>
    %1012 = arith.mulf %1011, %827 : vector<1x32xf32>
    %cst_383 = arith.constant dense<0.000000e+00> : vector<1xf32>
    %1013 = vector.multi_reduction <add>, %1012, %cst_383 [1] : vector<1x32xf32> to vector<1xf32>
    %1014 = vector.shape_cast %1013 : vector<1xf32> to vector<1x1xf32>
    %1015 = vector.extract_strided_slice %878 {offsets = [0, 128], sizes = [1, 32], strides = [1, 1]} : vector<1x192xf32> to vector<1x32xf32>
    %1016 = vector.extract_strided_slice %803 {offsets = [0, 128], sizes = [1, 32], strides = [1, 1]} : vector<1x192xf32> to vector<1x32xf32>
    %1017 = vector.extract_strided_slice %804 {offsets = [0, 128], sizes = [1, 32], strides = [1, 1]} : vector<1x192xf32> to vector<1x32xf32>
    %cst_384 = arith.constant dense<0.000000e+00> : vector<1xf32>
    %1018 = vector.multi_reduction <add>, %1015, %cst_384 [1] : vector<1x32xf32> to vector<1xf32>
    %1019 = vector.shape_cast %1018 : vector<1xf32> to vector<1x1xf32>
    %cst_385 = arith.constant 3.200000e+01 : f32
    %1020 = vector.broadcast %cst_385 : f32 to vector<1x1xf32>
    %1021 = arith.divf %1019, %1020 : vector<1x1xf32>
    %1022 = vector.broadcast %1021 : vector<1x1xf32> to vector<1x32xf32>
    %1023 = arith.subf %1015, %1022 : vector<1x32xf32>
    %1024 = arith.mulf %1023, %1023 : vector<1x32xf32>
    %cst_386 = arith.constant dense<0.000000e+00> : vector<1xf32>
    %1025 = vector.multi_reduction <add>, %1024, %cst_386 [1] : vector<1x32xf32> to vector<1xf32>
    %1026 = vector.shape_cast %1025 : vector<1xf32> to vector<1x1xf32>
    %cst_387 = arith.constant 3.200000e+01 : f32
    %1027 = vector.broadcast %cst_387 : f32 to vector<1x1xf32>
    %1028 = arith.divf %1026, %1027 : vector<1x1xf32>
    %1029 = vector.broadcast %1021 : vector<1x1xf32> to vector<1x32xf32>
    %1030 = arith.subf %1015, %1029 : vector<1x32xf32>
    %cst_388 = arith.constant 9.99999974E-6 : f32
    %1031 = vector.broadcast %cst_388 : f32 to vector<1x1xf32>
    %1032 = arith.addf %1028, %1031 : vector<1x1xf32>
    %1033 = math.rsqrt %1032 : vector<1x1xf32>
    %1034 = vector.broadcast %1033 : vector<1x1xf32> to vector<1x32xf32>
    %1035 = arith.mulf %1030, %1034 : vector<1x32xf32>
    %1036 = arith.mulf %1035, %1016 : vector<1x32xf32>
    %1037 = arith.addf %1036, %1017 : vector<1x32xf32>
    %1038 = arith.mulf %1037, %1037 : vector<1x32xf32>
    %cst_389 = arith.constant dense<0.000000e+00> : vector<1xf32>
    %1039 = vector.multi_reduction <add>, %1038, %cst_389 [1] : vector<1x32xf32> to vector<1xf32>
    %1040 = vector.shape_cast %1039 : vector<1xf32> to vector<1x1xf32>
    %1041 = math.sqrt %1040 : vector<1x1xf32>
    %cst_390 = arith.constant 9.99999996E-13 : f32
    %1042 = vector.broadcast %cst_390 : f32 to vector<1x1xf32>
    %1043 = arith.maximumf %1041, %1042 : vector<1x1xf32>
    %1044 = vector.broadcast %1043 : vector<1x1xf32> to vector<1x32xf32>
    %1045 = arith.divf %1037, %1044 : vector<1x32xf32>
    %1046 = arith.mulf %1045, %827 : vector<1x32xf32>
    %cst_391 = arith.constant dense<0.000000e+00> : vector<1xf32>
    %1047 = vector.multi_reduction <add>, %1046, %cst_391 [1] : vector<1x32xf32> to vector<1xf32>
    %1048 = vector.shape_cast %1047 : vector<1xf32> to vector<1x1xf32>
    %1049 = vector.extract_strided_slice %878 {offsets = [0, 160], sizes = [1, 32], strides = [1, 1]} : vector<1x192xf32> to vector<1x32xf32>
    %1050 = vector.extract_strided_slice %803 {offsets = [0, 160], sizes = [1, 32], strides = [1, 1]} : vector<1x192xf32> to vector<1x32xf32>
    %1051 = vector.extract_strided_slice %804 {offsets = [0, 160], sizes = [1, 32], strides = [1, 1]} : vector<1x192xf32> to vector<1x32xf32>
    %cst_392 = arith.constant dense<0.000000e+00> : vector<1xf32>
    %1052 = vector.multi_reduction <add>, %1049, %cst_392 [1] : vector<1x32xf32> to vector<1xf32>
    %1053 = vector.shape_cast %1052 : vector<1xf32> to vector<1x1xf32>
    %cst_393 = arith.constant 3.200000e+01 : f32
    %1054 = vector.broadcast %cst_393 : f32 to vector<1x1xf32>
    %1055 = arith.divf %1053, %1054 : vector<1x1xf32>
    %1056 = vector.broadcast %1055 : vector<1x1xf32> to vector<1x32xf32>
    %1057 = arith.subf %1049, %1056 : vector<1x32xf32>
    %1058 = arith.mulf %1057, %1057 : vector<1x32xf32>
    %cst_394 = arith.constant dense<0.000000e+00> : vector<1xf32>
    %1059 = vector.multi_reduction <add>, %1058, %cst_394 [1] : vector<1x32xf32> to vector<1xf32>
    %1060 = vector.shape_cast %1059 : vector<1xf32> to vector<1x1xf32>
    %cst_395 = arith.constant 3.200000e+01 : f32
    %1061 = vector.broadcast %cst_395 : f32 to vector<1x1xf32>
    %1062 = arith.divf %1060, %1061 : vector<1x1xf32>
    %1063 = vector.broadcast %1055 : vector<1x1xf32> to vector<1x32xf32>
    %1064 = arith.subf %1049, %1063 : vector<1x32xf32>
    %cst_396 = arith.constant 9.99999974E-6 : f32
    %1065 = vector.broadcast %cst_396 : f32 to vector<1x1xf32>
    %1066 = arith.addf %1062, %1065 : vector<1x1xf32>
    %1067 = math.rsqrt %1066 : vector<1x1xf32>
    %1068 = vector.broadcast %1067 : vector<1x1xf32> to vector<1x32xf32>
    %1069 = arith.mulf %1064, %1068 : vector<1x32xf32>
    %1070 = arith.mulf %1069, %1050 : vector<1x32xf32>
    %1071 = arith.addf %1070, %1051 : vector<1x32xf32>
    %1072 = arith.mulf %1071, %1071 : vector<1x32xf32>
    %cst_397 = arith.constant dense<0.000000e+00> : vector<1xf32>
    %1073 = vector.multi_reduction <add>, %1072, %cst_397 [1] : vector<1x32xf32> to vector<1xf32>
    %1074 = vector.shape_cast %1073 : vector<1xf32> to vector<1x1xf32>
    %1075 = math.sqrt %1074 : vector<1x1xf32>
    %cst_398 = arith.constant 9.99999996E-13 : f32
    %1076 = vector.broadcast %cst_398 : f32 to vector<1x1xf32>
    %1077 = arith.maximumf %1075, %1076 : vector<1x1xf32>
    %1078 = vector.broadcast %1077 : vector<1x1xf32> to vector<1x32xf32>
    %1079 = arith.divf %1071, %1078 : vector<1x32xf32>
    %1080 = arith.mulf %1079, %827 : vector<1x32xf32>
    %cst_399 = arith.constant dense<0.000000e+00> : vector<1xf32>
    %1081 = vector.multi_reduction <add>, %1080, %cst_399 [1] : vector<1x32xf32> to vector<1xf32>
    %1082 = vector.shape_cast %1081 : vector<1xf32> to vector<1x1xf32>
    %1083 = arith.maximumf %912, %946 : vector<1x1xf32>
    %1084 = arith.maximumf %1083, %980 : vector<1x1xf32>
    %1085 = arith.maximumf %1084, %1014 : vector<1x1xf32>
    %1086 = arith.maximumf %1085, %1048 : vector<1x1xf32>
    %1087 = arith.maximumf %1086, %1082 : vector<1x1xf32>
    %1088 = arith.subf %912, %1087 : vector<1x1xf32>
    %1089 = math.exp %1088 : vector<1x1xf32>
    %1090 = arith.subf %946, %1087 : vector<1x1xf32>
    %1091 = math.exp %1090 : vector<1x1xf32>
    %1092 = arith.subf %980, %1087 : vector<1x1xf32>
    %1093 = math.exp %1092 : vector<1x1xf32>
    %1094 = arith.subf %1014, %1087 : vector<1x1xf32>
    %1095 = math.exp %1094 : vector<1x1xf32>
    %1096 = arith.subf %1048, %1087 : vector<1x1xf32>
    %1097 = math.exp %1096 : vector<1x1xf32>
    %1098 = arith.subf %1082, %1087 : vector<1x1xf32>
    %1099 = math.exp %1098 : vector<1x1xf32>
    %1100 = arith.addf %1089, %1091 : vector<1x1xf32>
    %1101 = arith.addf %1100, %1093 : vector<1x1xf32>
    %1102 = arith.addf %1101, %1095 : vector<1x1xf32>
    %1103 = arith.addf %1102, %1097 : vector<1x1xf32>
    %1104 = arith.addf %1103, %1099 : vector<1x1xf32>
    %cst_400 = arith.constant 1.000000e+00 : f32
    %1105 = vector.broadcast %cst_400 : f32 to vector<1x1xf32>
    %1106 = arith.divf %1105, %1104 : vector<1x1xf32>
    %1107 = arith.mulf %1089, %1106 : vector<1x1xf32>
    %1108 = vector.broadcast %1107 : vector<1x1xf32> to vector<1x32xf32>
    %1109 = arith.mulf %909, %1108 : vector<1x32xf32>
    %1110 = arith.mulf %1091, %1106 : vector<1x1xf32>
    %1111 = vector.broadcast %1110 : vector<1x1xf32> to vector<1x32xf32>
    %1112 = arith.mulf %943, %1111 : vector<1x32xf32>
    %1113 = arith.addf %1109, %1112 : vector<1x32xf32>
    %1114 = arith.mulf %1093, %1106 : vector<1x1xf32>
    %1115 = vector.broadcast %1114 : vector<1x1xf32> to vector<1x32xf32>
    %1116 = arith.mulf %977, %1115 : vector<1x32xf32>
    %1117 = arith.addf %1113, %1116 : vector<1x32xf32>
    %1118 = arith.mulf %1095, %1106 : vector<1x1xf32>
    %1119 = vector.broadcast %1118 : vector<1x1xf32> to vector<1x32xf32>
    %1120 = arith.mulf %1011, %1119 : vector<1x32xf32>
    %1121 = arith.addf %1117, %1120 : vector<1x32xf32>
    %1122 = arith.mulf %1097, %1106 : vector<1x1xf32>
    %1123 = vector.broadcast %1122 : vector<1x1xf32> to vector<1x32xf32>
    %1124 = arith.mulf %1045, %1123 : vector<1x32xf32>
    %1125 = arith.addf %1121, %1124 : vector<1x32xf32>
    %1126 = arith.mulf %1099, %1106 : vector<1x1xf32>
    %1127 = vector.broadcast %1126 : vector<1x1xf32> to vector<1x32xf32>
    %1128 = arith.mulf %1079, %1127 : vector<1x32xf32>
    %1129 = arith.addf %1125, %1128 : vector<1x32xf32>
    %1130 = arith.mulf %827, %827 : vector<1x32xf32>
    %cst_401 = arith.constant dense<0.000000e+00> : vector<1xf32>
    %1131 = vector.multi_reduction <add>, %1130, %cst_401 [1] : vector<1x32xf32> to vector<1xf32>
    %1132 = vector.shape_cast %1131 : vector<1xf32> to vector<1x1xf32>
    %1133 = math.sqrt %1132 : vector<1x1xf32>
    %cst_402 = arith.constant 9.99999996E-13 : f32
    %1134 = vector.broadcast %cst_402 : f32 to vector<1x1xf32>
    %1135 = arith.maximumf %1133, %1134 : vector<1x1xf32>
    %1136 = vector.broadcast %1135 : vector<1x1xf32> to vector<1x32xf32>
    %1137 = arith.divf %827, %1136 : vector<1x32xf32>
    %1138 = arith.mulf %1129, %1129 : vector<1x32xf32>
    %cst_403 = arith.constant dense<0.000000e+00> : vector<1xf32>
    %1139 = vector.multi_reduction <add>, %1138, %cst_403 [1] : vector<1x32xf32> to vector<1xf32>
    %1140 = vector.shape_cast %1139 : vector<1xf32> to vector<1x1xf32>
    %1141 = math.sqrt %1140 : vector<1x1xf32>
    %cst_404 = arith.constant 9.99999996E-13 : f32
    %1142 = vector.broadcast %cst_404 : f32 to vector<1x1xf32>
    %1143 = arith.maximumf %1141, %1142 : vector<1x1xf32>
    %1144 = vector.broadcast %1143 : vector<1x1xf32> to vector<1x32xf32>
    %1145 = arith.divf %1129, %1144 : vector<1x32xf32>
    %1146 = tpu.concatenate %1137, %1145 in 1 : vector<1x32xf32>, vector<1x32xf32> -> vector<1x64xf32>
    %cst_405 = arith.constant dense<0.000000e+00> : vector<17xf32>
    %1147 = vector.multi_reduction <add>, %788, %cst_405 [1] : vector<17x32xf32> to vector<17xf32>
    %1148 = vector.shape_cast %1147 : vector<17xf32> to vector<17x1xf32>
    %cst_406 = arith.constant 3.200000e+01 : f32
    %1149 = vector.broadcast %cst_406 : f32 to vector<17x1xf32>
    %1150 = arith.divf %1148, %1149 : vector<17x1xf32>
    %1151 = vector.broadcast %1150 : vector<17x1xf32> to vector<17x32xf32>
    %1152 = arith.subf %788, %1151 : vector<17x32xf32>
    %1153 = arith.mulf %1152, %1152 : vector<17x32xf32>
    %cst_407 = arith.constant dense<0.000000e+00> : vector<17xf32>
    %1154 = vector.multi_reduction <add>, %1153, %cst_407 [1] : vector<17x32xf32> to vector<17xf32>
    %1155 = vector.shape_cast %1154 : vector<17xf32> to vector<17x1xf32>
    %cst_408 = arith.constant 3.200000e+01 : f32
    %1156 = vector.broadcast %cst_408 : f32 to vector<17x1xf32>
    %1157 = arith.divf %1155, %1156 : vector<17x1xf32>
    %1158 = vector.broadcast %1150 : vector<17x1xf32> to vector<17x32xf32>
    %1159 = arith.subf %788, %1158 : vector<17x32xf32>
    %cst_409 = arith.constant 9.99999997E-7 : f32
    %1160 = vector.broadcast %cst_409 : f32 to vector<17x1xf32>
    %1161 = arith.addf %1157, %1160 : vector<17x1xf32>
    %1162 = math.rsqrt %1161 : vector<17x1xf32>
    %1163 = vector.broadcast %1162 : vector<17x1xf32> to vector<17x32xf32>
    %1164 = arith.mulf %1159, %1163 : vector<17x32xf32>
    %1165 = vector.broadcast %789 : vector<1x32xf32> to vector<17x32xf32>
    %1166 = arith.mulf %1164, %1165 : vector<17x32xf32>
    %1167 = vector.broadcast %790 : vector<1x32xf32> to vector<17x32xf32>
    %1168 = arith.addf %1166, %1167 : vector<17x32xf32>
    %1169 = vector.extract_strided_slice %1168 {offsets = [0, 0], sizes = [1, 32], strides = [1, 1]} : vector<17x32xf32> to vector<1x32xf32>
    %1170 = vector.extract_strided_slice %1168 {offsets = [1, 0], sizes = [16, 32], strides = [1, 1]} : vector<17x32xf32> to vector<16x32xf32>
    %cst_410 = arith.constant dense<0.000000e+00> : vector<16x192xf32>
    %1171 = tpu.matmul %1170, %791, %cst_410 {dimension_numbers = #tpu.dot_dimension_numbers<[1], [0], [0], [1], [0, 0, 1, 1], [], []>} : vector<16x32xf32>, vector<32x192xf32>, vector<16x192xf32> -> vector<16x192xf32>
    %1172 = vector.broadcast %792 : vector<1x192xf32> to vector<16x192xf32>
    %1173 = arith.addf %1171, %1172 : vector<16x192xf32>
    %1174 = vector.broadcast %798 : vector<1x192xf32> to vector<16x192xf32>
    %1175 = arith.mulf %1173, %1174 : vector<16x192xf32>
    %1176 = vector.broadcast %802 : vector<1x192xf32> to vector<16x192xf32>
    %1177 = arith.addf %1175, %1176 : vector<16x192xf32>
    %cst_411 = arith.constant 5.000000e-01 : f32
    %1178 = vector.broadcast %cst_411 : f32 to vector<16x192xf32>
    %1179 = arith.mulf %1178, %1177 : vector<16x192xf32>
    %cst_412 = arith.constant 0.707106769 : f32
    %1180 = vector.broadcast %cst_412 : f32 to vector<16x192xf32>
    %1181 = arith.mulf %1177, %1180 : vector<16x192xf32>
    %cst_413 = arith.constant 0.000000e+00 : f32
    %1182 = vector.broadcast %cst_413 : f32 to vector<16x192xf32>
    %1183 = arith.cmpf oge, %1181, %1182 : vector<16x192xf32>
    %cst_414 = arith.constant 1.000000e+00 : f32
    %cst_415 = arith.constant -1.000000e+00 : f32
    %1184 = vector.broadcast %cst_414 : f32 to vector<16x192xf32>
    %1185 = vector.broadcast %cst_415 : f32 to vector<16x192xf32>
    %1186 = arith.select %1183, %1184, %1185 : vector<16x192xi1>, vector<16x192xf32>
    %1187 = math.absf %1181 : vector<16x192xf32>
    %cst_416 = arith.constant 0.327591091 : f32
    %1188 = vector.broadcast %cst_416 : f32 to vector<16x192xf32>
    %1189 = arith.mulf %1188, %1187 : vector<16x192xf32>
    %cst_417 = arith.constant 1.000000e+00 : f32
    %1190 = vector.broadcast %cst_417 : f32 to vector<16x192xf32>
    %1191 = arith.addf %1190, %1189 : vector<16x192xf32>
    %cst_418 = arith.constant 1.000000e+00 : f32
    %1192 = vector.broadcast %cst_418 : f32 to vector<16x192xf32>
    %1193 = arith.divf %1192, %1191 : vector<16x192xf32>
    %cst_419 = arith.constant 1.06140542 : f32
    %1194 = vector.broadcast %cst_419 : f32 to vector<16x192xf32>
    %1195 = arith.mulf %1193, %1194 : vector<16x192xf32>
    %cst_420 = arith.constant -1.45315206 : f32
    %1196 = vector.broadcast %cst_420 : f32 to vector<16x192xf32>
    %1197 = arith.addf %1196, %1195 : vector<16x192xf32>
    %1198 = arith.mulf %1193, %1197 : vector<16x192xf32>
    %cst_421 = arith.constant 1.42141378 : f32
    %1199 = vector.broadcast %cst_421 : f32 to vector<16x192xf32>
    %1200 = arith.addf %1199, %1198 : vector<16x192xf32>
    %1201 = arith.mulf %1193, %1200 : vector<16x192xf32>
    %cst_422 = arith.constant -0.284496725 : f32
    %1202 = vector.broadcast %cst_422 : f32 to vector<16x192xf32>
    %1203 = arith.addf %1202, %1201 : vector<16x192xf32>
    %1204 = arith.mulf %1193, %1203 : vector<16x192xf32>
    %cst_423 = arith.constant 0.254829586 : f32
    %1205 = vector.broadcast %cst_423 : f32 to vector<16x192xf32>
    %1206 = arith.addf %1205, %1204 : vector<16x192xf32>
    %1207 = arith.mulf %1193, %1206 : vector<16x192xf32>
    %cst_424 = arith.constant 0.000000e+00 : f32
    %1208 = vector.broadcast %cst_424 : f32 to vector<16x192xf32>
    %1209 = arith.subf %1208, %1187 : vector<16x192xf32>
    %1210 = arith.mulf %1209, %1187 : vector<16x192xf32>
    %1211 = math.exp %1210 : vector<16x192xf32>
    %1212 = arith.mulf %1207, %1211 : vector<16x192xf32>
    %cst_425 = arith.constant 1.000000e+00 : f32
    %1213 = vector.broadcast %cst_425 : f32 to vector<16x192xf32>
    %1214 = arith.subf %1213, %1212 : vector<16x192xf32>
    %1215 = arith.mulf %1186, %1214 : vector<16x192xf32>
    %cst_426 = arith.constant 1.000000e+00 : f32
    %1216 = vector.broadcast %cst_426 : f32 to vector<16x192xf32>
    %1217 = arith.addf %1216, %1215 : vector<16x192xf32>
    %1218 = arith.mulf %1179, %1217 : vector<16x192xf32>
    %cst_427 = arith.constant dense<0xFF800000> : vector<192xf32>
    %1219 = vector.multi_reduction <maximumf>, %1218, %cst_427 [0] : vector<16x192xf32> to vector<192xf32>
    %1220 = vector.shape_cast %1219 : vector<192xf32> to vector<1x192xf32>
    %1221 = vector.extract_strided_slice %1220 {offsets = [0, 0], sizes = [1, 32], strides = [1, 1]} : vector<1x192xf32> to vector<1x32xf32>
    %1222 = vector.extract_strided_slice %803 {offsets = [0, 0], sizes = [1, 32], strides = [1, 1]} : vector<1x192xf32> to vector<1x32xf32>
    %1223 = vector.extract_strided_slice %804 {offsets = [0, 0], sizes = [1, 32], strides = [1, 1]} : vector<1x192xf32> to vector<1x32xf32>
    %cst_428 = arith.constant dense<0.000000e+00> : vector<1xf32>
    %1224 = vector.multi_reduction <add>, %1221, %cst_428 [1] : vector<1x32xf32> to vector<1xf32>
    %1225 = vector.shape_cast %1224 : vector<1xf32> to vector<1x1xf32>
    %cst_429 = arith.constant 3.200000e+01 : f32
    %1226 = vector.broadcast %cst_429 : f32 to vector<1x1xf32>
    %1227 = arith.divf %1225, %1226 : vector<1x1xf32>
    %1228 = vector.broadcast %1227 : vector<1x1xf32> to vector<1x32xf32>
    %1229 = arith.subf %1221, %1228 : vector<1x32xf32>
    %1230 = arith.mulf %1229, %1229 : vector<1x32xf32>
    %cst_430 = arith.constant dense<0.000000e+00> : vector<1xf32>
    %1231 = vector.multi_reduction <add>, %1230, %cst_430 [1] : vector<1x32xf32> to vector<1xf32>
    %1232 = vector.shape_cast %1231 : vector<1xf32> to vector<1x1xf32>
    %cst_431 = arith.constant 3.200000e+01 : f32
    %1233 = vector.broadcast %cst_431 : f32 to vector<1x1xf32>
    %1234 = arith.divf %1232, %1233 : vector<1x1xf32>
    %1235 = vector.broadcast %1227 : vector<1x1xf32> to vector<1x32xf32>
    %1236 = arith.subf %1221, %1235 : vector<1x32xf32>
    %cst_432 = arith.constant 9.99999974E-6 : f32
    %1237 = vector.broadcast %cst_432 : f32 to vector<1x1xf32>
    %1238 = arith.addf %1234, %1237 : vector<1x1xf32>
    %1239 = math.rsqrt %1238 : vector<1x1xf32>
    %1240 = vector.broadcast %1239 : vector<1x1xf32> to vector<1x32xf32>
    %1241 = arith.mulf %1236, %1240 : vector<1x32xf32>
    %1242 = arith.mulf %1241, %1222 : vector<1x32xf32>
    %1243 = arith.addf %1242, %1223 : vector<1x32xf32>
    %1244 = arith.mulf %1243, %1243 : vector<1x32xf32>
    %cst_433 = arith.constant dense<0.000000e+00> : vector<1xf32>
    %1245 = vector.multi_reduction <add>, %1244, %cst_433 [1] : vector<1x32xf32> to vector<1xf32>
    %1246 = vector.shape_cast %1245 : vector<1xf32> to vector<1x1xf32>
    %1247 = math.sqrt %1246 : vector<1x1xf32>
    %cst_434 = arith.constant 9.99999996E-13 : f32
    %1248 = vector.broadcast %cst_434 : f32 to vector<1x1xf32>
    %1249 = arith.maximumf %1247, %1248 : vector<1x1xf32>
    %1250 = vector.broadcast %1249 : vector<1x1xf32> to vector<1x32xf32>
    %1251 = arith.divf %1243, %1250 : vector<1x32xf32>
    %1252 = arith.mulf %1251, %1169 : vector<1x32xf32>
    %cst_435 = arith.constant dense<0.000000e+00> : vector<1xf32>
    %1253 = vector.multi_reduction <add>, %1252, %cst_435 [1] : vector<1x32xf32> to vector<1xf32>
    %1254 = vector.shape_cast %1253 : vector<1xf32> to vector<1x1xf32>
    %1255 = vector.extract_strided_slice %1220 {offsets = [0, 32], sizes = [1, 32], strides = [1, 1]} : vector<1x192xf32> to vector<1x32xf32>
    %1256 = vector.extract_strided_slice %803 {offsets = [0, 32], sizes = [1, 32], strides = [1, 1]} : vector<1x192xf32> to vector<1x32xf32>
    %1257 = vector.extract_strided_slice %804 {offsets = [0, 32], sizes = [1, 32], strides = [1, 1]} : vector<1x192xf32> to vector<1x32xf32>
    %cst_436 = arith.constant dense<0.000000e+00> : vector<1xf32>
    %1258 = vector.multi_reduction <add>, %1255, %cst_436 [1] : vector<1x32xf32> to vector<1xf32>
    %1259 = vector.shape_cast %1258 : vector<1xf32> to vector<1x1xf32>
    %cst_437 = arith.constant 3.200000e+01 : f32
    %1260 = vector.broadcast %cst_437 : f32 to vector<1x1xf32>
    %1261 = arith.divf %1259, %1260 : vector<1x1xf32>
    %1262 = vector.broadcast %1261 : vector<1x1xf32> to vector<1x32xf32>
    %1263 = arith.subf %1255, %1262 : vector<1x32xf32>
    %1264 = arith.mulf %1263, %1263 : vector<1x32xf32>
    %cst_438 = arith.constant dense<0.000000e+00> : vector<1xf32>
    %1265 = vector.multi_reduction <add>, %1264, %cst_438 [1] : vector<1x32xf32> to vector<1xf32>
    %1266 = vector.shape_cast %1265 : vector<1xf32> to vector<1x1xf32>
    %cst_439 = arith.constant 3.200000e+01 : f32
    %1267 = vector.broadcast %cst_439 : f32 to vector<1x1xf32>
    %1268 = arith.divf %1266, %1267 : vector<1x1xf32>
    %1269 = vector.broadcast %1261 : vector<1x1xf32> to vector<1x32xf32>
    %1270 = arith.subf %1255, %1269 : vector<1x32xf32>
    %cst_440 = arith.constant 9.99999974E-6 : f32
    %1271 = vector.broadcast %cst_440 : f32 to vector<1x1xf32>
    %1272 = arith.addf %1268, %1271 : vector<1x1xf32>
    %1273 = math.rsqrt %1272 : vector<1x1xf32>
    %1274 = vector.broadcast %1273 : vector<1x1xf32> to vector<1x32xf32>
    %1275 = arith.mulf %1270, %1274 : vector<1x32xf32>
    %1276 = arith.mulf %1275, %1256 : vector<1x32xf32>
    %1277 = arith.addf %1276, %1257 : vector<1x32xf32>
    %1278 = arith.mulf %1277, %1277 : vector<1x32xf32>
    %cst_441 = arith.constant dense<0.000000e+00> : vector<1xf32>
    %1279 = vector.multi_reduction <add>, %1278, %cst_441 [1] : vector<1x32xf32> to vector<1xf32>
    %1280 = vector.shape_cast %1279 : vector<1xf32> to vector<1x1xf32>
    %1281 = math.sqrt %1280 : vector<1x1xf32>
    %cst_442 = arith.constant 9.99999996E-13 : f32
    %1282 = vector.broadcast %cst_442 : f32 to vector<1x1xf32>
    %1283 = arith.maximumf %1281, %1282 : vector<1x1xf32>
    %1284 = vector.broadcast %1283 : vector<1x1xf32> to vector<1x32xf32>
    %1285 = arith.divf %1277, %1284 : vector<1x32xf32>
    %1286 = arith.mulf %1285, %1169 : vector<1x32xf32>
    %cst_443 = arith.constant dense<0.000000e+00> : vector<1xf32>
    %1287 = vector.multi_reduction <add>, %1286, %cst_443 [1] : vector<1x32xf32> to vector<1xf32>
    %1288 = vector.shape_cast %1287 : vector<1xf32> to vector<1x1xf32>
    %1289 = vector.extract_strided_slice %1220 {offsets = [0, 64], sizes = [1, 32], strides = [1, 1]} : vector<1x192xf32> to vector<1x32xf32>
    %1290 = vector.extract_strided_slice %803 {offsets = [0, 64], sizes = [1, 32], strides = [1, 1]} : vector<1x192xf32> to vector<1x32xf32>
    %1291 = vector.extract_strided_slice %804 {offsets = [0, 64], sizes = [1, 32], strides = [1, 1]} : vector<1x192xf32> to vector<1x32xf32>
    %cst_444 = arith.constant dense<0.000000e+00> : vector<1xf32>
    %1292 = vector.multi_reduction <add>, %1289, %cst_444 [1] : vector<1x32xf32> to vector<1xf32>
    %1293 = vector.shape_cast %1292 : vector<1xf32> to vector<1x1xf32>
    %cst_445 = arith.constant 3.200000e+01 : f32
    %1294 = vector.broadcast %cst_445 : f32 to vector<1x1xf32>
    %1295 = arith.divf %1293, %1294 : vector<1x1xf32>
    %1296 = vector.broadcast %1295 : vector<1x1xf32> to vector<1x32xf32>
    %1297 = arith.subf %1289, %1296 : vector<1x32xf32>
    %1298 = arith.mulf %1297, %1297 : vector<1x32xf32>
    %cst_446 = arith.constant dense<0.000000e+00> : vector<1xf32>
    %1299 = vector.multi_reduction <add>, %1298, %cst_446 [1] : vector<1x32xf32> to vector<1xf32>
    %1300 = vector.shape_cast %1299 : vector<1xf32> to vector<1x1xf32>
    %cst_447 = arith.constant 3.200000e+01 : f32
    %1301 = vector.broadcast %cst_447 : f32 to vector<1x1xf32>
    %1302 = arith.divf %1300, %1301 : vector<1x1xf32>
    %1303 = vector.broadcast %1295 : vector<1x1xf32> to vector<1x32xf32>
    %1304 = arith.subf %1289, %1303 : vector<1x32xf32>
    %cst_448 = arith.constant 9.99999974E-6 : f32
    %1305 = vector.broadcast %cst_448 : f32 to vector<1x1xf32>
    %1306 = arith.addf %1302, %1305 : vector<1x1xf32>
    %1307 = math.rsqrt %1306 : vector<1x1xf32>
    %1308 = vector.broadcast %1307 : vector<1x1xf32> to vector<1x32xf32>
    %1309 = arith.mulf %1304, %1308 : vector<1x32xf32>
    %1310 = arith.mulf %1309, %1290 : vector<1x32xf32>
    %1311 = arith.addf %1310, %1291 : vector<1x32xf32>
    %1312 = arith.mulf %1311, %1311 : vector<1x32xf32>
    %cst_449 = arith.constant dense<0.000000e+00> : vector<1xf32>
    %1313 = vector.multi_reduction <add>, %1312, %cst_449 [1] : vector<1x32xf32> to vector<1xf32>
    %1314 = vector.shape_cast %1313 : vector<1xf32> to vector<1x1xf32>
    %1315 = math.sqrt %1314 : vector<1x1xf32>
    %cst_450 = arith.constant 9.99999996E-13 : f32
    %1316 = vector.broadcast %cst_450 : f32 to vector<1x1xf32>
    %1317 = arith.maximumf %1315, %1316 : vector<1x1xf32>
    %1318 = vector.broadcast %1317 : vector<1x1xf32> to vector<1x32xf32>
    %1319 = arith.divf %1311, %1318 : vector<1x32xf32>
    %1320 = arith.mulf %1319, %1169 : vector<1x32xf32>
    %cst_451 = arith.constant dense<0.000000e+00> : vector<1xf32>
    %1321 = vector.multi_reduction <add>, %1320, %cst_451 [1] : vector<1x32xf32> to vector<1xf32>
    %1322 = vector.shape_cast %1321 : vector<1xf32> to vector<1x1xf32>
    %1323 = vector.extract_strided_slice %1220 {offsets = [0, 96], sizes = [1, 32], strides = [1, 1]} : vector<1x192xf32> to vector<1x32xf32>
    %1324 = vector.extract_strided_slice %803 {offsets = [0, 96], sizes = [1, 32], strides = [1, 1]} : vector<1x192xf32> to vector<1x32xf32>
    %1325 = vector.extract_strided_slice %804 {offsets = [0, 96], sizes = [1, 32], strides = [1, 1]} : vector<1x192xf32> to vector<1x32xf32>
    %cst_452 = arith.constant dense<0.000000e+00> : vector<1xf32>
    %1326 = vector.multi_reduction <add>, %1323, %cst_452 [1] : vector<1x32xf32> to vector<1xf32>
    %1327 = vector.shape_cast %1326 : vector<1xf32> to vector<1x1xf32>
    %cst_453 = arith.constant 3.200000e+01 : f32
    %1328 = vector.broadcast %cst_453 : f32 to vector<1x1xf32>
    %1329 = arith.divf %1327, %1328 : vector<1x1xf32>
    %1330 = vector.broadcast %1329 : vector<1x1xf32> to vector<1x32xf32>
    %1331 = arith.subf %1323, %1330 : vector<1x32xf32>
    %1332 = arith.mulf %1331, %1331 : vector<1x32xf32>
    %cst_454 = arith.constant dense<0.000000e+00> : vector<1xf32>
    %1333 = vector.multi_reduction <add>, %1332, %cst_454 [1] : vector<1x32xf32> to vector<1xf32>
    %1334 = vector.shape_cast %1333 : vector<1xf32> to vector<1x1xf32>
    %cst_455 = arith.constant 3.200000e+01 : f32
    %1335 = vector.broadcast %cst_455 : f32 to vector<1x1xf32>
    %1336 = arith.divf %1334, %1335 : vector<1x1xf32>
    %1337 = vector.broadcast %1329 : vector<1x1xf32> to vector<1x32xf32>
    %1338 = arith.subf %1323, %1337 : vector<1x32xf32>
    %cst_456 = arith.constant 9.99999974E-6 : f32
    %1339 = vector.broadcast %cst_456 : f32 to vector<1x1xf32>
    %1340 = arith.addf %1336, %1339 : vector<1x1xf32>
    %1341 = math.rsqrt %1340 : vector<1x1xf32>
    %1342 = vector.broadcast %1341 : vector<1x1xf32> to vector<1x32xf32>
    %1343 = arith.mulf %1338, %1342 : vector<1x32xf32>
    %1344 = arith.mulf %1343, %1324 : vector<1x32xf32>
    %1345 = arith.addf %1344, %1325 : vector<1x32xf32>
    %1346 = arith.mulf %1345, %1345 : vector<1x32xf32>
    %cst_457 = arith.constant dense<0.000000e+00> : vector<1xf32>
    %1347 = vector.multi_reduction <add>, %1346, %cst_457 [1] : vector<1x32xf32> to vector<1xf32>
    %1348 = vector.shape_cast %1347 : vector<1xf32> to vector<1x1xf32>
    %1349 = math.sqrt %1348 : vector<1x1xf32>
    %cst_458 = arith.constant 9.99999996E-13 : f32
    %1350 = vector.broadcast %cst_458 : f32 to vector<1x1xf32>
    %1351 = arith.maximumf %1349, %1350 : vector<1x1xf32>
    %1352 = vector.broadcast %1351 : vector<1x1xf32> to vector<1x32xf32>
    %1353 = arith.divf %1345, %1352 : vector<1x32xf32>
    %1354 = arith.mulf %1353, %1169 : vector<1x32xf32>
    %cst_459 = arith.constant dense<0.000000e+00> : vector<1xf32>
    %1355 = vector.multi_reduction <add>, %1354, %cst_459 [1] : vector<1x32xf32> to vector<1xf32>
    %1356 = vector.shape_cast %1355 : vector<1xf32> to vector<1x1xf32>
    %1357 = vector.extract_strided_slice %1220 {offsets = [0, 128], sizes = [1, 32], strides = [1, 1]} : vector<1x192xf32> to vector<1x32xf32>
    %1358 = vector.extract_strided_slice %803 {offsets = [0, 128], sizes = [1, 32], strides = [1, 1]} : vector<1x192xf32> to vector<1x32xf32>
    %1359 = vector.extract_strided_slice %804 {offsets = [0, 128], sizes = [1, 32], strides = [1, 1]} : vector<1x192xf32> to vector<1x32xf32>
    %cst_460 = arith.constant dense<0.000000e+00> : vector<1xf32>
    %1360 = vector.multi_reduction <add>, %1357, %cst_460 [1] : vector<1x32xf32> to vector<1xf32>
    %1361 = vector.shape_cast %1360 : vector<1xf32> to vector<1x1xf32>
    %cst_461 = arith.constant 3.200000e+01 : f32
    %1362 = vector.broadcast %cst_461 : f32 to vector<1x1xf32>
    %1363 = arith.divf %1361, %1362 : vector<1x1xf32>
    %1364 = vector.broadcast %1363 : vector<1x1xf32> to vector<1x32xf32>
    %1365 = arith.subf %1357, %1364 : vector<1x32xf32>
    %1366 = arith.mulf %1365, %1365 : vector<1x32xf32>
    %cst_462 = arith.constant dense<0.000000e+00> : vector<1xf32>
    %1367 = vector.multi_reduction <add>, %1366, %cst_462 [1] : vector<1x32xf32> to vector<1xf32>
    %1368 = vector.shape_cast %1367 : vector<1xf32> to vector<1x1xf32>
    %cst_463 = arith.constant 3.200000e+01 : f32
    %1369 = vector.broadcast %cst_463 : f32 to vector<1x1xf32>
    %1370 = arith.divf %1368, %1369 : vector<1x1xf32>
    %1371 = vector.broadcast %1363 : vector<1x1xf32> to vector<1x32xf32>
    %1372 = arith.subf %1357, %1371 : vector<1x32xf32>
    %cst_464 = arith.constant 9.99999974E-6 : f32
    %1373 = vector.broadcast %cst_464 : f32 to vector<1x1xf32>
    %1374 = arith.addf %1370, %1373 : vector<1x1xf32>
    %1375 = math.rsqrt %1374 : vector<1x1xf32>
    %1376 = vector.broadcast %1375 : vector<1x1xf32> to vector<1x32xf32>
    %1377 = arith.mulf %1372, %1376 : vector<1x32xf32>
    %1378 = arith.mulf %1377, %1358 : vector<1x32xf32>
    %1379 = arith.addf %1378, %1359 : vector<1x32xf32>
    %1380 = arith.mulf %1379, %1379 : vector<1x32xf32>
    %cst_465 = arith.constant dense<0.000000e+00> : vector<1xf32>
    %1381 = vector.multi_reduction <add>, %1380, %cst_465 [1] : vector<1x32xf32> to vector<1xf32>
    %1382 = vector.shape_cast %1381 : vector<1xf32> to vector<1x1xf32>
    %1383 = math.sqrt %1382 : vector<1x1xf32>
    %cst_466 = arith.constant 9.99999996E-13 : f32
    %1384 = vector.broadcast %cst_466 : f32 to vector<1x1xf32>
    %1385 = arith.maximumf %1383, %1384 : vector<1x1xf32>
    %1386 = vector.broadcast %1385 : vector<1x1xf32> to vector<1x32xf32>
    %1387 = arith.divf %1379, %1386 : vector<1x32xf32>
    %1388 = arith.mulf %1387, %1169 : vector<1x32xf32>
    %cst_467 = arith.constant dense<0.000000e+00> : vector<1xf32>
    %1389 = vector.multi_reduction <add>, %1388, %cst_467 [1] : vector<1x32xf32> to vector<1xf32>
    %1390 = vector.shape_cast %1389 : vector<1xf32> to vector<1x1xf32>
    %1391 = vector.extract_strided_slice %1220 {offsets = [0, 160], sizes = [1, 32], strides = [1, 1]} : vector<1x192xf32> to vector<1x32xf32>
    %1392 = vector.extract_strided_slice %803 {offsets = [0, 160], sizes = [1, 32], strides = [1, 1]} : vector<1x192xf32> to vector<1x32xf32>
    %1393 = vector.extract_strided_slice %804 {offsets = [0, 160], sizes = [1, 32], strides = [1, 1]} : vector<1x192xf32> to vector<1x32xf32>
    %cst_468 = arith.constant dense<0.000000e+00> : vector<1xf32>
    %1394 = vector.multi_reduction <add>, %1391, %cst_468 [1] : vector<1x32xf32> to vector<1xf32>
    %1395 = vector.shape_cast %1394 : vector<1xf32> to vector<1x1xf32>
    %cst_469 = arith.constant 3.200000e+01 : f32
    %1396 = vector.broadcast %cst_469 : f32 to vector<1x1xf32>
    %1397 = arith.divf %1395, %1396 : vector<1x1xf32>
    %1398 = vector.broadcast %1397 : vector<1x1xf32> to vector<1x32xf32>
    %1399 = arith.subf %1391, %1398 : vector<1x32xf32>
    %1400 = arith.mulf %1399, %1399 : vector<1x32xf32>
    %cst_470 = arith.constant dense<0.000000e+00> : vector<1xf32>
    %1401 = vector.multi_reduction <add>, %1400, %cst_470 [1] : vector<1x32xf32> to vector<1xf32>
    %1402 = vector.shape_cast %1401 : vector<1xf32> to vector<1x1xf32>
    %cst_471 = arith.constant 3.200000e+01 : f32
    %1403 = vector.broadcast %cst_471 : f32 to vector<1x1xf32>
    %1404 = arith.divf %1402, %1403 : vector<1x1xf32>
    %1405 = vector.broadcast %1397 : vector<1x1xf32> to vector<1x32xf32>
    %1406 = arith.subf %1391, %1405 : vector<1x32xf32>
    %cst_472 = arith.constant 9.99999974E-6 : f32
    %1407 = vector.broadcast %cst_472 : f32 to vector<1x1xf32>
    %1408 = arith.addf %1404, %1407 : vector<1x1xf32>
    %1409 = math.rsqrt %1408 : vector<1x1xf32>
    %1410 = vector.broadcast %1409 : vector<1x1xf32> to vector<1x32xf32>
    %1411 = arith.mulf %1406, %1410 : vector<1x32xf32>
    %1412 = arith.mulf %1411, %1392 : vector<1x32xf32>
    %1413 = arith.addf %1412, %1393 : vector<1x32xf32>
    %1414 = arith.mulf %1413, %1413 : vector<1x32xf32>
    %cst_473 = arith.constant dense<0.000000e+00> : vector<1xf32>
    %1415 = vector.multi_reduction <add>, %1414, %cst_473 [1] : vector<1x32xf32> to vector<1xf32>
    %1416 = vector.shape_cast %1415 : vector<1xf32> to vector<1x1xf32>
    %1417 = math.sqrt %1416 : vector<1x1xf32>
    %cst_474 = arith.constant 9.99999996E-13 : f32
    %1418 = vector.broadcast %cst_474 : f32 to vector<1x1xf32>
    %1419 = arith.maximumf %1417, %1418 : vector<1x1xf32>
    %1420 = vector.broadcast %1419 : vector<1x1xf32> to vector<1x32xf32>
    %1421 = arith.divf %1413, %1420 : vector<1x32xf32>
    %1422 = arith.mulf %1421, %1169 : vector<1x32xf32>
    %cst_475 = arith.constant dense<0.000000e+00> : vector<1xf32>
    %1423 = vector.multi_reduction <add>, %1422, %cst_475 [1] : vector<1x32xf32> to vector<1xf32>
    %1424 = vector.shape_cast %1423 : vector<1xf32> to vector<1x1xf32>
    %1425 = arith.maximumf %1254, %1288 : vector<1x1xf32>
    %1426 = arith.maximumf %1425, %1322 : vector<1x1xf32>
    %1427 = arith.maximumf %1426, %1356 : vector<1x1xf32>
    %1428 = arith.maximumf %1427, %1390 : vector<1x1xf32>
    %1429 = arith.maximumf %1428, %1424 : vector<1x1xf32>
    %1430 = arith.subf %1254, %1429 : vector<1x1xf32>
    %1431 = math.exp %1430 : vector<1x1xf32>
    %1432 = arith.subf %1288, %1429 : vector<1x1xf32>
    %1433 = math.exp %1432 : vector<1x1xf32>
    %1434 = arith.subf %1322, %1429 : vector<1x1xf32>
    %1435 = math.exp %1434 : vector<1x1xf32>
    %1436 = arith.subf %1356, %1429 : vector<1x1xf32>
    %1437 = math.exp %1436 : vector<1x1xf32>
    %1438 = arith.subf %1390, %1429 : vector<1x1xf32>
    %1439 = math.exp %1438 : vector<1x1xf32>
    %1440 = arith.subf %1424, %1429 : vector<1x1xf32>
    %1441 = math.exp %1440 : vector<1x1xf32>
    %1442 = arith.addf %1431, %1433 : vector<1x1xf32>
    %1443 = arith.addf %1442, %1435 : vector<1x1xf32>
    %1444 = arith.addf %1443, %1437 : vector<1x1xf32>
    %1445 = arith.addf %1444, %1439 : vector<1x1xf32>
    %1446 = arith.addf %1445, %1441 : vector<1x1xf32>
    %cst_476 = arith.constant 1.000000e+00 : f32
    %1447 = vector.broadcast %cst_476 : f32 to vector<1x1xf32>
    %1448 = arith.divf %1447, %1446 : vector<1x1xf32>
    %1449 = arith.mulf %1431, %1448 : vector<1x1xf32>
    %1450 = vector.broadcast %1449 : vector<1x1xf32> to vector<1x32xf32>
    %1451 = arith.mulf %1251, %1450 : vector<1x32xf32>
    %1452 = arith.mulf %1433, %1448 : vector<1x1xf32>
    %1453 = vector.broadcast %1452 : vector<1x1xf32> to vector<1x32xf32>
    %1454 = arith.mulf %1285, %1453 : vector<1x32xf32>
    %1455 = arith.addf %1451, %1454 : vector<1x32xf32>
    %1456 = arith.mulf %1435, %1448 : vector<1x1xf32>
    %1457 = vector.broadcast %1456 : vector<1x1xf32> to vector<1x32xf32>
    %1458 = arith.mulf %1319, %1457 : vector<1x32xf32>
    %1459 = arith.addf %1455, %1458 : vector<1x32xf32>
    %1460 = arith.mulf %1437, %1448 : vector<1x1xf32>
    %1461 = vector.broadcast %1460 : vector<1x1xf32> to vector<1x32xf32>
    %1462 = arith.mulf %1353, %1461 : vector<1x32xf32>
    %1463 = arith.addf %1459, %1462 : vector<1x32xf32>
    %1464 = arith.mulf %1439, %1448 : vector<1x1xf32>
    %1465 = vector.broadcast %1464 : vector<1x1xf32> to vector<1x32xf32>
    %1466 = arith.mulf %1387, %1465 : vector<1x32xf32>
    %1467 = arith.addf %1463, %1466 : vector<1x32xf32>
    %1468 = arith.mulf %1441, %1448 : vector<1x1xf32>
    %1469 = vector.broadcast %1468 : vector<1x1xf32> to vector<1x32xf32>
    %1470 = arith.mulf %1421, %1469 : vector<1x32xf32>
    %1471 = arith.addf %1467, %1470 : vector<1x32xf32>
    %1472 = arith.mulf %1169, %1169 : vector<1x32xf32>
    %cst_477 = arith.constant dense<0.000000e+00> : vector<1xf32>
    %1473 = vector.multi_reduction <add>, %1472, %cst_477 [1] : vector<1x32xf32> to vector<1xf32>
    %1474 = vector.shape_cast %1473 : vector<1xf32> to vector<1x1xf32>
    %1475 = math.sqrt %1474 : vector<1x1xf32>
    %cst_478 = arith.constant 9.99999996E-13 : f32
    %1476 = vector.broadcast %cst_478 : f32 to vector<1x1xf32>
    %1477 = arith.maximumf %1475, %1476 : vector<1x1xf32>
    %1478 = vector.broadcast %1477 : vector<1x1xf32> to vector<1x32xf32>
    %1479 = arith.divf %1169, %1478 : vector<1x32xf32>
    %1480 = arith.mulf %1471, %1471 : vector<1x32xf32>
    %cst_479 = arith.constant dense<0.000000e+00> : vector<1xf32>
    %1481 = vector.multi_reduction <add>, %1480, %cst_479 [1] : vector<1x32xf32> to vector<1xf32>
    %1482 = vector.shape_cast %1481 : vector<1xf32> to vector<1x1xf32>
    %1483 = math.sqrt %1482 : vector<1x1xf32>
    %cst_480 = arith.constant 9.99999996E-13 : f32
    %1484 = vector.broadcast %cst_480 : f32 to vector<1x1xf32>
    %1485 = arith.maximumf %1483, %1484 : vector<1x1xf32>
    %1486 = vector.broadcast %1485 : vector<1x1xf32> to vector<1x32xf32>
    %1487 = arith.divf %1471, %1486 : vector<1x32xf32>
    %1488 = tpu.concatenate %1479, %1487 in 1 : vector<1x32xf32>, vector<1x32xf32> -> vector<1x64xf32>
    %1489 = tpu.concatenate %1146, %1488 in 0 : vector<1x64xf32>, vector<1x64xf32> -> vector<2x64xf32>
    %c0_481 = arith.constant 0 : index
    %c0_482 = arith.constant 0 : index
    %1490 = vector.load %arg27[%c0_481, %c0_482] : memref<2x64xf32, #tpu.memory_space<vmem>>, vector<2x64xf32>
    tpu.vector_store %arg27[%c0_481, %c0_482], %1489 {strides = array<i32>} : memref<2x64xf32, #tpu.memory_space<vmem>>, vector<2x64xf32>,
    return
  }
}

</mosaic_0001>

<bundles_post_ra>
// kernel: attribute_transformer9_forward.1
= control target key start
LH: loop header
LB: loop body
LE: loop exit
PB: predicated region body
PF: predicated region fallthrough
CT: control target
= control target key end

     0   :  { %s14064_s0 = inlined_call_operand.vmem [shape: f32[32,48], index: 0, kind: input, shape index: {}]   ;;  %s14065_s1 = inlined_call_operand.vmem [shape: f32[48,32], index: 1, kind: input, shape index: {}]   ;;  %s14066_s2 = inlined_call_operand.vmem [shape: f32[1,32], index: 2, kind: input, shape index: {}]   ;;  %s14067_s3 = inlined_call_operand.vmem [shape: f32[1,32], index: 3, kind: input, shape index: {}]   ;;  %s14068_s4 = inlined_call_operand.vmem [shape: f32[17,32], index: 4, kind: input, shape index: {}]   ;;  %s14069_s5 = inlined_call_operand.vmem [shape: f32[2,1,32], index: 5, kind: input, shape index: {}]   ;;  %s14070_s6 = inlined_call_operand.vmem [shape: f32[2,1,32], index: 6, kind: input, shape index: {}]   ;;  %s14071_s7 = inlined_call_operand.vmem [shape: f32[2,32,96], index: 7, kind: input, shape index: {}]   ;;  %s14072_s8 = inlined_call_operand.vmem [shape: f32[2,1,96], index: 8, kind: input, shape index: {}]   ;;  %s14073_s9 = inlined_call_operand.vmem [shape: f32[2,32,32], index: 9, kind: input, shape index: {}]   ;;  %s14074_s10 = inlined_call_operand.vmem [shape: f32[2,1,32], index: 10, kind: input, shape index: {}]   ;;  %s14075_s11 = inlined_call_operand.vmem [shape: f32[2,1,32], index: 11, kind: input, shape index: {}]   ;;  %s14076_s12 = inlined_call_operand.vmem [shape: f32[2,1,32], index: 12, kind: input, shape index: {}]   ;;  %s14077_s13 = inlined_call_operand.vmem [shape: f32[2,32,128], index: 13, kind: input, shape index: {}]   ;;  %s14078_s14 = inlined_call_operand.vmem [shape: f32[2,1,128], index: 14, kind: input, shape index: {}]   ;;  %s14079_s15 = inlined_call_operand.vmem [shape: f32[2,128,32], index: 15, kind: input, shape index: {}]   ;;  %s14080_s16 = inlined_call_operand.vmem [shape: f32[2,1,32], index: 16, kind: input, shape index: {}]   ;;  %s14081_s17 = inlined_call_operand.vmem [shape: f32[1,32], index: 17, kind: input, shape index: {}]   ;;  %s14082_s18 = inlined_call_operand.vmem [shape: f32[1,32], index: 18, kind: input, shape index: {}]   ;;  %s14083_s19 = inlined_call_operand.vmem [shape: f32[32,192], index: 19, kind: input, shape index: {}]   ;;  %s14084_s20 = inlined_call_operand.vmem [shape: f32[1,192], index: 20, kind: input, shape index: {}]   ;;  %s14085_s21 = inlined_call_operand.vmem [shape: f32[1,192], index: 21, kind: input, shape index: {}]   ;;  %s14086_s22 = inlined_call_operand.vmem [shape: f32[1,192], index: 22, kind: input, shape index: {}]   ;;  %s14087_s23 = inlined_call_operand.vmem [shape: f32[1,192], index: 23, kind: input, shape index: {}]   ;;  %s14088_s24 = inlined_call_operand.vmem [shape: f32[1,192], index: 24, kind: input, shape index: {}]   ;;  %s14089_s25 = inlined_call_operand.vmem [shape: f32[1,192], index: 25, kind: input, shape index: {}]   ;;  %s14090_s26 = inlined_call_operand.vmem [shape: f32[1,192], index: 26, kind: input, shape index: {}]   ;;  %s14091_s27 = inlined_call_operand.hbm [shape: f32[2,64], index: 27, kind: output, shape index: {}]  }
   0x1   :  { %14128 = sst [smem:[#allocation5_spill]] %s14064_s0 }
   0x2   :  { %14129 = sst [smem:[#allocation6_spill]] %s14065_s1 }
   0x3   :  { %14130 = sst [smem:[#allocation7_spill]] %s14066_s2 }
   0x4   :  { %14131 = sst [smem:[#allocation8_spill]] %s14067_s3 }
   0x5   :  { %14132 = sst [smem:[#allocation9_spill]] %s14068_s4 }
   0x6   :  { %14133 = sst [smem:[#allocation10_spill]] %s14069_s5 }
   0x7   :  { %14134 = sst [smem:[#allocation11_spill]] %s14070_s6 }
   0x8   :  { %14135 = sst [smem:[#allocation12_spill]] %s14071_s7 }
   0x9   :  { %14136 = sst [smem:[#allocation13_spill]] %s14072_s8 }
   0xa   :  { %14137 = sst [smem:[#allocation14_spill]] %s14073_s9 }
   0xb   :  { %14138 = sst [smem:[#allocation15_spill]] %s14074_s10 }
   0xc   :  { %14139 = sst [smem:[#allocation16_spill]] %s14075_s11 }
   0xd   :  { %14140 = sst [smem:[#allocation17_spill]] %s14081_s17 }
   0xe   :  { %14141 = sst [smem:[#allocation18_spill]] %s14082_s18 }
   0xf   :  { %14142 = sst [smem:[#allocation19_spill]] %s14083_s19 }
  0x10   :  { %14143 = sst [smem:[#allocation20_spill]] %s14084_s20 }
  0x11   :  { %14144 = sst [smem:[#allocation21_spill]] %s14085_s21 }
  0x12   :  { %14145 = sst [smem:[#allocation22_spill]] %s14086_s22 }
  0x13   :  { %14146 = sst [smem:[#allocation23_spill]] %s14087_s23 }
  0x14   :  { %14147 = sst [smem:[#allocation24_spill]] %s14088_s24 }
  0x15   :  { %14148 = sst [smem:[#allocation25_spill]] %s14089_s25 }
  0x16   :  { %14149 = sst [smem:[#allocation26_spill]] %s14090_s26 }
  0x17   :  { %14150 = sst [smem:[#allocation27_spill]] %s14091_s27 }
  0x18   :  { %s14151_s8 = sld [smem:[#allocation6_spill]]  ;;  %vm104_vm0 = vcmask 392192  }
  0x19   :  { %s14152_s29 = sld [smem:[#allocation5_spill]] }
  0x1e   :  { %v96_v0 = vld [vmem:[%s14151_s8 + $0x28] sm:$0xff]  ;;  %v95_v1 = vld [vmem:[%s14151_s8 + $0x20] sm:$0xff]  ;;  %v94_v2 = vld [vmem:[%s14151_s8 + $0x18] sm:$0xff] }
  0x1f   :  { %9554 = vmatprep.subr.mxu0 %v96_v0  ;;  %v87_v3 = vld [vmem:[%s14152_s29] sm:$0xff] }
  0x20   :  { %9555 = vmatpush3.msra.mxu0 %v96_v0 }
  0x21   :  { %32 = vsyncpa [#allocation3], 0  ;;  %9556 = vmatprep.subr.mxu0 %v95_v1  ;;  %9566 = vmatprep.mubr.msk.f32.mxu0 %vm104_vm0, %v87_v3  ;;  %v93_v4 = vld [vmem:[%s14151_s8 + $0x10] sm:$0xff]  ;;  %v92_v5 = vld [vmem:[%s14151_s8 + $0x8] sm:$0xff]  ;;  %s14153_s28 = sld [smem:[#allocation9_spill]]  ;;  %vm210_vm1 = vcmask 1046528  }
  0x22   :  { %9557 = vmatpush3.msra.mxu0 %v95_v1  ;;  %v91_v6 = vld [vmem:[%s14151_s8] sm:$0xff]  ;;  %v88_v7 = vld [vmem:[%s14152_s29 + $0x8] sm:$0xff]  ;;  %s14154_s2 = sld [smem:[#allocation7_spill]]  ;;  %vm284_vm2 = vcmask 253952   ;;  %vm222_vm3 = vcmask 1040384   ;;  %vm277_vm4 = vcmask 261120  }
  0x23   :  { %9558 = vmatprep.subr.mxu0 %v94_v2  ;;  %s14155_s4 = sld [smem:[#allocation8_spill]]  ;;  %v11096_v48 = vmov 0.0   ;;  %vm11097_vm5 = vmmov 0   ;;  %s14123_s1 = smov 96   ;;  %vm441_vm6 = vcmask 64512   ;;  %vm537_vm7 = vcmask 138240  }
  0x24   :  { %9559 = vmatpush3.msra.mxu0 %v94_v2  ;;  %s14156_s5 = sld [smem:[#allocation12_spill]]  ;;  %9572 = vmatprep.subr.mxu1 %v11096_v48  ;;  %vm544_vm8 = vcmask 131072   ;;  %s14117_s8 = smov 64  }
  0x25   :  { %9560 = vmatprep.subr.mxu0 %v93_v4  ;;  %9580 = vmatprep.mubr.msk.f32.mxu1 %vm11097_vm5, %v11096_v48  ;;  %s14157_s7 = sld [smem:[#allocation10_spill]]  ;;  %s14121_s6 = smov 88  }
  0x26   :  { %9561 = vmatpush3.msra.mxu0 %v93_v4  ;;  %s14158_s9 = sld [smem:[#allocation11_spill]]  ;;  %s14113_s0 = smov 80  }
  0x27   :  { %9562 = vmatprep.subr.mxu0 %v92_v5  ;;  %v203_v8 = vld [vmem:[%s14153_s28 + $0x8] sm:$0xff]  ;;  %v204_v9 = vld [vmem:[%s14153_s28 + $0x10] sm:$0x1]  ;;  %v202_v10 = vld [vmem:[%s14153_s28] sm:$0xff]  ;;  %s14159_s10 = sld [smem:[#allocation13_spill]]  ;;  %s14103_s11 = smov 112  }
  0x28   :  { %9563 = vmatpush3.msra.mxu0 %v92_v5  ;;  %v212_v11 = vrot.slane %v203_v8, 1  ;;  %v214_v12 = vrot.slane %v204_v9, 1  ;;  %v8861_v13 = vld [vmem:[%s14154_s2] ss:$0 sm:$0xff]  ;;  %v211_v14 = vrot.slane %v202_v10, 1  ;;  %s14160_s28 = sld [smem:[#allocation14_spill]] }
  0x29   :  { %9564 = vmatprep.subr.mxu0 %v91_v6  ;;  %v205_v20 = vld [vmem:[%s14155_s4] sm:$0x1]  ;;  %s14119_s4 = smov 120   ;;  %s14107_s30 = smov 72  }
  0x2a   :  { %9565 = vmatpush3.msra.mxu0 %v91_v6  ;;  %v11291_v16 = vsel %vm210_vm1, %v212_v11, %v214_v12  ;;  %v11294_v19 = vsel %vm210_vm1, %v211_v14, %v212_v11  ;;  %v11303_v25 = vadd.f32 %v205_v20, %v202_v10  ;;  %v246_v47 = vld [vmem:[%s14156_s5 + $0x18] sm:$0xff]  ;;  %v245_v49 = vld [vmem:[%s14156_s5 + $0x10] sm:$0xff]  ;;  %v244_v50 = vld [vmem:[%s14156_s5 + $0x8] sm:$0xff]  ;;  %s14105_s3 = smov 104   ;;  %s14170_s27 = smov 48  }
  0x2b   :  { %9567 = vmatmul.mubr.msk.f32.vlgmr.msra.gmra.mxu0 %vm104_vm0, %v88_v7  ;;  %9573 = vmatpush3.msra.mxu1 %v246_v47  ;;  %v243_v51 = vld [vmem:[%s14156_s5] sm:$0xff]  ;;  %s14172_s26 = smov 104   ;;  %s14173_s22 = smov 40  }
  0x2c   :  { %9604 = vmatprep.subr.mxu0 %v11096_v48  ;;  %9574 = vmatprep.subr.mxu1 %v11096_v48  ;;  %v8866_v62 = vld [vmem:[%s14157_s7] ss:$0 sm:$0xff]  ;;  %s14180_s25 = sld [smem:[#allocation20_spill]] }
  0x2d   :  { %9575 = vmatpush3.msra.mxu1 %v245_v49  ;;  %v8867_v0 = vld [vmem:[%s14158_s9] ss:$0 sm:$0xff]  ;;  %s14181_s21 = sld [smem:[#allocation22_spill]] }
  0x2e   :  { %9576 = vmatprep.subr.mxu1 %v11096_v48  ;;  %s14182_s20 = sld [smem:[#allocation25_spill]] }
  0x2f   :  { %9577 = vmatpush3.msra.mxu1 %v244_v50 }
  0x30   :  { %9578 = vmatprep.subr.mxu1 %v11096_v48 }
  0x31   :  { %9579 = vmatpush3.msra.mxu1 %v243_v51 }
  0x32   :  { %9589 = vmatprep.subr.mxu1 %v11096_v48 }
  0xeb   :  { %v9568_v15 = vpop.f32.mrf.mxu0 }
  0xec   :  { %v189_v17 = vadd.f32 %v9568_v15, %v8861_v13 }
  0xed   :  { %v183_v18 = vpop.f32.mrf.mxu0 }
  0xee   :  { %v219_v21 = vadd.f32 %v11291_v16, %v189_v17  ;;  %v184_v22 = vadd.f32 %v8861_v13, %v183_v18  ;;  %v8868_v13 = vld [vmem:[%s14159_s10] ss:$0 sm:$0xff] }
  0xf0   :  { %v11300_v23 = vrot.slane %v219_v21, 7  ;;  %v218_v24 = vadd.f32 %v11294_v19, %v184_v22 }
  0xf2   :  { %v223_v26 = vrot.slane %v218_v24, 7  ;;  %v285_v27 = vsel %vm284_vm2, %v11300_v23, 0.0 }
  0xf3   :  { %286 = vadd.xlane.f32.xlu1 %v285_v27 }
  0xf4   :  { %v11309_v28 = vsel %vm222_vm3, %v11303_v25, %v223_v26  ;;  %v11315_v30 = vsel %vm222_vm3, %v223_v26, %v11300_v23 }
  0xf5   :  { %v278_v29 = vsel %vm277_vm4, %v11309_v28, 0.0  ;;  %v281_v31 = vsel %vm277_vm4, %v11315_v30, 0.0 }
  0xf6   :  { %279 = vadd.xlane.f32.xlu0 %v278_v29 }
  0xfa   :  { %282 = vadd.xlane.f32.xlu0 %v281_v31 }
 0x17c   :  { %v287_v32 = vpop.xlane.xlu1 %286 }
 0x17d   :  { %v291_v33 = vmul.f32 0.03125, %v287_v32 }
 0x17f   :  { %v280_v34 = vpop.xlane.xlu0 %279  ;;  %v294_v36 = vsub.f32 %v11300_v23, %v291_v33 }
 0x180   :  { %v289_v35 = vmul.f32 0.03125, %v280_v34 }
 0x181   :  { %v297_v43 = vmul.f32 %v294_v36, %v294_v36 }
 0x182   :  { %v292_v37 = vsub.f32 %v11309_v28, %v289_v35 }
 0x183   :  { %v283_v38 = vpop.xlane.xlu0 %282  ;;  %v304_v45 = vsel %vm284_vm2, %v297_v43, 0.0 }
 0x184   :  { %v290_v39 = vmul.f32 0.03125, %v283_v38  ;;  %v295_v40 = vmul.f32 %v292_v37, %v292_v37 }
 0x186   :  { %v293_v41 = vsub.f32 %v11315_v30, %v290_v39  ;;  %v298_v42 = vsel %vm277_vm4, %v295_v40, 0.0 }
 0x187   :  { %299 = vadd.xlane.f32.xlu1 %v298_v42 }
 0x188   :  { %v296_v44 = vmul.f32 %v293_v41, %v293_v41 }
 0x18a   :  { %v301_v46 = vsel %vm277_vm4, %v296_v44, 0.0 }
 0x18b   :  { %305 = vadd.xlane.f32.xlu1 %v304_v45  ;;  %302 = vadd.xlane.f32.xlu0 %v301_v46 }
 0x210   :  { %v300_v52 = vpop.xlane.xlu1 %299 }
 0x211   :  { %v307_v53 = vmul.f32 0.03125, %v300_v52 }
 0x213   :  { %v310_v54 = vadd.f32 1e-06, %v307_v53 }
 0x214   :  { %v306_v55 = vpop.xlane.xlu1 %305  ;;  %v303_v56 = vpop.xlane.xlu0 %302 }
 0x215   :  { %10550 = vrsqrt.f32 %v310_v54  ;;  %v309_v57 = vmul.f32 0.03125, %v306_v55  ;;  %v308_v58 = vmul.f32 0.03125, %v303_v56  ;;  %v89_v54 = vld [vmem:[%s14152_s29 + $0x10] sm:$0xff]  ;;  %v90_v55 = vld [vmem:[%s14152_s29 + $0x18] sm:$0xff]  ;;  %s14115_s29 = smov 56  }
 0x216   :  { %9569 = vmatprep.mubr.msk.f32.mxu0 %vm104_vm0, %v89_v54 }
 0x217   :  { %v312_v59 = vadd.f32 1e-06, %v309_v57  ;;  %v311_v60 = vadd.f32 1e-06, %v308_v58  ;;  %9570 = vmatmul.mubr.msk.f32.gmra.mxu0 %vm104_vm0, %v90_v55 }
 0x218   :  { %9610 = vmatprep.mubr.msk.f32.mxu0 %vm11097_vm5, %v11096_v48 }
 0x219   :  { %10552 = vrsqrt.f32 %v312_v59 }
 0x21a   :  { %10554 = vrsqrt.f32 %v311_v60 }
 0x222   :  { %v10551_v61 = vpop.eup %10550 }
 0x223   :  { %v316_v63 = vmul.f32 %v10551_v61, %v292_v37 }
 0x225   :  { %v325_v1 = vmul.f32 %v8866_v62, %v316_v63 }
 0x226   :  { %v10553_v2 = vpop.eup %10552 }
 0x227   :  { %v10555_v3 = vpop.eup %10554  ;;  %v334_v4 = vadd.f32 %v8867_v0, %v325_v1  ;;  %v318_v6 = vmul.f32 %v10553_v2, %v294_v36 }
 0x228   :  { %v317_v5 = vmul.f32 %v10555_v3, %v293_v41 }
 0x229   :  { %9581 = vmatmul.mubr.msk.f32.vlgmr.msra.gmra.mxu1 %vm277_vm4, %v334_v4  ;;  %v327_v9 = vmul.f32 %v8866_v62, %v318_v6 }
 0x22a   :  { %9583 = vmatprep.mubr.msk.f32.mxu1 %vm11097_vm5, %v11096_v48  ;;  %v326_v7 = vmul.f32 %v8866_v62, %v317_v5 }
 0x22b   :  { %v336_v10 = vadd.f32 %v8867_v0, %v327_v9 }
 0x22c   :  { %v335_v8 = vadd.f32 %v8867_v0, %v326_v7 }
 0x22e   :  { %9584 = vmatmul.mubr.msk.f32.gmra.mxu1 %vm277_vm4, %v335_v8 }
 0x22f   :  { %9586 = vmatprep.mubr.msk.f32.mxu1 %vm11097_vm5, %v11096_v48 }
 0x232   :  { %9587 = vmatmul.mubr.msk.f32.gmra.mxu1 %vm277_vm4, %v336_v10 }
 0x233   :  { %9595 = vmatprep.mubr.msk.f32.mxu1 %vm11097_vm5, %v11096_v48 }
 0x2e9   :  { %v418_v11 = vpop.f32.mrf.mxu1 }
 0x2ea   :  { %v11367_v20 = vadd.f32 %v8868_v13, %v418_v11 }
 0x2eb   :  { %v9582_v12 = vpop.f32.mrf.mxu1 }
 0x2ee   :  { %v423_v14 = vpop.f32.mrf.mxu1 }
 0x2ef   :  { %v11363_v15 = vadd.f32 %v8868_v13, %v423_v14  ;;  %v11455_v14 = vpop.f32.mrf.mxu0 }
 0x2f0   :  { %v9585_v17 = vpop.f32.mrf.mxu1 }
 0x2f1   :  { %437 = vrot.lane.b32.xlu1 %v11363_v15, %s14123_s1  ;;  %v11457_v17 = vpop.f32.mrf.mxu0 }
 0x2f2   :  { %v428_v18 = vpop.f32.mrf.mxu1 }
 0x2f3   :  { %v11369_v21 = vadd.f32 %v8868_v13, %v428_v18 }
 0x2f4   :  { %v9588_v22 = vpop.f32.mrf.mxu1 }
 0x2f5   :  { %435 = vrot.lane.b32.xlu1 %v11367_v20, %s14123_s1  ;;  %439 = vrot.lane.b32.xlu0 %v11369_v21, %s14123_s1  ;;  %s14167_s1 = smov 56  }
 0x363   :  { %v438_v26 = vpop.permute.xlu1 %437 }
 0x367   :  { %v440_v24 = vpop.permute.xlu0 %439  ;;  %v436_v27 = vpop.permute.xlu1 %435 }
 0x368   :  { %9590 = vmatpush3.xpose.msk.msra.mxu1 %vm441_vm6, %v440_v24 }
 0x369   :  { %9591 = vmatprep.subr.mxu1 %v11096_v48 }
 0x36c   :  { %9592 = vmatpush3.xpose.msk.msra.mxu1 %vm441_vm6, %v438_v26 }
 0x36d   :  { %9593 = vmatprep.subr.mxu1 %v11096_v48 }
 0x370   :  { %9594 = vmatpush3.xpose.msk.msra.mxu1 %vm441_vm6, %v436_v27 }
 0x371   :  { %10528 = vmatprep.subr.mxu1 %v11096_v48 }
 0x373   :  { %9596 = vmatmul.mubr.msk.f32.vlgmr.msra.gmra.mxu1 %vm441_vm6, %v11367_v20 }
 0x374   :  { %9598 = vmatprep.mubr.msk.f32.mxu1 %vm11097_vm5, %v11096_v48 }
 0x377   :  { %9599 = vmatmul.mubr.msk.f32.gmra.mxu1 %vm441_vm6, %v11363_v15 }
 0x378   :  { %9601 = vmatprep.mubr.msk.f32.mxu1 %vm11097_vm5, %v11096_v48 }
 0x37b   :  { %9602 = vmatmul.mubr.msk.f32.gmra.mxu1 %vm441_vm6, %v11369_v21 }
 0x37c   :  { %9646 = vmatprep.mubr.msk.f32.mxu1 %vm11097_vm5, %v11096_v48 }
 0x433   :  { %v520_v29 = vpop.f32.mrf.mxu1 }
 0x434   :  { %v534_v31 = vmul.f32 0.35355338, %v520_v29 }
 0x435   :  { %v9597_v32 = vpop.f32.mrf.mxu1 }
 0x436   :  { %v538_v33 = vsel %vm537_vm7, %v534_v31, -inf }
 0x437   :  { %539 = vmax.xlane.f32.xlu1 %v538_v33  ;;  %v525_v34 = vpop.f32.mrf.mxu1 }
 0x438   :  { %v535_v35 = vmul.f32 0.35355338, %v525_v34 }
 0x439   :  { %v9600_v36 = vpop.f32.mrf.mxu1 }
 0x43a   :  { %v541_v37 = vsel %vm537_vm7, %v535_v35, -inf }
 0x43b   :  { %542 = vmax.xlane.f32.xlu0 %v541_v37  ;;  %v530_v38 = vpop.f32.mrf.mxu1 }
 0x43c   :  { %v536_v39 = vmul.f32 0.35355338, %v530_v38 }
 0x43d   :  { %v9603_v40 = vpop.f32.mrf.mxu1 }
 0x43e   :  { %v545_v41 = vsel %vm544_vm8, %v536_v39, -inf }
 0x43f   :  { %546 = vmax.xlane.f32.xlu0 %v545_v41 }
 0x448   :  { %579 = vrot.lane.b32.xlu1 %v11369_v21, %s14117_s8 }
 0x44c   :  { %575 = vrot.lane.b32.xlu1 %v11367_v20, %s14117_s8 }
 0x450   :  { %684 = vrot.lane.b32.xlu1 %v11369_v21, %s14121_s6 }
 0x454   :  { %682 = vrot.lane.b32.xlu1 %v11363_v15, %s14121_s6 }
 0x4c0   :  { %v540_v42 = vpop.xlane.xlu1 %539 }
 0x4c1   :  { %v548_v43 = vsub.f32 %v534_v31, %v540_v42 }
 0x4c3   :  { %v551_v44 = vmul.f32 1.442695, %v548_v43 }
 0x4c4   :  { %v580_v45 = vpop.permute.xlu1 %579  ;;  %v543_v46 = vpop.xlane.xlu0 %542 }
 0x4c5   :  { %10556 = vpow2.f32 %v551_v44  ;;  %v549_v47 = vsub.f32 %v535_v35, %v543_v46  ;;  %9605 = vmatpush3.msk.msra.mxu0 %vm222_vm3, %v580_v45 }
 0x4c6   :  { %9606 = vmatprep.subr.mxu0 %v11096_v48 }
 0x4c7   :  { %v553_v49 = vmul.f32 1.442695, %v549_v47 }
 0x4c8   :  { %v547_v56 = vpop.xlane.xlu0 %546  ;;  %v576_v61 = vpop.permute.xlu1 %575 }
 0x4c9   :  { %10558 = vpow2.f32 %v553_v49  ;;  %v550_v57 = vsub.f32 %v536_v39, %v547_v56 }
 0x4cb   :  { %v555_v58 = vmul.f32 1.442695, %v550_v57 }
 0x4cc   :  { %v685_v62 = vpop.permute.xlu1 %684 }
 0x4cd   :  { %10560 = vpow2.f32 %v555_v58 }
 0x4d0   :  { %v683_v63 = vpop.permute.xlu1 %682 }
 0x4d2   :  { %v10557_v50 = vpop.eup %10556 }
 0x4d3   :  { %v557_v51 = vsel %vm537_vm7, %v10557_v50, 0.0 }
 0x4d4   :  { %558 = vadd.xlane.f32.xlu0 %v557_v51 }
 0x4d6   :  { %v10559_v52 = vpop.eup %10558 }
 0x4d7   :  { %v560_v53 = vsel %vm537_vm7, %v10559_v52, 0.0 }
 0x4d8   :  { %561 = vadd.xlane.f32.xlu1 %v560_v53 }
 0x4da   :  { %v10561_v59 = vpop.eup %10560 }
 0x4db   :  { %v563_v60 = vsel %vm544_vm8, %v10561_v59, 0.0 }
 0x4e9   :  { %674 = vrot.lane.b32.xlu1 %v11367_v20, %s14119_s4 }
 0x4ea   :  { %577 = vrot.lane.b32.xlu0 %v11363_v15, %s14117_s8  ;;  %s14169_s8 = smov 112  }
 0x4ed   :  { %678 = vrot.lane.b32.xlu1 %v11369_v21, %s14119_s4 }
 0x509   :  { %564 = vadd.xlane.f32.xlu0 %v563_v60 }
 0x51f   :  { %680 = vrot.lane.b32.xlu0 %v11367_v20, %s14121_s6  ;;  %s14163_s6 = smov 96  }
 0x523   :  { %676 = vrot.lane.b32.xlu0 %v11363_v15, %s14119_s4  ;;  %s14171_s4 = smov 72  }
 0x55d   :  { %v559_v0 = vpop.xlane.xlu0 %558 }
 0x55e   :  { %10562 = vrcp.f32 %v559_v0 }
 0x561   :  { %v562_v1 = vpop.xlane.xlu1 %561  ;;  %v578_v2 = vpop.permute.xlu0 %577 }
 0x562   :  { %10564 = vrcp.f32 %v562_v1  ;;  %9607 = vmatpush3.msra.mxu0 %v578_v2 }
 0x563   :  { %9608 = vmatprep.subr.mxu0 %v11096_v48 }
 0x564   :  { %9609 = vmatpush3.msra.mxu0 %v576_v61 }
 0x565   :  { %9619 = vmatprep.subr.mxu0 %v11096_v48  ;;  %v675_v11 = vpop.permute.xlu1 %674 }
 0x569   :  { %v679_v13 = vpop.permute.xlu1 %678 }
 0x56b   :  { %v10563_v3 = vpop.eup %10562 }
 0x56c   :  { %v572_v4 = vmul.f32 %v10563_v3, %v10557_v50  ;;  %v249_v3 = vld [vmem:[%s14160_s28 + $0x8] sm:$0xff] }
 0x56e   :  { %9611 = vmatmul.mubr.msk.f32.vlgmr.msra.gmra.mxu0 %vm537_vm7, %v572_v4 }
 0x56f   :  { %v10565_v5 = vpop.eup %10564  ;;  %9620 = vmatpush3.xpose.msk.msra.mxu0 %vm441_vm6, %v685_v62  ;;  %9613 = vmatprep.mubr.msk.f32.mxu0 %vm11097_vm5, %v11096_v48 }
 0x570   :  { %9621 = vmatprep.subr.mxu0 %v11096_v48  ;;  %v573_v6 = vmul.f32 %v10565_v5, %v10559_v52 }
 0x572   :  { %9614 = vmatmul.mubr.msk.f32.gmra.mxu0 %vm537_vm7, %v573_v6 }
 0x573   :  { %9622 = vmatpush3.xpose.msk.msra.mxu0 %vm441_vm6, %v683_v63  ;;  %9616 = vmatprep.mubr.msk.f32.mxu0 %vm11097_vm5, %v11096_v48 }
 0x574   :  { %9623 = vmatprep.subr.mxu0 %v11096_v48 }
 0x592   :  { %v565_v7 = vpop.xlane.xlu0 %564 }
 0x593   :  { %10566 = vrcp.f32 %v565_v7 }
 0x596   :  { %v681_v8 = vpop.permute.xlu0 %680 }
 0x597   :  { %9624 = vmatpush3.xpose.msk.msra.mxu0 %vm441_vm6, %v681_v8  ;;  %v248_v8 = vld [vmem:[%s14160_s28] sm:$0xff] }
 0x598   :  { %9634 = vmatprep.subr.mxu0 %v11096_v48 }
 0x59a   :  { %v677_v12 = vpop.permute.xlu0 %676 }
 0x5a0   :  { %v10567_v9 = vpop.eup %10566 }
 0x5a1   :  { %v574_v10 = vmul.f32 %v10567_v9, %v10561_v59 }
 0x5a3   :  { %9617 = vmatmul.mubr.msk.f32.gmra.mxu0 %vm537_vm7, %v574_v10 }
 0x5a4   :  { %9625 = vmatprep.mubr.msk.f32.mxu0 %vm11097_vm5, %v11096_v48 }
 0x5a7   :  { %9626 = vmatmul.mubr.msk.f32.vlgmr.msra.gmra.mxu0 %vm441_vm6, %v675_v11 }
 0x5a8   :  { %9628 = vmatprep.mubr.msk.f32.mxu0 %vm11097_vm5, %v11096_v48 }
 0x5ab   :  { %9629 = vmatmul.mubr.msk.f32.gmra.mxu0 %vm441_vm6, %v677_v12 }
 0x5ac   :  { %9631 = vmatprep.mubr.msk.f32.mxu0 %vm11097_vm5, %v11096_v48 }
 0x5af   :  { %9632 = vmatmul.mubr.msk.f32.gmra.mxu0 %vm441_vm6, %v679_v13 }
 0x5b0   :  { %9640 = vmatprep.mubr.msk.f32.mxu0 %vm11097_vm5, %v11096_v48 }
 0x62e   :  { %v11459_v18 = vpop.f32.mrf.mxu0 }
 0x630   :  { %v9612_v22 = vpop.f32.mrf.mxu0 }
 0x632   :  { %v11461_v24 = vpop.f32.mrf.mxu0 }
 0x634   :  { %v9615_v26 = vpop.f32.mrf.mxu0 }
 0x663   :  { %v11463_v27 = vpop.f32.mrf.mxu0 }
 0x665   :  { %v9618_v29 = vpop.f32.mrf.mxu0 }
 0x667   :  { %v764_v31 = vpop.f32.mrf.mxu0 }
 0x668   :  { %v778_v32 = vmul.f32 0.35355338, %v764_v31 }
 0x669   :  { %v9627_v33 = vpop.f32.mrf.mxu0 }
 0x66a   :  { %v781_v34 = vsel %vm537_vm7, %v778_v32, -inf }
 0x66b   :  { %782 = vmax.xlane.f32.xlu0 %v781_v34  ;;  %v769_v35 = vpop.f32.mrf.mxu0 }
 0x66c   :  { %v779_v36 = vmul.f32 0.35355338, %v769_v35 }
 0x66d   :  { %v9630_v37 = vpop.f32.mrf.mxu0 }
 0x66e   :  { %v784_v38 = vsel %vm537_vm7, %v779_v36, -inf }
 0x66f   :  { %785 = vmax.xlane.f32.xlu1 %v784_v38  ;;  %v774_v39 = vpop.f32.mrf.mxu0 }
 0x670   :  { %v780_v40 = vmul.f32 0.35355338, %v774_v39 }
 0x671   :  { %v9633_v41 = vpop.f32.mrf.mxu0 }
 0x672   :  { %v787_v42 = vsel %vm544_vm8, %v780_v40, -inf }
 0x673   :  { %788 = vmax.xlane.f32.xlu0 %v787_v42 }
 0x680   :  { %819 = vrot.lane.b32.xlu1 %v11363_v15, %s14115_s29 }
 0x6f4   :  { %v783_v43 = vpop.xlane.xlu0 %782 }
 0x6f5   :  { %v790_v44 = vsub.f32 %v778_v32, %v783_v43 }
 0x6f7   :  { %v793_v45 = vmul.f32 1.442695, %v790_v44 }
 0x6f8   :  { %v786_v46 = vpop.xlane.xlu1 %785 }
 0x6f9   :  { %10568 = vpow2.f32 %v793_v45  ;;  %v791_v47 = vsub.f32 %v779_v36, %v786_v46 }
 0x6fb   :  { %v795_v49 = vmul.f32 1.442695, %v791_v47 }
 0x6fc   :  { %v789_v50 = vpop.xlane.xlu0 %788  ;;  %v820_v60 = vpop.permute.xlu1 %819 }
 0x6fd   :  { %10570 = vpow2.f32 %v795_v49  ;;  %v792_v51 = vsub.f32 %v780_v40, %v789_v50 }
 0x6ff   :  { %v797_v52 = vmul.f32 1.442695, %v792_v51 }
 0x701   :  { %10572 = vpow2.f32 %v797_v52 }
 0x706   :  { %v10569_v53 = vpop.eup %10568 }
 0x707   :  { %v799_v54 = vsel %vm537_vm7, %v10569_v53, 0.0 }
 0x708   :  { %800 = vadd.xlane.f32.xlu0 %v799_v54 }
 0x70a   :  { %v10571_v55 = vpop.eup %10570 }
 0x70b   :  { %v802_v56 = vsel %vm537_vm7, %v10571_v55, 0.0 }
 0x70c   :  { %803 = vadd.xlane.f32.xlu0 %v802_v56 }
 0x70e   :  { %v10573_v57 = vpop.eup %10572 }
 0x70f   :  { %v805_v58 = vsel %vm544_vm8, %v10573_v57, 0.0 }
 0x710   :  { %806 = vadd.xlane.f32.xlu1 %v805_v58 }
 0x721   :  { %817 = vrot.lane.b32.xlu1 %v11367_v20, %s14115_s29 }
 0x722   :  { %821 = vrot.lane.b32.xlu0 %v11369_v21, %s14115_s29  ;;  %s14161_s29 = sld [smem:[#allocation15_spill]] }
 0x725   :  { %1104 = vrot.lane.b32.xlu1 %v11369_v21, %s14113_s0 }
 0x726   :  { %1102 = vrot.lane.b32.xlu0 %v11363_v15, %s14113_s0 }
 0x729   :  { %1100 = vrot.lane.b32.xlu1 %v11367_v20, %s14113_s0  ;;  %s14162_s0 = sld [smem:[#allocation16_spill]] }
 0x72a   :  { %1094 = vrot.lane.b32.xlu0 %v11367_v20, %s14103_s11 }
 0x72d   :  { %1096 = vrot.lane.b32.xlu1 %v11363_v15, %s14103_s11 }
 0x72e   :  { %1098 = vrot.lane.b32.xlu0 %v11369_v21, %s14103_s11  ;;  %s14109_s11 = smov 48  }
 0x791   :  { %v801_v59 = vpop.xlane.xlu0 %800 }
 0x792   :  { %10574 = vrcp.f32 %v801_v59 }
 0x795   :  { %v804_v61 = vpop.xlane.xlu0 %803 }
 0x796   :  { %10576 = vrcp.f32 %v804_v61 }
 0x799   :  { %v807_v62 = vpop.xlane.xlu1 %806  ;;  %v822_v63 = vpop.permute.xlu0 %821 }
 0x79a   :  { %10578 = vrcp.f32 %v807_v62  ;;  %9635 = vmatpush3.msk.msra.mxu0 %vm222_vm3, %v822_v63  ;;  %10531 = vmatpush3.msk.msra.mxu1 %vm222_vm3, %v822_v63 }
 0x79b   :  { %9636 = vmatprep.subr.mxu0 %v11096_v48  ;;  %10529 = vmatprep.subr.mxu1 %v11096_v48 }
 0x79c   :  { %9637 = vmatpush3.msra.mxu0 %v820_v60  ;;  %10532 = vmatpush3.msra.mxu1 %v820_v60 }
 0x79d   :  { %v818_v0 = vpop.permute.xlu1 %817  ;;  %9638 = vmatprep.subr.mxu0 %v11096_v48  ;;  %10530 = vmatprep.subr.mxu1 %v11096_v48  ;;  %v1103_v13 = vpop.permute.xlu0 %1102 }
 0x79e   :  { %9639 = vmatpush3.msra.mxu0 %v818_v0  ;;  %10533 = vmatpush3.msra.mxu1 %v818_v0 }
 0x79f   :  { %v10575_v1 = vpop.eup %10574  ;;  %9660 = vmatprep.subr.mxu1 %v11096_v48  ;;  %9649 = vmatprep.subr.mxu0 %v11096_v48 }
 0x7a0   :  { %v814_v2 = vmul.f32 %v10575_v1, %v10569_v53 }
 0x7a1   :  { %v1105_v10 = vpop.permute.xlu1 %1104 }
 0x7a2   :  { %9641 = vmatmul.mubr.msk.f32.vlgmr.msra.gmra.mxu0 %vm537_vm7, %v814_v2 }
 0x7a3   :  { %v10577_v4 = vpop.eup %10576  ;;  %9643 = vmatprep.mubr.msk.f32.mxu0 %vm11097_vm5, %v11096_v48  ;;  %9650 = vmatpush3.msra.mxu0 %v249_v3 }
 0x7a4   :  { %v815_v5 = vmul.f32 %v10577_v4, %v10571_v55  ;;  %9671 = vmatprep.subr.mxu0 %v11096_v48 }
 0x7a6   :  { %9644 = vmatmul.mubr.msk.f32.gmra.mxu0 %vm537_vm7, %v815_v5 }
 0x7a7   :  { %v10579_v6 = vpop.eup %10578  ;;  %9651 = vmatprep.mubr.msk.f32.mxu0 %vm11097_vm5, %v11096_v48 }
 0x7a8   :  { %v816_v7 = vmul.f32 %v10579_v6, %v10573_v57 }
 0x7aa   :  { %9647 = vmatmul.mubr.msk.f32.vlgmr.msra.gmra.mxu1 %vm537_vm7, %v816_v7 }
 0x7ab   :  { %9661 = vmatpush3.msra.mxu1 %v248_v8  ;;  %9662 = vmatprep.mubr.msk.f32.mxu1 %vm11097_vm5, %v11096_v48 }
 0x7ac   :  { %9686 = vmatprep.subr.mxu1 %v11096_v48 }
 0x7ae   :  { %9663 = vmatmul.mubr.msk.f32.vlgmr.msra.gmra.mxu1 %vm441_vm6, %v11459_v18 }
 0x7af   :  { %9665 = vmatprep.mubr.msk.f32.mxu1 %vm11097_vm5, %v11096_v48 }
 0x7b2   :  { %9666 = vmatmul.mubr.msk.f32.gmra.mxu1 %vm441_vm6, %v11461_v24  ;;  %v1101_v24 = vpop.permute.xlu1 %1100 }
 0x7b3   :  { %9668 = vmatprep.mubr.msk.f32.mxu1 %vm11097_vm5, %v11096_v48 }
 0x7b6   :  { %9669 = vmatmul.mubr.msk.f32.gmra.mxu1 %vm441_vm6, %v11463_v27  ;;  %v1095_v27 = vpop.permute.xlu0 %1094  ;;  %v1097_v32 = vpop.permute.xlu1 %1096 }
 0x7b7   :  { %9692 = vmatprep.mubr.msk.f32.mxu1 %vm11097_vm5, %v11096_v48 }
 0x7ba   :  { %v1099_v35 = vpop.permute.xlu0 %1098 }
 0x862   :  { %v902_v9 = vpop.f32.mrf.mxu0 }
 0x863   :  { %9652 = vmatmul.mubr.msk.f32.vlgmr.msra.gmra.mxu0 %vm441_vm6, %v902_v9 }
 0x864   :  { %9672 = vmatpush3.xpose.msk.msra.mxu0 %vm441_vm6, %v1105_v10  ;;  %v9642_v11 = vpop.f32.mrf.mxu0  ;;  %9654 = vmatprep.mubr.msk.f32.mxu0 %vm11097_vm5, %v11096_v48 }
 0x865   :  { %9673 = vmatprep.subr.mxu0 %v11096_v48 }
 0x866   :  { %v907_v12 = vpop.f32.mrf.mxu0 }
 0x867   :  { %9655 = vmatmul.mubr.msk.f32.gmra.mxu0 %vm441_vm6, %v907_v12 }
 0x868   :  { %9674 = vmatpush3.xpose.msk.msra.mxu0 %vm441_vm6, %v1103_v13  ;;  %v9645_v18 = vpop.f32.mrf.mxu0  ;;  %9657 = vmatprep.mubr.msk.f32.mxu0 %vm11097_vm5, %v11096_v48 }
 0x869   :  { %9675 = vmatprep.subr.mxu0 %v11096_v48 }
 0x86a   :  { %v912_v22 = vpop.f32.mrf.mxu1 }
 0x86b   :  { %9658 = vmatmul.mubr.msk.f32.gmra.mxu0 %vm441_vm6, %v912_v22 }
 0x86c   :  { %9676 = vmatpush3.xpose.msk.msra.mxu0 %vm441_vm6, %v1101_v24  ;;  %v9648_v26 = vpop.f32.mrf.mxu1  ;;  %9677 = vmatprep.mubr.msk.f32.mxu0 %vm11097_vm5, %v11096_v48 }
 0x86d   :  { %9701 = vmatprep.subr.mxu0 %v11096_v48 }
 0x86e   :  { %v11541_v29 = vpop.f32.mrf.mxu1 }
 0x86f   :  { %9678 = vmatmul.mubr.msk.f32.vlgmr.msra.gmra.mxu0 %vm441_vm6, %v1095_v27 }
 0x870   :  { %v9664_v31 = vpop.f32.mrf.mxu1  ;;  %9680 = vmatprep.mubr.msk.f32.mxu0 %vm11097_vm5, %v11096_v48 }
 0x872   :  { %v11546_v33 = vpop.f32.mrf.mxu1 }
 0x873   :  { %9681 = vmatmul.mubr.msk.f32.gmra.mxu0 %vm441_vm6, %v1097_v32 }
 0x874   :  { %v9667_v34 = vpop.f32.mrf.mxu1  ;;  %9683 = vmatprep.mubr.msk.f32.mxu0 %vm11097_vm5, %v11096_v48 }
 0x876   :  { %v11551_v36 = vpop.f32.mrf.mxu1 }
 0x877   :  { %9684 = vmatmul.mubr.msk.f32.gmra.mxu0 %vm441_vm6, %v1099_v35 }
 0x878   :  { %v9670_v37 = vpop.f32.mrf.mxu1  ;;  %9703 = vmatprep.mubr.msk.f32.mxu0 %vm11097_vm5, %v11096_v48 }
 0x923   :  { %v11556_v38 = vpop.f32.mrf.mxu0 }
 0x925   :  { %v9653_v39 = vpop.f32.mrf.mxu0 }
 0x927   :  { %v11558_v40 = vpop.f32.mrf.mxu0 }
 0x929   :  { %v9656_v41 = vpop.f32.mrf.mxu0 }
 0x92b   :  { %v11560_v42 = vpop.f32.mrf.mxu0 }
 0x92d   :  { %v9659_v43 = vpop.f32.mrf.mxu0 }
 0x92e   :  { %v250_v43 = vld [vmem:[%s14160_s28 + $0x10] sm:$0xff] }
 0x92f   :  { %v1184_v44 = vpop.f32.mrf.mxu0  ;;  %9702 = vmatpush3.msra.mxu0 %v250_v43 }
 0x930   :  { %v1198_v45 = vmul.f32 0.35355338, %v1184_v44  ;;  %9727 = vmatprep.subr.mxu0 %v11096_v48 }
 0x931   :  { %v9679_v46 = vpop.f32.mrf.mxu0 }
 0x932   :  { %v1201_v47 = vsel %vm537_vm7, %v1198_v45, -inf }
 0x933   :  { %1202 = vmax.xlane.f32.xlu1 %v1201_v47  ;;  %v1189_v49 = vpop.f32.mrf.mxu0 }
 0x934   :  { %v1199_v50 = vmul.f32 0.35355338, %v1189_v49 }
 0x935   :  { %v9682_v51 = vpop.f32.mrf.mxu0 }
 0x936   :  { %v1204_v52 = vsel %vm537_vm7, %v1199_v50, -inf }
 0x937   :  { %1205 = vmax.xlane.f32.xlu0 %v1204_v52  ;;  %v1194_v53 = vpop.f32.mrf.mxu0 }
 0x938   :  { %v1200_v54 = vmul.f32 0.35355338, %v1194_v53 }
 0x939   :  { %v9685_v55 = vpop.f32.mrf.mxu0 }
 0x93a   :  { %v1207_v56 = vsel %vm544_vm8, %v1200_v54, -inf }
 0x93b   :  { %1208 = vmax.xlane.f32.xlu0 %v1207_v56 }
 0x944   :  { %1241 = vrot.lane.b32.xlu1 %v11369_v21, %s14109_s11 }
 0x948   :  { %1237 = vrot.lane.b32.xlu1 %v11367_v20, %s14109_s11 }
 0x94c   :  { %1438 = vrot.lane.b32.xlu1 %v11369_v21, %s14107_s30 }
 0x950   :  { %1436 = vrot.lane.b32.xlu1 %v11363_v15, %s14107_s30 }
 0x9bc   :  { %v1203_v57 = vpop.xlane.xlu1 %1202 }
 0x9bd   :  { %v1210_v58 = vsub.f32 %v1198_v45, %v1203_v57 }
 0x9bf   :  { %v1213_v59 = vmul.f32 1.442695, %v1210_v58 }
 0x9c0   :  { %v1242_v60 = vpop.permute.xlu1 %1241  ;;  %v1206_v61 = vpop.xlane.xlu0 %1205 }
 0x9c1   :  { %10580 = vpow2.f32 %v1213_v59  ;;  %v1211_v62 = vsub.f32 %v1199_v50, %v1206_v61  ;;  %9687 = vmatpush3.msk.msra.mxu1 %vm222_vm3, %v1242_v60 }
 0x9c2   :  { %9688 = vmatprep.subr.mxu1 %v11096_v48 }
 0x9c3   :  { %v1215_v63 = vmul.f32 1.442695, %v1211_v62 }
 0x9c4   :  { %v1209_v4 = vpop.xlane.xlu0 %1208  ;;  %v1238_v9 = vpop.permute.xlu1 %1237 }
 0x9c5   :  { %10582 = vpow2.f32 %v1215_v63  ;;  %v1212_v5 = vsub.f32 %v1200_v54, %v1209_v4  ;;  %v1081_v63 = vadd.f32 %v11541_v29, %v11556_v38 }
 0x9c7   :  { %v1217_v6 = vmul.f32 1.442695, %v1212_v5 }
 0x9c8   :  { %v1439_v10 = vpop.permute.xlu1 %1438 }
 0x9c9   :  { %10584 = vpow2.f32 %v1217_v6 }
 0x9cc   :  { %v1437_v11 = vpop.permute.xlu1 %1436 }
 0x9ce   :  { %v10581_v0 = vpop.eup %10580 }
 0x9cf   :  { %v1219_v1 = vsel %vm537_vm7, %v10581_v0, 0.0 }
 0x9d0   :  { %1220 = vadd.xlane.f32.xlu0 %v1219_v1 }
 0x9d2   :  { %v10583_v2 = vpop.eup %10582 }
 0x9d3   :  { %v1222_v3 = vsel %vm537_vm7, %v10583_v2, 0.0 }
 0x9d4   :  { %1223 = vadd.xlane.f32.xlu1 %v1222_v3  ;;  %v1086_v3 = vadd.f32 %v11546_v33, %v11558_v40 }
 0x9d6   :  { %v10585_v7 = vpop.eup %10584 }
 0x9d7   :  { %v1225_v8 = vsel %vm544_vm8, %v10585_v7, 0.0 }
 0x9e5   :  { %1428 = vrot.lane.b32.xlu1 %v11367_v20, %s14105_s3 }
 0x9e6   :  { %1239 = vrot.lane.b32.xlu0 %v11363_v15, %s14109_s11  ;;  %s14168_s11 = smov 80  }
 0x9e9   :  { %1432 = vrot.lane.b32.xlu1 %v11369_v21, %s14105_s3 }
 0xa05   :  { %1226 = vadd.xlane.f32.xlu0 %v1225_v8 }
 0xa1b   :  { %1434 = vrot.lane.b32.xlu0 %v11367_v20, %s14107_s30  ;;  %s14111_s30 = smov 40  }
 0xa1f   :  { %1430 = vrot.lane.b32.xlu0 %v11363_v15, %s14105_s3  ;;  %s14164_s3 = smov 88  }
 0xa59   :  { %v1221_v12 = vpop.xlane.xlu0 %1220 }
 0xa5a   :  { %10586 = vrcp.f32 %v1221_v12 }
 0xa5d   :  { %v1224_v13 = vpop.xlane.xlu1 %1223  ;;  %v1240_v18 = vpop.permute.xlu0 %1239 }
 0xa5e   :  { %10588 = vrcp.f32 %v1224_v13  ;;  %9689 = vmatpush3.msra.mxu1 %v1240_v18 }
 0xa5f   :  { %9690 = vmatprep.subr.mxu1 %v11096_v48 }
 0xa60   :  { %9691 = vmatpush3.msra.mxu1 %v1238_v9 }
 0xa61   :  { %9712 = vmatprep.subr.mxu1 %v11096_v48  ;;  %v1429_v37 = vpop.permute.xlu1 %1428 }
 0xa65   :  { %v1433_v41 = vpop.permute.xlu1 %1432 }
 0xa67   :  { %v10587_v22 = vpop.eup %10586 }
 0xa68   :  { %v1234_v24 = vmul.f32 %v10587_v22, %v10581_v0 }
 0xa6a   :  { %9693 = vmatmul.mubr.msk.f32.vlgmr.msra.gmra.mxu1 %vm537_vm7, %v1234_v24 }
 0xa6b   :  { %v10589_v26 = vpop.eup %10588  ;;  %9713 = vmatpush3.xpose.msk.msra.mxu1 %vm441_vm6, %v1439_v10  ;;  %9695 = vmatprep.mubr.msk.f32.mxu1 %vm11097_vm5, %v11096_v48 }
 0xa6c   :  { %9714 = vmatprep.subr.mxu1 %v11096_v48  ;;  %v1235_v27 = vmul.f32 %v10589_v26, %v10583_v2  ;;  %v1091_v26 = vadd.f32 %v11551_v36, %v11560_v42 }
 0xa6e   :  { %9696 = vmatmul.mubr.msk.f32.gmra.mxu1 %vm537_vm7, %v1235_v27 }
 0xa6f   :  { %9715 = vmatpush3.xpose.msk.msra.mxu1 %vm441_vm6, %v1437_v11  ;;  %9698 = vmatprep.mubr.msk.f32.mxu1 %vm11097_vm5, %v11096_v48 }
 0xa70   :  { %9716 = vmatprep.subr.mxu1 %v11096_v48 }
 0xa8e   :  { %v1227_v31 = vpop.xlane.xlu0 %1226 }
 0xa8f   :  { %10590 = vrcp.f32 %v1227_v31 }
 0xa92   :  { %v1435_v32 = vpop.permute.xlu0 %1434 }
 0xa93   :  { %9717 = vmatpush3.xpose.msk.msra.mxu1 %vm441_vm6, %v1435_v32 }
 0xa94   :  { %9742 = vmatprep.subr.mxu1 %v11096_v48 }
 0xa96   :  { %v1431_v39 = vpop.permute.xlu0 %1430 }
 0xa9c   :  { %v10591_v34 = vpop.eup %10590 }
 0xa9d   :  { %v1236_v35 = vmul.f32 %v10591_v34, %v10585_v7  ;;  %v251_v34 = vld [vmem:[%s14160_s28 + $0x18] sm:$0xff] }
 0xa9f   :  { %9699 = vmatmul.mubr.msk.f32.gmra.mxu1 %vm537_vm7, %v1236_v35 }
 0xaa0   :  { %9718 = vmatprep.mubr.msk.f32.mxu1 %vm11097_vm5, %v11096_v48 }
 0xaa3   :  { %9719 = vmatmul.mubr.msk.f32.vlgmr.msra.gmra.mxu1 %vm441_vm6, %v1429_v37 }
 0xaa4   :  { %9721 = vmatprep.mubr.msk.f32.mxu1 %vm11097_vm5, %v11096_v48  ;;  %9743 = vmatpush3.msra.mxu1 %v251_v34 }
 0xaa5   :  { %9770 = vmatprep.subr.mxu1 %v11096_v48 }
 0xaa7   :  { %9722 = vmatmul.mubr.msk.f32.gmra.mxu1 %vm441_vm6, %v1431_v39 }
 0xaa8   :  { %9724 = vmatprep.mubr.msk.f32.mxu1 %vm11097_vm5, %v11096_v48 }
 0xaab   :  { %9725 = vmatmul.mubr.msk.f32.gmra.mxu1 %vm441_vm6, %v1433_v41 }
 0xaac   :  { %9744 = vmatprep.mubr.msk.f32.mxu1 %vm11097_vm5, %v11096_v48 }
 0xb2a   :  { %v1322_v44 = vpop.f32.mrf.mxu1 }
 0xb2b   :  { %9704 = vmatmul.mubr.msk.f32.vlgmr.msra.gmra.mxu0 %vm441_vm6, %v1322_v44 }
 0xb2c   :  { %v9694_v45 = vpop.f32.mrf.mxu1  ;;  %9706 = vmatprep.mubr.msk.f32.mxu0 %vm11097_vm5, %v11096_v48 }
 0xb2e   :  { %v1327_v46 = vpop.f32.mrf.mxu1 }
 0xb2f   :  { %9707 = vmatmul.mubr.msk.f32.gmra.mxu0 %vm441_vm6, %v1327_v46 }
 0xb30   :  { %v9697_v47 = vpop.f32.mrf.mxu1  ;;  %9709 = vmatprep.mubr.msk.f32.mxu0 %vm11097_vm5, %v11096_v48 }
 0xb5f   :  { %v1332_v49 = vpop.f32.mrf.mxu1 }
 0xb60   :  { %9710 = vmatmul.mubr.msk.f32.gmra.mxu0 %vm441_vm6, %v1332_v49 }
 0xb61   :  { %v9700_v50 = vpop.f32.mrf.mxu1  ;;  %9733 = vmatprep.mubr.msk.f32.mxu0 %vm11097_vm5, %v11096_v48 }
 0xb63   :  { %v1518_v51 = vpop.f32.mrf.mxu1 }
 0xb64   :  { %v1532_v52 = vmul.f32 0.35355338, %v1518_v51 }
 0xb65   :  { %v9720_v53 = vpop.f32.mrf.mxu1 }
 0xb66   :  { %v1535_v54 = vsel %vm537_vm7, %v1532_v52, -inf }
 0xb67   :  { %1536 = vmax.xlane.f32.xlu0 %v1535_v54  ;;  %v1523_v55 = vpop.f32.mrf.mxu1  ;;  %v11000_v54 = vld [vmem:[%s14154_s2] ss:$0 sm:$0xff]  ;;  %s14165_s2 = smov 120  }
 0xb68   :  { %v1533_v56 = vmul.f32 0.35355338, %v1523_v55  ;;  %v199_v55 = vadd.f32 %v11000_v54, %v11455_v14 }
 0xb69   :  { %v9723_v57 = vpop.f32.mrf.mxu1 }
 0xb6a   :  { %v1538_v58 = vsel %vm537_vm7, %v1533_v56, -inf  ;;  %v231_v57 = vadd.f32 %v11291_v16, %v199_v55  ;;  %v255_v55 = vld [vmem:[%s14077_s13] sm:$0xff] }
 0xb6b   :  { %1539 = vmax.xlane.f32.xlu1 %v1538_v58  ;;  %v1528_v59 = vpop.f32.mrf.mxu1 }
 0xb6c   :  { %v1534_v60 = vmul.f32 0.35355338, %v1528_v59 }
 0xb6d   :  { %v9726_v61 = vpop.f32.mrf.mxu1 }
 0xb6e   :  { %v1541_v62 = vsel %vm544_vm8, %v1534_v60, -inf  ;;  %v8924_v61 = vld [vmem:[%s14161_s29] ss:$0 sm:$0xff] }
 0xb6f   :  { %1542 = vmax.xlane.f32.xlu0 %v1541_v62 }
 0xb7c   :  { %1573 = vrot.lane.b32.xlu1 %v11363_v15, %s14111_s30 }
 0xbeb   :  { %v1411_v0 = vpop.f32.mrf.mxu0 }
 0xbec   :  { %v11634_v1 = vadd.f32 %v1411_v0, %v1081_v63  ;;  %v11689_v0 = vrot.slane %v231_v57, 7 }
 0xbed   :  { %v9705_v2 = vpop.f32.mrf.mxu0 }
 0xbef   :  { %v1416_v4 = vpop.f32.mrf.mxu0 }
 0xbf0   :  { %v11638_v5 = vadd.f32 %v1416_v4, %v1086_v3  ;;  %v1537_v6 = vpop.xlane.xlu0 %1536 }
 0xbf1   :  { %v1544_v7 = vsub.f32 %v1532_v52, %v1537_v6  ;;  %v9708_v8 = vpop.f32.mrf.mxu0 }
 0xbf3   :  { %v1547_v9 = vmul.f32 1.442695, %v1544_v7 }
 0xbf4   :  { %v1540_v10 = vpop.xlane.xlu1 %1539 }
 0xbf5   :  { %10592 = vpow2.f32 %v1547_v9  ;;  %v1545_v15 = vsub.f32 %v1533_v56, %v1540_v10  ;;  %v194_v56 = vadd.f32 %v11000_v54, %v11457_v17  ;;  %v256_v54 = vld [vmem:[%s14077_s13 + $0x8] sm:$0xff] }
 0xbf7   :  { %v1549_v11 = vmul.f32 1.442695, %v1545_v15  ;;  %v230_v58 = vadd.f32 %v11294_v19, %v194_v56 }
 0xbf8   :  { %v1543_v12 = vpop.xlane.xlu0 %1542 }
 0xbf9   :  { %10594 = vpow2.f32 %v1549_v11  ;;  %v1546_v29 = vsub.f32 %v1534_v60, %v1543_v12  ;;  %v234_v2 = vrot.slane %v230_v58, 7  ;;  %v2105_v12 = vsel %vm284_vm2, %v11689_v0, 0.0 }
 0xbfb   :  { %v1551_v38 = vmul.f32 1.442695, %v1546_v29  ;;  %v11699_v6 = vsel %vm222_vm3, %v234_v2, %v11689_v0  ;;  %v11715_v11 = vsel %vm222_vm3, %v11303_v25, %v234_v2 }
 0xbfd   :  { %10596 = vpow2.f32 %v1551_v38 }
 0xc02   :  { %v10593_v13 = vpop.eup %10592 }
 0xc03   :  { %v1553_v18 = vsel %vm537_vm7, %v10593_v13, 0.0 }
 0xc04   :  { %1554 = vadd.xlane.f32.xlu0 %v1553_v18 }
 0xc06   :  { %v10595_v33 = vpop.eup %10594 }
 0xc07   :  { %v1556_v40 = vsel %vm537_vm7, %v10595_v33, 0.0 }
 0xc08   :  { %1557 = vadd.xlane.f32.xlu0 %v1556_v40 }
 0xc0a   :  { %v10597_v22 = vpop.eup %10596 }
 0xc0b   :  { %v1559_v24 = vsel %vm544_vm8, %v10597_v22, 0.0 }
 0xc0c   :  { %1560 = vadd.xlane.f32.xlu1 %v1559_v24 }
 0xc1d   :  { %1571 = vrot.lane.b32.xlu1 %v11367_v20, %s14111_s30  ;;  %v1574_v20 = vpop.permute.xlu1 %1573 }
 0xc1e   :  { %1575 = vrot.lane.b32.xlu0 %v11369_v21, %s14111_s30  ;;  %s14166_s30 = smov 64  }
 0xc20   :  { %v1421_v27 = vpop.f32.mrf.mxu0 }
 0xc21   :  { %v11649_v31 = vadd.f32 %v1421_v27, %v1091_v26 }
 0xc22   :  { %v9711_v32 = vpop.f32.mrf.mxu0 }
 0xc8d   :  { %v1555_v35 = vpop.xlane.xlu0 %1554 }
 0xc8e   :  { %10598 = vrcp.f32 %v1555_v35 }
 0xc91   :  { %v1558_v37 = vpop.xlane.xlu0 %1557 }
 0xc92   :  { %10600 = vrcp.f32 %v1558_v37 }
 0xc95   :  { %v1561_v21 = vpop.xlane.xlu1 %1560  ;;  %v1576_v39 = vpop.permute.xlu0 %1575 }
 0xc96   :  { %10602 = vrcp.f32 %v1561_v21  ;;  %9728 = vmatpush3.msk.msra.mxu0 %vm222_vm3, %v1576_v39 }
 0xc97   :  { %9729 = vmatprep.subr.mxu0 %v11096_v48 }
 0xc98   :  { %9730 = vmatpush3.msra.mxu0 %v1574_v20 }
 0xc99   :  { %v1572_v36 = vpop.permute.xlu1 %1571  ;;  %9731 = vmatprep.subr.mxu0 %v11096_v48 }
 0xc9a   :  { %9732 = vmatpush3.msra.mxu0 %v1572_v36 }
 0xc9b   :  { %v10599_v42 = vpop.eup %10598  ;;  %9753 = vmatprep.subr.mxu0 %v11096_v48 }
 0xc9c   :  { %v1568_v41 = vmul.f32 %v10599_v42, %v10593_v13 }
 0xc9e   :  { %9734 = vmatmul.mubr.msk.f32.vlgmr.msra.gmra.mxu0 %vm537_vm7, %v1568_v41 }
 0xc9f   :  { %v10601_v43 = vpop.eup %10600  ;;  %9736 = vmatprep.mubr.msk.f32.mxu0 %vm11097_vm5, %v11096_v48 }
 0xca0   :  { %v1569_v44 = vmul.f32 %v10601_v43, %v10595_v33 }
 0xca2   :  { %9737 = vmatmul.mubr.msk.f32.gmra.mxu0 %vm537_vm7, %v1569_v44 }
 0xca3   :  { %v10603_v45 = vpop.eup %10602  ;;  %9739 = vmatprep.mubr.msk.f32.mxu0 %vm11097_vm5, %v11096_v48 }
 0xca4   :  { %v1570_v46 = vmul.f32 %v10603_v45, %v10597_v22 }
 0xca6   :  { %9740 = vmatmul.mubr.msk.f32.gmra.mxu0 %vm537_vm7, %v1570_v46 }
 0xca7   :  { %9761 = vmatprep.mubr.msk.f32.mxu0 %vm11097_vm5, %v11096_v48 }
 0xd5e   :  { %v1656_v47 = vpop.f32.mrf.mxu0 }
 0xd5f   :  { %9745 = vmatmul.mubr.msk.f32.vlgmr.msra.gmra.mxu1 %vm441_vm6, %v1656_v47 }
 0xd60   :  { %v9735_v49 = vpop.f32.mrf.mxu0  ;;  %9747 = vmatprep.mubr.msk.f32.mxu1 %vm11097_vm5, %v11096_v48 }
 0xd62   :  { %v1661_v50 = vpop.f32.mrf.mxu0 }
 0xd63   :  { %9748 = vmatmul.mubr.msk.f32.gmra.mxu1 %vm441_vm6, %v1661_v50 }
 0xd64   :  { %v9738_v51 = vpop.f32.mrf.mxu0  ;;  %9750 = vmatprep.mubr.msk.f32.mxu1 %vm11097_vm5, %v11096_v48 }
 0xd66   :  { %v1666_v52 = vpop.f32.mrf.mxu0 }
 0xd67   :  { %9751 = vmatmul.mubr.msk.f32.gmra.mxu1 %vm441_vm6, %v1666_v52  ;;  %v258_v52 = vld [vmem:[%s14077_s13 + $0x18] sm:$0xff] }
 0xd68   :  { %v9741_v53 = vpop.f32.mrf.mxu0  ;;  %9802 = vmatprep.mubr.msk.f32.mxu1 %vm11097_vm5, %v11096_v48  ;;  %9754 = vmatpush3.msra.mxu0 %v258_v52  ;;  %v272_v52 = vld [vmem:[%s14079_s15 + $0x60] sm:$0xff] }
 0xd69   :  { %9755 = vmatprep.subr.mxu0 %v11096_v48  ;;  %v257_v53 = vld [vmem:[%s14077_s13 + $0x10] sm:$0xff] }
 0xd6a   :  { %9756 = vmatpush3.msra.mxu0 %v257_v53  ;;  %v271_v53 = vld [vmem:[%s14079_s15 + $0x58] sm:$0xff] }
 0xd6b   :  { %9757 = vmatprep.subr.mxu0 %v11096_v48 }
 0xd6c   :  { %9758 = vmatpush3.msra.mxu0 %v256_v54  ;;  %v270_v54 = vld [vmem:[%s14079_s15 + $0x50] sm:$0xff] }
 0xd6d   :  { %9759 = vmatprep.subr.mxu0 %v11096_v48 }
 0xd6e   :  { %9760 = vmatpush3.msra.mxu0 %v255_v55  ;;  %v269_v55 = vld [vmem:[%s14079_s15 + $0x48] sm:$0xff] }
 0xd6f   :  { %9811 = vmatprep.subr.mxu0 %v11096_v48 }
 0xe1f   :  { %v1745_v59 = vpop.f32.mrf.mxu1 }
 0xe20   :  { %v1759_v60 = vadd.f32 %v1745_v59, %v11634_v1 }
 0xe21   :  { %v9746_v62 = vpop.f32.mrf.mxu1 }
 0xe22   :  { %v1762_v63 = vadd.f32 %v1759_v60, %v11309_v28 }
 0xe23   :  { %v1750_v14 = vpop.f32.mrf.mxu1 }
 0xe24   :  { %v11691_v3 = vadd.f32 %v8924_v61, %v1762_v63  ;;  %v1760_v16 = vadd.f32 %v1750_v14, %v11638_v5  ;;  %v2102_v5 = vsel %vm277_vm4, %v11699_v6, 0.0 }
 0xe25   :  { %v9749_v17 = vpop.f32.mrf.mxu1 }
 0xe26   :  { %v1763_v19 = vadd.f32 %v1760_v16, %v11315_v30  ;;  %v1774_v1 = vsel %vm277_vm4, %v11691_v3, 0.0 }
 0xe27   :  { %1775 = vadd.xlane.f32.xlu1 %v1774_v1  ;;  %v1755_v4 = vpop.f32.mrf.mxu1 }
 0xe28   :  { %v11701_v28 = vadd.f32 %v8924_v61, %v1763_v19  ;;  %v1761_v7 = vadd.f32 %v1755_v4, %v11649_v31 }
 0xe29   :  { %v9752_v8 = vpop.f32.mrf.mxu1 }
 0xe2a   :  { %v1764_v9 = vadd.f32 %v1761_v7, %v11300_v23  ;;  %v1777_v30 = vsel %vm277_vm4, %v11701_v28, 0.0  ;;  %v2099_v23 = vsel %vm277_vm4, %v11715_v11, 0.0 }
 0xe2b   :  { %2103 = vadd.xlane.f32.xlu1 %v2102_v5  ;;  %1778 = vadd.xlane.f32.xlu0 %v1777_v30  ;;  %v8925_v5 = vld [vmem:[%s14162_s0] ss:$0 sm:$0xff] }
 0xe2c   :  { %v11709_v10 = vadd.f32 %v8924_v61, %v1764_v9 }
 0xe2e   :  { %v1780_v15 = vsel %vm284_vm2, %v11709_v10, 0.0 }
 0xe2f   :  { %1781 = vadd.xlane.f32.xlu0 %v1780_v15 }
 0xe33   :  { %2100 = vadd.xlane.f32.xlu0 %v2099_v23  ;;  %v8926_v23 = vld [vmem:[%s14076_s12] ss:$0 sm:$0xff] }
 0xe37   :  { %2106 = vadd.xlane.f32.xlu0 %v2105_v12 }
 0xeb0   :  { %v1776_v29 = vpop.xlane.xlu1 %1775 }
 0xeb1   :  { %v1783_v38 = vmul.f32 0.03125, %v1776_v29 }
 0xeb3   :  { %v11722_v13 = vsub.f32 %v11691_v3, %v1783_v38 }
 0xeb4   :  { %v2104_v18 = vpop.xlane.xlu1 %2103  ;;  %v1779_v33 = vpop.xlane.xlu0 %1778 }
 0xeb5   :  { %v1784_v40 = vmul.f32 0.03125, %v1779_v33  ;;  %v1789_v25 = vmul.f32 %v11722_v13, %v11722_v13  ;;  %v2109_v22 = vmul.f32 0.03125, %v2104_v18 }
 0xeb7   :  { %v11727_v24 = vsub.f32 %v11701_v28, %v1784_v40  ;;  %v1792_v26 = vsel %vm277_vm4, %v1789_v25, 0.0  ;;  %v11733_v34 = vsub.f32 %v11699_v6, %v2109_v22 }
 0xeb8   :  { %1793 = vadd.xlane.f32.xlu1 %v1792_v26  ;;  %v1782_v27 = vpop.xlane.xlu0 %1781 }
 0xeb9   :  { %v1785_v31 = vmul.f32 0.03125, %v1782_v27  ;;  %v1790_v32 = vmul.f32 %v11727_v24, %v11727_v24  ;;  %v2115_v41 = vmul.f32 %v11733_v34, %v11733_v34 }
 0xebb   :  { %v11736_v35 = vsub.f32 %v11709_v10, %v1785_v31  ;;  %v1795_v20 = vsel %vm277_vm4, %v1790_v32, 0.0  ;;  %v2120_v47 = vsel %vm277_vm4, %v2115_v41, 0.0  ;;  %v11003_v31 = vld [vmem:[%s14156_s5 + $0x8] sm:$0xff] }
 0xebc   :  { %1796 = vadd.xlane.f32.xlu0 %v1795_v20  ;;  %v2101_v37 = vpop.xlane.xlu0 %2100 }
 0xebd   :  { %v2108_v21 = vmul.f32 0.03125, %v2101_v37  ;;  %v1791_v39 = vmul.f32 %v11736_v35, %v11736_v35  ;;  %v11004_v37 = vld [vmem:[%s14156_s5] sm:$0xff] }
 0xebf   :  { %v11742_v36 = vsub.f32 %v11715_v11, %v2108_v21  ;;  %v1798_v42 = vsel %vm284_vm2, %v1791_v39, 0.0 }
 0xec0   :  { %1799 = vadd.xlane.f32.xlu1 %v1798_v42  ;;  %v2107_v43 = vpop.xlane.xlu0 %2106  ;;  %v11005_v42 = vld [vmem:[%s14157_s7] ss:$0 sm:$0xff] }
 0xec1   :  { %v2110_v44 = vmul.f32 0.03125, %v2107_v43  ;;  %v2114_v45 = vmul.f32 %v11742_v36, %v11742_v36 }
 0xec3   :  { %v11750_v46 = vsub.f32 %v11689_v0, %v2110_v44  ;;  %v2117_v49 = vsel %vm277_vm4, %v2114_v45, 0.0 }
 0xec4   :  { %2121 = vadd.xlane.f32.xlu1 %v2120_v47  ;;  %2118 = vadd.xlane.f32.xlu0 %v2117_v49 }
 0xec5   :  { %v2116_v50 = vmul.f32 %v11750_v46, %v11750_v46 }
 0xec7   :  { %v2123_v51 = vsel %vm284_vm2, %v2116_v50, 0.0  ;;  %v274_v50 = vld [vmem:[%s14079_s15 + $0x70] sm:$0xff] }
 0xec8   :  { %2124 = vadd.xlane.f32.xlu0 %v2123_v51  ;;  %v273_v51 = vld [vmem:[%s14079_s15 + $0x68] sm:$0xff] }
 0xf41   :  { %v1794_v56 = vpop.xlane.xlu1 %1793 }
 0xf42   :  { %v1801_v57 = vmul.f32 0.03125, %v1794_v56  ;;  %v268_v56 = vld [vmem:[%s14079_s15 + $0x40] sm:$0xff] }
 0xf44   :  { %v1804_v58 = vadd.f32 1e-06, %v1801_v57  ;;  %v267_v57 = vld [vmem:[%s14079_s15 + $0x38] sm:$0xff] }
 0xf45   :  { %v1797_v59 = vpop.xlane.xlu0 %1796 }
 0xf46   :  { %10604 = vrsqrt.f32 %v1804_v58  ;;  %v1802_v60 = vmul.f32 0.03125, %v1797_v59  ;;  %v266_v58 = vld [vmem:[%s14079_s15 + $0x30] sm:$0xff]  ;;  %v265_v59 = vld [vmem:[%s14079_s15 + $0x28] sm:$0xff] }
 0xf48   :  { %v1805_v61 = vadd.f32 1e-06, %v1802_v60  ;;  %v264_v60 = vld [vmem:[%s14079_s15 + $0x20] sm:$0xff] }
 0xf49   :  { %v1800_v62 = vpop.xlane.xlu1 %1799 }
 0xf4a   :  { %10606 = vrsqrt.f32 %v1805_v61  ;;  %v1803_v63 = vmul.f32 0.03125, %v1800_v62  ;;  %v263_v61 = vld [vmem:[%s14079_s15 + $0x18] sm:$0xff]  ;;  %v262_v62 = vld [vmem:[%s14079_s15 + $0x10] sm:$0xff] }
 0xf4c   :  { %v1806_v2 = vadd.f32 1e-06, %v1803_v63  ;;  %v261_v63 = vld [vmem:[%s14079_s15 + $0x8] sm:$0xff] }
 0xf4d   :  { %v2122_v14 = vpop.xlane.xlu1 %2121  ;;  %v2119_v16 = vpop.xlane.xlu0 %2118 }
 0xf4e   :  { %10608 = vrsqrt.f32 %v1806_v2  ;;  %v2127_v17 = vmul.f32 0.03125, %v2122_v14  ;;  %v2126_v19 = vmul.f32 0.03125, %v2119_v16  ;;  %v260_v2 = vld [vmem:[%s14079_s15] sm:$0xff] }
 0xf4f   :  { %v8927_v14 = vld [vmem:[%s14078_s14] ss:$0 sm:$0xff] }
 0xf50   :  { %v2130_v1 = vadd.f32 1e-06, %v2127_v17  ;;  %v2129_v4 = vadd.f32 1e-06, %v2126_v19 }
 0xf51   :  { %v2125_v7 = vpop.xlane.xlu0 %2124 }
 0xf52   :  { %10610 = vrsqrt.f32 %v2130_v1  ;;  %v2128_v8 = vmul.f32 0.03125, %v2125_v7 }
 0xf53   :  { %v10605_v9 = vpop.eup %10604  ;;  %10612 = vrsqrt.f32 %v2129_v4 }
 0xf54   :  { %v1810_v30 = vmul.f32 %v10605_v9, %v11722_v13  ;;  %v2131_v15 = vadd.f32 1e-06, %v2128_v8  ;;  %v11001_v13 = vld [vmem:[%s14156_s5 + $0x18] sm:$0xff] }
 0xf56   :  { %v1819_v12 = vmul.f32 %v8925_v5, %v1810_v30  ;;  %10614 = vrsqrt.f32 %v2131_v15 }
 0xf57   :  { %v10607_v29 = vpop.eup %10606 }
 0xf58   :  { %v1828_v38 = vadd.f32 %v8926_v23, %v1819_v12  ;;  %v1811_v18 = vmul.f32 %v10607_v29, %v11727_v24  ;;  %v11002_v24 = vld [vmem:[%s14156_s5 + $0x10] sm:$0xff] }
 0xf5a   :  { %9762 = vmatmul.mubr.msk.f32.vlgmr.msra.gmra.mxu0 %vm277_vm4, %v1828_v38  ;;  %v1820_v33 = vmul.f32 %v8925_v5, %v1811_v18 }
 0xf5b   :  { %v10609_v40 = vpop.eup %10608  ;;  %9764 = vmatprep.mubr.msk.f32.mxu0 %vm11097_vm5, %v11096_v48  ;;  %9812 = vmatpush3.msra.mxu0 %v11001_v13 }
 0xf5c   :  { %v1829_v25 = vadd.f32 %v8926_v23, %v1820_v33  ;;  %9813 = vmatprep.subr.mxu0 %v11096_v48  ;;  %v1812_v22 = vmul.f32 %v10609_v40, %v11736_v35 }
 0xf5d   :  { %9814 = vmatpush3.msra.mxu0 %v11002_v24 }
 0xf5e   :  { %9765 = vmatmul.mubr.msk.f32.gmra.mxu0 %vm277_vm4, %v1829_v25  ;;  %v1821_v26 = vmul.f32 %v8925_v5, %v1812_v22  ;;  %9815 = vmatprep.subr.mxu0 %v11096_v48 }
 0xf5f   :  { %v10611_v27 = vpop.eup %10610  ;;  %9767 = vmatprep.mubr.msk.f32.mxu0 %vm11097_vm5, %v11096_v48  ;;  %9816 = vmatpush3.msra.mxu0 %v11003_v31 }
 0xf60   :  { %v10613_v32 = vpop.eup %10612  ;;  %v1830_v35 = vadd.f32 %v8926_v23, %v1821_v26  ;;  %9817 = vmatprep.subr.mxu0 %v11096_v48  ;;  %v2136_v21 = vmul.f32 %v10611_v27, %v11733_v34 }
 0xf61   :  { %v2135_v20 = vmul.f32 %v10613_v32, %v11742_v36  ;;  %9818 = vmatpush3.msra.mxu0 %v11004_v37  ;;  %v11006_v36 = vld [vmem:[%s14158_s9] ss:$0 sm:$0xff] }
 0xf62   :  { %9768 = vmatmul.mubr.msk.f32.gmra.mxu0 %vm277_vm4, %v1830_v35  ;;  %9828 = vmatprep.subr.mxu0 %v11096_v48  ;;  %v2139_v44 = vmul.f32 %v11005_v42, %v2136_v21  ;;  %v11007_v32 = vld [vmem:[%s14159_s10] ss:$0 sm:$0xff] }
 0xf63   :  { %v10615_v39 = vpop.eup %10614  ;;  %v2138_v41 = vmul.f32 %v11005_v42, %v2135_v20  ;;  %9819 = vmatprep.mubr.msk.f32.mxu0 %vm11097_vm5, %v11096_v48 }
 0xf64   :  { %v2137_v34 = vmul.f32 %v10615_v39, %v11750_v46  ;;  %v2142_v45 = vadd.f32 %v11006_v36, %v2139_v44  ;;  %v275_v46 = vld [vmem:[%s14079_s15 + $0x78] sm:$0xff] }
 0xf65   :  { %v2141_v43 = vadd.f32 %v11006_v36, %v2138_v41  ;;  %9771 = vmatpush3.msra.mxu1 %v275_v46 }
 0xf66   :  { %v2140_v47 = vmul.f32 %v11005_v42, %v2137_v34  ;;  %9772 = vmatprep.subr.mxu1 %v11096_v48 }
 0xf67   :  { %9820 = vmatmul.mubr.msk.f32.vlgmr.msra.gmra.mxu0 %vm277_vm4, %v2141_v43  ;;  %9773 = vmatpush3.msra.mxu1 %v274_v50 }
 0xf68   :  { %9822 = vmatprep.mubr.msk.f32.mxu0 %vm11097_vm5, %v11096_v48  ;;  %v2143_v49 = vadd.f32 %v11006_v36, %v2140_v47  ;;  %9774 = vmatprep.subr.mxu1 %v11096_v48 }
 0xf69   :  { %9775 = vmatpush3.msra.mxu1 %v273_v51 }
 0xf6a   :  { %9776 = vmatprep.subr.mxu1 %v11096_v48 }
 0xf6b   :  { %9823 = vmatmul.mubr.msk.f32.gmra.mxu0 %vm277_vm4, %v2142_v45  ;;  %9777 = vmatpush3.msra.mxu1 %v272_v52 }
 0xf6c   :  { %9825 = vmatprep.mubr.msk.f32.mxu0 %vm11097_vm5, %v11096_v48  ;;  %9778 = vmatprep.subr.mxu1 %v11096_v48 }
 0xf6d   :  { %9779 = vmatpush3.msra.mxu1 %v271_v53 }
 0xf6e   :  { %9780 = vmatprep.subr.mxu1 %v11096_v48 }
 0xf6f   :  { %9826 = vmatmul.mubr.msk.f32.gmra.mxu0 %vm277_vm4, %v2143_v49  ;;  %9781 = vmatpush3.msra.mxu1 %v270_v54 }
 0xf70   :  { %9834 = vmatprep.mubr.msk.f32.mxu0 %vm11097_vm5, %v11096_v48  ;;  %9782 = vmatprep.subr.mxu1 %v11096_v48 }
 0xf71   :  { %9783 = vmatpush3.msra.mxu1 %v269_v55 }
 0xf72   :  { %9784 = vmatprep.subr.mxu1 %v11096_v48 }
 0xf73   :  { %9785 = vmatpush3.msra.mxu1 %v268_v56 }
 0xf74   :  { %9786 = vmatprep.subr.mxu1 %v11096_v48 }
 0xf75   :  { %9787 = vmatpush3.msra.mxu1 %v267_v57 }
 0xf76   :  { %9788 = vmatprep.subr.mxu1 %v11096_v48 }
 0xf77   :  { %9789 = vmatpush3.msra.mxu1 %v266_v58 }
 0xf78   :  { %9790 = vmatprep.subr.mxu1 %v11096_v48 }
 0xf79   :  { %9791 = vmatpush3.msra.mxu1 %v265_v59 }
 0xf7a   :  { %9792 = vmatprep.subr.mxu1 %v11096_v48 }
 0xf7b   :  { %9793 = vmatpush3.msra.mxu1 %v264_v60 }
 0xf7c   :  { %9794 = vmatprep.subr.mxu1 %v11096_v48 }
 0xf7d   :  { %9795 = vmatpush3.msra.mxu1 %v263_v61 }
 0xf7e   :  { %9796 = vmatprep.subr.mxu1 %v11096_v48 }
 0xf7f   :  { %9797 = vmatpush3.msra.mxu1 %v262_v62 }
 0xf80   :  { %9798 = vmatprep.subr.mxu1 %v11096_v48 }
 0xf81   :  { %9799 = vmatpush3.msra.mxu1 %v261_v63 }
 0xf82   :  { %9800 = vmatprep.subr.mxu1 %v11096_v48 }
 0xf83   :  { %9801 = vmatpush3.msra.mxu1 %v260_v2 }
 0xf84   :  { %9843 = vmatprep.subr.mxu1 %v11096_v48 }
0x101a   :  { %v1912_v16 = vpop.f32.mrf.mxu0 }
0x101b   :  { %v11892_v17 = vadd.f32 %v8927_v14, %v1912_v16 }
0x101c   :  { %v9763_v19 = vpop.f32.mrf.mxu0 }
0x101d   :  { %v11895_v1 = vmul.f32 0.70710677, %v11892_v17 }
0x101e   :  { %v1917_v4 = vpop.f32.mrf.mxu0 }
0x101f   :  { %v1938_v7 = vand.u32 2147483647, %v11895_v1  ;;  %v11898_v8 = vadd.f32 %v8927_v14, %v1917_v4  ;;  %vm1932_vm9 = vcmp.ge.f32.partialorder %v11895_v1, 0.0  ;;  %v1926_v1 = vmul.f32 0.5, %v11892_v17 }
0x1020   :  { %v9766_v9 = vpop.f32.mrf.mxu0 }
0x1021   :  { %v1941_v5 = vmul.f32 0.3275911, %v1938_v7  ;;  %v11901_v30 = vmul.f32 0.70710677, %v11898_v8  ;;  %v1980_v26 = vsub.f32 0.0, %v1938_v7 }
0x1022   :  { %v1922_v15 = vpop.f32.mrf.mxu0 }
0x1023   :  { %v1944_v23 = vadd.f32 1.0, %v1941_v5  ;;  %v1939_v12 = vand.u32 2147483647, %v11901_v30  ;;  %v11904_v29 = vadd.f32 %v8927_v14, %v1922_v15  ;;  %v1983_v37 = vmul.f32 %v1980_v26, %v1938_v7 }
0x1024   :  { %v9769_v38 = vpop.f32.mrf.mxu0  ;;  %vm1933_vm10 = vcmp.ge.f32.partialorder %v11901_v30, 0.0 }
0x1025   :  { %10616 = vrcp.f32 %v1944_v23  ;;  %v1942_v18 = vmul.f32 0.3275911, %v1939_v12  ;;  %v11907_v33 = vmul.f32 0.70710677, %v11904_v29  ;;  %v1981_v21 = vsub.f32 0.0, %v1939_v12 }
0x1026   :  { %v1986_v34 = vmul.f32 1.442695, %v1983_v37 }
0x1027   :  { %v1945_v40 = vadd.f32 1.0, %v1942_v18  ;;  %v2219_v13 = vpop.f32.mrf.mxu0  ;;  %v1940_v25 = vand.u32 2147483647, %v11907_v33  ;;  %v1984_v45 = vmul.f32 %v1981_v21, %v1939_v12  ;;  %vm1934_vm11 = vcmp.ge.f32.partialorder %v11907_v33, 0.0 }
0x1028   :  { %v11917_v42 = vadd.f32 %v11007_v32, %v2219_v13 }
0x1029   :  { %10618 = vrcp.f32 %v1945_v40  ;;  %v9821_v22 = vpop.f32.mrf.mxu0  ;;  %v1943_v24 = vmul.f32 0.3275911, %v1940_v25  ;;  %v1982_v47 = vsub.f32 0.0, %v1940_v25  ;;  %v1988_v51 = vmul.f32 1.442695, %v1984_v45 }
0x102a   :  { %v11109_v22 = vmov -1.0   ;;  %v1927_v45 = vmul.f32 0.5, %v11898_v8 }
0x102b   :  { %v2224_v27 = vpop.f32.mrf.mxu0  ;;  %v1946_v31 = vadd.f32 1.0, %v1943_v24  ;;  %v1985_v53 = vmul.f32 %v1982_v47, %v1940_v25  ;;  %v1935_v24 = vsel %vm1932_vm9, 1.0, %v11109_v22  ;;  %v1936_v21 = vsel %vm1933_vm10, 1.0, %v11109_v22 }
0x102c   :  { %v11913_v35 = vadd.f32 %v11007_v32, %v2224_v27  ;;  %v1937_v17 = vsel %vm1934_vm11, 1.0, %v11109_v22 }
0x102d   :  { %v9824_v20 = vpop.f32.mrf.mxu0  ;;  %10620 = vrcp.f32 %v1946_v31  ;;  %v1990_v59 = vmul.f32 1.442695, %v1985_v53 }
0x102e   :  { %2238 = vrot.lane.b32.xlu0 %v11913_v35, %s14163_s6  ;;  %10622 = vpow2.f32 %v1986_v34 }
0x102f   :  { %v2229_v39 = vpop.f32.mrf.mxu0  ;;  %10624 = vpow2.f32 %v1988_v51 }
0x1030   :  { %v11919_v41 = vadd.f32 %v11007_v32, %v2229_v39  ;;  %10626 = vpow2.f32 %v1990_v59 }
0x1031   :  { %v9827_v36 = vpop.f32.mrf.mxu0 }
0x1032   :  { %v10617_v43 = vpop.eup %10616  ;;  %2478 = vrot.lane.b32.xlu0 %v11917_v42, %s14164_s3  ;;  %2240 = vrot.lane.b32.xlu1 %v11919_v41, %s14163_s6 }
0x1033   :  { %v1953_v44 = vmul.f32 1.0614054, %v10617_v43 }
0x1035   :  { %v1956_v49 = vadd.f32 -1.4531521, %v1953_v44 }
0x1036   :  { %v10619_v46 = vpop.eup %10618  ;;  %2474 = vrot.lane.b32.xlu0 %v11913_v35, %s14165_s2  ;;  %2236 = vrot.lane.b32.xlu1 %v11917_v42, %s14163_s6 }
0x1037   :  { %v1959_v50 = vmul.f32 %v10617_v43, %v1956_v49  ;;  %v1954_v52 = vmul.f32 1.0614054, %v10619_v46 }
0x1039   :  { %v1962_v54 = vadd.f32 1.4214138, %v1959_v50  ;;  %v1957_v55 = vadd.f32 -1.4531521, %v1954_v52  ;;  %v1928_v50 = vmul.f32 0.5, %v11904_v29 }
0x103a   :  { %2482 = vrot.lane.b32.xlu1 %v11919_v41, %s14164_s3  ;;  %v10621_v56 = vpop.eup %10620 }
0x103b   :  { %v1965_v57 = vmul.f32 %v10617_v43, %v1962_v54  ;;  %v1960_v58 = vmul.f32 %v10619_v46, %v1957_v55  ;;  %v1955_v60 = vmul.f32 1.0614054, %v10621_v56  ;;  %v10623_v15 = vpop.eup %10622 }
0x103c   :  { %v10625_v25 = vpop.eup %10624 }
0x103d   :  { %v1968_v61 = vadd.f32 -0.28449672, %v1965_v57  ;;  %v1963_v62 = vadd.f32 1.4214138, %v1960_v58  ;;  %v1958_v63 = vadd.f32 -1.4531521, %v1955_v60  ;;  %v10627_v36 = vpop.eup %10626 }
0x103e   :  { %2480 = vrot.lane.b32.xlu1 %v11913_v35, %s14164_s3  ;;  %v11008_v57 = vld [vmem:[%s14160_s28 + $0x8] sm:$0xff] }
0x103f   :  { %v1971_v2 = vmul.f32 %v10617_v43, %v1968_v61  ;;  %v1966_v14 = vmul.f32 %v10619_v46, %v1963_v62  ;;  %v1961_v16 = vmul.f32 %v10621_v56, %v1958_v63 }
0x1041   :  { %v1974_v19 = vadd.f32 0.2548296, %v1971_v2  ;;  %v1969_v4 = vadd.f32 -0.28449672, %v1966_v14  ;;  %v1964_v7 = vadd.f32 1.4214138, %v1961_v16 }
0x1042   :  { %2472 = vrot.lane.b32.xlu1 %v11917_v42, %s14165_s2 }
0x1043   :  { %v1977_v9 = vmul.f32 %v10617_v43, %v1974_v19  ;;  %v1972_v5 = vmul.f32 %v10619_v46, %v1969_v4  ;;  %v1967_v23 = vmul.f32 %v10621_v56, %v1964_v7 }
0x1045   :  { %v1992_v12 = vmul.f32 %v10623_v15, %v1977_v9  ;;  %v1975_v38 = vadd.f32 0.2548296, %v1972_v5  ;;  %v1970_v18 = vadd.f32 -0.28449672, %v1967_v23 }
0x1046   :  { %2476 = vrot.lane.b32.xlu1 %v11919_v41, %s14165_s2 }
0x1047   :  { %v1995_v40 = vsub.f32 1.0, %v1992_v12  ;;  %v1978_v13 = vmul.f32 %v10619_v46, %v1975_v38  ;;  %v1973_v26 = vmul.f32 %v10621_v56, %v1970_v18 }
0x1049   :  { %v1998_v27 = vmul.f32 %v1995_v40, %v1935_v24  ;;  %v1993_v31 = vmul.f32 %v10625_v25, %v1978_v13  ;;  %v1976_v32 = vadd.f32 0.2548296, %v1973_v26 }
0x104b   :  { %v2001_v20 = vadd.f32 1.0, %v1998_v27  ;;  %v1996_v37 = vsub.f32 1.0, %v1993_v31  ;;  %v1979_v39 = vmul.f32 %v10621_v56, %v1976_v32 }
0x104d   :  { %v2004_v43 = vmul.f32 %v2001_v20, %v1926_v1  ;;  %v1999_v44 = vmul.f32 %v1996_v37, %v1936_v21  ;;  %v1994_v34 = vmul.f32 %v10627_v36, %v1979_v39 }
0x104f   :  { %9803 = vmatmul.mubr.f32.vlgmr.msra.gmra.mxu1 %v2004_v43  ;;  %v2002_v47 = vadd.f32 1.0, %v1999_v44  ;;  %v1997_v30 = vsub.f32 1.0, %v1994_v34 }
0x1050   :  { %9805 = vmatprep.mubr.msk.f32.mxu1 %vm11097_vm5, %v11096_v48 }
0x1051   :  { %v2005_v49 = vmul.f32 %v2002_v47, %v1927_v45  ;;  %v2000_v46 = vmul.f32 %v1997_v30, %v1937_v17 }
0x1053   :  { %9806 = vmatmul.mubr.f32.gmra.mxu1 %v2005_v49  ;;  %v2003_v33 = vadd.f32 1.0, %v2000_v46 }
0x1054   :  { %9808 = vmatprep.mubr.msk.f32.mxu1 %vm11097_vm5, %v11096_v48 }
0x1055   :  { %v2006_v51 = vmul.f32 %v2003_v33, %v1928_v50 }
0x1057   :  { %9809 = vmatmul.mubr.f32.gmra.mxu1 %v2006_v51 }
0x1058   :  { %9849 = vmatprep.mubr.msk.f32.mxu1 %vm11097_vm5, %v11096_v48 }
0x10a0   :  { %v2239_v52 = vpop.permute.xlu0 %2238 }
0x10a4   :  { %v2241_v8 = vpop.permute.xlu1 %2240  ;;  %v2479_v55 = vpop.permute.xlu0 %2478 }
0x10a5   :  { %9829 = vmatpush3.xpose.msk.msra.mxu0 %vm441_vm6, %v2241_v8 }
0x10a6   :  { %9830 = vmatprep.subr.mxu0 %v11096_v48 }
0x10a8   :  { %v2237_v53 = vpop.permute.xlu1 %2236  ;;  %v2475_v58 = vpop.permute.xlu0 %2474 }
0x10a9   :  { %9831 = vmatpush3.xpose.msk.msra.mxu0 %vm441_vm6, %v2239_v52 }
0x10aa   :  { %9832 = vmatprep.subr.mxu0 %v11096_v48 }
0x10ac   :  { %v2483_v29 = vpop.permute.xlu1 %2482 }
0x10ad   :  { %9833 = vmatpush3.xpose.msk.msra.mxu0 %vm441_vm6, %v2237_v53 }
0x10ae   :  { %9858 = vmatprep.subr.mxu0 %v11096_v48 }
0x10b0   :  { %9835 = vmatmul.mubr.msk.f32.vlgmr.msra.gmra.mxu0 %vm441_vm6, %v11917_v42  ;;  %v2481_v54 = vpop.permute.xlu1 %2480 }
0x10b1   :  { %9859 = vmatpush3.xpose.msk.msra.mxu0 %vm441_vm6, %v2483_v29  ;;  %9837 = vmatprep.mubr.msk.f32.mxu0 %vm11097_vm5, %v11096_v48 }
0x10b2   :  { %9860 = vmatprep.subr.mxu0 %v11096_v48 }
0x10b4   :  { %9838 = vmatmul.mubr.msk.f32.gmra.mxu0 %vm441_vm6, %v11913_v35  ;;  %v2473_v56 = vpop.permute.xlu1 %2472 }
0x10b5   :  { %9861 = vmatpush3.xpose.msk.msra.mxu0 %vm441_vm6, %v2481_v54  ;;  %9840 = vmatprep.mubr.msk.f32.mxu0 %vm11097_vm5, %v11096_v48 }
0x10b6   :  { %9862 = vmatprep.subr.mxu0 %v11096_v48 }
0x10b8   :  { %9841 = vmatmul.mubr.msk.f32.gmra.mxu0 %vm441_vm6, %v11919_v41  ;;  %v2477_v59 = vpop.permute.xlu1 %2476 }
0x10b9   :  { %9863 = vmatpush3.xpose.msk.msra.mxu0 %vm441_vm6, %v2479_v55  ;;  %9864 = vmatprep.mubr.msk.f32.mxu0 %vm11097_vm5, %v11096_v48 }
0x10ba   :  { %9888 = vmatprep.subr.mxu0 %v11096_v48 }
0x10bc   :  { %9865 = vmatmul.mubr.msk.f32.vlgmr.msra.gmra.mxu0 %vm441_vm6, %v2473_v56 }
0x10bd   :  { %9867 = vmatprep.mubr.msk.f32.mxu0 %vm11097_vm5, %v11096_v48  ;;  %9889 = vmatpush3.msra.mxu0 %v11008_v57 }
0x10be   :  { %9910 = vmatprep.subr.mxu0 %v11096_v48 }
0x10c0   :  { %9868 = vmatmul.mubr.msk.f32.gmra.mxu0 %vm441_vm6, %v2475_v58 }
0x10c1   :  { %9870 = vmatprep.mubr.msk.f32.mxu0 %vm11097_vm5, %v11096_v48 }
0x10c4   :  { %9871 = vmatmul.mubr.msk.f32.gmra.mxu0 %vm441_vm6, %v2477_v59 }
0x10c5   :  { %9890 = vmatprep.mubr.msk.f32.mxu0 %vm11097_vm5, %v11096_v48 }
0x110f   :  { %v11989_v60 = vpop.f32.mrf.mxu1 }
0x1111   :  { %v9804_v61 = vpop.f32.mrf.mxu1 }
0x1113   :  { %v11991_v62 = vpop.f32.mrf.mxu1 }
0x1115   :  { %v9807_v63 = vpop.f32.mrf.mxu1 }
0x1117   :  { %v11993_v2 = vpop.f32.mrf.mxu1 }
0x1119   :  { %v9810_v14 = vpop.f32.mrf.mxu1 }
0x1170   :  { %v2320_v16 = vpop.f32.mrf.mxu0 }
0x1171   :  { %v2334_v19 = vmul.f32 0.35355338, %v2320_v16 }
0x1172   :  { %v9836_v4 = vpop.f32.mrf.mxu0 }
0x1173   :  { %v2337_v7 = vsel %vm537_vm7, %v2334_v19, -inf }
0x1174   :  { %2338 = vmax.xlane.f32.xlu0 %v2337_v7  ;;  %v2325_v9 = vpop.f32.mrf.mxu0 }
0x1175   :  { %v2335_v5 = vmul.f32 0.35355338, %v2325_v9 }
0x1176   :  { %v9839_v15 = vpop.f32.mrf.mxu0 }
0x1177   :  { %v2340_v23 = vsel %vm537_vm7, %v2335_v5, -inf }
0x1178   :  { %2341 = vmax.xlane.f32.xlu1 %v2340_v23  ;;  %v2330_v12 = vpop.f32.mrf.mxu0 }
0x1179   :  { %v2336_v38 = vmul.f32 0.35355338, %v2330_v12 }
0x117a   :  { %v9842_v18 = vpop.f32.mrf.mxu0 }
0x117b   :  { %v2343_v40 = vsel %vm544_vm8, %v2336_v38, -inf }
0x117c   :  { %2344 = vmax.xlane.f32.xlu0 %v2343_v40  ;;  %v2562_v13 = vpop.f32.mrf.mxu0 }
0x117d   :  { %v2576_v25 = vmul.f32 0.35355338, %v2562_v13 }
0x117e   :  { %v9866_v24 = vpop.f32.mrf.mxu0 }
0x117f   :  { %v2579_v26 = vsel %vm537_vm7, %v2576_v25, -inf }
0x1180   :  { %2580 = vmax.xlane.f32.xlu0 %v2579_v26  ;;  %v2567_v27 = vpop.f32.mrf.mxu0 }
0x1181   :  { %v2577_v31 = vmul.f32 0.35355338, %v2567_v27 }
0x1182   :  { %v9869_v32 = vpop.f32.mrf.mxu0 }
0x1183   :  { %v2582_v1 = vsel %vm537_vm7, %v2577_v31, -inf }
0x1184   :  { %2583 = vmax.xlane.f32.xlu0 %v2582_v1  ;;  %v2572_v20 = vpop.f32.mrf.mxu0 }
0x1185   :  { %v2578_v37 = vmul.f32 0.35355338, %v2572_v20 }
0x1186   :  { %v9872_v21 = vpop.f32.mrf.mxu0 }
0x1187   :  { %v2585_v39 = vsel %vm544_vm8, %v2578_v37, -inf }
0x1188   :  { %2586 = vmax.xlane.f32.xlu1 %v2585_v39 }
0x1199   :  { %2375 = vrot.lane.b32.xlu1 %v11913_v35, %s14166_s30 }
0x119a   :  { %2377 = vrot.lane.b32.xlu0 %v11919_v41, %s14166_s30 }
0x119d   :  { %2373 = vrot.lane.b32.xlu1 %v11917_v42, %s14166_s30 }
0x11a1   :  { %2619 = vrot.lane.b32.xlu1 %v11919_v41, %s14167_s1 }
0x11fd   :  { %v2339_v36 = vpop.xlane.xlu0 %2338 }
0x11fe   :  { %v2346_v43 = vsub.f32 %v2334_v19, %v2339_v36 }
0x1200   :  { %v2349_v44 = vmul.f32 1.442695, %v2346_v43  ;;  %v11009_v43 = vld [vmem:[%s14160_s28] sm:$0xff] }
0x1201   :  { %v2342_v34 = vpop.xlane.xlu1 %2341 }
0x1202   :  { %10628 = vpow2.f32 %v2349_v44  ;;  %v2347_v45 = vsub.f32 %v2335_v5, %v2342_v34 }
0x1204   :  { %v2351_v47 = vmul.f32 1.442695, %v2347_v45 }
0x1205   :  { %v2345_v30 = vpop.xlane.xlu0 %2344 }
0x1206   :  { %10630 = vpow2.f32 %v2351_v47  ;;  %v2348_v17 = vsub.f32 %v2336_v38, %v2345_v30 }
0x1208   :  { %v2353_v49 = vmul.f32 1.442695, %v2348_v17 }
0x1209   :  { %v2581_v46 = vpop.xlane.xlu0 %2580 }
0x120a   :  { %10632 = vpow2.f32 %v2353_v49  ;;  %v2588_v50 = vsub.f32 %v2576_v25, %v2581_v46 }
0x120c   :  { %v2591_v33 = vmul.f32 1.442695, %v2588_v50 }
0x120d   :  { %v2584_v51 = vpop.xlane.xlu0 %2583 }
0x120e   :  { %10634 = vpow2.f32 %v2591_v33  ;;  %v2589_v8 = vsub.f32 %v2577_v31, %v2584_v51 }
0x120f   :  { %v10629_v52 = vpop.eup %10628 }
0x1210   :  { %v2593_v53 = vmul.f32 1.442695, %v2589_v8  ;;  %v2355_v29 = vsel %vm537_vm7, %v10629_v52, 0.0 }
0x1211   :  { %v2587_v54 = vpop.xlane.xlu1 %2586  ;;  %2356 = vadd.xlane.f32.xlu0 %v2355_v29  ;;  %v2378_v55 = vpop.permute.xlu0 %2377 }
0x1212   :  { %10636 = vpow2.f32 %v2593_v53  ;;  %v2590_v56 = vsub.f32 %v2578_v37, %v2587_v54  ;;  %9844 = vmatpush3.msk.msra.mxu1 %vm222_vm3, %v2378_v55 }
0x1213   :  { %v10631_v57 = vpop.eup %10630  ;;  %9845 = vmatprep.subr.mxu1 %v11096_v48 }
0x1214   :  { %v2595_v58 = vmul.f32 1.442695, %v2590_v56  ;;  %v2358_v59 = vsel %vm537_vm7, %v10631_v57, 0.0 }
0x1215   :  { %2359 = vadd.xlane.f32.xlu1 %v2358_v59  ;;  %v2376_v61 = vpop.permute.xlu1 %2375 }
0x1216   :  { %10638 = vpow2.f32 %v2595_v58  ;;  %9846 = vmatpush3.msra.mxu1 %v2376_v61  ;;  %v11010_v58 = vld [vmem:[%s14160_s28 + $0x10] sm:$0xff] }
0x1217   :  { %v10633_v63 = vpop.eup %10632  ;;  %9847 = vmatprep.subr.mxu1 %v11096_v48 }
0x1218   :  { %v2361_v14 = vsel %vm544_vm8, %v10633_v63, 0.0 }
0x1219   :  { %v2374_v16 = vpop.permute.xlu1 %2373  ;;  %2362 = vadd.xlane.f32.xlu0 %v2361_v14 }
0x121a   :  { %9848 = vmatpush3.msra.mxu1 %v2374_v16 }
0x121b   :  { %v10635_v19 = vpop.eup %10634  ;;  %9873 = vmatprep.subr.mxu1 %v11096_v48 }
0x121c   :  { %v2597_v4 = vsel %vm537_vm7, %v10635_v19, 0.0 }
0x121d   :  { %2598 = vadd.xlane.f32.xlu1 %v2597_v4  ;;  %v2620_v23 = vpop.permute.xlu1 %2619 }
0x121f   :  { %v10637_v7 = vpop.eup %10636 }
0x1220   :  { %v2600_v9 = vsel %vm537_vm7, %v10637_v7, 0.0 }
0x1221   :  { %2601 = vadd.xlane.f32.xlu0 %v2600_v9 }
0x1223   :  { %v10639_v5 = vpop.eup %10638 }
0x1224   :  { %v2603_v15 = vsel %vm544_vm8, %v10639_v5, 0.0 }
0x1225   :  { %2604 = vadd.xlane.f32.xlu1 %v2603_v15 }
0x1236   :  { %2615 = vrot.lane.b32.xlu1 %v11917_v42, %s14167_s1 }
0x1237   :  { %2617 = vrot.lane.b32.xlu0 %v11913_v35, %s14167_s1 }
0x123a   :  { %2900 = vrot.lane.b32.xlu1 %v11913_v35, %s14168_s11 }
0x123b   :  { %2902 = vrot.lane.b32.xlu0 %v11919_v41, %s14168_s11 }
0x123e   :  { %2892 = vrot.lane.b32.xlu1 %v11917_v42, %s14169_s8 }
0x123f   :  { %2898 = vrot.lane.b32.xlu0 %v11917_v42, %s14168_s11 }
0x1242   :  { %2896 = vrot.lane.b32.xlu1 %v11919_v41, %s14169_s8 }
0x1243   :  { %2894 = vrot.lane.b32.xlu0 %v11913_v35, %s14169_s8 }
0x129a   :  { %v2357_v12 = vpop.xlane.xlu0 %2356 }
0x129b   :  { %10640 = vrcp.f32 %v2357_v12 }
0x129e   :  { %v2360_v38 = vpop.xlane.xlu1 %2359 }
0x129f   :  { %10642 = vrcp.f32 %v2360_v38 }
0x12a2   :  { %v2363_v18 = vpop.xlane.xlu0 %2362 }
0x12a3   :  { %10644 = vrcp.f32 %v2363_v18 }
0x12a6   :  { %v2599_v40 = vpop.xlane.xlu1 %2598 }
0x12a7   :  { %10646 = vrcp.f32 %v2599_v40 }
0x12a8   :  { %v10641_v13 = vpop.eup %10640 }
0x12a9   :  { %v2370_v25 = vmul.f32 %v10641_v13, %v10629_v52 }
0x12aa   :  { %v2602_v24 = vpop.xlane.xlu0 %2601 }
0x12ab   :  { %10648 = vrcp.f32 %v2602_v24  ;;  %9850 = vmatmul.mubr.msk.f32.vlgmr.msra.gmra.mxu1 %vm537_vm7, %v2370_v25 }
0x12ac   :  { %v10643_v26 = vpop.eup %10642  ;;  %9874 = vmatpush3.msk.msra.mxu1 %vm222_vm3, %v2620_v23  ;;  %9852 = vmatprep.mubr.msk.f32.mxu1 %vm11097_vm5, %v11096_v48 }
0x12ad   :  { %9875 = vmatprep.subr.mxu1 %v11096_v48  ;;  %v2371_v27 = vmul.f32 %v10643_v26, %v10631_v57 }
0x12ae   :  { %v2605_v31 = vpop.xlane.xlu1 %2604  ;;  %v2618_v32 = vpop.permute.xlu0 %2617 }
0x12af   :  { %10650 = vrcp.f32 %v2605_v31  ;;  %9853 = vmatmul.mubr.msk.f32.gmra.mxu1 %vm537_vm7, %v2371_v27 }
0x12b0   :  { %v10645_v1 = vpop.eup %10644  ;;  %9876 = vmatpush3.msra.mxu1 %v2618_v32  ;;  %9855 = vmatprep.mubr.msk.f32.mxu1 %vm11097_vm5, %v11096_v48 }
0x12b1   :  { %9877 = vmatprep.subr.mxu1 %v11096_v48  ;;  %v2372_v20 = vmul.f32 %v10645_v1, %v10633_v63 }
0x12b2   :  { %v2616_v37 = vpop.permute.xlu1 %2615  ;;  %v2903_v51 = vpop.permute.xlu0 %2902 }
0x12b3   :  { %9856 = vmatmul.mubr.msk.f32.gmra.mxu1 %vm537_vm7, %v2372_v20 }
0x12b4   :  { %v10647_v21 = vpop.eup %10646  ;;  %9878 = vmatpush3.msra.mxu1 %v2616_v37  ;;  %9879 = vmatprep.mubr.msk.f32.mxu1 %vm11097_vm5, %v11096_v48 }
0x12b5   :  { %v2612_v39 = vmul.f32 %v10647_v21, %v10635_v19  ;;  %9899 = vmatprep.subr.mxu1 %v11096_v48 }
0x12b6   :  { %v2901_v53 = vpop.permute.xlu1 %2900  ;;  %v2899_v55 = vpop.permute.xlu0 %2898 }
0x12b7   :  { %9880 = vmatmul.mubr.msk.f32.vlgmr.msra.gmra.mxu1 %vm537_vm7, %v2612_v39 }
0x12b8   :  { %v10649_v36 = vpop.eup %10648  ;;  %9882 = vmatprep.mubr.msk.f32.mxu1 %vm11097_vm5, %v11096_v48  ;;  %9900 = vmatpush3.msra.mxu1 %v11009_v43 }
0x12b9   :  { %v2613_v44 = vmul.f32 %v10649_v36, %v10637_v7  ;;  %9925 = vmatprep.subr.mxu1 %v11096_v48 }
0x12ba   :  { %v2893_v57 = vpop.permute.xlu1 %2892  ;;  %v2895_v59 = vpop.permute.xlu0 %2894 }
0x12bb   :  { %9883 = vmatmul.mubr.msk.f32.gmra.mxu1 %vm537_vm7, %v2613_v44 }
0x12bc   :  { %v10651_v34 = vpop.eup %10650  ;;  %9885 = vmatprep.mubr.msk.f32.mxu1 %vm11097_vm5, %v11096_v48 }
0x12bd   :  { %v2614_v45 = vmul.f32 %v10651_v34, %v10639_v5 }
0x12be   :  { %v2897_v61 = vpop.permute.xlu1 %2896 }
0x12bf   :  { %9886 = vmatmul.mubr.msk.f32.gmra.mxu1 %vm537_vm7, %v2614_v45 }
0x12c0   :  { %9901 = vmatprep.mubr.msk.f32.mxu1 %vm11097_vm5, %v11096_v48 }
0x136b   :  { %v2458_v47 = vpop.f32.mrf.mxu1 }
0x136c   :  { %9902 = vmatmul.mubr.msk.f32.vlgmr.msra.gmra.mxu1 %vm441_vm6, %v2458_v47 }
0x136d   :  { %v9851_v30 = vpop.f32.mrf.mxu1  ;;  %9904 = vmatprep.mubr.msk.f32.mxu1 %vm11097_vm5, %v11096_v48 }
0x136f   :  { %v2463_v17 = vpop.f32.mrf.mxu1 }
0x1370   :  { %9905 = vmatmul.mubr.msk.f32.gmra.mxu1 %vm441_vm6, %v2463_v17 }
0x1371   :  { %v9854_v49 = vpop.f32.mrf.mxu1  ;;  %9907 = vmatprep.mubr.msk.f32.mxu1 %vm11097_vm5, %v11096_v48 }
0x1373   :  { %v2468_v46 = vpop.f32.mrf.mxu1 }
0x1374   :  { %9908 = vmatmul.mubr.msk.f32.gmra.mxu1 %vm441_vm6, %v2468_v46 }
0x1375   :  { %v9857_v50 = vpop.f32.mrf.mxu1  ;;  %9931 = vmatprep.mubr.msk.f32.mxu1 %vm11097_vm5, %v11096_v48 }
0x1377   :  { %v2700_v33 = vpop.f32.mrf.mxu1 }
0x1378   :  { %9891 = vmatmul.mubr.msk.f32.vlgmr.msra.gmra.mxu0 %vm441_vm6, %v2700_v33 }
0x1379   :  { %9911 = vmatpush3.xpose.msk.msra.mxu0 %vm441_vm6, %v2903_v51  ;;  %v9881_v8 = vpop.f32.mrf.mxu1  ;;  %9893 = vmatprep.mubr.msk.f32.mxu0 %vm11097_vm5, %v11096_v48 }
0x137a   :  { %9912 = vmatprep.subr.mxu0 %v11096_v48 }
0x137b   :  { %v2705_v52 = vpop.f32.mrf.mxu1 }
0x137c   :  { %9894 = vmatmul.mubr.msk.f32.gmra.mxu0 %vm441_vm6, %v2705_v52 }
0x137d   :  { %9913 = vmatpush3.xpose.msk.msra.mxu0 %vm441_vm6, %v2901_v53  ;;  %v9884_v29 = vpop.f32.mrf.mxu1  ;;  %9896 = vmatprep.mubr.msk.f32.mxu0 %vm11097_vm5, %v11096_v48 }
0x137e   :  { %9914 = vmatprep.subr.mxu0 %v11096_v48 }
0x137f   :  { %v2710_v54 = vpop.f32.mrf.mxu1 }
0x1380   :  { %9897 = vmatmul.mubr.msk.f32.gmra.mxu0 %vm441_vm6, %v2710_v54 }
0x1381   :  { %9915 = vmatpush3.xpose.msk.msra.mxu0 %vm441_vm6, %v2899_v55  ;;  %v9887_v56 = vpop.f32.mrf.mxu1  ;;  %9916 = vmatprep.mubr.msk.f32.mxu0 %vm11097_vm5, %v11096_v48 }
0x1382   :  { %9940 = vmatprep.subr.mxu0 %v11096_v48 }
0x1384   :  { %9917 = vmatmul.mubr.msk.f32.vlgmr.msra.gmra.mxu0 %vm441_vm6, %v2893_v57 }
0x1385   :  { %9919 = vmatprep.mubr.msk.f32.mxu0 %vm11097_vm5, %v11096_v48  ;;  %9941 = vmatpush3.msra.mxu0 %v11010_v58 }
0x1386   :  { %9966 = vmatprep.subr.mxu0 %v11096_v48 }
0x1388   :  { %9920 = vmatmul.mubr.msk.f32.gmra.mxu0 %vm441_vm6, %v2895_v59 }
0x1389   :  { %9922 = vmatprep.mubr.msk.f32.mxu0 %vm11097_vm5, %v11096_v48 }
0x138c   :  { %9923 = vmatmul.mubr.msk.f32.gmra.mxu0 %vm441_vm6, %v2897_v61 }
0x138d   :  { %9942 = vmatprep.mubr.msk.f32.mxu0 %vm11097_vm5, %v11096_v48 }
0x142c   :  { %v2878_v63 = vpop.f32.mrf.mxu1 }
0x142e   :  { %v9903_v14 = vpop.f32.mrf.mxu1 }
0x1430   :  { %v2883_v16 = vpop.f32.mrf.mxu1 }
0x1432   :  { %v9906_v19 = vpop.f32.mrf.mxu1 }
0x1434   :  { %v2888_v4 = vpop.f32.mrf.mxu1 }
0x1436   :  { %v9909_v7 = vpop.f32.mrf.mxu1 }
0x1438   :  { %v2789_v9 = vpop.f32.mrf.mxu0 }
0x1439   :  { %v12098_v5 = vadd.f32 %v2878_v63, %v2789_v9 }
0x143a   :  { %v9892_v15 = vpop.f32.mrf.mxu0 }
0x143c   :  { %v2794_v23 = vpop.f32.mrf.mxu0 }
0x143d   :  { %v12100_v12 = vadd.f32 %v2883_v16, %v2794_v23  ;;  %v11011_v23 = vld [vmem:[%s14160_s28 + $0x18] sm:$0xff] }
0x143e   :  { %v9895_v38 = vpop.f32.mrf.mxu0 }
0x1440   :  { %v2799_v18 = vpop.f32.mrf.mxu0 }
0x1441   :  { %v12102_v40 = vadd.f32 %v2888_v4, %v2799_v18 }
0x1442   :  { %v9898_v13 = vpop.f32.mrf.mxu0 }
0x1444   :  { %v2982_v25 = vpop.f32.mrf.mxu0 }
0x1445   :  { %v2996_v24 = vmul.f32 0.35355338, %v2982_v25 }
0x1446   :  { %v9918_v26 = vpop.f32.mrf.mxu0 }
0x1447   :  { %v2999_v27 = vsel %vm537_vm7, %v2996_v24, -inf }
0x1448   :  { %3000 = vmax.xlane.f32.xlu0 %v2999_v27  ;;  %v2987_v31 = vpop.f32.mrf.mxu0 }
0x1449   :  { %v2997_v32 = vmul.f32 0.35355338, %v2987_v31 }
0x144a   :  { %v9921_v1 = vpop.f32.mrf.mxu0 }
0x144b   :  { %v3002_v20 = vsel %vm537_vm7, %v2997_v32, -inf }
0x144c   :  { %3003 = vmax.xlane.f32.xlu1 %v3002_v20  ;;  %v2992_v37 = vpop.f32.mrf.mxu0 }
0x144d   :  { %v2998_v21 = vmul.f32 0.35355338, %v2992_v37 }
0x144e   :  { %v9924_v39 = vpop.f32.mrf.mxu0 }
0x144f   :  { %v3005_v36 = vsel %vm544_vm8, %v2998_v21, -inf }
0x1450   :  { %3006 = vmax.xlane.f32.xlu0 %v3005_v36 }
0x145d   :  { %3037 = vrot.lane.b32.xlu1 %v11913_v35, %s14170_s27 }
0x1461   :  { %3035 = vrot.lane.b32.xlu1 %v11917_v42, %s14170_s27 }
0x1465   :  { %3236 = vrot.lane.b32.xlu1 %v11919_v41, %s14171_s4 }
0x1466   :  { %3039 = vrot.lane.b32.xlu0 %v11919_v41, %s14170_s27 }
0x1469   :  { %3232 = vrot.lane.b32.xlu1 %v11917_v42, %s14171_s4 }
0x14d1   :  { %v3001_v43 = vpop.xlane.xlu0 %3000 }
0x14d2   :  { %v3008_v44 = vsub.f32 %v2996_v24, %v3001_v43 }
0x14d4   :  { %v3011_v34 = vmul.f32 1.442695, %v3008_v44 }
0x14d5   :  { %v3004_v45 = vpop.xlane.xlu1 %3003 }
0x14d6   :  { %10652 = vpow2.f32 %v3011_v34  ;;  %v3009_v47 = vsub.f32 %v2997_v32, %v3004_v45 }
0x14d8   :  { %v3013_v30 = vmul.f32 1.442695, %v3009_v47 }
0x14d9   :  { %v3007_v17 = vpop.xlane.xlu0 %3006  ;;  %v3038_v46 = vpop.permute.xlu1 %3037 }
0x14da   :  { %10654 = vpow2.f32 %v3013_v30  ;;  %v3010_v49 = vsub.f32 %v2998_v21, %v3007_v17 }
0x14dc   :  { %v3015_v50 = vmul.f32 1.442695, %v3010_v49 }
0x14dd   :  { %v3040_v33 = vpop.permute.xlu0 %3039  ;;  %v3036_v51 = vpop.permute.xlu1 %3035 }
0x14de   :  { %10656 = vpow2.f32 %v3015_v50  ;;  %9926 = vmatpush3.msk.msra.mxu1 %vm222_vm3, %v3040_v33 }
0x14df   :  { %9927 = vmatprep.subr.mxu1 %v11096_v48 }
0x14e0   :  { %9928 = vmatpush3.msra.mxu1 %v3038_v46 }
0x14e1   :  { %9929 = vmatprep.subr.mxu1 %v11096_v48  ;;  %v3237_v56 = vpop.permute.xlu1 %3236 }
0x14e2   :  { %9930 = vmatpush3.msra.mxu1 %v3036_v51 }
0x14e3   :  { %v10653_v8 = vpop.eup %10652  ;;  %9951 = vmatprep.subr.mxu1 %v11096_v48 }
0x14e4   :  { %v3017_v52 = vsel %vm537_vm7, %v10653_v8, 0.0 }
0x14e5   :  { %3018 = vadd.xlane.f32.xlu0 %v3017_v52  ;;  %v3233_v58 = vpop.permute.xlu1 %3232 }
0x14e7   :  { %v10655_v53 = vpop.eup %10654 }
0x14e8   :  { %v3020_v29 = vsel %vm537_vm7, %v10655_v53, 0.0 }
0x14e9   :  { %3021 = vadd.xlane.f32.xlu0 %v3020_v29 }
0x14eb   :  { %v10657_v54 = vpop.eup %10656 }
0x14ec   :  { %v3023_v55 = vsel %vm544_vm8, %v10657_v54, 0.0 }
0x14ed   :  { %3024 = vadd.xlane.f32.xlu1 %v3023_v55 }
0x14fe   :  { %3228 = vrot.lane.b32.xlu1 %v11913_v35, %s14172_s26 }
0x14ff   :  { %3234 = vrot.lane.b32.xlu0 %v11913_v35, %s14171_s4 }
0x1503   :  { %3226 = vrot.lane.b32.xlu0 %v11917_v42, %s14172_s26 }
0x1507   :  { %3230 = vrot.lane.b32.xlu0 %v11919_v41, %s14172_s26 }
0x156e   :  { %v3019_v57 = vpop.xlane.xlu0 %3018 }
0x156f   :  { %10658 = vrcp.f32 %v3019_v57 }
0x1572   :  { %v3022_v59 = vpop.xlane.xlu0 %3021 }
0x1573   :  { %10660 = vrcp.f32 %v3022_v59 }
0x1576   :  { %v3025_v61 = vpop.xlane.xlu1 %3024  ;;  %v3235_v4 = vpop.permute.xlu0 %3234 }
0x1577   :  { %10662 = vrcp.f32 %v3025_v61 }
0x157a   :  { %v3227_v15 = vpop.permute.xlu0 %3226  ;;  %v3229_v38 = vpop.permute.xlu1 %3228 }
0x157c   :  { %v10659_v63 = vpop.eup %10658 }
0x157d   :  { %v3032_v14 = vmul.f32 %v10659_v63, %v10653_v8 }
0x157e   :  { %v3231_v18 = vpop.permute.xlu0 %3230 }
0x157f   :  { %9932 = vmatmul.mubr.msk.f32.vlgmr.msra.gmra.mxu1 %vm537_vm7, %v3032_v14 }
0x1580   :  { %v10661_v16 = vpop.eup %10660  ;;  %9952 = vmatpush3.xpose.msk.msra.mxu1 %vm441_vm6, %v3237_v56  ;;  %9934 = vmatprep.mubr.msk.f32.mxu1 %vm11097_vm5, %v11096_v48 }
0x1581   :  { %9953 = vmatprep.subr.mxu1 %v11096_v48  ;;  %v3033_v19 = vmul.f32 %v10661_v16, %v10655_v53 }
0x1583   :  { %9935 = vmatmul.mubr.msk.f32.gmra.mxu1 %vm537_vm7, %v3033_v19 }
0x1584   :  { %v10663_v7 = vpop.eup %10662  ;;  %9954 = vmatpush3.xpose.msk.msra.mxu1 %vm441_vm6, %v3235_v4  ;;  %9937 = vmatprep.mubr.msk.f32.mxu1 %vm11097_vm5, %v11096_v48 }
0x1585   :  { %9955 = vmatprep.subr.mxu1 %v11096_v48  ;;  %v3034_v9 = vmul.f32 %v10663_v7, %v10657_v54 }
0x1587   :  { %9938 = vmatmul.mubr.msk.f32.gmra.mxu1 %vm537_vm7, %v3034_v9 }
0x1588   :  { %9956 = vmatpush3.xpose.msk.msra.mxu1 %vm441_vm6, %v3233_v58  ;;  %9957 = vmatprep.mubr.msk.f32.mxu1 %vm11097_vm5, %v11096_v48 }
0x1589   :  { %9981 = vmatprep.subr.mxu1 %v11096_v48 }
0x158b   :  { %9958 = vmatmul.mubr.msk.f32.vlgmr.msra.gmra.mxu1 %vm441_vm6, %v3227_v15 }
0x158c   :  { %9960 = vmatprep.mubr.msk.f32.mxu1 %vm11097_vm5, %v11096_v48  ;;  %9982 = vmatpush3.msra.mxu1 %v11011_v23 }
0x158d   :  { %10009 = vmatprep.subr.mxu1 %v11096_v48 }
0x158f   :  { %9961 = vmatmul.mubr.msk.f32.gmra.mxu1 %vm441_vm6, %v3229_v38 }
0x1590   :  { %9963 = vmatprep.mubr.msk.f32.mxu1 %vm11097_vm5, %v11096_v48 }
0x1593   :  { %9964 = vmatmul.mubr.msk.f32.gmra.mxu1 %vm441_vm6, %v3231_v18 }
0x1594   :  { %9983 = vmatprep.mubr.msk.f32.mxu1 %vm11097_vm5, %v11096_v48 }
0x163f   :  { %v3120_v13 = vpop.f32.mrf.mxu1 }
0x1640   :  { %9943 = vmatmul.mubr.msk.f32.vlgmr.msra.gmra.mxu0 %vm441_vm6, %v3120_v13  ;;  %v11013_v13 = vld [vmem:[%s14077_s13 + $0x10] sm:$0xff] }
0x1641   :  { %v9933_v25 = vpop.f32.mrf.mxu1  ;;  %9945 = vmatprep.mubr.msk.f32.mxu0 %vm11097_vm5, %v11096_v48 }
0x1643   :  { %v3125_v24 = vpop.f32.mrf.mxu1 }
0x1644   :  { %9946 = vmatmul.mubr.msk.f32.gmra.mxu0 %vm441_vm6, %v3125_v24  ;;  %v11014_v24 = vld [vmem:[%s14077_s13 + $0x8] sm:$0xff] }
0x1645   :  { %v9936_v26 = vpop.f32.mrf.mxu1  ;;  %9948 = vmatprep.mubr.msk.f32.mxu0 %vm11097_vm5, %v11096_v48 }
0x1647   :  { %v3130_v27 = vpop.f32.mrf.mxu1 }
0x1648   :  { %9949 = vmatmul.mubr.msk.f32.gmra.mxu0 %vm441_vm6, %v3130_v27  ;;  %v11015_v27 = vld [vmem:[%s14077_s13] sm:$0xff] }
0x1649   :  { %v9939_v31 = vpop.f32.mrf.mxu1  ;;  %9972 = vmatprep.mubr.msk.f32.mxu0 %vm11097_vm5, %v11096_v48 }
0x164b   :  { %v3316_v32 = vpop.f32.mrf.mxu1 }
0x164c   :  { %v3330_v1 = vmul.f32 0.35355338, %v3316_v32 }
0x164d   :  { %v9959_v20 = vpop.f32.mrf.mxu1 }
0x164e   :  { %v3333_v37 = vsel %vm537_vm7, %v3330_v1, -inf }
0x164f   :  { %3334 = vmax.xlane.f32.xlu1 %v3333_v37  ;;  %v3321_v21 = vpop.f32.mrf.mxu1  ;;  %v11017_v37 = vld [vmem:[%s14079_s15 + $0x70] sm:$0xff] }
0x1650   :  { %v3331_v39 = vmul.f32 0.35355338, %v3321_v21 }
0x1651   :  { %v9962_v36 = vpop.f32.mrf.mxu1 }
0x1652   :  { %v3336_v43 = vsel %vm537_vm7, %v3331_v39, -inf }
0x1653   :  { %3337 = vmax.xlane.f32.xlu0 %v3336_v43  ;;  %v3326_v44 = vpop.f32.mrf.mxu1  ;;  %v11019_v43 = vld [vmem:[%s14079_s15 + $0x60] sm:$0xff] }
0x1654   :  { %v3332_v34 = vmul.f32 0.35355338, %v3326_v44 }
0x1655   :  { %v9965_v45 = vpop.f32.mrf.mxu1 }
0x1656   :  { %v3339_v47 = vsel %vm544_vm8, %v3332_v34, -inf  ;;  %v11021_v45 = vld [vmem:[%s14079_s15 + $0x50] sm:$0xff] }
0x1657   :  { %3340 = vmax.xlane.f32.xlu0 %v3339_v47  ;;  %v11022_v47 = vld [vmem:[%s14079_s15 + $0x48] sm:$0xff] }
0x1660   :  { %3373 = vrot.lane.b32.xlu1 %v11919_v41, %s14173_s22 }
0x16d8   :  { %v3335_v30 = vpop.xlane.xlu1 %3334 }
0x16d9   :  { %v3342_v17 = vsub.f32 %v3330_v1, %v3335_v30  ;;  %v11016_v1 = vld [vmem:[%s14079_s15 + $0x78] sm:$0xff]  ;;  %v11023_v30 = vld [vmem:[%s14079_s15 + $0x40] sm:$0xff] }
0x16db   :  { %v3345_v49 = vmul.f32 1.442695, %v3342_v17  ;;  %v11024_v17 = vld [vmem:[%s14079_s15 + $0x38] sm:$0xff] }
0x16dc   :  { %v3374_v46 = vpop.permute.xlu1 %3373  ;;  %v3338_v50 = vpop.xlane.xlu0 %3337 }
0x16dd   :  { %10664 = vpow2.f32 %v3345_v49  ;;  %v3343_v33 = vsub.f32 %v3331_v39, %v3338_v50  ;;  %9967 = vmatpush3.msk.msra.mxu0 %vm222_vm3, %v3374_v46  ;;  %v11018_v39 = vld [vmem:[%s14079_s15 + $0x68] sm:$0xff]  ;;  %v11025_v49 = vld [vmem:[%s14079_s15 + $0x30] sm:$0xff]  ;;  %v11027_v50 = vld [vmem:[%s14079_s15 + $0x20] sm:$0xff] }
0x16de   :  { %9968 = vmatprep.subr.mxu0 %v11096_v48  ;;  %v11026_v46 = vld [vmem:[%s14079_s15 + $0x28] sm:$0xff] }
0x16df   :  { %v3347_v51 = vmul.f32 1.442695, %v3343_v33  ;;  %v11028_v33 = vld [vmem:[%s14079_s15 + $0x18] sm:$0xff] }
0x16e0   :  { %v3341_v8 = vpop.xlane.xlu0 %3340 }
0x16e1   :  { %10666 = vpow2.f32 %v3347_v51  ;;  %v3344_v52 = vsub.f32 %v3332_v34, %v3341_v8  ;;  %v11020_v34 = vld [vmem:[%s14079_s15 + $0x58] sm:$0xff]  ;;  %v11029_v51 = vld [vmem:[%s14079_s15 + $0x10] sm:$0xff]  ;;  %v11030_v8 = vld [vmem:[%s14079_s15 + $0x8] sm:$0xff] }
0x16e3   :  { %v3349_v53 = vmul.f32 1.442695, %v3344_v52  ;;  %v11031_v52 = vld [vmem:[%s14079_s15] sm:$0xff] }
0x16e5   :  { %10668 = vpow2.f32 %v3349_v53 }
0x16ea   :  { %v10665_v29 = vpop.eup %10664 }
0x16eb   :  { %v3351_v41 = vsel %vm537_vm7, %v10665_v29, 0.0 }
0x16ec   :  { %3352 = vadd.xlane.f32.xlu0 %v3351_v41 }
0x16ee   :  { %v10667_v54 = vpop.eup %10666 }
0x16ef   :  { %v3354_v55 = vsel %vm537_vm7, %v10667_v54, 0.0 }
0x16f0   :  { %3355 = vadd.xlane.f32.xlu1 %v3354_v55 }
0x16f2   :  { %v10669_v56 = vpop.eup %10668 }
0x16f3   :  { %v3357_v57 = vsel %vm544_vm8, %v10669_v56, 0.0 }
0x16f4   :  { %3358 = vadd.xlane.f32.xlu0 %v3357_v57 }
0x1700   :  { %v3209_v58 = vpop.f32.mrf.mxu0 }
0x1701   :  { %v12180_v59 = vadd.f32 %v3209_v58, %v12098_v5  ;;  %3369 = vrot.lane.b32.xlu1 %v11917_v42, %s14173_s22  ;;  %v11032_v58 = vld [vmem:[%s14161_s29] ss:$0 sm:$0xff] }
0x1702   :  { %v9944_v61 = vpop.f32.mrf.mxu0 }
0x1704   :  { %v3214_v63 = vpop.f32.mrf.mxu0 }
0x1705   :  { %v12185_v14 = vadd.f32 %v3214_v63, %v12100_v12 }
0x1706   :  { %v9947_v16 = vpop.f32.mrf.mxu0 }
0x1708   :  { %v3219_v19 = vpop.f32.mrf.mxu0 }
0x1709   :  { %v12188_v4 = vadd.f32 %v3219_v19, %v12102_v40 }
0x170a   :  { %v9950_v7 = vpop.f32.mrf.mxu0  ;;  %3371 = vrot.lane.b32.xlu0 %v11913_v35, %s14173_s22  ;;  %v11012_v35 = vld [vmem:[%s14077_s13 + $0x18] sm:$0xff] }
0x1775   :  { %v3353_v9 = vpop.xlane.xlu0 %3352 }
0x1776   :  { %10670 = vrcp.f32 %v3353_v9 }
0x1779   :  { %v3356_v5 = vpop.xlane.xlu1 %3355 }
0x177a   :  { %10672 = vrcp.f32 %v3356_v5 }
0x177d   :  { %v3359_v15 = vpop.xlane.xlu0 %3358  ;;  %v3370_v12 = vpop.permute.xlu1 %3369 }
0x177e   :  { %10674 = vrcp.f32 %v3359_v15 }
0x1781   :  { %v3372_v42 = vpop.permute.xlu0 %3371 }
0x1782   :  { %9969 = vmatpush3.msra.mxu0 %v3372_v42 }
0x1783   :  { %v10671_v23 = vpop.eup %10670  ;;  %9970 = vmatprep.subr.mxu0 %v11096_v48 }
0x1784   :  { %v3366_v38 = vmul.f32 %v10671_v23, %v10665_v29  ;;  %9971 = vmatpush3.msra.mxu0 %v3370_v12 }
0x1785   :  { %9992 = vmatprep.subr.mxu0 %v11096_v48 }
0x1786   :  { %9973 = vmatmul.mubr.msk.f32.vlgmr.msra.gmra.mxu0 %vm537_vm7, %v3366_v38 }
0x1787   :  { %v10673_v40 = vpop.eup %10672  ;;  %9975 = vmatprep.mubr.msk.f32.mxu0 %vm11097_vm5, %v11096_v48  ;;  %9993 = vmatpush3.msra.mxu0 %v11012_v35 }
0x1788   :  { %v3367_v18 = vmul.f32 %v10673_v40, %v10667_v54  ;;  %9994 = vmatprep.subr.mxu0 %v11096_v48  ;;  %v2087_v54 = vadd.f32 %v11989_v60, %v11691_v3  ;;  %v2089_v3 = vadd.f32 %v11993_v2, %v11709_v10 }
0x1789   :  { %9995 = vmatpush3.msra.mxu0 %v11013_v13 }
0x178a   :  { %9976 = vmatmul.mubr.msk.f32.gmra.mxu0 %vm537_vm7, %v3367_v18  ;;  %9996 = vmatprep.subr.mxu0 %v11096_v48 }
0x178b   :  { %v10675_v25 = vpop.eup %10674  ;;  %9978 = vmatprep.mubr.msk.f32.mxu0 %vm11097_vm5, %v11096_v48  ;;  %9997 = vmatpush3.msra.mxu0 %v11014_v24 }
0x178c   :  { %v3368_v26 = vmul.f32 %v10675_v25, %v10669_v56  ;;  %9998 = vmatprep.subr.mxu0 %v11096_v48  ;;  %v8931_v56 = vld [vmem:[%s14080_s16] ss:$0 sm:$0xff] }
0x178d   :  { %9999 = vmatpush3.msra.mxu0 %v11015_v27  ;;  %v12305_v16 = vadd.f32 %v8931_v56, %v2087_v54  ;;  %v12317_v15 = vadd.f32 %v8931_v56, %v2089_v3 }
0x178e   :  { %9979 = vmatmul.mubr.msk.f32.gmra.mxu0 %vm537_vm7, %v3368_v26  ;;  %10050 = vmatprep.subr.mxu0 %v11096_v48 }
0x178f   :  { %10000 = vmatprep.mubr.msk.f32.mxu0 %vm11097_vm5, %v11096_v48 }
0x1846   :  { %v3454_v31 = vpop.f32.mrf.mxu0 }
0x1847   :  { %9984 = vmatmul.mubr.msk.f32.vlgmr.msra.gmra.mxu1 %vm441_vm6, %v3454_v31 }
0x1848   :  { %v9974_v32 = vpop.f32.mrf.mxu0  ;;  %9986 = vmatprep.mubr.msk.f32.mxu1 %vm11097_vm5, %v11096_v48  ;;  %10010 = vmatpush3.msra.mxu1 %v11016_v1 }
0x1849   :  { %10011 = vmatprep.subr.mxu1 %v11096_v48 }
0x184a   :  { %v3459_v20 = vpop.f32.mrf.mxu0  ;;  %10012 = vmatpush3.msra.mxu1 %v11017_v37 }
0x184b   :  { %9987 = vmatmul.mubr.msk.f32.gmra.mxu1 %vm441_vm6, %v3459_v20  ;;  %10013 = vmatprep.subr.mxu1 %v11096_v48 }
0x184c   :  { %v9977_v21 = vpop.f32.mrf.mxu0  ;;  %9989 = vmatprep.mubr.msk.f32.mxu1 %vm11097_vm5, %v11096_v48  ;;  %10014 = vmatpush3.msra.mxu1 %v11018_v39 }
0x184d   :  { %10015 = vmatprep.subr.mxu1 %v11096_v48 }
0x184e   :  { %v3464_v36 = vpop.f32.mrf.mxu0  ;;  %10016 = vmatpush3.msra.mxu1 %v11019_v43 }
0x184f   :  { %9990 = vmatmul.mubr.msk.f32.gmra.mxu1 %vm441_vm6, %v3464_v36  ;;  %10017 = vmatprep.subr.mxu1 %v11096_v48 }
0x1850   :  { %v9980_v44 = vpop.f32.mrf.mxu0  ;;  %10018 = vmatpush3.msra.mxu1 %v11020_v34  ;;  %10041 = vmatprep.mubr.msk.f32.mxu1 %vm11097_vm5, %v11096_v48 }
0x1851   :  { %10019 = vmatprep.subr.mxu1 %v11096_v48 }
0x1852   :  { %10020 = vmatpush3.msra.mxu1 %v11021_v45 }
0x1853   :  { %10021 = vmatprep.subr.mxu1 %v11096_v48 }
0x1854   :  { %10022 = vmatpush3.msra.mxu1 %v11022_v47 }
0x1855   :  { %10023 = vmatprep.subr.mxu1 %v11096_v48 }
0x1856   :  { %10024 = vmatpush3.msra.mxu1 %v11023_v30 }
0x1857   :  { %10025 = vmatprep.subr.mxu1 %v11096_v48 }
0x1858   :  { %10026 = vmatpush3.msra.mxu1 %v11024_v17 }
0x1859   :  { %10027 = vmatprep.subr.mxu1 %v11096_v48 }
0x185a   :  { %10028 = vmatpush3.msra.mxu1 %v11025_v49 }
0x185b   :  { %10029 = vmatprep.subr.mxu1 %v11096_v48 }
0x185c   :  { %10030 = vmatpush3.msra.mxu1 %v11026_v46 }
0x185d   :  { %10031 = vmatprep.subr.mxu1 %v11096_v48 }
0x185e   :  { %10032 = vmatpush3.msra.mxu1 %v11027_v50 }
0x185f   :  { %10033 = vmatprep.subr.mxu1 %v11096_v48 }
0x1860   :  { %10034 = vmatpush3.msra.mxu1 %v11028_v33 }
0x1861   :  { %10035 = vmatprep.subr.mxu1 %v11096_v48 }
0x1862   :  { %10036 = vmatpush3.msra.mxu1 %v11029_v51 }
0x1863   :  { %10037 = vmatprep.subr.mxu1 %v11096_v48 }
0x1864   :  { %10038 = vmatpush3.msra.mxu1 %v11030_v8 }
0x1865   :  { %10039 = vmatprep.subr.mxu1 %v11096_v48 }
0x1866   :  { %10040 = vmatpush3.msra.mxu1 %v11031_v52 }
0x1867   :  { %10097 = vmatprep.subr.mxu1 %v11096_v48 }
0x1907   :  { %v3543_v53 = vpop.f32.mrf.mxu1 }
0x1908   :  { %v3557_v29 = vadd.f32 %v3543_v53, %v12180_v59 }
0x1909   :  { %v9985_v41 = vpop.f32.mrf.mxu1 }
0x190a   :  { %v3560_v55 = vadd.f32 %v3557_v29, %v11715_v11 }
0x190b   :  { %v3548_v57 = vpop.f32.mrf.mxu1 }
0x190c   :  { %v12302_v61 = vadd.f32 %v11032_v58, %v3560_v55  ;;  %v3558_v63 = vadd.f32 %v3548_v57, %v12185_v14  ;;  %v2088_v14 = vadd.f32 %v11991_v62, %v11701_v28  ;;  %v3921_v28 = vsel %vm284_vm2, %v12317_v15, 0.0 }
0x190d   :  { %v9988_v59 = vpop.f32.mrf.mxu1 }
0x190e   :  { %v3561_v11 = vadd.f32 %v3558_v63, %v11699_v6  ;;  %v3566_v60 = vsel %vm277_vm4, %v12302_v61, 0.0  ;;  %v3915_v6 = vsel %vm277_vm4, %v12305_v16, 0.0  ;;  %v12326_v23 = vadd.f32 %v8931_v56, %v2088_v14 }
0x190f   :  { %3567 = vadd.xlane.f32.xlu1 %v3566_v60  ;;  %v3553_v19 = vpop.f32.mrf.mxu1 }
0x1910   :  { %v12312_v7 = vadd.f32 %v11032_v58, %v3561_v11  ;;  %v3559_v9 = vadd.f32 %v3553_v19, %v12188_v4 }
0x1911   :  { %v9991_v5 = vpop.f32.mrf.mxu1 }
0x1912   :  { %v3562_v42 = vadd.f32 %v3559_v9, %v11689_v0  ;;  %v3569_v10 = vsel %vm277_vm4, %v12312_v7, 0.0  ;;  %v3918_v0 = vsel %vm277_vm4, %v12326_v23, 0.0 }
0x1913   :  { %3916 = vadd.xlane.f32.xlu1 %v3915_v6  ;;  %3570 = vadd.xlane.f32.xlu0 %v3569_v10 }
0x1914   :  { %v12324_v2 = vadd.f32 %v11032_v58, %v3562_v42  ;;  %v11033_v42 = vld [vmem:[%s14162_s0] ss:$0 sm:$0xff] }
0x1916   :  { %v3572_v62 = vsel %vm284_vm2, %v12324_v2, 0.0 }
0x1917   :  { %3922 = vadd.xlane.f32.xlu1 %v3921_v28  ;;  %3573 = vadd.xlane.f32.xlu0 %v3572_v62  ;;  %v11034_v28 = vld [vmem:[%s14076_s12] ss:$0 sm:$0xff] }
0x191b   :  { %3919 = vadd.xlane.f32.xlu0 %v3918_v0 }
0x1998   :  { %v3568_v4 = vpop.xlane.xlu1 %3567 }
0x1999   :  { %v3575_v12 = vmul.f32 0.03125, %v3568_v4  ;;  %v8995_v4 = vld [vmem:[%s14156_s5 + $0x38] sm:$0xff] }
0x199b   :  { %v3578_v38 = vsub.f32 %v12302_v61, %v3575_v12 }
0x199c   :  { %v3917_v40 = vpop.xlane.xlu1 %3916  ;;  %v3571_v35 = vpop.xlane.xlu0 %3570 }
0x199d   :  { %v3924_v18 = vmul.f32 0.03125, %v3917_v40  ;;  %v3576_v13 = vmul.f32 0.03125, %v3571_v35  ;;  %v3581_v25 = vmul.f32 %v3578_v38, %v3578_v38 }
0x199f   :  { %v12336_v24 = vsub.f32 %v12305_v16, %v3924_v18  ;;  %v3579_v26 = vsub.f32 %v12312_v7, %v3576_v13  ;;  %v3584_v27 = vsel %vm277_vm4, %v3581_v25, 0.0  ;;  %v8993_v13 = vld [vmem:[%s14156_s5 + $0x28] sm:$0xff] }
0x19a0   :  { %v3923_v31 = vpop.xlane.xlu1 %3922  ;;  %3585 = vadd.xlane.f32.xlu0 %v3584_v27  ;;  %v3574_v32 = vpop.xlane.xlu0 %3573  ;;  %v9026_v27 = vld [vmem:[%s14157_s7 + $0x1] ss:$0 sm:$0xff] }
0x19a1   :  { %v3926_v1 = vmul.f32 0.03125, %v3923_v31  ;;  %v3577_v20 = vmul.f32 0.03125, %v3574_v32  ;;  %v3582_v37 = vmul.f32 %v3579_v26, %v3579_v26  ;;  %v3930_v43 = vmul.f32 %v12336_v24, %v12336_v24  ;;  %v8992_v31 = vld [vmem:[%s14156_s5 + $0x20] sm:$0xff] }
0x19a3   :  { %v12341_v21 = vsub.f32 %v12317_v15, %v3926_v1  ;;  %v12344_v39 = vsub.f32 %v12324_v2, %v3577_v20  ;;  %v3587_v36 = vsel %vm277_vm4, %v3582_v37, 0.0  ;;  %v3933_v30 = vsel %vm277_vm4, %v3930_v43, 0.0 }
0x19a4   :  { %3588 = vadd.xlane.f32.xlu1 %v3587_v36  ;;  %v3920_v44 = vpop.xlane.xlu0 %3919  ;;  %v9027_v36 = vld [vmem:[%s14158_s9 + $0x1] ss:$0 sm:$0xff] }
0x19a5   :  { %v3925_v34 = vmul.f32 0.03125, %v3920_v44  ;;  %v3583_v45 = vmul.f32 %v12344_v39, %v12344_v39  ;;  %v3932_v49 = vmul.f32 %v12341_v21, %v12341_v21 }
0x19a7   :  { %v12352_v47 = vsub.f32 %v12326_v23, %v3925_v34  ;;  %v3590_v17 = vsel %vm284_vm2, %v3583_v45, 0.0  ;;  %v3939_v50 = vsel %vm284_vm2, %v3932_v49, 0.0 }
0x19a8   :  { %3934 = vadd.xlane.f32.xlu1 %v3933_v30  ;;  %3591 = vadd.xlane.f32.xlu0 %v3590_v17 }
0x19a9   :  { %v3931_v46 = vmul.f32 %v12352_v47, %v12352_v47 }
0x19ab   :  { %v3936_v33 = vsel %vm277_vm4, %v3931_v46, 0.0 }
0x19ac   :  { %3940 = vadd.xlane.f32.xlu1 %v3939_v50  ;;  %3937 = vadd.xlane.f32.xlu0 %v3936_v33 }
0x1a29   :  { %v3586_v51 = vpop.xlane.xlu0 %3585 }
0x1a2a   :  { %v3593_v8 = vmul.f32 0.03125, %v3586_v51 }
0x1a2c   :  { %v3596_v52 = vadd.f32 1e-06, %v3593_v8 }
0x1a2d   :  { %v3589_v53 = vpop.xlane.xlu1 %3588 }
0x1a2e   :  { %10676 = vrsqrt.f32 %v3596_v52  ;;  %v3594_v29 = vmul.f32 0.03125, %v3589_v53 }
0x1a30   :  { %v3597_v41 = vadd.f32 1e-06, %v3594_v29 }
0x1a31   :  { %v3935_v54 = vpop.xlane.xlu1 %3934  ;;  %v3592_v55 = vpop.xlane.xlu0 %3591 }
0x1a32   :  { %10678 = vrsqrt.f32 %v3597_v41  ;;  %v3942_v56 = vmul.f32 0.03125, %v3935_v54  ;;  %v3595_v57 = vmul.f32 0.03125, %v3592_v55 }
0x1a34   :  { %v3945_v58 = vadd.f32 1e-06, %v3942_v56  ;;  %v3598_v63 = vadd.f32 1e-06, %v3595_v57 }
0x1a35   :  { %v3941_v59 = vpop.xlane.xlu1 %3940  ;;  %v3938_v3 = vpop.xlane.xlu0 %3937 }
0x1a36   :  { %10680 = vrsqrt.f32 %v3945_v58  ;;  %v3944_v11 = vmul.f32 0.03125, %v3941_v59  ;;  %v3943_v60 = vmul.f32 0.03125, %v3938_v3 }
0x1a37   :  { %10682 = vrsqrt.f32 %v3598_v63 }
0x1a38   :  { %v3946_v19 = vadd.f32 1e-06, %v3943_v60  ;;  %v3947_v9 = vadd.f32 1e-06, %v3944_v11 }
0x1a3a   :  { %10684 = vrsqrt.f32 %v3946_v19 }
0x1a3b   :  { %v10677_v14 = vpop.eup %10676  ;;  %10686 = vrsqrt.f32 %v3947_v9 }
0x1a3c   :  { %v3602_v5 = vmul.f32 %v10677_v14, %v3578_v38  ;;  %v8994_v38 = vld [vmem:[%s14156_s5 + $0x30] sm:$0xff]  ;;  %v9028_v14 = vld [vmem:[%s14159_s10 + $0x1] ss:$0 sm:$0xff] }
0x1a3e   :  { %v3605_v6 = vmul.f32 %v11033_v42, %v3602_v5 }
0x1a3f   :  { %v10679_v10 = vpop.eup %10678 }
0x1a40   :  { %v3608_v62 = vadd.f32 %v11034_v28, %v3605_v6  ;;  %v3603_v0 = vmul.f32 %v10679_v10, %v3579_v26 }
0x1a42   :  { %10001 = vmatmul.mubr.msk.f32.vlgmr.msra.gmra.mxu0 %vm277_vm4, %v3608_v62  ;;  %v3606_v12 = vmul.f32 %v11033_v42, %v3603_v0 }
0x1a43   :  { %v10681_v40 = vpop.eup %10680  ;;  %10003 = vmatprep.mubr.msk.f32.mxu0 %vm11097_vm5, %v11096_v48  ;;  %10051 = vmatpush3.msra.mxu0 %v8995_v4 }
0x1a44   :  { %v10683_v35 = vpop.eup %10682  ;;  %v3609_v18 = vadd.f32 %v11034_v28, %v3606_v12  ;;  %10052 = vmatprep.subr.mxu0 %v11096_v48  ;;  %v3951_v25 = vmul.f32 %v10681_v40, %v12336_v24 }
0x1a45   :  { %10053 = vmatpush3.msra.mxu0 %v8994_v38  ;;  %v3604_v26 = vmul.f32 %v10683_v35, %v12344_v39 }
0x1a46   :  { %10004 = vmatmul.mubr.msk.f32.gmra.mxu0 %vm277_vm4, %v3609_v18  ;;  %10054 = vmatprep.subr.mxu0 %v11096_v48  ;;  %v3960_v1 = vmul.f32 %v9026_v27, %v3951_v25 }
0x1a47   :  { %10006 = vmatprep.mubr.msk.f32.mxu0 %vm11097_vm5, %v11096_v48  ;;  %v3607_v32 = vmul.f32 %v11033_v42, %v3604_v26  ;;  %10055 = vmatpush3.msra.mxu0 %v8993_v13  ;;  %v10685_v24 = vpop.eup %10684 }
0x1a48   :  { %10056 = vmatprep.subr.mxu0 %v11096_v48  ;;  %v3952_v37 = vmul.f32 %v10685_v24, %v12352_v47  ;;  %v10687_v39 = vpop.eup %10686  ;;  %v3969_v43 = vadd.f32 %v9027_v36, %v3960_v1 }
0x1a49   :  { %v3610_v20 = vadd.f32 %v11034_v28, %v3607_v32  ;;  %10057 = vmatpush3.msra.mxu0 %v8992_v31  ;;  %v3953_v34 = vmul.f32 %v10687_v39, %v12341_v21  ;;  %v11035_v21 = vld [vmem:[%s14078_s14] ss:$0 sm:$0xff] }
0x1a4a   :  { %10067 = vmatprep.subr.mxu0 %v11096_v48  ;;  %v3961_v44 = vmul.f32 %v9026_v27, %v3952_v37 }
0x1a4b   :  { %10007 = vmatmul.mubr.msk.f32.gmra.mxu0 %vm277_vm4, %v3610_v20  ;;  %v3962_v47 = vmul.f32 %v9026_v27, %v3953_v34 }
0x1a4c   :  { %10058 = vmatprep.mubr.msk.f32.mxu0 %vm11097_vm5, %v11096_v48  ;;  %v3970_v45 = vadd.f32 %v9027_v36, %v3961_v44 }
0x1a4d   :  { %v3971_v30 = vadd.f32 %v9027_v36, %v3962_v47 }
0x1a4f   :  { %10059 = vmatmul.mubr.msk.f32.vlgmr.msra.gmra.mxu0 %vm277_vm4, %v3969_v43 }
0x1a50   :  { %10061 = vmatprep.mubr.msk.f32.mxu0 %vm11097_vm5, %v11096_v48 }
0x1a53   :  { %10062 = vmatmul.mubr.msk.f32.gmra.mxu0 %vm277_vm4, %v3970_v45 }
0x1a54   :  { %10064 = vmatprep.mubr.msk.f32.mxu0 %vm11097_vm5, %v11096_v48 }
0x1a57   :  { %10065 = vmatmul.mubr.msk.f32.gmra.mxu0 %vm277_vm4, %v3971_v30 }
0x1a58   :  { %10073 = vmatprep.mubr.msk.f32.mxu0 %vm11097_vm5, %v11096_v48 }
0x1b02   :  { %v3686_v17 = vpop.f32.mrf.mxu0 }
0x1b03   :  { %v12415_v49 = vadd.f32 %v11035_v21, %v3686_v17 }
0x1b04   :  { %v10002_v46 = vpop.f32.mrf.mxu0 }
0x1b05   :  { %v12418_v50 = vmul.f32 0.70710677, %v12415_v49 }
0x1b06   :  { %v3691_v33 = vpop.f32.mrf.mxu0 }
0x1b07   :  { %v3712_v51 = vand.u32 2147483647, %v12418_v50  ;;  %v12421_v8 = vadd.f32 %v11035_v21, %v3691_v33  ;;  %vm3706_vm12 = vcmp.ge.f32.partialorder %v12418_v50, 0.0 }
0x1b08   :  { %v10005_v52 = vpop.f32.mrf.mxu0 }
0x1b09   :  { %v3715_v53 = vmul.f32 0.3275911, %v3712_v51  ;;  %v12424_v29 = vmul.f32 0.70710677, %v12421_v8  ;;  %v3754_v9 = vsub.f32 0.0, %v3712_v51 }
0x1b0b   :  { %v3718_v41 = vadd.f32 1.0, %v3715_v53  ;;  %v3713_v54 = vand.u32 2147483647, %v12424_v29  ;;  %v3696_v55 = vpop.f32.mrf.mxu0  ;;  %v3757_v28 = vmul.f32 %v3754_v9, %v3712_v51  ;;  %vm3707_vm13 = vcmp.ge.f32.partialorder %v12424_v29, 0.0 }
0x1b0c   :  { %v12427_v56 = vadd.f32 %v11035_v21, %v3696_v55  ;;  %v3710_v50 = vsel %vm3707_vm13, 1.0, %v11109_v22 }
0x1b0d   :  { %10688 = vrcp.f32 %v3718_v41  ;;  %v3716_v57 = vmul.f32 0.3275911, %v3713_v54  ;;  %v10008_v58 = vpop.f32.mrf.mxu0  ;;  %v3755_v62 = vsub.f32 0.0, %v3713_v54  ;;  %v3760_v18 = vmul.f32 1.442695, %v3757_v28 }
0x1b0e   :  { %v12430_v63 = vmul.f32 0.70710677, %v12427_v56 }
0x1b0f   :  { %v3719_v59 = vadd.f32 1.0, %v3716_v57  ;;  %v4053_v3 = vpop.f32.mrf.mxu0  ;;  %v3758_v13 = vmul.f32 %v3755_v62, %v3713_v54 }
0x1b10   :  { %v3714_v11 = vand.u32 2147483647, %v12430_v63  ;;  %v12440_v4 = vadd.f32 %v9028_v14, %v4053_v3  ;;  %vm3708_vm14 = vcmp.ge.f32.partialorder %v12430_v63, 0.0 }
0x1b11   :  { %10690 = vrcp.f32 %v3719_v59  ;;  %v10060_v60 = vpop.f32.mrf.mxu0  ;;  %v3762_v32 = vmul.f32 1.442695, %v3758_v13  ;;  %v3701_v13 = vmul.f32 0.5, %v12421_v8 }
0x1b12   :  { %v3717_v19 = vmul.f32 0.3275911, %v3714_v11  ;;  %v3756_v25 = vsub.f32 0.0, %v3714_v11 }
0x1b13   :  { %v4058_v5 = vpop.f32.mrf.mxu0 }
0x1b14   :  { %v3720_v42 = vadd.f32 1.0, %v3717_v19  ;;  %v12436_v6 = vadd.f32 %v9028_v14, %v4058_v5  ;;  %v3759_v1 = vmul.f32 %v3756_v25, %v3714_v11  ;;  %v3709_v19 = vsel %vm3706_vm12, 1.0, %v11109_v22 }
0x1b15   :  { %v10063_v10 = vpop.f32.mrf.mxu0  ;;  %vm7823_vm12 = vcmask 523264  }
0x1b16   :  { %10692 = vrcp.f32 %v3720_v42  ;;  %4072 = vrot.lane.b32.xlu1 %v12436_v6, %s14163_s6  ;;  %v3764_v44 = vmul.f32 1.442695, %v3759_v1  ;;  %v3700_v10 = vmul.f32 0.5, %v12415_v49  ;;  %v3711_v49 = vsel %vm3708_vm14, 1.0, %v11109_v22 }
0x1b17   :  { %v4063_v0 = vpop.f32.mrf.mxu0  ;;  %10694 = vpow2.f32 %v3760_v18 }
0x1b18   :  { %v12442_v12 = vadd.f32 %v9028_v14, %v4063_v0  ;;  %10696 = vpow2.f32 %v3762_v32 }
0x1b19   :  { %v10066_v38 = vpop.f32.mrf.mxu0  ;;  %10698 = vpow2.f32 %v3764_v44 }
0x1b1a   :  { %v10689_v40 = vpop.eup %10688  ;;  %4070 = vrot.lane.b32.xlu1 %v12440_v4, %s14163_s6  ;;  %4074 = vrot.lane.b32.xlu0 %v12442_v12, %s14163_s6 }
0x1b1b   :  { %v3727_v35 = vmul.f32 1.0614054, %v10689_v40 }
0x1b1d   :  { %v3730_v26 = vadd.f32 -1.4531521, %v3727_v35 }
0x1b1e   :  { %v10691_v27 = vpop.eup %10690  ;;  %4316 = vrot.lane.b32.xlu1 %v12442_v12, %s14164_s3  ;;  %4314 = vrot.lane.b32.xlu0 %v12436_v6, %s14164_s3 }
0x1b1f   :  { %v3733_v31 = vmul.f32 %v10689_v40, %v3730_v26  ;;  %v3728_v24 = vmul.f32 1.0614054, %v10691_v27 }
0x1b21   :  { %v3736_v20 = vadd.f32 1.4214138, %v3733_v31  ;;  %v3731_v37 = vadd.f32 -1.4531521, %v3728_v24  ;;  %v3702_v31 = vmul.f32 0.5, %v12427_v56 }
0x1b22   :  { %4312 = vrot.lane.b32.xlu1 %v12440_v4, %s14164_s3  ;;  %4306 = vrot.lane.b32.xlu0 %v12440_v4, %s14165_s2 }
0x1b23   :  { %v10693_v39 = vpop.eup %10692  ;;  %v3739_v36 = vmul.f32 %v10689_v40, %v3736_v20  ;;  %v3734_v43 = vmul.f32 %v10691_v27, %v3731_v37 }
0x1b24   :  { %v3729_v34 = vmul.f32 1.0614054, %v10693_v39  ;;  %v10695_v54 = vpop.eup %10694 }
0x1b25   :  { %v3742_v45 = vadd.f32 -0.28449672, %v3739_v36  ;;  %v3737_v47 = vadd.f32 1.4214138, %v3734_v43  ;;  %v10697_v60 = vpop.eup %10696 }
0x1b26   :  { %4308 = vrot.lane.b32.xlu1 %v12436_v6, %s14165_s2  ;;  %4310 = vrot.lane.b32.xlu0 %v12442_v12, %s14165_s2  ;;  %v3732_v30 = vadd.f32 -1.4531521, %v3729_v34  ;;  %v10699_v38 = vpop.eup %10698 }
0x1b27   :  { %v3745_v17 = vmul.f32 %v10689_v40, %v3742_v45  ;;  %v3740_v21 = vmul.f32 %v10691_v27, %v3737_v47 }
0x1b28   :  { %v3735_v46 = vmul.f32 %v10693_v39, %v3732_v30 }
0x1b29   :  { %v3748_v33 = vadd.f32 0.2548296, %v3745_v17  ;;  %v3743_v51 = vadd.f32 -0.28449672, %v3740_v21 }
0x1b2a   :  { %v3738_v52 = vadd.f32 1.4214138, %v3735_v46 }
0x1b2b   :  { %v3751_v53 = vmul.f32 %v10689_v40, %v3748_v33  ;;  %v3746_v41 = vmul.f32 %v10691_v27, %v3743_v51 }
0x1b2c   :  { %v3741_v55 = vmul.f32 %v10693_v39, %v3738_v52 }
0x1b2d   :  { %v3766_v57 = vmul.f32 %v10695_v54, %v3751_v53  ;;  %v3749_v58 = vadd.f32 0.2548296, %v3746_v41 }
0x1b2e   :  { %v3744_v59 = vadd.f32 -0.28449672, %v3741_v55 }
0x1b2f   :  { %v3769_v3 = vsub.f32 1.0, %v3766_v57  ;;  %v3752_v11 = vmul.f32 %v10691_v27, %v3749_v58 }
0x1b30   :  { %v3747_v9 = vmul.f32 %v10693_v39, %v3744_v59 }
0x1b31   :  { %v3772_v14 = vmul.f32 %v3769_v3, %v3709_v19  ;;  %v3767_v5 = vmul.f32 %v10697_v60, %v3752_v11 }
0x1b32   :  { %v3750_v42 = vadd.f32 0.2548296, %v3747_v9 }
0x1b33   :  { %v3775_v28 = vadd.f32 1.0, %v3772_v14  ;;  %v3770_v62 = vsub.f32 1.0, %v3767_v5 }
0x1b34   :  { %v3753_v0 = vmul.f32 %v10693_v39, %v3750_v42 }
0x1b35   :  { %v3778_v40 = vmul.f32 %v3775_v28, %v3700_v10  ;;  %v3773_v35 = vmul.f32 %v3770_v62, %v3710_v50 }
0x1b36   :  { %v3768_v18 = vmul.f32 %v10699_v38, %v3753_v0 }
0x1b37   :  { %10042 = vmatmul.mubr.f32.vlgmr.msra.gmra.mxu1 %v3778_v40  ;;  %v3776_v25 = vadd.f32 1.0, %v3773_v35 }
0x1b38   :  { %10044 = vmatprep.mubr.msk.f32.mxu1 %vm11097_vm5, %v11096_v48  ;;  %v3771_v29 = vsub.f32 1.0, %v3768_v18 }
0x1b39   :  { %v3779_v26 = vmul.f32 %v3776_v25, %v3701_v13 }
0x1b3a   :  { %v3774_v27 = vmul.f32 %v3771_v29, %v3711_v49 }
0x1b3b   :  { %10045 = vmatmul.mubr.f32.gmra.mxu1 %v3779_v26 }
0x1b3c   :  { %10047 = vmatprep.mubr.msk.f32.mxu1 %vm11097_vm5, %v11096_v48  ;;  %v3777_v63 = vadd.f32 1.0, %v3774_v27 }
0x1b3e   :  { %v3780_v32 = vmul.f32 %v3777_v63, %v3702_v31 }
0x1b40   :  { %10048 = vmatmul.mubr.f32.gmra.mxu1 %v3780_v32 }
0x1b41   :  { %10103 = vmatprep.mubr.msk.f32.mxu1 %vm11097_vm5, %v11096_v48 }
0x1b88   :  { %v4073_v8 = vpop.permute.xlu1 %4072 }
0x1b8c   :  { %v4071_v24 = vpop.permute.xlu1 %4070  ;;  %v4075_v1 = vpop.permute.xlu0 %4074 }
0x1b8d   :  { %10068 = vmatpush3.xpose.msk.msra.mxu0 %vm441_vm6, %v4075_v1 }
0x1b8e   :  { %10069 = vmatprep.subr.mxu0 %v11096_v48 }
0x1b90   :  { %v4317_v20 = vpop.permute.xlu1 %4316  ;;  %v4315_v56 = vpop.permute.xlu0 %4314 }
0x1b91   :  { %10070 = vmatpush3.xpose.msk.msra.mxu0 %vm441_vm6, %v4073_v8  ;;  %10098 = vmatpush3.xpose.msk.msra.mxu1 %vm441_vm6, %v4317_v20 }
0x1b92   :  { %10099 = vmatprep.subr.mxu1 %v11096_v48  ;;  %10071 = vmatprep.subr.mxu0 %v11096_v48 }
0x1b94   :  { %v4313_v37 = vpop.permute.xlu1 %4312  ;;  %v4307_v39 = vpop.permute.xlu0 %4306 }
0x1b95   :  { %10072 = vmatpush3.xpose.msk.msra.mxu0 %vm441_vm6, %v4071_v24  ;;  %10100 = vmatpush3.xpose.msk.msra.mxu1 %vm441_vm6, %v4315_v56 }
0x1b96   :  { %10101 = vmatprep.subr.mxu1 %v11096_v48  ;;  %10082 = vmatprep.subr.mxu0 %v11096_v48 }
0x1b98   :  { %10074 = vmatmul.mubr.msk.f32.vlgmr.msra.gmra.mxu0 %vm441_vm6, %v12440_v4  ;;  %v4309_v36 = vpop.permute.xlu1 %4308  ;;  %v4311_v43 = vpop.permute.xlu0 %4310 }
0x1b99   :  { %10102 = vmatpush3.xpose.msk.msra.mxu1 %vm441_vm6, %v4313_v37  ;;  %10076 = vmatprep.mubr.msk.f32.mxu0 %vm11097_vm5, %v11096_v48 }
0x1b9a   :  { %10127 = vmatprep.subr.mxu1 %v11096_v48 }
0x1b9c   :  { %10077 = vmatmul.mubr.msk.f32.gmra.mxu0 %vm441_vm6, %v12436_v6  ;;  %10104 = vmatmul.mubr.msk.f32.vlgmr.msra.gmra.mxu1 %vm441_vm6, %v4307_v39 }
0x1b9d   :  { %10079 = vmatprep.mubr.msk.f32.mxu0 %vm11097_vm5, %v11096_v48  ;;  %10106 = vmatprep.mubr.msk.f32.mxu1 %vm11097_vm5, %v11096_v48 }
0x1ba0   :  { %10080 = vmatmul.mubr.msk.f32.gmra.mxu0 %vm441_vm6, %v12442_v12  ;;  %10107 = vmatmul.mubr.msk.f32.gmra.mxu1 %vm441_vm6, %v4309_v36 }
0x1ba1   :  { %10109 = vmatprep.mubr.msk.f32.mxu1 %vm11097_vm5, %v11096_v48  ;;  %10088 = vmatprep.mubr.msk.f32.mxu0 %vm11097_vm5, %v11096_v48 }
0x1ba4   :  { %10110 = vmatmul.mubr.msk.f32.gmra.mxu1 %vm441_vm6, %v4311_v43 }
0x1ba5   :  { %10129 = vmatprep.mubr.msk.f32.mxu1 %vm11097_vm5, %v11096_v48 }
0x1bf7   :  { %v12508_v44 = vpop.f32.mrf.mxu1 }
0x1bf9   :  { %v10043_v34 = vpop.f32.mrf.mxu1 }
0x1bfb   :  { %v12510_v45 = vpop.f32.mrf.mxu1 }
0x1bfd   :  { %v10046_v47 = vpop.f32.mrf.mxu1 }
0x1c00   :  { %v12512_v30 = vpop.f32.mrf.mxu1 }
0x1c02   :  { %v10049_v17 = vpop.f32.mrf.mxu1 }
0x1c58   :  { %v4154_v21 = vpop.f32.mrf.mxu0 }
0x1c59   :  { %v4168_v46 = vmul.f32 0.35355338, %v4154_v21 }
0x1c5a   :  { %v10075_v33 = vpop.f32.mrf.mxu0 }
0x1c5b   :  { %v4171_v51 = vsel %vm537_vm7, %v4168_v46, -inf }
0x1c5c   :  { %4172 = vmax.xlane.f32.xlu1 %v4171_v51  ;;  %v4159_v52 = vpop.f32.mrf.mxu0  ;;  %v4396_v53 = vpop.f32.mrf.mxu1 }
0x1c5d   :  { %v4169_v41 = vmul.f32 0.35355338, %v4159_v52  ;;  %v4410_v9 = vmul.f32 0.35355338, %v4396_v53 }
0x1c5e   :  { %v10078_v54 = vpop.f32.mrf.mxu0  ;;  %v10105_v55 = vpop.f32.mrf.mxu1 }
0x1c5f   :  { %v4174_v57 = vsel %vm537_vm7, %v4169_v41, -inf  ;;  %v4413_v62 = vsel %vm537_vm7, %v4410_v9, -inf }
0x1c60   :  { %4175 = vmax.xlane.f32.xlu0 %v4174_v57  ;;  %v4164_v58 = vpop.f32.mrf.mxu0  ;;  %v4401_v59 = vpop.f32.mrf.mxu1 }
0x1c61   :  { %v4170_v3 = vmul.f32 0.35355338, %v4164_v58  ;;  %v4411_v11 = vmul.f32 0.35355338, %v4401_v59 }
0x1c62   :  { %v10081_v60 = vpop.f32.mrf.mxu0  ;;  %v10108_v19 = vpop.f32.mrf.mxu1 }
0x1c63   :  { %v4177_v14 = vsel %vm544_vm8, %v4170_v3, -inf  ;;  %v4416_v5 = vsel %vm537_vm7, %v4411_v11, -inf }
0x1c64   :  { %4178 = vmax.xlane.f32.xlu0 %v4177_v14  ;;  %4417 = vmax.xlane.f32.xlu1 %v4416_v5  ;;  %v4406_v42 = vpop.f32.mrf.mxu1 }
0x1c65   :  { %v4412_v28 = vmul.f32 0.35355338, %v4406_v42 }
0x1c66   :  { %v10111_v10 = vpop.f32.mrf.mxu1 }
0x1c67   :  { %v4419_v50 = vsel %vm544_vm8, %v4412_v28, -inf }
0x1c68   :  { %4414 = vmax.xlane.f32.xlu0 %v4413_v62 }
0x1c6c   :  { %4420 = vmax.xlane.f32.xlu0 %v4419_v50 }
0x1c75   :  { %4211 = vrot.lane.b32.xlu1 %v12442_v12, %s14166_s30 }
0x1c79   :  { %4207 = vrot.lane.b32.xlu1 %v12440_v4, %s14166_s30 }
0x1c7d   :  { %4453 = vrot.lane.b32.xlu1 %v12442_v12, %s14167_s1 }
0x1c82   :  { %4209 = vrot.lane.b32.xlu0 %v12436_v6, %s14166_s30 }
0x1ce5   :  { %v4173_v0 = vpop.xlane.xlu1 %4172 }
0x1ce6   :  { %v4180_v38 = vsub.f32 %v4168_v46, %v4173_v0 }
0x1ce8   :  { %v4183_v40 = vmul.f32 1.442695, %v4180_v38 }
0x1ce9   :  { %v4176_v35 = vpop.xlane.xlu0 %4175 }
0x1cea   :  { %10700 = vpow2.f32 %v4183_v40  ;;  %v4181_v49 = vsub.f32 %v4169_v41, %v4176_v35 }
0x1cec   :  { %v4185_v8 = vmul.f32 1.442695, %v4181_v49 }
0x1ced   :  { %v4179_v18 = vpop.xlane.xlu0 %4178  ;;  %v4418_v13 = vpop.xlane.xlu1 %4417 }
0x1cee   :  { %v4182_v25 = vsub.f32 %v4170_v3, %v4179_v18  ;;  %v4423_v29 = vsub.f32 %v4411_v11, %v4418_v13  ;;  %v8997_v18 = vld [vmem:[%s14160_s28 + $0x20] sm:$0xff]  ;;  %v8998_v13 = vld [vmem:[%s14160_s28 + $0x28] sm:$0xff] }
0x1cef   :  { %10128 = vmatpush3.msra.mxu1 %v8998_v13 }
0x1cf0   :  { %v4427_v26 = vmul.f32 1.442695, %v4423_v29  ;;  %v4187_v27 = vmul.f32 1.442695, %v4182_v25  ;;  %10149 = vmatprep.subr.mxu1 %v11096_v48 }
0x1cf1   :  { %v4415_v31 = vpop.xlane.xlu0 %4414  ;;  %v4212_v63 = vpop.permute.xlu1 %4211 }
0x1cf2   :  { %v4422_v32 = vsub.f32 %v4410_v9, %v4415_v31  ;;  %10083 = vmatpush3.msk.msra.mxu0 %vm222_vm3, %v4212_v63  ;;  %10702 = vpow2.f32 %v4427_v26 }
0x1cf3   :  { %10084 = vmatprep.subr.mxu0 %v11096_v48  ;;  %10704 = vpow2.f32 %v4187_v27 }
0x1cf4   :  { %v4425_v24 = vmul.f32 1.442695, %v4422_v32 }
0x1cf5   :  { %v4421_v1 = vpop.xlane.xlu0 %4420  ;;  %v4208_v43 = vpop.permute.xlu1 %4207 }
0x1cf6   :  { %10706 = vpow2.f32 %v4425_v24  ;;  %v4424_v20 = vsub.f32 %v4412_v28, %v4421_v1 }
0x1cf7   :  { %v10701_v56 = vpop.eup %10700  ;;  %10708 = vpow2.f32 %v4185_v8 }
0x1cf8   :  { %v4429_v37 = vmul.f32 1.442695, %v4424_v20  ;;  %v4189_v39 = vsel %vm537_vm7, %v10701_v56, 0.0 }
0x1cf9   :  { %4190 = vadd.xlane.f32.xlu1 %v4189_v39  ;;  %v4210_v36 = vpop.permute.xlu0 %4209  ;;  %v4454_v54 = vpop.permute.xlu1 %4453 }
0x1cfa   :  { %10085 = vmatpush3.msra.mxu0 %v4210_v36  ;;  %10710 = vpow2.f32 %v4429_v37 }
0x1cfb   :  { %10086 = vmatprep.subr.mxu0 %v11096_v48 }
0x1cfc   :  { %10087 = vmatpush3.msra.mxu0 %v4208_v43 }
0x1cfd   :  { %10112 = vmatprep.subr.mxu0 %v11096_v48 }
0x1cff   :  { %v10703_v34 = vpop.eup %10702 }
0x1d00   :  { %v4434_v47 = vsel %vm537_vm7, %v10703_v34, 0.0  ;;  %v10705_v17 = vpop.eup %10704 }
0x1d01   :  { %4435 = vadd.xlane.f32.xlu1 %v4434_v47  ;;  %v4195_v51 = vsel %vm544_vm8, %v10705_v17, 0.0 }
0x1d03   :  { %v10707_v21 = vpop.eup %10706 }
0x1d04   :  { %v4431_v46 = vsel %vm537_vm7, %v10707_v21, 0.0  ;;  %v10709_v33 = vpop.eup %10708 }
0x1d05   :  { %4432 = vadd.xlane.f32.xlu0 %v4431_v46  ;;  %4196 = vadd.xlane.f32.xlu1 %v4195_v51  ;;  %v4192_v52 = vsel %vm537_vm7, %v10709_v33, 0.0 }
0x1d07   :  { %v10711_v53 = vpop.eup %10710 }
0x1d08   :  { %v4437_v41 = vsel %vm544_vm8, %v10711_v53, 0.0 }
0x1d09   :  { %4193 = vadd.xlane.f32.xlu0 %v4192_v52 }
0x1d0d   :  { %4438 = vadd.xlane.f32.xlu0 %v4437_v41 }
0x1d16   :  { %4451 = vrot.lane.b32.xlu1 %v12436_v6, %s14167_s1 }
0x1d1a   :  { %4736 = vrot.lane.b32.xlu1 %v12442_v12, %s14168_s11 }
0x1d1e   :  { %4732 = vrot.lane.b32.xlu1 %v12440_v4, %s14168_s11 }
0x1d22   :  { %4728 = vrot.lane.b32.xlu1 %v12436_v6, %s14169_s8 }
0x1d23   :  { %4449 = vrot.lane.b32.xlu0 %v12440_v4, %s14167_s1 }
0x1d27   :  { %4734 = vrot.lane.b32.xlu0 %v12436_v6, %s14168_s11 }
0x1d2b   :  { %4726 = vrot.lane.b32.xlu0 %v12440_v4, %s14169_s8 }
0x1d2f   :  { %4730 = vrot.lane.b32.xlu0 %v12442_v12, %s14169_s8 }
0x1d82   :  { %v4191_v55 = vpop.xlane.xlu1 %4190 }
0x1d83   :  { %10712 = vrcp.f32 %v4191_v55 }
0x1d8a   :  { %v4436_v57 = vpop.xlane.xlu1 %4435 }
0x1d8e   :  { %v4433_v58 = vpop.xlane.xlu0 %4432  ;;  %v4197_v59 = vpop.xlane.xlu1 %4196 }
0x1d90   :  { %v10713_v3 = vpop.eup %10712 }
0x1d91   :  { %v4204_v11 = vmul.f32 %v10713_v3, %v10701_v56 }
0x1d92   :  { %v4194_v60 = vpop.xlane.xlu0 %4193  ;;  %v4452_v19 = vpop.permute.xlu1 %4451 }
0x1d93   :  { %10714 = vrcp.f32 %v4194_v60  ;;  %10089 = vmatmul.mubr.msk.f32.vlgmr.msra.gmra.mxu0 %vm537_vm7, %v4204_v11 }
0x1d94   :  { %10113 = vmatpush3.msk.msra.mxu0 %vm222_vm3, %v4454_v54  ;;  %10091 = vmatprep.mubr.msk.f32.mxu0 %vm11097_vm5, %v11096_v48  ;;  %10716 = vrcp.f32 %v4197_v59 }
0x1d95   :  { %10114 = vmatprep.subr.mxu0 %v11096_v48  ;;  %10718 = vrcp.f32 %v4433_v58 }
0x1d96   :  { %10115 = vmatpush3.msra.mxu0 %v4452_v19  ;;  %v4439_v9 = vpop.xlane.xlu0 %4438  ;;  %10720 = vrcp.f32 %v4436_v57  ;;  %v4737_v32 = vpop.permute.xlu1 %4736 }
0x1d97   :  { %10116 = vmatprep.subr.mxu0 %v11096_v48  ;;  %10722 = vrcp.f32 %v4439_v9 }
0x1d9a   :  { %v4450_v14 = vpop.permute.xlu0 %4449  ;;  %v4733_v37 = vpop.permute.xlu1 %4732 }
0x1d9b   :  { %10117 = vmatpush3.msra.mxu0 %v4450_v14 }
0x1d9c   :  { %10138 = vmatprep.subr.mxu0 %v11096_v48 }
0x1d9e   :  { %v4735_v1 = vpop.permute.xlu0 %4734  ;;  %v4729_v43 = vpop.permute.xlu1 %4728 }
0x1da0   :  { %v10715_v5 = vpop.eup %10714 }
0x1da1   :  { %v4205_v42 = vmul.f32 %v10715_v5, %v10709_v33  ;;  %v10717_v10 = vpop.eup %10716 }
0x1da2   :  { %v4206_v28 = vmul.f32 %v10717_v10, %v10705_v17  ;;  %v10719_v62 = vpop.eup %10718  ;;  %v4727_v36 = vpop.permute.xlu0 %4726 }
0x1da3   :  { %10092 = vmatmul.mubr.msk.f32.gmra.mxu0 %vm537_vm7, %v4205_v42  ;;  %v4446_v50 = vmul.f32 %v10719_v62, %v10707_v21  ;;  %v10721_v0 = vpop.eup %10720 }
0x1da4   :  { %10094 = vmatprep.mubr.msk.f32.mxu0 %vm11097_vm5, %v11096_v48  ;;  %v4447_v38 = vmul.f32 %v10721_v0, %v10703_v34  ;;  %v10723_v40 = vpop.eup %10722 }
0x1da5   :  { %v4448_v35 = vmul.f32 %v10723_v40, %v10711_v53 }
0x1da6   :  { %v4731_v34 = vpop.permute.xlu0 %4730 }
0x1da7   :  { %10095 = vmatmul.mubr.msk.f32.gmra.mxu0 %vm537_vm7, %v4206_v28 }
0x1da8   :  { %10118 = vmatprep.mubr.msk.f32.mxu0 %vm11097_vm5, %v11096_v48 }
0x1dab   :  { %10119 = vmatmul.mubr.msk.f32.vlgmr.msra.gmra.mxu0 %vm537_vm7, %v4446_v50 }
0x1dac   :  { %10121 = vmatprep.mubr.msk.f32.mxu0 %vm11097_vm5, %v11096_v48  ;;  %10139 = vmatpush3.msra.mxu0 %v8997_v18 }
0x1dad   :  { %10164 = vmatprep.subr.mxu0 %v11096_v48 }
0x1daf   :  { %10122 = vmatmul.mubr.msk.f32.gmra.mxu0 %vm537_vm7, %v4447_v38 }
0x1db0   :  { %10124 = vmatprep.mubr.msk.f32.mxu0 %vm11097_vm5, %v11096_v48 }
0x1db3   :  { %10125 = vmatmul.mubr.msk.f32.gmra.mxu0 %vm537_vm7, %v4448_v35 }
0x1db4   :  { %10140 = vmatprep.mubr.msk.f32.mxu0 %vm11097_vm5, %v11096_v48 }
0x1e53   :  { %v4292_v25 = vpop.f32.mrf.mxu0 }
0x1e54   :  { %10141 = vmatmul.mubr.msk.f32.vlgmr.msra.gmra.mxu0 %vm441_vm6, %v4292_v25 }
0x1e55   :  { %v10090_v29 = vpop.f32.mrf.mxu0  ;;  %10143 = vmatprep.mubr.msk.f32.mxu0 %vm11097_vm5, %v11096_v48 }
0x1e63   :  { %v4297_v49 = vpop.f32.mrf.mxu0 }
0x1e64   :  { %10144 = vmatmul.mubr.msk.f32.gmra.mxu0 %vm441_vm6, %v4297_v49 }
0x1e65   :  { %v10093_v26 = vpop.f32.mrf.mxu0  ;;  %10146 = vmatprep.mubr.msk.f32.mxu0 %vm11097_vm5, %v11096_v48 }
0x1e67   :  { %v4302_v27 = vpop.f32.mrf.mxu0 }
0x1e68   :  { %10147 = vmatmul.mubr.msk.f32.gmra.mxu0 %vm441_vm6, %v4302_v27 }
0x1e69   :  { %v10096_v31 = vpop.f32.mrf.mxu0  ;;  %10170 = vmatprep.mubr.msk.f32.mxu0 %vm11097_vm5, %v11096_v48 }
0x1e6b   :  { %v4534_v63 = vpop.f32.mrf.mxu0 }
0x1e6c   :  { %10130 = vmatmul.mubr.msk.f32.vlgmr.msra.gmra.mxu1 %vm441_vm6, %v4534_v63 }
0x1e6d   :  { %10150 = vmatpush3.xpose.msk.msra.mxu1 %vm441_vm6, %v4737_v32  ;;  %v10120_v8 = vpop.f32.mrf.mxu0  ;;  %10132 = vmatprep.mubr.msk.f32.mxu1 %vm11097_vm5, %v11096_v48 }
0x1e6e   :  { %10151 = vmatprep.subr.mxu1 %v11096_v48 }
0x1e6f   :  { %v4539_v24 = vpop.f32.mrf.mxu0 }
0x1e70   :  { %10133 = vmatmul.mubr.msk.f32.gmra.mxu1 %vm441_vm6, %v4539_v24 }
0x1e71   :  { %10152 = vmatpush3.xpose.msk.msra.mxu1 %vm441_vm6, %v4735_v1  ;;  %v10123_v20 = vpop.f32.mrf.mxu0  ;;  %10135 = vmatprep.mubr.msk.f32.mxu1 %vm11097_vm5, %v11096_v48 }
0x1e72   :  { %10153 = vmatprep.subr.mxu1 %v11096_v48 }
0x1e73   :  { %v4544_v56 = vpop.f32.mrf.mxu0 }
0x1e74   :  { %10136 = vmatmul.mubr.msk.f32.gmra.mxu1 %vm441_vm6, %v4544_v56 }
0x1e75   :  { %10154 = vmatpush3.xpose.msk.msra.mxu1 %vm441_vm6, %v4733_v37  ;;  %v10126_v39 = vpop.f32.mrf.mxu0  ;;  %10155 = vmatprep.mubr.msk.f32.mxu1 %vm11097_vm5, %v11096_v48 }
0x1e76   :  { %10179 = vmatprep.subr.mxu1 %v11096_v48 }
0x1e78   :  { %10156 = vmatmul.mubr.msk.f32.vlgmr.msra.gmra.mxu1 %vm441_vm6, %v4727_v36 }
0x1e79   :  { %10158 = vmatprep.mubr.msk.f32.mxu1 %vm11097_vm5, %v11096_v48 }
0x1e7c   :  { %10159 = vmatmul.mubr.msk.f32.gmra.mxu1 %vm441_vm6, %v4729_v43 }
0x1e7d   :  { %10161 = vmatprep.mubr.msk.f32.mxu1 %vm11097_vm5, %v11096_v48 }
0x1e80   :  { %10162 = vmatmul.mubr.msk.f32.gmra.mxu1 %vm441_vm6, %v4731_v34 }
0x1e81   :  { %10181 = vmatprep.mubr.msk.f32.mxu1 %vm11097_vm5, %v11096_v48 }
0x1f14   :  { %v4712_v47 = vpop.f32.mrf.mxu0 }
0x1f16   :  { %v10142_v17 = vpop.f32.mrf.mxu0 }
0x1f24   :  { %v4717_v21 = vpop.f32.mrf.mxu0 }
0x1f26   :  { %v10145_v46 = vpop.f32.mrf.mxu0 }
0x1f28   :  { %v4722_v33 = vpop.f32.mrf.mxu0 }
0x1f2a   :  { %v10148_v51 = vpop.f32.mrf.mxu0 }
0x1f2c   :  { %v4623_v52 = vpop.f32.mrf.mxu1 }
0x1f2d   :  { %v12617_v53 = vadd.f32 %v4712_v47, %v4623_v52 }
0x1f2e   :  { %v10131_v41 = vpop.f32.mrf.mxu1 }
0x1f30   :  { %v4628_v54 = vpop.f32.mrf.mxu1 }
0x1f31   :  { %v12619_v55 = vadd.f32 %v4717_v21, %v4628_v54 }
0x1f32   :  { %v10134_v57 = vpop.f32.mrf.mxu1 }
0x1f34   :  { %v4633_v58 = vpop.f32.mrf.mxu1 }
0x1f35   :  { %v12621_v59 = vadd.f32 %v4722_v33, %v4633_v58  ;;  %v8999_v58 = vld [vmem:[%s14160_s28 + $0x30] sm:$0xff] }
0x1f36   :  { %v10137_v3 = vpop.f32.mrf.mxu1  ;;  %10180 = vmatpush3.msra.mxu1 %v8999_v58 }
0x1f37   :  { %10205 = vmatprep.subr.mxu1 %v11096_v48 }
0x1f38   :  { %v4816_v11 = vpop.f32.mrf.mxu1 }
0x1f39   :  { %v4830_v60 = vmul.f32 0.35355338, %v4816_v11 }
0x1f3a   :  { %v10157_v19 = vpop.f32.mrf.mxu1 }
0x1f3b   :  { %v4833_v9 = vsel %vm537_vm7, %v4830_v60, -inf }
0x1f3c   :  { %4834 = vmax.xlane.f32.xlu1 %v4833_v9  ;;  %v4821_v14 = vpop.f32.mrf.mxu1 }
0x1f3d   :  { %v4831_v5 = vmul.f32 0.35355338, %v4821_v14 }
0x1f3e   :  { %v10160_v42 = vpop.f32.mrf.mxu1 }
0x1f3f   :  { %v4836_v10 = vsel %vm537_vm7, %v4831_v5, -inf }
0x1f40   :  { %4837 = vmax.xlane.f32.xlu0 %v4836_v10  ;;  %v4826_v28 = vpop.f32.mrf.mxu1 }
0x1f41   :  { %v4832_v62 = vmul.f32 0.35355338, %v4826_v28 }
0x1f42   :  { %v10163_v50 = vpop.f32.mrf.mxu1 }
0x1f43   :  { %v4839_v0 = vsel %vm544_vm8, %v4832_v62, -inf }
0x1f44   :  { %4840 = vmax.xlane.f32.xlu0 %v4839_v0 }
0x1f4d   :  { %4873 = vrot.lane.b32.xlu1 %v12442_v12, %s14170_s27 }
0x1f51   :  { %4869 = vrot.lane.b32.xlu1 %v12440_v4, %s14170_s27 }
0x1f55   :  { %5070 = vrot.lane.b32.xlu1 %v12442_v12, %s14171_s4 }
0x1f59   :  { %5068 = vrot.lane.b32.xlu1 %v12436_v6, %s14171_s4 }
0x1fc5   :  { %v4835_v38 = vpop.xlane.xlu1 %4834 }
0x1fc6   :  { %v4842_v40 = vsub.f32 %v4830_v60, %v4835_v38 }
0x1fc8   :  { %v4845_v35 = vmul.f32 1.442695, %v4842_v40 }
0x1fc9   :  { %v4874_v18 = vpop.permute.xlu1 %4873  ;;  %v4838_v13 = vpop.xlane.xlu0 %4837 }
0x1fca   :  { %10724 = vpow2.f32 %v4845_v35  ;;  %v4843_v25 = vsub.f32 %v4831_v5, %v4838_v13  ;;  %10165 = vmatpush3.msk.msra.mxu0 %vm222_vm3, %v4874_v18 }
0x1fcb   :  { %10166 = vmatprep.subr.mxu0 %v11096_v48 }
0x1fcc   :  { %v4847_v29 = vmul.f32 1.442695, %v4843_v25 }
0x1fcd   :  { %v4841_v63 = vpop.xlane.xlu0 %4840  ;;  %v4870_v20 = vpop.permute.xlu1 %4869 }
0x1fce   :  { %10726 = vpow2.f32 %v4847_v29  ;;  %v4844_v32 = vsub.f32 %v4832_v62, %v4841_v63 }
0x1fd0   :  { %v4849_v8 = vmul.f32 1.442695, %v4844_v32 }
0x1fd1   :  { %v5071_v56 = vpop.permute.xlu1 %5070 }
0x1fd2   :  { %10728 = vpow2.f32 %v4849_v8 }
0x1fd5   :  { %v5069_v37 = vpop.permute.xlu1 %5068 }
0x1fd7   :  { %v10725_v49 = vpop.eup %10724 }
0x1fd8   :  { %v4851_v26 = vsel %vm537_vm7, %v10725_v49, 0.0 }
0x1fd9   :  { %4852 = vadd.xlane.f32.xlu0 %v4851_v26 }
0x1fdb   :  { %v10727_v27 = vpop.eup %10726 }
0x1fdc   :  { %v4854_v31 = vsel %vm537_vm7, %v10727_v27, 0.0 }
0x1fdd   :  { %4855 = vadd.xlane.f32.xlu1 %v4854_v31 }
0x1fdf   :  { %v10729_v24 = vpop.eup %10728 }
0x1fe0   :  { %v4857_v1 = vsel %vm544_vm8, %v10729_v24, 0.0 }
0x1fee   :  { %5060 = vrot.lane.b32.xlu1 %v12440_v4, %s14172_s26 }
0x1fef   :  { %4871 = vrot.lane.b32.xlu0 %v12436_v6, %s14170_s27 }
0x1ff2   :  { %5064 = vrot.lane.b32.xlu1 %v12442_v12, %s14172_s26 }
0x200e   :  { %4858 = vadd.xlane.f32.xlu0 %v4857_v1 }
0x2024   :  { %5066 = vrot.lane.b32.xlu0 %v12440_v4, %s14171_s4 }
0x2028   :  { %5062 = vrot.lane.b32.xlu0 %v12436_v6, %s14172_s26 }
0x2062   :  { %v4853_v39 = vpop.xlane.xlu0 %4852 }
0x2063   :  { %10730 = vrcp.f32 %v4853_v39 }
0x2066   :  { %v4856_v36 = vpop.xlane.xlu1 %4855  ;;  %v4872_v43 = vpop.permute.xlu0 %4871 }
0x2067   :  { %10732 = vrcp.f32 %v4856_v36  ;;  %10167 = vmatpush3.msra.mxu0 %v4872_v43 }
0x2068   :  { %10168 = vmatprep.subr.mxu0 %v11096_v48 }
0x2069   :  { %10169 = vmatpush3.msra.mxu0 %v4870_v20 }
0x206a   :  { %10190 = vmatprep.subr.mxu0 %v11096_v48  ;;  %v5061_v41 = vpop.permute.xlu1 %5060 }
0x206e   :  { %v5065_v57 = vpop.permute.xlu1 %5064 }
0x2070   :  { %v10731_v34 = vpop.eup %10730 }
0x2071   :  { %v4866_v47 = vmul.f32 %v10731_v34, %v10725_v49 }
0x2073   :  { %10171 = vmatmul.mubr.msk.f32.vlgmr.msra.gmra.mxu0 %vm537_vm7, %v4866_v47 }
0x2074   :  { %v10733_v17 = vpop.eup %10732  ;;  %10191 = vmatpush3.xpose.msk.msra.mxu0 %vm441_vm6, %v5071_v56  ;;  %10173 = vmatprep.mubr.msk.f32.mxu0 %vm11097_vm5, %v11096_v48 }
0x2075   :  { %10192 = vmatprep.subr.mxu0 %v11096_v48  ;;  %v4867_v21 = vmul.f32 %v10733_v17, %v10727_v27 }
0x2077   :  { %10174 = vmatmul.mubr.msk.f32.gmra.mxu0 %vm537_vm7, %v4867_v21 }
0x2078   :  { %10193 = vmatpush3.xpose.msk.msra.mxu0 %vm441_vm6, %v5069_v37  ;;  %10176 = vmatprep.mubr.msk.f32.mxu0 %vm11097_vm5, %v11096_v48 }
0x2079   :  { %10194 = vmatprep.subr.mxu0 %v11096_v48 }
0x2097   :  { %v4859_v46 = vpop.xlane.xlu0 %4858 }
0x2098   :  { %10734 = vrcp.f32 %v4859_v46  ;;  %v9000_v46 = vld [vmem:[%s14160_s28 + $0x38] sm:$0xff] }
0x209b   :  { %v5067_v33 = vpop.permute.xlu0 %5066 }
0x209c   :  { %10195 = vmatpush3.xpose.msk.msra.mxu0 %vm441_vm6, %v5067_v33 }
0x209d   :  { %10220 = vmatprep.subr.mxu0 %v11096_v48 }
0x209f   :  { %v5063_v54 = vpop.permute.xlu0 %5062 }
0x20a5   :  { %v10735_v51 = vpop.eup %10734 }
0x20a6   :  { %v4868_v52 = vmul.f32 %v10735_v51, %v10729_v24 }
0x20a8   :  { %10177 = vmatmul.mubr.msk.f32.gmra.mxu0 %vm537_vm7, %v4868_v52 }
0x20a9   :  { %10196 = vmatprep.mubr.msk.f32.mxu0 %vm11097_vm5, %v11096_v48 }
0x20ac   :  { %10197 = vmatmul.mubr.msk.f32.vlgmr.msra.gmra.mxu0 %vm441_vm6, %v5061_v41 }
0x20ad   :  { %10199 = vmatprep.mubr.msk.f32.mxu0 %vm11097_vm5, %v11096_v48  ;;  %10221 = vmatpush3.msra.mxu0 %v9000_v46 }
0x20ae   :  { %10248 = vmatprep.subr.mxu0 %v11096_v48 }
0x20b0   :  { %10200 = vmatmul.mubr.msk.f32.gmra.mxu0 %vm441_vm6, %v5063_v54 }
0x20b1   :  { %10202 = vmatprep.mubr.msk.f32.mxu0 %vm11097_vm5, %v11096_v48 }
0x20b4   :  { %10203 = vmatmul.mubr.msk.f32.gmra.mxu0 %vm441_vm6, %v5065_v57 }
0x20b5   :  { %10222 = vmatprep.mubr.msk.f32.mxu0 %vm11097_vm5, %v11096_v48 }
0x2133   :  { %v4954_v3 = vpop.f32.mrf.mxu0 }
0x2134   :  { %10182 = vmatmul.mubr.msk.f32.vlgmr.msra.gmra.mxu1 %vm441_vm6, %v4954_v3 }
0x2135   :  { %v10172_v11 = vpop.f32.mrf.mxu0  ;;  %10184 = vmatprep.mubr.msk.f32.mxu1 %vm11097_vm5, %v11096_v48 }
0x2137   :  { %v4959_v60 = vpop.f32.mrf.mxu0 }
0x2138   :  { %10185 = vmatmul.mubr.msk.f32.gmra.mxu1 %vm441_vm6, %v4959_v60 }
0x2139   :  { %v10175_v19 = vpop.f32.mrf.mxu0  ;;  %10187 = vmatprep.mubr.msk.f32.mxu1 %vm11097_vm5, %v11096_v48 }
0x2168   :  { %v4964_v9 = vpop.f32.mrf.mxu0 }
0x2169   :  { %10188 = vmatmul.mubr.msk.f32.gmra.mxu1 %vm441_vm6, %v4964_v9 }
0x216a   :  { %v10178_v14 = vpop.f32.mrf.mxu0  ;;  %10211 = vmatprep.mubr.msk.f32.mxu1 %vm11097_vm5, %v11096_v48 }
0x216c   :  { %v5150_v5 = vpop.f32.mrf.mxu0 }
0x216d   :  { %v5164_v42 = vmul.f32 0.35355338, %v5150_v5 }
0x216e   :  { %v10198_v10 = vpop.f32.mrf.mxu0 }
0x216f   :  { %v5167_v28 = vsel %vm537_vm7, %v5164_v42, -inf }
0x2170   :  { %5168 = vmax.xlane.f32.xlu0 %v5167_v28  ;;  %v5155_v62 = vpop.f32.mrf.mxu0 }
0x2171   :  { %v5165_v50 = vmul.f32 0.35355338, %v5155_v62  ;;  %v9084_v62 = vld [vmem:[%s14161_s29 + $0x1] ss:$0 sm:$0xff] }
0x2172   :  { %v10201_v0 = vpop.f32.mrf.mxu0 }
0x2173   :  { %v5170_v38 = vsel %vm537_vm7, %v5165_v50, -inf  ;;  %v3862_v0 = vadd.f32 %v12510_v45, %v12312_v7 }
0x2174   :  { %5171 = vmax.xlane.f32.xlu1 %v5170_v38  ;;  %v5160_v40 = vpop.f32.mrf.mxu0 }
0x2175   :  { %v5166_v35 = vmul.f32 0.35355338, %v5160_v40 }
0x2176   :  { %v10204_v18 = vpop.f32.mrf.mxu0 }
0x2177   :  { %v5173_v13 = vsel %vm544_vm8, %v5166_v35, -inf }
0x2178   :  { %5174 = vmax.xlane.f32.xlu0 %v5173_v13 }
0x2185   :  { %5205 = vrot.lane.b32.xlu1 %v12436_v6, %s14173_s22 }
0x21f4   :  { %v5043_v25 = vpop.f32.mrf.mxu1 }
0x21f5   :  { %v12694_v29 = vadd.f32 %v5043_v25, %v12617_v53  ;;  %v11036_v25 = vld [vmem:[%s14080_s16] ss:$0 sm:$0xff] }
0x21f6   :  { %v10183_v49 = vpop.f32.mrf.mxu1 }
0x21f8   :  { %v5048_v26 = vpop.f32.mrf.mxu1 }
0x21f9   :  { %v12697_v27 = vadd.f32 %v5048_v26, %v12619_v55  ;;  %v5169_v31 = vpop.xlane.xlu0 %5168 }
0x21fa   :  { %v5176_v63 = vsub.f32 %v5164_v42, %v5169_v31  ;;  %v10186_v32 = vpop.f32.mrf.mxu1 }
0x21fc   :  { %v5179_v8 = vmul.f32 1.442695, %v5176_v63 }
0x21fd   :  { %v5172_v24 = vpop.xlane.xlu1 %5171 }
0x21fe   :  { %10736 = vpow2.f32 %v5179_v8  ;;  %v5177_v1 = vsub.f32 %v5165_v50, %v5172_v24 }
0x2200   :  { %v5181_v20 = vmul.f32 1.442695, %v5177_v1  ;;  %v3863_v1 = vadd.f32 %v12512_v30, %v12324_v2 }
0x2201   :  { %v5175_v56 = vpop.xlane.xlu0 %5174  ;;  %v5206_v51 = vpop.permute.xlu1 %5205 }
0x2202   :  { %10738 = vpow2.f32 %v5181_v20  ;;  %v5178_v6 = vsub.f32 %v5166_v35, %v5175_v56 }
0x2204   :  { %v5183_v37 = vmul.f32 1.442695, %v5178_v6 }
0x2206   :  { %10740 = vpow2.f32 %v5183_v37 }
0x220b   :  { %v10737_v53 = vpop.eup %10736 }
0x220c   :  { %v5185_v39 = vsel %vm537_vm7, %v10737_v53, 0.0 }
0x220d   :  { %5186 = vadd.xlane.f32.xlu0 %v5185_v39 }
0x220f   :  { %v10739_v36 = vpop.eup %10738 }
0x2210   :  { %v5188_v55 = vsel %vm537_vm7, %v10739_v36, 0.0 }
0x2211   :  { %5189 = vadd.xlane.f32.xlu0 %v5188_v55 }
0x2213   :  { %v10741_v43 = vpop.eup %10740 }
0x2214   :  { %v5191_v34 = vsel %vm544_vm8, %v10741_v43, 0.0 }
0x2215   :  { %5192 = vadd.xlane.f32.xlu1 %v5191_v34 }
0x2226   :  { %5203 = vrot.lane.b32.xlu1 %v12440_v4, %s14173_s22 }
0x2227   :  { %5207 = vrot.lane.b32.xlu0 %v12442_v12, %s14173_s22 }
0x2229   :  { %v5053_v47 = vpop.f32.mrf.mxu1 }
0x222a   :  { %v5059_v17 = vadd.f32 %v5053_v47, %v12621_v59 }
0x222b   :  { %v10189_v21 = vpop.f32.mrf.mxu1 }
0x2296   :  { %v5187_v33 = vpop.xlane.xlu0 %5186 }
0x2297   :  { %10742 = vrcp.f32 %v5187_v33 }
0x229a   :  { %v5190_v52 = vpop.xlane.xlu0 %5189 }
0x229b   :  { %10744 = vrcp.f32 %v5190_v52 }
0x229e   :  { %v5193_v4 = vpop.xlane.xlu1 %5192  ;;  %v5208_v41 = vpop.permute.xlu0 %5207 }
0x229f   :  { %10746 = vrcp.f32 %v5193_v4  ;;  %10206 = vmatpush3.msk.msra.mxu1 %vm222_vm3, %v5208_v41 }
0x22a0   :  { %10207 = vmatprep.subr.mxu1 %v11096_v48 }
0x22a1   :  { %10208 = vmatpush3.msra.mxu1 %v5206_v51 }
0x22a2   :  { %v5204_v12 = vpop.permute.xlu1 %5203  ;;  %10209 = vmatprep.subr.mxu1 %v11096_v48 }
0x22a3   :  { %10210 = vmatpush3.msra.mxu1 %v5204_v12 }
0x22a4   :  { %v10743_v59 = vpop.eup %10742  ;;  %10231 = vmatprep.subr.mxu1 %v11096_v48 }
0x22a5   :  { %v5200_v54 = vmul.f32 %v10743_v59, %v10737_v53 }
0x22a7   :  { %10212 = vmatmul.mubr.msk.f32.vlgmr.msra.gmra.mxu1 %vm537_vm7, %v5200_v54 }
0x22a8   :  { %v10745_v57 = vpop.eup %10744  ;;  %10214 = vmatprep.mubr.msk.f32.mxu1 %vm11097_vm5, %v11096_v48 }
0x22a9   :  { %v5201_v58 = vmul.f32 %v10745_v57, %v10739_v36 }
0x22ab   :  { %10215 = vmatmul.mubr.msk.f32.gmra.mxu1 %vm537_vm7, %v5201_v58 }
0x22ac   :  { %v10747_v3 = vpop.eup %10746  ;;  %10217 = vmatprep.mubr.msk.f32.mxu1 %vm11097_vm5, %v11096_v48 }
0x22ad   :  { %v5202_v11 = vmul.f32 %v10747_v3, %v10741_v43 }
0x22af   :  { %10218 = vmatmul.mubr.msk.f32.gmra.mxu1 %vm537_vm7, %v5202_v11 }
0x22b0   :  { %10239 = vmatprep.mubr.msk.f32.mxu1 %vm11097_vm5, %v11096_v48 }
0x2367   :  { %v5288_v60 = vpop.f32.mrf.mxu1 }
0x2368   :  { %10223 = vmatmul.mubr.msk.f32.vlgmr.msra.gmra.mxu0 %vm441_vm6, %v5288_v60 }
0x2369   :  { %v10213_v19 = vpop.f32.mrf.mxu1  ;;  %10225 = vmatprep.mubr.msk.f32.mxu0 %vm11097_vm5, %v11096_v48 }
0x236b   :  { %v5293_v9 = vpop.f32.mrf.mxu1 }
0x236c   :  { %10226 = vmatmul.mubr.msk.f32.gmra.mxu0 %vm441_vm6, %v5293_v9 }
0x236d   :  { %v10216_v14 = vpop.f32.mrf.mxu1  ;;  %10228 = vmatprep.mubr.msk.f32.mxu0 %vm11097_vm5, %v11096_v48 }
0x236e   :  { %v9007_v14 = vld [vmem:[%s14077_s13 + $0x38] sm:$0xff] }
0x236f   :  { %v5298_v5 = vpop.f32.mrf.mxu1  ;;  %10232 = vmatpush3.msra.mxu1 %v9007_v14  ;;  %v9022_v14 = vld [vmem:[%s14079_s15 + $0xe8] sm:$0xff] }
0x2370   :  { %10229 = vmatmul.mubr.msk.f32.gmra.mxu0 %vm441_vm6, %v5298_v5  ;;  %10233 = vmatprep.subr.mxu1 %v11096_v48  ;;  %v9006_v5 = vld [vmem:[%s14077_s13 + $0x30] sm:$0xff] }
0x2371   :  { %v10219_v42 = vpop.f32.mrf.mxu1  ;;  %10280 = vmatprep.mubr.msk.f32.mxu0 %vm11097_vm5, %v11096_v48  ;;  %10234 = vmatpush3.msra.mxu1 %v9006_v5  ;;  %v9021_v5 = vld [vmem:[%s14079_s15 + $0xe0] sm:$0xff] }
0x2372   :  { %10235 = vmatprep.subr.mxu1 %v11096_v48  ;;  %v9005_v42 = vld [vmem:[%s14077_s13 + $0x28] sm:$0xff] }
0x2373   :  { %10236 = vmatpush3.msra.mxu1 %v9005_v42  ;;  %v9020_v42 = vld [vmem:[%s14079_s15 + $0xd8] sm:$0xff] }
0x2374   :  { %10237 = vmatprep.subr.mxu1 %v11096_v48 }
0x2428   :  { %v5377_v10 = vpop.f32.mrf.mxu0 }
0x2429   :  { %v5391_v28 = vadd.f32 %v5377_v10, %v12694_v29  ;;  %v12746_v29 = vadd.f32 %v11036_v25, %v3862_v0  ;;  %v9004_v10 = vld [vmem:[%s14077_s13 + $0x20] sm:$0xff] }
0x242a   :  { %v10224_v50 = vpop.f32.mrf.mxu0  ;;  %10238 = vmatpush3.msra.mxu1 %v9004_v10  ;;  %v9019_v10 = vld [vmem:[%s14079_s15 + $0xd0] sm:$0xff] }
0x242b   :  { %v5394_v38 = vadd.f32 %v5391_v28, %v12305_v16  ;;  %v5734_v32 = vsel %vm277_vm4, %v12746_v29, 0.0  ;;  %10289 = vmatprep.subr.mxu1 %v11096_v48 }
0x242c   :  { %v5382_v40 = vpop.f32.mrf.mxu0 }
0x242d   :  { %v12740_v35 = vadd.f32 %v9084_v62, %v5394_v38  ;;  %v5392_v18 = vadd.f32 %v5382_v40, %v12697_v27  ;;  %v3861_v27 = vadd.f32 %v12508_v44, %v12302_v61 }
0x242e   :  { %v10227_v13 = vpop.f32.mrf.mxu0 }
0x242f   :  { %v5395_v49 = vadd.f32 %v5392_v18, %v12326_v23  ;;  %v5406_v26 = vsel %vm277_vm4, %v12740_v35, 0.0  ;;  %v12762_v24 = vadd.f32 %v11036_v25, %v3861_v27 }
0x2430   :  { %5407 = vadd.xlane.f32.xlu1 %v5406_v26  ;;  %v5387_v7 = vpop.f32.mrf.mxu0 }
0x2431   :  { %v12751_v16 = vadd.f32 %v9084_v62, %v5395_v49  ;;  %v5393_v45 = vadd.f32 %v5387_v7, %v5059_v17  ;;  %v5731_v44 = vsel %vm277_vm4, %v12762_v24, 0.0 }
0x2432   :  { %v10230_v31 = vpop.f32.mrf.mxu0 }
0x2433   :  { %v5396_v63 = vadd.f32 %v5393_v45, %v12317_v15  ;;  %v5409_v23 = vsel %vm277_vm4, %v12751_v16, 0.0  ;;  %v12768_v15 = vadd.f32 %v11036_v25, %v3863_v1  ;;  %v9085_v1 = vld [vmem:[%s14162_s0 + $0x1] ss:$0 sm:$0xff] }
0x2434   :  { %5735 = vadd.xlane.f32.xlu1 %v5734_v32  ;;  %5410 = vadd.xlane.f32.xlu0 %v5409_v23 }
0x2435   :  { %v12760_v8 = vadd.f32 %v9084_v62, %v5396_v63  ;;  %v5737_v20 = vsel %vm284_vm2, %v12768_v15, 0.0 }
0x2437   :  { %v5412_v61 = vsel %vm284_vm2, %v12760_v8, 0.0 }
0x2438   :  { %5413 = vadd.xlane.f32.xlu0 %v5412_v61 }
0x243c   :  { %5732 = vadd.xlane.f32.xlu0 %v5731_v44 }
0x2440   :  { %5738 = vadd.xlane.f32.xlu0 %v5737_v20  ;;  %v9086_v20 = vld [vmem:[%s14076_s12 + $0x1] ss:$0 sm:$0xff] }
0x24b9   :  { %v5408_v56 = vpop.xlane.xlu1 %5407 }
0x24ba   :  { %v5415_v6 = vmul.f32 0.03125, %v5408_v56 }
0x24bc   :  { %v12775_v37 = vsub.f32 %v12740_v35, %v5415_v6 }
0x24bd   :  { %v5736_v2 = vpop.xlane.xlu1 %5735  ;;  %v5411_v30 = vpop.xlane.xlu0 %5410 }
0x24be   :  { %v5416_v53 = vmul.f32 0.03125, %v5411_v30  ;;  %v5421_v39 = vmul.f32 %v12775_v37, %v12775_v37  ;;  %v5741_v36 = vmul.f32 0.03125, %v5736_v2 }
0x24c0   :  { %v12780_v55 = vsub.f32 %v12751_v16, %v5416_v53  ;;  %v5424_v43 = vsel %vm277_vm4, %v5421_v39, 0.0  ;;  %v12786_v21 = vsub.f32 %v12746_v29, %v5741_v36 }
0x24c1   :  { %5425 = vadd.xlane.f32.xlu1 %v5424_v43  ;;  %v5414_v34 = vpop.xlane.xlu0 %5413 }
0x24c2   :  { %v5417_v47 = vmul.f32 0.03125, %v5414_v34  ;;  %v5422_v17 = vmul.f32 %v12780_v55, %v12780_v55  ;;  %v5747_v59 = vmul.f32 %v12786_v21, %v12786_v21 }
0x24c4   :  { %v12789_v46 = vsub.f32 %v12760_v8, %v5417_v47  ;;  %v5427_v33 = vsel %vm277_vm4, %v5422_v17, 0.0  ;;  %v5752_v11 = vsel %vm277_vm4, %v5747_v59, 0.0  ;;  %v11039_v17 = vld [vmem:[%s14156_s5 + $0x28] sm:$0xff]  ;;  %v11041_v59 = vld [vmem:[%s14157_s7 + $0x1] ss:$0 sm:$0xff]  ;;  %s11110_s7 = smov 32  }
0x24c5   :  { %5428 = vadd.xlane.f32.xlu0 %v5427_v33  ;;  %v5733_v51 = vpop.xlane.xlu0 %5732 }
0x24c6   :  { %v5740_v52 = vmul.f32 0.03125, %v5733_v51  ;;  %v5423_v4 = vmul.f32 %v12789_v46, %v12789_v46 }
0x24c8   :  { %v12795_v41 = vsub.f32 %v12762_v24, %v5740_v52  ;;  %v5430_v12 = vsel %vm284_vm2, %v5423_v4, 0.0  ;;  %v11040_v52 = vld [vmem:[%s14156_s5 + $0x20] sm:$0xff] }
0x24c9   :  { %5431 = vadd.xlane.f32.xlu1 %v5430_v12  ;;  %v5739_v54 = vpop.xlane.xlu0 %5738 }
0x24ca   :  { %v5742_v57 = vmul.f32 0.03125, %v5739_v54  ;;  %v5746_v58 = vmul.f32 %v12795_v41, %v12795_v41 }
0x24cc   :  { %v12803_v3 = vsub.f32 %v12768_v15, %v5742_v57  ;;  %v5749_v60 = vsel %vm277_vm4, %v5746_v58, 0.0 }
0x24cd   :  { %5753 = vadd.xlane.f32.xlu1 %v5752_v11  ;;  %5750 = vadd.xlane.f32.xlu0 %v5749_v60 }
0x24ce   :  { %v5748_v19 = vmul.f32 %v12803_v3, %v12803_v3 }
0x24d0   :  { %v5755_v9 = vsel %vm284_vm2, %v5748_v19, 0.0 }
0x24d1   :  { %5756 = vadd.xlane.f32.xlu0 %v5755_v9  ;;  %v9023_v9 = vld [vmem:[%s14079_s15 + $0xf0] sm:$0xff] }
0x254a   :  { %v5426_v28 = vpop.xlane.xlu1 %5425 }
0x254b   :  { %v5433_v62 = vmul.f32 0.03125, %v5426_v28  ;;  %v9018_v28 = vld [vmem:[%s14079_s15 + $0xc8] sm:$0xff] }
0x254d   :  { %v5436_v50 = vadd.f32 1e-06, %v5433_v62  ;;  %v9017_v62 = vld [vmem:[%s14079_s15 + $0xc0] sm:$0xff] }
0x254e   :  { %v5429_v0 = vpop.xlane.xlu0 %5428 }
0x254f   :  { %10748 = vrsqrt.f32 %v5436_v50  ;;  %v5434_v38 = vmul.f32 0.03125, %v5429_v0  ;;  %v9016_v50 = vld [vmem:[%s14079_s15 + $0xb8] sm:$0xff]  ;;  %v9015_v0 = vld [vmem:[%s14079_s15 + $0xb0] sm:$0xff] }
0x2551   :  { %v5437_v40 = vadd.f32 1e-06, %v5434_v38  ;;  %v9014_v38 = vld [vmem:[%s14079_s15 + $0xa8] sm:$0xff] }
0x2552   :  { %v5432_v18 = vpop.xlane.xlu1 %5431 }
0x2553   :  { %10750 = vrsqrt.f32 %v5437_v40  ;;  %v5435_v13 = vmul.f32 0.03125, %v5432_v18  ;;  %v9013_v40 = vld [vmem:[%s14079_s15 + $0xa0] sm:$0xff]  ;;  %v9012_v18 = vld [vmem:[%s14079_s15 + $0x98] sm:$0xff] }
0x2555   :  { %v5438_v25 = vadd.f32 1e-06, %v5435_v13  ;;  %v9011_v13 = vld [vmem:[%s14079_s15 + $0x90] sm:$0xff] }
0x2556   :  { %v5754_v49 = vpop.xlane.xlu1 %5753  ;;  %v5751_v26 = vpop.xlane.xlu0 %5750 }
0x2557   :  { %10752 = vrsqrt.f32 %v5438_v25  ;;  %v5759_v7 = vmul.f32 0.03125, %v5754_v49  ;;  %v5758_v45 = vmul.f32 0.03125, %v5751_v26  ;;  %v9010_v25 = vld [vmem:[%s14079_s15 + $0x88] sm:$0xff]  ;;  %v9009_v49 = vld [vmem:[%s14079_s15 + $0x80] sm:$0xff] }
0x2558   :  { %v9087_v26 = vld [vmem:[%s14078_s14 + $0x1] ss:$0 sm:$0xff] }
0x2559   :  { %v5762_v31 = vadd.f32 1e-06, %v5759_v7  ;;  %v5761_v27 = vadd.f32 1e-06, %v5758_v45 }
0x255a   :  { %v5757_v63 = vpop.xlane.xlu0 %5756 }
0x255b   :  { %10754 = vrsqrt.f32 %v5762_v31  ;;  %v5760_v32 = vmul.f32 0.03125, %v5757_v63 }
0x255c   :  { %v10749_v23 = vpop.eup %10748  ;;  %10756 = vrsqrt.f32 %v5761_v27 }
0x255d   :  { %v5442_v61 = vmul.f32 %v10749_v23, %v12775_v37  ;;  %v5763_v44 = vadd.f32 1e-06, %v5760_v32  ;;  %v11037_v37 = vld [vmem:[%s14156_s5 + $0x38] sm:$0xff] }
0x255f   :  { %v5451_v56 = vmul.f32 %v9085_v1, %v5442_v61  ;;  %10758 = vrsqrt.f32 %v5763_v44 }
0x2560   :  { %v10751_v6 = vpop.eup %10750 }
0x2561   :  { %v5460_v2 = vadd.f32 %v9086_v20, %v5451_v56  ;;  %v5443_v30 = vmul.f32 %v10751_v6, %v12780_v55  ;;  %v11038_v55 = vld [vmem:[%s14156_s5 + $0x30] sm:$0xff]  ;;  %s14183_s5 = sld [smem:[#allocation26_spill]] }
0x2563   :  { %10240 = vmatmul.mubr.msk.f32.vlgmr.msra.gmra.mxu1 %vm277_vm4, %v5460_v2  ;;  %v5452_v53 = vmul.f32 %v9085_v1, %v5443_v30 }
0x2564   :  { %v10753_v39 = vpop.eup %10752  ;;  %10242 = vmatprep.mubr.msk.f32.mxu1 %vm11097_vm5, %v11096_v48  ;;  %10290 = vmatpush3.msra.mxu1 %v11037_v37 }
0x2565   :  { %v5461_v36 = vadd.f32 %v9086_v20, %v5452_v53  ;;  %10291 = vmatprep.subr.mxu1 %v11096_v48  ;;  %v5444_v43 = vmul.f32 %v10753_v39, %v12789_v46 }
0x2566   :  { %10292 = vmatpush3.msra.mxu1 %v11038_v55 }
0x2567   :  { %10243 = vmatmul.mubr.msk.f32.gmra.mxu1 %vm277_vm4, %v5461_v36  ;;  %v5453_v34 = vmul.f32 %v9085_v1, %v5444_v43  ;;  %10293 = vmatprep.subr.mxu1 %v11096_v48 }
0x2568   :  { %v10755_v47 = vpop.eup %10754  ;;  %10245 = vmatprep.mubr.msk.f32.mxu1 %vm11097_vm5, %v11096_v48  ;;  %10294 = vmatpush3.msra.mxu1 %v11039_v17 }
0x2569   :  { %v10757_v46 = vpop.eup %10756  ;;  %v5462_v33 = vadd.f32 %v9086_v20, %v5453_v34  ;;  %10295 = vmatprep.subr.mxu1 %v11096_v48  ;;  %v5768_v4 = vmul.f32 %v10755_v47, %v12786_v21 }
0x256a   :  { %v5767_v51 = vmul.f32 %v10757_v46, %v12795_v41  ;;  %10296 = vmatpush3.msra.mxu1 %v11040_v52  ;;  %v11042_v41 = vld [vmem:[%s14158_s9 + $0x1] ss:$0 sm:$0xff] }
0x256b   :  { %10246 = vmatmul.mubr.msk.f32.gmra.mxu1 %vm277_vm4, %v5462_v33  ;;  %10306 = vmatprep.subr.mxu1 %v11096_v48  ;;  %v5771_v58 = vmul.f32 %v11041_v59, %v5768_v4  ;;  %v11043_v33 = vld [vmem:[%s14159_s10 + $0x1] ss:$0 sm:$0xff] }
0x256c   :  { %v10759_v12 = vpop.eup %10758  ;;  %v5770_v54 = vmul.f32 %v11041_v59, %v5767_v51  ;;  %10297 = vmatprep.mubr.msk.f32.mxu1 %vm11097_vm5, %v11096_v48 }
0x256d   :  { %v5769_v21 = vmul.f32 %v10759_v12, %v12803_v3  ;;  %v5774_v11 = vadd.f32 %v11042_v41, %v5771_v58  ;;  %v9024_v3 = vld [vmem:[%s14079_s15 + $0xf8] sm:$0xff] }
0x256e   :  { %v5773_v57 = vadd.f32 %v11042_v41, %v5770_v54  ;;  %10249 = vmatpush3.msra.mxu0 %v9024_v3 }
0x256f   :  { %v5772_v60 = vmul.f32 %v11041_v59, %v5769_v21  ;;  %10250 = vmatprep.subr.mxu0 %v11096_v48 }
0x2570   :  { %10298 = vmatmul.mubr.msk.f32.vlgmr.msra.gmra.mxu1 %vm277_vm4, %v5773_v57  ;;  %10251 = vmatpush3.msra.mxu0 %v9023_v9 }
0x2571   :  { %10300 = vmatprep.mubr.msk.f32.mxu1 %vm11097_vm5, %v11096_v48  ;;  %v5775_v19 = vadd.f32 %v11042_v41, %v5772_v60  ;;  %10252 = vmatprep.subr.mxu0 %v11096_v48 }
0x2572   :  { %10253 = vmatpush3.msra.mxu0 %v9022_v14 }
0x2573   :  { %10254 = vmatprep.subr.mxu0 %v11096_v48 }
0x2574   :  { %10301 = vmatmul.mubr.msk.f32.gmra.mxu1 %vm277_vm4, %v5774_v11  ;;  %10255 = vmatpush3.msra.mxu0 %v9021_v5 }
0x2575   :  { %10303 = vmatprep.mubr.msk.f32.mxu1 %vm11097_vm5, %v11096_v48  ;;  %10256 = vmatprep.subr.mxu0 %v11096_v48 }
0x2576   :  { %10257 = vmatpush3.msra.mxu0 %v9020_v42 }
0x2577   :  { %10258 = vmatprep.subr.mxu0 %v11096_v48 }
0x2578   :  { %10304 = vmatmul.mubr.msk.f32.gmra.mxu1 %vm277_vm4, %v5775_v19  ;;  %10259 = vmatpush3.msra.mxu0 %v9019_v10 }
0x2579   :  { %10312 = vmatprep.mubr.msk.f32.mxu1 %vm11097_vm5, %v11096_v48  ;;  %10260 = vmatprep.subr.mxu0 %v11096_v48 }
0x257a   :  { %10261 = vmatpush3.msra.mxu0 %v9018_v28 }
0x257b   :  { %10262 = vmatprep.subr.mxu0 %v11096_v48 }
0x257c   :  { %10263 = vmatpush3.msra.mxu0 %v9017_v62 }
0x257d   :  { %10264 = vmatprep.subr.mxu0 %v11096_v48 }
0x257e   :  { %10265 = vmatpush3.msra.mxu0 %v9016_v50 }
0x257f   :  { %10266 = vmatprep.subr.mxu0 %v11096_v48 }
0x2580   :  { %10267 = vmatpush3.msra.mxu0 %v9015_v0 }
0x2581   :  { %10268 = vmatprep.subr.mxu0 %v11096_v48 }
0x2582   :  { %10269 = vmatpush3.msra.mxu0 %v9014_v38 }
0x2583   :  { %10270 = vmatprep.subr.mxu0 %v11096_v48 }
0x2584   :  { %10271 = vmatpush3.msra.mxu0 %v9013_v40 }
0x2585   :  { %10272 = vmatprep.subr.mxu0 %v11096_v48 }
0x2586   :  { %10273 = vmatpush3.msra.mxu0 %v9012_v18 }
0x2587   :  { %10274 = vmatprep.subr.mxu0 %v11096_v48 }
0x2588   :  { %10275 = vmatpush3.msra.mxu0 %v9011_v13 }
0x2589   :  { %10276 = vmatprep.subr.mxu0 %v11096_v48 }
0x258a   :  { %10277 = vmatpush3.msra.mxu0 %v9010_v25 }
0x258b   :  { %10278 = vmatprep.subr.mxu0 %v11096_v48 }
0x258c   :  { %10279 = vmatpush3.msra.mxu0 %v9009_v49 }
0x258d   :  { %10336 = vmatprep.subr.mxu0 %v11096_v48 }
0x2623   :  { %v5544_v7 = vpop.f32.mrf.mxu1 }
0x2624   :  { %v12945_v45 = vadd.f32 %v9087_v26, %v5544_v7 }
0x2625   :  { %v10241_v31 = vpop.f32.mrf.mxu1 }
0x2626   :  { %v12948_v27 = vmul.f32 0.70710677, %v12945_v45 }
0x2627   :  { %v5549_v63 = vpop.f32.mrf.mxu1 }
0x2628   :  { %v5570_v32 = vand.u32 2147483647, %v12948_v27  ;;  %v12951_v23 = vadd.f32 %v9087_v26, %v5549_v63  ;;  %vm5564_vm15 = vcmp.ge.f32.partialorder %v12948_v27, 0.0 }
0x2629   :  { %v10244_v1 = vpop.f32.mrf.mxu1 }
0x262a   :  { %v5573_v61 = vmul.f32 0.3275911, %v5570_v32  ;;  %v12954_v44 = vmul.f32 0.70710677, %v12951_v23  ;;  %v5612_v47 = vsub.f32 0.0, %v5570_v32 }
0x262b   :  { %v5554_v20 = vpop.f32.mrf.mxu1 }
0x262c   :  { %v5576_v56 = vadd.f32 1.0, %v5573_v61  ;;  %v5571_v6 = vand.u32 2147483647, %v12954_v44  ;;  %v12957_v2 = vadd.f32 %v9087_v26, %v5554_v20  ;;  %v5615_v4 = vmul.f32 %v5612_v47, %v5570_v32 }
0x262d   :  { %v10247_v30 = vpop.f32.mrf.mxu1  ;;  %vm5565_vm0 = vcmp.ge.f32.partialorder %v12954_v44, 0.0 }
0x262e   :  { %10760 = vrcp.f32 %v5576_v56  ;;  %v5574_v53 = vmul.f32 0.3275911, %v5571_v6  ;;  %v12960_v39 = vmul.f32 0.70710677, %v12957_v2  ;;  %v5613_v12 = vsub.f32 0.0, %v5571_v6 }
0x262f   :  { %v5618_v11 = vmul.f32 1.442695, %v5615_v4 }
0x2630   :  { %v5577_v37 = vadd.f32 1.0, %v5574_v53  ;;  %v5851_v36 = vpop.f32.mrf.mxu1  ;;  %v5572_v43 = vand.u32 2147483647, %v12960_v39  ;;  %v5616_v60 = vmul.f32 %v5613_v12, %v5571_v6  ;;  %v5568_v12 = vsel %vm5565_vm0, 1.0, %v11109_v22 }
0x2631   :  { %v12970_v54 = vadd.f32 %v11043_v33, %v5851_v36  ;;  %vm5566_vm9 = vcmp.ge.f32.partialorder %v12960_v39, 0.0 }
0x2632   :  { %10762 = vrcp.f32 %v5577_v37  ;;  %v10299_v55 = vpop.f32.mrf.mxu1  ;;  %v5575_v34 = vmul.f32 0.3275911, %v5572_v43  ;;  %v5614_v19 = vsub.f32 0.0, %v5572_v43  ;;  %v5620_v42 = vmul.f32 1.442695, %v5616_v60 }
0x2633   :  { %v5559_v60 = vmul.f32 0.5, %v12951_v23 }
0x2634   :  { %v5856_v17 = vpop.f32.mrf.mxu1  ;;  %v5578_v46 = vadd.f32 1.0, %v5575_v34  ;;  %v5617_v10 = vmul.f32 %v5614_v19, %v5572_v43  ;;  %v5567_v34 = vsel %vm5564_vm15, 1.0, %v11109_v22 }
0x2635   :  { %v12966_v51 = vadd.f32 %v11043_v33, %v5856_v17 }
0x2636   :  { %v10302_v52 = vpop.f32.mrf.mxu1  ;;  %10764 = vrcp.f32 %v5578_v46  ;;  %v5622_v18 = vmul.f32 1.442695, %v5617_v10 }
0x2637   :  { %5870 = vrot.lane.b32.xlu0 %v12966_v51, %s14163_s6  ;;  %10766 = vpow2.f32 %v5618_v11  ;;  %v5558_v52 = vmul.f32 0.5, %v12945_v45 }
0x2638   :  { %v5861_v59 = vpop.f32.mrf.mxu1  ;;  %10768 = vpow2.f32 %v5620_v42 }
0x2639   :  { %v12972_v41 = vadd.f32 %v11043_v33, %v5861_v59  ;;  %10770 = vpow2.f32 %v5622_v18 }
0x263a   :  { %v10305_v57 = vpop.f32.mrf.mxu1 }
0x263b   :  { %v10761_v58 = vpop.eup %10760  ;;  %6110 = vrot.lane.b32.xlu0 %v12970_v54, %s14164_s3  ;;  %5872 = vrot.lane.b32.xlu1 %v12972_v41, %s14163_s6 }
0x263c   :  { %v5585_v21 = vmul.f32 1.0614054, %v10761_v58 }
0x263e   :  { %v5588_v3 = vadd.f32 -1.4531521, %v5585_v21 }
0x263f   :  { %v10763_v9 = vpop.eup %10762  ;;  %6106 = vrot.lane.b32.xlu0 %v12966_v51, %s14165_s2  ;;  %5868 = vrot.lane.b32.xlu1 %v12970_v54, %s14163_s6 }
0x2640   :  { %v5591_v14 = vmul.f32 %v10761_v58, %v5588_v3  ;;  %v5586_v5 = vmul.f32 1.0614054, %v10763_v9  ;;  %v5569_v3 = vsel %vm5566_vm9, 1.0, %v11109_v22 }
0x2642   :  { %v5594_v28 = vadd.f32 1.4214138, %v5591_v14  ;;  %v5589_v62 = vadd.f32 -1.4531521, %v5586_v5  ;;  %v5560_v14 = vmul.f32 0.5, %v12957_v2 }
0x2643   :  { %6114 = vrot.lane.b32.xlu1 %v12972_v41, %s14164_s3  ;;  %v10765_v50 = vpop.eup %10764 }
0x2644   :  { %v5597_v0 = vmul.f32 %v10761_v58, %v5594_v28  ;;  %v5592_v38 = vmul.f32 %v10763_v9, %v5589_v62  ;;  %v5587_v40 = vmul.f32 1.0614054, %v10765_v50  ;;  %v10767_v56 = vpop.eup %10766 }
0x2645   :  { %v10769_v55 = vpop.eup %10768 }
0x2646   :  { %v5600_v13 = vadd.f32 -0.28449672, %v5597_v0  ;;  %v5595_v25 = vadd.f32 1.4214138, %v5592_v38  ;;  %v5590_v49 = vadd.f32 -1.4531521, %v5587_v40  ;;  %v10771_v57 = vpop.eup %10770 }
0x2647   :  { %6112 = vrot.lane.b32.xlu1 %v12966_v51, %s14164_s3  ;;  %v11044_v0 = vld [vmem:[%s14160_s28 + $0x28] sm:$0xff] }
0x2648   :  { %v5603_v26 = vmul.f32 %v10761_v58, %v5600_v13  ;;  %v5598_v7 = vmul.f32 %v10763_v9, %v5595_v25  ;;  %v5593_v31 = vmul.f32 %v10765_v50, %v5590_v49 }
0x264a   :  { %v5606_v63 = vadd.f32 0.2548296, %v5603_v26  ;;  %v5601_v32 = vadd.f32 -0.28449672, %v5598_v7  ;;  %v5596_v1 = vadd.f32 1.4214138, %v5593_v31 }
0x264b   :  { %6104 = vrot.lane.b32.xlu1 %v12970_v54, %s14165_s2 }
0x264c   :  { %v5609_v61 = vmul.f32 %v10761_v58, %v5606_v63  ;;  %v5604_v20 = vmul.f32 %v10763_v9, %v5601_v32  ;;  %v5599_v6 = vmul.f32 %v10765_v50, %v5596_v1 }
0x264e   :  { %v5624_v30 = vmul.f32 %v10767_v56, %v5609_v61  ;;  %v5607_v53 = vadd.f32 0.2548296, %v5604_v20  ;;  %v5602_v37 = vadd.f32 -0.28449672, %v5599_v6 }
0x264f   :  { %6108 = vrot.lane.b32.xlu1 %v12972_v41, %s14165_s2  ;;  %s14175_s2 = sld [smem:[#allocation17_spill]] }
0x2650   :  { %v5627_v36 = vsub.f32 1.0, %v5624_v30  ;;  %v5610_v43 = vmul.f32 %v10763_v9, %v5607_v53  ;;  %v5605_v47 = vmul.f32 %v10765_v50, %v5602_v37 }
0x2652   :  { %v5630_v17 = vmul.f32 %v5627_v36, %v5567_v34  ;;  %v5625_v46 = vmul.f32 %v10769_v55, %v5610_v43  ;;  %v5608_v33 = vadd.f32 0.2548296, %v5605_v47 }
0x2654   :  { %v5633_v27 = vadd.f32 1.0, %v5630_v17  ;;  %v5628_v4 = vsub.f32 1.0, %v5625_v46  ;;  %v5611_v59 = vmul.f32 %v10765_v50, %v5608_v33 }
0x2656   :  { %v5636_v58 = vmul.f32 %v5633_v27, %v5558_v52  ;;  %v5631_v21 = vmul.f32 %v5628_v4, %v5568_v12  ;;  %v5626_v11 = vmul.f32 %v10771_v57, %v5611_v59 }
0x2658   :  { %v5634_v19 = vadd.f32 1.0, %v5631_v21  ;;  %10281 = vmatmul.mubr.f32.vlgmr.msra.gmra.mxu0 %v5636_v58  ;;  %v5629_v44 = vsub.f32 1.0, %v5626_v11 }
0x2659   :  { %10283 = vmatprep.mubr.msk.f32.mxu0 %vm11097_vm5, %v11096_v48 }
0x265a   :  { %v5637_v45 = vmul.f32 %v5634_v19, %v5559_v60  ;;  %v5632_v9 = vmul.f32 %v5629_v44, %v5569_v3 }
0x265c   :  { %10284 = vmatmul.mubr.f32.gmra.mxu0 %v5637_v45  ;;  %v5635_v5 = vadd.f32 1.0, %v5632_v9 }
0x265d   :  { %10286 = vmatprep.mubr.msk.f32.mxu0 %vm11097_vm5, %v11096_v48 }
0x265e   :  { %v5638_v39 = vmul.f32 %v5635_v5, %v5560_v14 }
0x2660   :  { %10287 = vmatmul.mubr.f32.gmra.mxu0 %v5638_v39 }
0x2661   :  { %10342 = vmatprep.mubr.msk.f32.mxu0 %vm11097_vm5, %v11096_v48 }
0x26a9   :  { %v5871_v42 = vpop.permute.xlu0 %5870 }
0x26ad   :  { %v5873_v23 = vpop.permute.xlu1 %5872  ;;  %v6111_v62 = vpop.permute.xlu0 %6110 }
0x26ae   :  { %10307 = vmatpush3.xpose.msk.msra.mxu1 %vm441_vm6, %v5873_v23 }
0x26af   :  { %10308 = vmatprep.subr.mxu1 %v11096_v48 }
0x26b1   :  { %v5869_v10 = vpop.permute.xlu1 %5868  ;;  %v6107_v38 = vpop.permute.xlu0 %6106 }
0x26b2   :  { %10309 = vmatpush3.xpose.msk.msra.mxu1 %vm441_vm6, %v5871_v42 }
0x26b3   :  { %10310 = vmatprep.subr.mxu1 %v11096_v48 }
0x26b5   :  { %v6115_v2 = vpop.permute.xlu1 %6114 }
0x26b6   :  { %10311 = vmatpush3.xpose.msk.msra.mxu1 %vm441_vm6, %v5869_v10  ;;  %10337 = vmatpush3.xpose.msk.msra.mxu0 %vm441_vm6, %v6115_v2 }
0x26b7   :  { %10338 = vmatprep.subr.mxu0 %v11096_v48  ;;  %10321 = vmatprep.subr.mxu1 %v11096_v48 }
0x26b9   :  { %10313 = vmatmul.mubr.msk.f32.vlgmr.msra.gmra.mxu1 %vm441_vm6, %v12970_v54  ;;  %v6113_v28 = vpop.permute.xlu1 %6112 }
0x26ba   :  { %10339 = vmatpush3.xpose.msk.msra.mxu0 %vm441_vm6, %v6113_v28  ;;  %10315 = vmatprep.mubr.msk.f32.mxu1 %vm11097_vm5, %v11096_v48 }
0x26bb   :  { %10340 = vmatprep.subr.mxu0 %v11096_v48 }
0x26bd   :  { %10316 = vmatmul.mubr.msk.f32.gmra.mxu1 %vm441_vm6, %v12966_v51  ;;  %v6105_v50 = vpop.permute.xlu1 %6104 }
0x26be   :  { %10341 = vmatpush3.xpose.msk.msra.mxu0 %vm441_vm6, %v6111_v62  ;;  %10318 = vmatprep.mubr.msk.f32.mxu1 %vm11097_vm5, %v11096_v48 }
0x26bf   :  { %10366 = vmatprep.subr.mxu0 %v11096_v48 }
0x26c1   :  { %10319 = vmatmul.mubr.msk.f32.gmra.mxu1 %vm441_vm6, %v12972_v41  ;;  %10343 = vmatmul.mubr.msk.f32.vlgmr.msra.gmra.mxu0 %vm441_vm6, %v6105_v50  ;;  %v6109_v40 = vpop.permute.xlu1 %6108 }
0x26c2   :  { %10345 = vmatprep.mubr.msk.f32.mxu0 %vm11097_vm5, %v11096_v48  ;;  %10327 = vmatprep.mubr.msk.f32.mxu1 %vm11097_vm5, %v11096_v48 }
0x26c3   :  { %10367 = vmatpush3.msra.mxu0 %v11044_v0 }
0x26c4   :  { %10388 = vmatprep.subr.mxu0 %v11096_v48 }
0x26c5   :  { %10346 = vmatmul.mubr.msk.f32.gmra.mxu0 %vm441_vm6, %v6107_v38 }
0x26c6   :  { %10348 = vmatprep.mubr.msk.f32.mxu0 %vm11097_vm5, %v11096_v48 }
0x26c9   :  { %10349 = vmatmul.mubr.msk.f32.gmra.mxu0 %vm441_vm6, %v6109_v40 }
0x26ca   :  { %10368 = vmatprep.mubr.msk.f32.mxu0 %vm11097_vm5, %v11096_v48 }
0x2718   :  { %v13042_v18 = vpop.f32.mrf.mxu0 }
0x271a   :  { %v10282_v13 = vpop.f32.mrf.mxu0 }
0x271c   :  { %v13044_v25 = vpop.f32.mrf.mxu0 }
0x271e   :  { %v10285_v49 = vpop.f32.mrf.mxu0 }
0x2720   :  { %v13046_v26 = vpop.f32.mrf.mxu0 }
0x2722   :  { %v10288_v7 = vpop.f32.mrf.mxu0 }
0x2779   :  { %v5952_v31 = vpop.f32.mrf.mxu1 }
0x277a   :  { %v5966_v63 = vmul.f32 0.35355338, %v5952_v31 }
0x277b   :  { %v10314_v32 = vpop.f32.mrf.mxu1 }
0x277c   :  { %v5969_v1 = vsel %vm537_vm7, %v5966_v63, -inf }
0x277d   :  { %5970 = vmax.xlane.f32.xlu0 %v5969_v1  ;;  %v5957_v61 = vpop.f32.mrf.mxu1 }
0x277e   :  { %v5967_v20 = vmul.f32 0.35355338, %v5957_v61 }
0x277f   :  { %v10317_v56 = vpop.f32.mrf.mxu1 }
0x2780   :  { %v5972_v6 = vsel %vm537_vm7, %v5967_v20, -inf }
0x2781   :  { %v6194_v30 = vpop.f32.mrf.mxu0  ;;  %5973 = vmax.xlane.f32.xlu1 %v5972_v6  ;;  %v5962_v53 = vpop.f32.mrf.mxu1 }
0x2782   :  { %v5968_v37 = vmul.f32 0.35355338, %v5962_v53  ;;  %v6208_v55 = vmul.f32 0.35355338, %v6194_v30 }
0x2783   :  { %v10320_v36 = vpop.f32.mrf.mxu1  ;;  %v10344_v43 = vpop.f32.mrf.mxu0 }
0x2784   :  { %v5975_v34 = vsel %vm544_vm8, %v5968_v37, -inf  ;;  %v6211_v33 = vsel %vm537_vm7, %v6208_v55, -inf }
0x2785   :  { %v6199_v47 = vpop.f32.mrf.mxu0  ;;  %5976 = vmax.xlane.f32.xlu0 %v5975_v34 }
0x2786   :  { %v6209_v46 = vmul.f32 0.35355338, %v6199_v47 }
0x2787   :  { %v10347_v17 = vpop.f32.mrf.mxu0 }
0x2788   :  { %v6214_v59 = vsel %vm537_vm7, %v6209_v46, -inf }
0x2789   :  { %v6204_v52 = vpop.f32.mrf.mxu0  ;;  %6212 = vmax.xlane.f32.xlu0 %v6211_v33 }
0x278a   :  { %v6210_v27 = vmul.f32 0.35355338, %v6204_v52 }
0x278b   :  { %v10350_v4 = vpop.f32.mrf.mxu0 }
0x278c   :  { %v6217_v12 = vsel %vm544_vm8, %v6210_v27, -inf }
0x278d   :  { %6218 = vmax.xlane.f32.xlu1 %v6217_v12  ;;  %6215 = vmax.xlane.f32.xlu0 %v6214_v59 }
0x279e   :  { %6007 = vrot.lane.b32.xlu1 %v12966_v51, %s14166_s30 }
0x27a2   :  { %6005 = vrot.lane.b32.xlu1 %v12970_v54, %s14166_s30 }
0x27a3   :  { %6009 = vrot.lane.b32.xlu0 %v12972_v41, %s14166_s30 }
0x27a6   :  { %6251 = vrot.lane.b32.xlu1 %v12972_v41, %s14167_s1 }
0x2806   :  { %v5971_v57 = vpop.xlane.xlu0 %5970 }
0x2807   :  { %v5978_v58 = vsub.f32 %v5966_v63, %v5971_v57 }
0x2809   :  { %v5981_v21 = vmul.f32 1.442695, %v5978_v58  ;;  %v11045_v58 = vld [vmem:[%s14160_s28 + $0x20] sm:$0xff] }
0x280a   :  { %v5974_v11 = vpop.xlane.xlu1 %5973 }
0x280b   :  { %10772 = vpow2.f32 %v5981_v21  ;;  %v5979_v19 = vsub.f32 %v5967_v20, %v5974_v11 }
0x280d   :  { %v5983_v3 = vmul.f32 1.442695, %v5979_v19 }
0x280e   :  { %v5977_v60 = vpop.xlane.xlu0 %5976 }
0x280f   :  { %v5980_v14 = vsub.f32 %v5968_v37, %v5977_v60 }
0x2811   :  { %v5985_v50 = vmul.f32 1.442695, %v5980_v14 }
0x2812   :  { %v6213_v44 = vpop.xlane.xlu0 %6212 }
0x2813   :  { %v6220_v45 = vsub.f32 %v6208_v55, %v6213_v44 }
0x2815   :  { %v6223_v9 = vmul.f32 1.442695, %v6220_v45 }
0x2816   :  { %v6219_v5 = vpop.xlane.xlu1 %6218  ;;  %v6216_v39 = vpop.xlane.xlu0 %6215 }
0x2817   :  { %10774 = vpow2.f32 %v6223_v9  ;;  %v6222_v23 = vsub.f32 %v6210_v27, %v6219_v5  ;;  %v6221_v42 = vsub.f32 %v6209_v46, %v6216_v39 }
0x2818   :  { %v10773_v10 = vpop.eup %10772  ;;  %10776 = vpow2.f32 %v5983_v3 }
0x2819   :  { %v6227_v2 = vmul.f32 1.442695, %v6222_v23  ;;  %v6225_v28 = vmul.f32 1.442695, %v6221_v42  ;;  %v5987_v62 = vsel %vm537_vm7, %v10773_v10, 0.0 }
0x281a   :  { %v6008_v0 = vpop.permute.xlu1 %6007  ;;  %5988 = vadd.xlane.f32.xlu0 %v5987_v62  ;;  %v6010_v38 = vpop.permute.xlu0 %6009 }
0x281b   :  { %10322 = vmatpush3.msk.msra.mxu1 %vm222_vm3, %v6010_v38  ;;  %10778 = vpow2.f32 %v6225_v28  ;;  %v11046_v38 = vld [vmem:[%s14160_s28 + $0x30] sm:$0xff] }
0x281c   :  { %10323 = vmatprep.subr.mxu1 %v11096_v48  ;;  %10780 = vpow2.f32 %v6227_v2 }
0x281d   :  { %10324 = vmatpush3.msra.mxu1 %v6008_v0  ;;  %10782 = vpow2.f32 %v5985_v50 }
0x281e   :  { %v6006_v40 = vpop.permute.xlu1 %6005  ;;  %10325 = vmatprep.subr.mxu1 %v11096_v48 }
0x281f   :  { %10326 = vmatpush3.msra.mxu1 %v6006_v40 }
0x2820   :  { %10351 = vmatprep.subr.mxu1 %v11096_v48 }
0x2822   :  { %v6252_v30 = vpop.permute.xlu1 %6251 }
0x2824   :  { %v10775_v13 = vpop.eup %10774 }
0x2825   :  { %v6229_v49 = vsel %vm537_vm7, %v10775_v13, 0.0  ;;  %v10777_v7 = vpop.eup %10776 }
0x2826   :  { %6230 = vadd.xlane.f32.xlu1 %v6229_v49  ;;  %v5990_v63 = vsel %vm537_vm7, %v10777_v7, 0.0 }
0x2828   :  { %v10779_v31 = vpop.eup %10778 }
0x2829   :  { %v10781_v32 = vpop.eup %10780  ;;  %v6232_v1 = vsel %vm537_vm7, %v10779_v31, 0.0 }
0x282a   :  { %5991 = vadd.xlane.f32.xlu1 %v5990_v63  ;;  %v10783_v61 = vpop.eup %10782  ;;  %6233 = vadd.xlane.f32.xlu0 %v6232_v1  ;;  %v6235_v20 = vsel %vm544_vm8, %v10781_v32, 0.0 }
0x282b   :  { %v5993_v56 = vsel %vm544_vm8, %v10783_v61, 0.0 }
0x282e   :  { %6236 = vadd.xlane.f32.xlu1 %v6235_v20  ;;  %5994 = vadd.xlane.f32.xlu0 %v5993_v56 }
0x283f   :  { %6247 = vrot.lane.b32.xlu1 %v12970_v54, %s14167_s1 }
0x2843   :  { %6532 = vrot.lane.b32.xlu1 %v12966_v51, %s14168_s11 }
0x2844   :  { %6249 = vrot.lane.b32.xlu0 %v12966_v51, %s14167_s1 }
0x2847   :  { %6524 = vrot.lane.b32.xlu1 %v12970_v54, %s14169_s8 }
0x2848   :  { %6534 = vrot.lane.b32.xlu0 %v12972_v41, %s14168_s11 }
0x284b   :  { %6528 = vrot.lane.b32.xlu1 %v12972_v41, %s14169_s8 }
0x284c   :  { %6530 = vrot.lane.b32.xlu0 %v12970_v54, %s14168_s11 }
0x2850   :  { %6526 = vrot.lane.b32.xlu0 %v12966_v51, %s14169_s8  ;;  %s14177_s8 = sld [smem:[#allocation24_spill]] }
0x28a3   :  { %v5989_v6 = vpop.xlane.xlu0 %5988 }
0x28a4   :  { %10784 = vrcp.f32 %v5989_v6 }
0x28af   :  { %v6231_v53 = vpop.xlane.xlu1 %6230 }
0x28b1   :  { %v10785_v37 = vpop.eup %10784 }
0x28b2   :  { %v6002_v36 = vmul.f32 %v10785_v37, %v10773_v10 }
0x28b3   :  { %v5992_v43 = vpop.xlane.xlu1 %5991  ;;  %v6234_v55 = vpop.xlane.xlu0 %6233 }
0x28b4   :  { %10786 = vrcp.f32 %v5992_v43  ;;  %10328 = vmatmul.mubr.msk.f32.vlgmr.msra.gmra.mxu1 %vm537_vm7, %v6002_v36 }
0x28b5   :  { %10352 = vmatpush3.msk.msra.mxu1 %vm222_vm3, %v6252_v30  ;;  %10330 = vmatprep.mubr.msk.f32.mxu1 %vm11097_vm5, %v11096_v48 }
0x28b6   :  { %10353 = vmatprep.subr.mxu1 %v11096_v48 }
0x28b7   :  { %v6237_v34 = vpop.xlane.xlu1 %6236  ;;  %v5995_v47 = vpop.xlane.xlu0 %5994 }
0x28b8   :  { %10788 = vrcp.f32 %v5995_v47 }
0x28b9   :  { %10790 = vrcp.f32 %v6231_v53 }
0x28ba   :  { %10792 = vrcp.f32 %v6234_v55 }
0x28bb   :  { %v6250_v17 = vpop.permute.xlu0 %6249  ;;  %v6248_v46 = vpop.permute.xlu1 %6247  ;;  %10794 = vrcp.f32 %v6237_v34 }
0x28bc   :  { %10354 = vmatpush3.msra.mxu1 %v6250_v17 }
0x28bd   :  { %10355 = vmatprep.subr.mxu1 %v11096_v48 }
0x28be   :  { %10356 = vmatpush3.msra.mxu1 %v6248_v46 }
0x28bf   :  { %10377 = vmatprep.subr.mxu1 %v11096_v48  ;;  %v6535_v39 = vpop.permute.xlu0 %6534  ;;  %v6533_v10 = vpop.permute.xlu1 %6532 }
0x28c1   :  { %v10787_v33 = vpop.eup %10786 }
0x28c2   :  { %v6003_v52 = vmul.f32 %v10787_v33, %v10777_v7 }
0x28c3   :  { %v6531_v62 = vpop.permute.xlu0 %6530  ;;  %v6525_v0 = vpop.permute.xlu1 %6524 }
0x28c4   :  { %10331 = vmatmul.mubr.msk.f32.gmra.mxu1 %vm537_vm7, %v6003_v52 }
0x28c5   :  { %10333 = vmatprep.mubr.msk.f32.mxu1 %vm11097_vm5, %v11096_v48  ;;  %v10789_v27 = vpop.eup %10788 }
0x28c6   :  { %v6004_v4 = vmul.f32 %v10789_v27, %v10783_v61  ;;  %v10791_v12 = vpop.eup %10790 }
0x28c7   :  { %v6244_v59 = vmul.f32 %v10791_v12, %v10775_v13  ;;  %v10793_v57 = vpop.eup %10792  ;;  %v6527_v40 = vpop.permute.xlu0 %6526 }
0x28c8   :  { %10334 = vmatmul.mubr.msk.f32.gmra.mxu1 %vm537_vm7, %v6004_v4  ;;  %v6245_v21 = vmul.f32 %v10793_v57, %v10779_v31  ;;  %v10795_v11 = vpop.eup %10794  ;;  %v6529_v13 = vpop.permute.xlu1 %6528 }
0x28c9   :  { %10357 = vmatprep.mubr.msk.f32.mxu1 %vm11097_vm5, %v11096_v48  ;;  %v6246_v60 = vmul.f32 %v10795_v11, %v10781_v32 }
0x28cc   :  { %10358 = vmatmul.mubr.msk.f32.vlgmr.msra.gmra.mxu1 %vm537_vm7, %v6244_v59 }
0x28cd   :  { %10360 = vmatprep.mubr.msk.f32.mxu1 %vm11097_vm5, %v11096_v48  ;;  %10378 = vmatpush3.msra.mxu1 %v11045_v58 }
0x28ce   :  { %10403 = vmatprep.subr.mxu1 %v11096_v48 }
0x28d0   :  { %10361 = vmatmul.mubr.msk.f32.gmra.mxu1 %vm537_vm7, %v6245_v21 }
0x28d1   :  { %10363 = vmatprep.mubr.msk.f32.mxu1 %vm11097_vm5, %v11096_v48 }
0x28d4   :  { %10364 = vmatmul.mubr.msk.f32.gmra.mxu1 %vm537_vm7, %v6246_v60 }
0x28d5   :  { %10379 = vmatprep.mubr.msk.f32.mxu1 %vm11097_vm5, %v11096_v48 }
0x2974   :  { %v6090_v19 = vpop.f32.mrf.mxu1 }
0x2975   :  { %10380 = vmatmul.mubr.msk.f32.vlgmr.msra.gmra.mxu1 %vm441_vm6, %v6090_v19 }
0x2976   :  { %v10329_v44 = vpop.f32.mrf.mxu1  ;;  %10382 = vmatprep.mubr.msk.f32.mxu1 %vm11097_vm5, %v11096_v48 }
0x2984   :  { %v6095_v45 = vpop.f32.mrf.mxu1 }
0x2985   :  { %10383 = vmatmul.mubr.msk.f32.gmra.mxu1 %vm441_vm6, %v6095_v45 }
0x2986   :  { %v10332_v3 = vpop.f32.mrf.mxu1  ;;  %10385 = vmatprep.mubr.msk.f32.mxu1 %vm11097_vm5, %v11096_v48 }
0x2988   :  { %v6100_v9 = vpop.f32.mrf.mxu1 }
0x2989   :  { %10386 = vmatmul.mubr.msk.f32.gmra.mxu1 %vm441_vm6, %v6100_v9 }
0x298a   :  { %v10335_v14 = vpop.f32.mrf.mxu1  ;;  %10409 = vmatprep.mubr.msk.f32.mxu1 %vm11097_vm5, %v11096_v48 }
0x298c   :  { %v6332_v5 = vpop.f32.mrf.mxu1 }
0x298d   :  { %10369 = vmatmul.mubr.msk.f32.vlgmr.msra.gmra.mxu0 %vm441_vm6, %v6332_v5 }
0x298e   :  { %10389 = vmatpush3.xpose.msk.msra.mxu0 %vm441_vm6, %v6535_v39  ;;  %v10359_v23 = vpop.f32.mrf.mxu1  ;;  %10371 = vmatprep.mubr.msk.f32.mxu0 %vm11097_vm5, %v11096_v48 }
0x298f   :  { %10390 = vmatprep.subr.mxu0 %v11096_v48 }
0x2990   :  { %v6337_v42 = vpop.f32.mrf.mxu1 }
0x2991   :  { %10372 = vmatmul.mubr.msk.f32.gmra.mxu0 %vm441_vm6, %v6337_v42 }
0x2992   :  { %10391 = vmatpush3.xpose.msk.msra.mxu0 %vm441_vm6, %v6533_v10  ;;  %v10362_v2 = vpop.f32.mrf.mxu1  ;;  %10374 = vmatprep.mubr.msk.f32.mxu0 %vm11097_vm5, %v11096_v48 }
0x2993   :  { %10392 = vmatprep.subr.mxu0 %v11096_v48 }
0x2994   :  { %v6342_v28 = vpop.f32.mrf.mxu1 }
0x2995   :  { %10375 = vmatmul.mubr.msk.f32.gmra.mxu0 %vm441_vm6, %v6342_v28 }
0x2996   :  { %10393 = vmatpush3.xpose.msk.msra.mxu0 %vm441_vm6, %v6531_v62  ;;  %v10365_v50 = vpop.f32.mrf.mxu1  ;;  %10394 = vmatprep.mubr.msk.f32.mxu0 %vm11097_vm5, %v11096_v48 }
0x2997   :  { %10418 = vmatprep.subr.mxu0 %v11096_v48 }
0x2999   :  { %10395 = vmatmul.mubr.msk.f32.vlgmr.msra.gmra.mxu0 %vm441_vm6, %v6525_v0 }
0x299a   :  { %10397 = vmatprep.mubr.msk.f32.mxu0 %vm11097_vm5, %v11096_v48  ;;  %10419 = vmatpush3.msra.mxu0 %v11046_v38 }
0x299b   :  { %10444 = vmatprep.subr.mxu0 %v11096_v48 }
0x299d   :  { %10398 = vmatmul.mubr.msk.f32.gmra.mxu0 %vm441_vm6, %v6527_v40 }
0x299e   :  { %10400 = vmatprep.mubr.msk.f32.mxu0 %vm11097_vm5, %v11096_v48 }
0x29a1   :  { %10401 = vmatmul.mubr.msk.f32.gmra.mxu0 %vm441_vm6, %v6529_v13 }
0x29a2   :  { %10420 = vmatprep.mubr.msk.f32.mxu0 %vm11097_vm5, %v11096_v48 }
0x2a35   :  { %v6510_v49 = vpop.f32.mrf.mxu1 }
0x2a37   :  { %v10381_v7 = vpop.f32.mrf.mxu1 }
0x2a45   :  { %v6515_v31 = vpop.f32.mrf.mxu1 }
0x2a47   :  { %v10384_v63 = vpop.f32.mrf.mxu1 }
0x2a49   :  { %v6520_v32 = vpop.f32.mrf.mxu1 }
0x2a4b   :  { %v10387_v1 = vpop.f32.mrf.mxu1 }
0x2a4d   :  { %v6421_v61 = vpop.f32.mrf.mxu0 }
0x2a4e   :  { %v13151_v20 = vadd.f32 %v6510_v49, %v6421_v61 }
0x2a4f   :  { %v10370_v56 = vpop.f32.mrf.mxu0 }
0x2a51   :  { %v6426_v6 = vpop.f32.mrf.mxu0 }
0x2a52   :  { %v13153_v30 = vadd.f32 %v6515_v31, %v6426_v6  ;;  %v11047_v6 = vld [vmem:[%s14160_s28 + $0x38] sm:$0xff]  ;;  %s14174_s28 = sld [smem:[#allocation19_spill]] }
0x2a53   :  { %v10373_v53 = vpop.f32.mrf.mxu0 }
0x2a55   :  { %v6431_v37 = vpop.f32.mrf.mxu0 }
0x2a56   :  { %v13155_v36 = vadd.f32 %v6520_v32, %v6431_v37 }
0x2a57   :  { %v10376_v43 = vpop.f32.mrf.mxu0 }
0x2a59   :  { %v6614_v55 = vpop.f32.mrf.mxu0 }
0x2a5a   :  { %v6628_v34 = vmul.f32 0.35355338, %v6614_v55 }
0x2a5b   :  { %v10396_v47 = vpop.f32.mrf.mxu0 }
0x2a5c   :  { %v6631_v17 = vsel %vm537_vm7, %v6628_v34, -inf }
0x2a5d   :  { %6632 = vmax.xlane.f32.xlu0 %v6631_v17  ;;  %v6619_v46 = vpop.f32.mrf.mxu0 }
0x2a5e   :  { %v6629_v33 = vmul.f32 0.35355338, %v6619_v46 }
0x2a5f   :  { %v10399_v52 = vpop.f32.mrf.mxu0 }
0x2a60   :  { %v6634_v27 = vsel %vm537_vm7, %v6629_v33, -inf }
0x2a61   :  { %6635 = vmax.xlane.f32.xlu1 %v6634_v27  ;;  %v6624_v4 = vpop.f32.mrf.mxu0 }
0x2a62   :  { %v6630_v12 = vmul.f32 0.35355338, %v6624_v4 }
0x2a63   :  { %v10402_v59 = vpop.f32.mrf.mxu0 }
0x2a64   :  { %v6637_v57 = vsel %vm544_vm8, %v6630_v12, -inf }
0x2a65   :  { %6638 = vmax.xlane.f32.xlu0 %v6637_v57 }
0x2a72   :  { %6669 = vrot.lane.b32.xlu1 %v12966_v51, %s14170_s27 }
0x2a76   :  { %6667 = vrot.lane.b32.xlu1 %v12970_v54, %s14170_s27 }
0x2a7a   :  { %6868 = vrot.lane.b32.xlu1 %v12972_v41, %s14171_s4 }
0x2a7b   :  { %6671 = vrot.lane.b32.xlu0 %v12972_v41, %s14170_s27 }
0x2a7e   :  { %6864 = vrot.lane.b32.xlu1 %v12970_v54, %s14171_s4 }
0x2ae6   :  { %v6633_v58 = vpop.xlane.xlu0 %6632 }
0x2ae7   :  { %v6640_v21 = vsub.f32 %v6628_v34, %v6633_v58 }
0x2ae9   :  { %v6643_v11 = vmul.f32 1.442695, %v6640_v21 }
0x2aea   :  { %v6636_v60 = vpop.xlane.xlu1 %6635 }
0x2aeb   :  { %10796 = vpow2.f32 %v6643_v11  ;;  %v6641_v19 = vsub.f32 %v6629_v33, %v6636_v60 }
0x2aed   :  { %v6645_v44 = vmul.f32 1.442695, %v6641_v19 }
0x2aee   :  { %v6639_v45 = vpop.xlane.xlu0 %6638  ;;  %v6670_v9 = vpop.permute.xlu1 %6669 }
0x2aef   :  { %10798 = vpow2.f32 %v6645_v44  ;;  %v6642_v3 = vsub.f32 %v6630_v12, %v6639_v45 }
0x2af1   :  { %v6647_v14 = vmul.f32 1.442695, %v6642_v3 }
0x2af2   :  { %v6672_v5 = vpop.permute.xlu0 %6671  ;;  %v6668_v39 = vpop.permute.xlu1 %6667 }
0x2af3   :  { %10800 = vpow2.f32 %v6647_v14  ;;  %10404 = vmatpush3.msk.msra.mxu1 %vm222_vm3, %v6672_v5 }
0x2af4   :  { %10405 = vmatprep.subr.mxu1 %v11096_v48 }
0x2af5   :  { %10406 = vmatpush3.msra.mxu1 %v6670_v9 }
0x2af6   :  { %10407 = vmatprep.subr.mxu1 %v11096_v48  ;;  %v6869_v50 = vpop.permute.xlu1 %6868 }
0x2af7   :  { %10408 = vmatpush3.msra.mxu1 %v6668_v39 }
0x2af8   :  { %v10797_v23 = vpop.eup %10796  ;;  %10429 = vmatprep.subr.mxu1 %v11096_v48 }
0x2af9   :  { %v6649_v42 = vsel %vm537_vm7, %v10797_v23, 0.0 }
0x2afa   :  { %6650 = vadd.xlane.f32.xlu0 %v6649_v42  ;;  %v6865_v38 = vpop.permute.xlu1 %6864 }
0x2afc   :  { %v10799_v10 = vpop.eup %10798 }
0x2afd   :  { %v6652_v2 = vsel %vm537_vm7, %v10799_v10, 0.0 }
0x2afe   :  { %6653 = vadd.xlane.f32.xlu0 %v6652_v2 }
0x2b00   :  { %v10801_v28 = vpop.eup %10800 }
0x2b01   :  { %v6655_v62 = vsel %vm544_vm8, %v10801_v28, 0.0 }
0x2b02   :  { %6656 = vadd.xlane.f32.xlu1 %v6655_v62 }
0x2b13   :  { %6860 = vrot.lane.b32.xlu1 %v12966_v51, %s14172_s26 }
0x2b14   :  { %6866 = vrot.lane.b32.xlu0 %v12966_v51, %s14171_s4 }
0x2b18   :  { %6858 = vrot.lane.b32.xlu0 %v12970_v54, %s14172_s26 }
0x2b1c   :  { %6862 = vrot.lane.b32.xlu0 %v12972_v41, %s14172_s26 }
0x2b83   :  { %v6651_v0 = vpop.xlane.xlu0 %6650 }
0x2b84   :  { %10802 = vrcp.f32 %v6651_v0 }
0x2b87   :  { %v6654_v40 = vpop.xlane.xlu0 %6653 }
0x2b88   :  { %10804 = vrcp.f32 %v6654_v40 }
0x2b8b   :  { %v6657_v13 = vpop.xlane.xlu1 %6656  ;;  %v6867_v32 = vpop.permute.xlu0 %6866 }
0x2b8c   :  { %10806 = vrcp.f32 %v6657_v13 }
0x2b8f   :  { %v6859_v56 = vpop.permute.xlu0 %6858  ;;  %v6861_v53 = vpop.permute.xlu1 %6860 }
0x2b91   :  { %v10803_v49 = vpop.eup %10802 }
0x2b92   :  { %v6664_v7 = vmul.f32 %v10803_v49, %v10797_v23 }
0x2b93   :  { %v6863_v37 = vpop.permute.xlu0 %6862 }
0x2b94   :  { %10410 = vmatmul.mubr.msk.f32.vlgmr.msra.gmra.mxu1 %vm537_vm7, %v6664_v7 }
0x2b95   :  { %v10805_v31 = vpop.eup %10804  ;;  %10430 = vmatpush3.xpose.msk.msra.mxu1 %vm441_vm6, %v6869_v50  ;;  %10412 = vmatprep.mubr.msk.f32.mxu1 %vm11097_vm5, %v11096_v48 }
0x2b96   :  { %10431 = vmatprep.subr.mxu1 %v11096_v48  ;;  %v6665_v63 = vmul.f32 %v10805_v31, %v10799_v10 }
0x2b98   :  { %10413 = vmatmul.mubr.msk.f32.gmra.mxu1 %vm537_vm7, %v6665_v63 }
0x2b99   :  { %v10807_v1 = vpop.eup %10806  ;;  %10432 = vmatpush3.xpose.msk.msra.mxu1 %vm441_vm6, %v6867_v32  ;;  %10415 = vmatprep.mubr.msk.f32.mxu1 %vm11097_vm5, %v11096_v48 }
0x2b9a   :  { %10433 = vmatprep.subr.mxu1 %v11096_v48  ;;  %v6666_v61 = vmul.f32 %v10807_v1, %v10801_v28 }
0x2b9c   :  { %10416 = vmatmul.mubr.msk.f32.gmra.mxu1 %vm537_vm7, %v6666_v61 }
0x2b9d   :  { %10434 = vmatpush3.xpose.msk.msra.mxu1 %vm441_vm6, %v6865_v38  ;;  %10435 = vmatprep.mubr.msk.f32.mxu1 %vm11097_vm5, %v11096_v48 }
0x2b9e   :  { %10459 = vmatprep.subr.mxu1 %v11096_v48 }
0x2ba0   :  { %10436 = vmatmul.mubr.msk.f32.vlgmr.msra.gmra.mxu1 %vm441_vm6, %v6859_v56 }
0x2ba1   :  { %10438 = vmatprep.mubr.msk.f32.mxu1 %vm11097_vm5, %v11096_v48  ;;  %10460 = vmatpush3.msra.mxu1 %v11047_v6 }
0x2ba2   :  { %10487 = vmatprep.subr.mxu1 %v11096_v48 }
0x2ba4   :  { %10439 = vmatmul.mubr.msk.f32.gmra.mxu1 %vm441_vm6, %v6861_v53 }
0x2ba5   :  { %10441 = vmatprep.mubr.msk.f32.mxu1 %vm11097_vm5, %v11096_v48 }
0x2ba8   :  { %10442 = vmatmul.mubr.msk.f32.gmra.mxu1 %vm441_vm6, %v6863_v37 }
0x2ba9   :  { %10461 = vmatprep.mubr.msk.f32.mxu1 %vm11097_vm5, %v11096_v48 }
0x2c54   :  { %v6752_v43 = vpop.f32.mrf.mxu1 }
0x2c55   :  { %10421 = vmatmul.mubr.msk.f32.vlgmr.msra.gmra.mxu0 %vm441_vm6, %v6752_v43  ;;  %v11049_v43 = vld [vmem:[%s14077_s13 + $0x30] sm:$0xff] }
0x2c56   :  { %v10411_v55 = vpop.f32.mrf.mxu1  ;;  %10423 = vmatprep.mubr.msk.f32.mxu0 %vm11097_vm5, %v11096_v48 }
0x2c58   :  { %v6757_v34 = vpop.f32.mrf.mxu1 }
0x2c59   :  { %10424 = vmatmul.mubr.msk.f32.gmra.mxu0 %vm441_vm6, %v6757_v34  ;;  %v11050_v34 = vld [vmem:[%s14077_s13 + $0x28] sm:$0xff] }
0x2c5a   :  { %v10414_v47 = vpop.f32.mrf.mxu1  ;;  %10426 = vmatprep.mubr.msk.f32.mxu0 %vm11097_vm5, %v11096_v48 }
0x2c5c   :  { %v6762_v17 = vpop.f32.mrf.mxu1 }
0x2c5d   :  { %10427 = vmatmul.mubr.msk.f32.gmra.mxu0 %vm441_vm6, %v6762_v17  ;;  %v11051_v17 = vld [vmem:[%s14077_s13 + $0x20] sm:$0xff] }
0x2c5e   :  { %v10417_v46 = vpop.f32.mrf.mxu1  ;;  %10450 = vmatprep.mubr.msk.f32.mxu0 %vm11097_vm5, %v11096_v48 }
0x2c60   :  { %v6948_v33 = vpop.f32.mrf.mxu1 }
0x2c61   :  { %v6962_v52 = vmul.f32 0.35355338, %v6948_v33 }
0x2c62   :  { %v10437_v27 = vpop.f32.mrf.mxu1 }
0x2c63   :  { %v6965_v4 = vsel %vm537_vm7, %v6962_v52, -inf }
0x2c64   :  { %6966 = vmax.xlane.f32.xlu1 %v6965_v4  ;;  %v6953_v12 = vpop.f32.mrf.mxu1  ;;  %v11053_v4 = vld [vmem:[%s14079_s15 + $0xf0] sm:$0xff] }
0x2c65   :  { %v6963_v59 = vmul.f32 0.35355338, %v6953_v12 }
0x2c66   :  { %v10440_v57 = vpop.f32.mrf.mxu1 }
0x2c67   :  { %v6968_v58 = vsel %vm537_vm7, %v6963_v59, -inf }
0x2c68   :  { %6969 = vmax.xlane.f32.xlu0 %v6968_v58  ;;  %v6958_v21 = vpop.f32.mrf.mxu1  ;;  %v11055_v58 = vld [vmem:[%s14079_s15 + $0xe0] sm:$0xff] }
0x2c69   :  { %v6964_v11 = vmul.f32 0.35355338, %v6958_v21 }
0x2c6a   :  { %v10443_v60 = vpop.f32.mrf.mxu1 }
0x2c6b   :  { %v6971_v19 = vsel %vm544_vm8, %v6964_v11, -inf  ;;  %v11057_v60 = vld [vmem:[%s14079_s15 + $0xd0] sm:$0xff] }
0x2c6c   :  { %6972 = vmax.xlane.f32.xlu0 %v6971_v19  ;;  %v11058_v19 = vld [vmem:[%s14079_s15 + $0xc8] sm:$0xff] }
0x2c75   :  { %7005 = vrot.lane.b32.xlu1 %v12972_v41, %s14173_s22 }
0x2ced   :  { %v6967_v44 = vpop.xlane.xlu1 %6966 }
0x2cee   :  { %v6974_v45 = vsub.f32 %v6962_v52, %v6967_v44  ;;  %v11052_v52 = vld [vmem:[%s14079_s15 + $0xf8] sm:$0xff]  ;;  %v11059_v44 = vld [vmem:[%s14079_s15 + $0xc0] sm:$0xff] }
0x2cf0   :  { %v6977_v3 = vmul.f32 1.442695, %v6974_v45  ;;  %v11060_v45 = vld [vmem:[%s14079_s15 + $0xb8] sm:$0xff] }
0x2cf1   :  { %v7006_v9 = vpop.permute.xlu1 %7005  ;;  %v6970_v14 = vpop.xlane.xlu0 %6969 }
0x2cf2   :  { %10808 = vpow2.f32 %v6977_v3  ;;  %v6975_v5 = vsub.f32 %v6963_v59, %v6970_v14  ;;  %10445 = vmatpush3.msk.msra.mxu0 %vm222_vm3, %v7006_v9  ;;  %v11054_v59 = vld [vmem:[%s14079_s15 + $0xe8] sm:$0xff]  ;;  %v11061_v3 = vld [vmem:[%s14079_s15 + $0xb0] sm:$0xff]  ;;  %v11063_v14 = vld [vmem:[%s14079_s15 + $0xa0] sm:$0xff] }
0x2cf3   :  { %10446 = vmatprep.subr.mxu0 %v11096_v48  ;;  %v11062_v9 = vld [vmem:[%s14079_s15 + $0xa8] sm:$0xff] }
0x2cf4   :  { %v6979_v39 = vmul.f32 1.442695, %v6975_v5  ;;  %v11064_v5 = vld [vmem:[%s14079_s15 + $0x98] sm:$0xff] }
0x2cf5   :  { %v6973_v23 = vpop.xlane.xlu0 %6972 }
0x2cf6   :  { %10810 = vpow2.f32 %v6979_v39  ;;  %v6976_v42 = vsub.f32 %v6964_v11, %v6973_v23  ;;  %v11056_v11 = vld [vmem:[%s14079_s15 + $0xd8] sm:$0xff]  ;;  %v11065_v39 = vld [vmem:[%s14079_s15 + $0x90] sm:$0xff]  ;;  %v11066_v23 = vld [vmem:[%s14079_s15 + $0x88] sm:$0xff] }
0x2cf8   :  { %v6981_v10 = vmul.f32 1.442695, %v6976_v42  ;;  %v11067_v42 = vld [vmem:[%s14079_s15 + $0x80] sm:$0xff] }
0x2cfa   :  { %10812 = vpow2.f32 %v6981_v10 }
0x2cff   :  { %v10809_v2 = vpop.eup %10808 }
0x2d00   :  { %v6983_v41 = vsel %vm537_vm7, %v10809_v2, 0.0 }
0x2d01   :  { %6984 = vadd.xlane.f32.xlu0 %v6983_v41 }
0x2d03   :  { %v10811_v28 = vpop.eup %10810 }
0x2d04   :  { %v6986_v62 = vsel %vm537_vm7, %v10811_v28, 0.0 }
0x2d05   :  { %6987 = vadd.xlane.f32.xlu1 %v6986_v62 }
0x2d07   :  { %v10813_v50 = vpop.eup %10812 }
0x2d08   :  { %v6989_v0 = vsel %vm544_vm8, %v10813_v50, 0.0 }
0x2d09   :  { %6990 = vadd.xlane.f32.xlu0 %v6989_v0 }
0x2d15   :  { %v6841_v38 = vpop.f32.mrf.mxu0 }
0x2d16   :  { %v13233_v40 = vadd.f32 %v6841_v38, %v13151_v20  ;;  %7001 = vrot.lane.b32.xlu1 %v12970_v54, %s14173_s22 }
0x2d17   :  { %v10422_v13 = vpop.f32.mrf.mxu0 }
0x2d19   :  { %v6846_v49 = vpop.f32.mrf.mxu0 }
0x2d1a   :  { %v13238_v7 = vadd.f32 %v6846_v49, %v13153_v30 }
0x2d1b   :  { %v10425_v31 = vpop.f32.mrf.mxu0 }
0x2d1d   :  { %v6851_v63 = vpop.f32.mrf.mxu0 }
0x2d1e   :  { %v13241_v32 = vadd.f32 %v6851_v63, %v13155_v36 }
0x2d1f   :  { %v10428_v1 = vpop.f32.mrf.mxu0  ;;  %7003 = vrot.lane.b32.xlu0 %v12966_v51, %s14173_s22  ;;  %v11048_v51 = vld [vmem:[%s14077_s13 + $0x38] sm:$0xff] }
0x2d8a   :  { %v6985_v61 = vpop.xlane.xlu0 %6984 }
0x2d8b   :  { %10814 = vrcp.f32 %v6985_v61 }
0x2d8e   :  { %v6988_v20 = vpop.xlane.xlu1 %6987 }
0x2d8f   :  { %10816 = vrcp.f32 %v6988_v20 }
0x2d92   :  { %v6991_v56 = vpop.xlane.xlu0 %6990  ;;  %v7002_v30 = vpop.permute.xlu1 %7001 }
0x2d93   :  { %10818 = vrcp.f32 %v6991_v56 }
0x2d96   :  { %v7004_v54 = vpop.permute.xlu0 %7003 }
0x2d97   :  { %10447 = vmatpush3.msra.mxu0 %v7004_v54 }
0x2d98   :  { %v10815_v6 = vpop.eup %10814  ;;  %10448 = vmatprep.subr.mxu0 %v11096_v48 }
0x2d99   :  { %v6998_v53 = vmul.f32 %v10815_v6, %v10809_v2  ;;  %10449 = vmatpush3.msra.mxu0 %v7002_v30 }
0x2d9a   :  { %10470 = vmatprep.subr.mxu0 %v11096_v48 }
0x2d9b   :  { %10451 = vmatmul.mubr.msk.f32.vlgmr.msra.gmra.mxu0 %vm537_vm7, %v6998_v53 }
0x2d9c   :  { %v10817_v36 = vpop.eup %10816  ;;  %10453 = vmatprep.mubr.msk.f32.mxu0 %vm11097_vm5, %v11096_v48  ;;  %10471 = vmatpush3.msra.mxu0 %v11048_v51 }
0x2d9d   :  { %v6999_v37 = vmul.f32 %v10817_v36, %v10811_v28  ;;  %10472 = vmatprep.subr.mxu0 %v11096_v48  ;;  %v13370_v36 = vld [vmem:[%s14080_s16 + $0x1] ss:$0 sm:$0xff] }
0x2d9e   :  { %10473 = vmatpush3.msra.mxu0 %v11049_v43 }
0x2d9f   :  { %10454 = vmatmul.mubr.msk.f32.gmra.mxu0 %vm537_vm7, %v6999_v37  ;;  %10474 = vmatprep.subr.mxu0 %v11096_v48 }
0x2da0   :  { %v10819_v55 = vpop.eup %10818  ;;  %10456 = vmatprep.mubr.msk.f32.mxu0 %vm11097_vm5, %v11096_v48  ;;  %10475 = vmatpush3.msra.mxu0 %v11050_v34 }
0x2da1   :  { %v7000_v47 = vmul.f32 %v10819_v55, %v10813_v50  ;;  %10476 = vmatprep.subr.mxu0 %v11096_v48  ;;  %v11068_v50 = vld [vmem:[%s14161_s29 + $0x1] ss:$0 sm:$0xff]  ;;  %s14176_s29 = sld [smem:[#allocation18_spill]] }
0x2da2   :  { %10477 = vmatpush3.msra.mxu0 %v11051_v17  ;;  %v5720_v17 = vadd.f32 %v13044_v25, %v12751_v16 }
0x2da3   :  { %10457 = vmatmul.mubr.msk.f32.gmra.mxu0 %vm537_vm7, %v7000_v47 }
0x2da4   :  { %10478 = vmatprep.mubr.msk.f32.mxu0 %vm11097_vm5, %v11096_v48 }
0x2e5b   :  { %v7086_v46 = vpop.f32.mrf.mxu0 }
0x2e5c   :  { %10462 = vmatmul.mubr.msk.f32.vlgmr.msra.gmra.mxu1 %vm441_vm6, %v7086_v46 }
0x2e5d   :  { %v10452_v33 = vpop.f32.mrf.mxu0  ;;  %10464 = vmatprep.mubr.msk.f32.mxu1 %vm11097_vm5, %v11096_v48  ;;  %10488 = vmatpush3.msra.mxu1 %v11052_v52  ;;  %v13384_v52 = vadd.f32 %v13370_v36, %v5720_v17 }
0x2e5e   :  { %10489 = vmatprep.subr.mxu1 %v11096_v48 }
0x2e5f   :  { %v7091_v27 = vpop.f32.mrf.mxu0  ;;  %10490 = vmatpush3.msra.mxu1 %v11053_v4  ;;  %v7524_v25 = vsel %vm277_vm4, %v13384_v52, 0.0 }
0x2e60   :  { %10465 = vmatmul.mubr.msk.f32.gmra.mxu1 %vm441_vm6, %v7091_v27  ;;  %10491 = vmatprep.subr.mxu1 %v11096_v48 }
0x2e61   :  { %v10455_v12 = vpop.f32.mrf.mxu0  ;;  %10467 = vmatprep.mubr.msk.f32.mxu1 %vm11097_vm5, %v11096_v48  ;;  %10492 = vmatpush3.msra.mxu1 %v11054_v59 }
0x2e62   :  { %10493 = vmatprep.subr.mxu1 %v11096_v48 }
0x2e63   :  { %v7096_v57 = vpop.f32.mrf.mxu0  ;;  %10494 = vmatpush3.msra.mxu1 %v11055_v58 }
0x2e64   :  { %10468 = vmatmul.mubr.msk.f32.gmra.mxu1 %vm441_vm6, %v7096_v57  ;;  %10495 = vmatprep.subr.mxu1 %v11096_v48 }
0x2e65   :  { %v10458_v21 = vpop.f32.mrf.mxu0  ;;  %10496 = vmatpush3.msra.mxu1 %v11056_v11  ;;  %10519 = vmatprep.mubr.msk.f32.mxu1 %vm11097_vm5, %v11096_v48 }
0x2e66   :  { %10497 = vmatprep.subr.mxu1 %v11096_v48 }
0x2e67   :  { %10498 = vmatpush3.msra.mxu1 %v11057_v60 }
0x2e68   :  { %10499 = vmatprep.subr.mxu1 %v11096_v48 }
0x2e69   :  { %10500 = vmatpush3.msra.mxu1 %v11058_v19 }
0x2e6a   :  { %10501 = vmatprep.subr.mxu1 %v11096_v48 }
0x2e6b   :  { %10502 = vmatpush3.msra.mxu1 %v11059_v44 }
0x2e6c   :  { %10503 = vmatprep.subr.mxu1 %v11096_v48 }
0x2e6d   :  { %10504 = vmatpush3.msra.mxu1 %v11060_v45 }
0x2e6e   :  { %10505 = vmatprep.subr.mxu1 %v11096_v48 }
0x2e6f   :  { %10506 = vmatpush3.msra.mxu1 %v11061_v3  ;;  %v11069_v3 = vld [vmem:[%s14162_s0 + $0x1] ss:$0 sm:$0xff]  ;;  %s14178_s0 = sld [smem:[#allocation21_spill]] }
0x2e70   :  { %10507 = vmatprep.subr.mxu1 %v11096_v48 }
0x2e71   :  { %10508 = vmatpush3.msra.mxu1 %v11062_v9 }
0x2e72   :  { %10509 = vmatprep.subr.mxu1 %v11096_v48 }
0x2e73   :  { %10510 = vmatpush3.msra.mxu1 %v11063_v14 }
0x2e74   :  { %10511 = vmatprep.subr.mxu1 %v11096_v48 }
0x2e75   :  { %10512 = vmatpush3.msra.mxu1 %v11064_v5  ;;  %v11070_v5 = vld [vmem:[%s14076_s12 + $0x1] ss:$0 sm:$0xff] }
0x2e76   :  { %10513 = vmatprep.subr.mxu1 %v11096_v48 }
0x2e77   :  { %10514 = vmatpush3.msra.mxu1 %v11065_v39 }
0x2e78   :  { %10515 = vmatprep.subr.mxu1 %v11096_v48 }
0x2e79   :  { %10516 = vmatpush3.msra.mxu1 %v11066_v23 }
0x2e7a   :  { %10517 = vmatprep.subr.mxu1 %v11096_v48 }
0x2e7b   :  { %10518 = vmatpush3.msra.mxu1 %v11067_v42 }
0x2f1c   :  { %v7175_v10 = vpop.f32.mrf.mxu1 }
0x2f1d   :  { %v7189_v2 = vadd.f32 %v7175_v10, %v13233_v40 }
0x2f1e   :  { %v10463_v41 = vpop.f32.mrf.mxu1 }
0x2f1f   :  { %v7192_v28 = vadd.f32 %v7189_v2, %v12762_v24 }
0x2f20   :  { %v7180_v62 = vpop.f32.mrf.mxu1 }
0x2f21   :  { %v13348_v0 = vadd.f32 %v11068_v50, %v7192_v28  ;;  %v7190_v38 = vadd.f32 %v7180_v62, %v13238_v7 }
0x2f22   :  { %v10466_v13 = vpop.f32.mrf.mxu1 }
0x2f23   :  { %v7193_v49 = vadd.f32 %v7190_v38, %v12746_v29  ;;  %v7198_v31 = vsel %vm277_vm4, %v13348_v0, 0.0  ;;  %v11071_v38 = vld [vmem:[%s14078_s14 + $0x1] ss:$0 sm:$0xff] }
0x2f24   :  { %7199 = vadd.xlane.f32.xlu1 %v7198_v31  ;;  %v7185_v40 = vpop.f32.mrf.mxu1 }
0x2f25   :  { %v13354_v63 = vadd.f32 %v11068_v50, %v7193_v49  ;;  %v7191_v24 = vadd.f32 %v7185_v40, %v13241_v32 }
0x2f26   :  { %v10469_v1 = vpop.f32.mrf.mxu1 }
0x2f27   :  { %v7194_v61 = vadd.f32 %v7191_v24, %v12768_v15  ;;  %v7201_v20 = vsel %vm277_vm4, %v13354_v63, 0.0  ;;  %v5719_v15 = vadd.f32 %v13042_v18, %v12740_v35  ;;  %v5721_v35 = vadd.f32 %v13046_v26, %v12760_v8 }
0x2f28   :  { %7202 = vadd.xlane.f32.xlu0 %v7201_v20 }
0x2f29   :  { %v13360_v7 = vadd.f32 %v11068_v50, %v7194_v61  ;;  %v13375_v47 = vadd.f32 %v13370_v36, %v5719_v15  ;;  %v13387_v27 = vadd.f32 %v13370_v36, %v5721_v35 }
0x2f2b   :  { %v7204_v29 = vsel %vm284_vm2, %v13360_v7, 0.0  ;;  %v7521_v4 = vsel %vm277_vm4, %v13375_v47, 0.0  ;;  %v7527_v8 = vsel %vm284_vm2, %v13387_v27, 0.0 }
0x2f2c   :  { %7205 = vadd.xlane.f32.xlu0 %v7204_v29 }
0x2fad   :  { %v7200_v56 = vpop.xlane.xlu1 %7199 }
0x2fae   :  { %v7207_v54 = vmul.f32 0.03125, %v7200_v56 }
0x2fb0   :  { %v7210_v6 = vsub.f32 %v13348_v0, %v7207_v54 }
0x2fb1   :  { %v7203_v30 = vpop.xlane.xlu0 %7202 }
0x2fb2   :  { %v7208_v53 = vmul.f32 0.03125, %v7203_v30  ;;  %v7213_v32 = vmul.f32 %v7210_v6, %v7210_v6 }
0x2fb4   :  { %v7211_v51 = vsub.f32 %v13354_v63, %v7208_v53  ;;  %v7216_v37 = vsel %vm277_vm4, %v7213_v32, 0.0 }
0x2fb5   :  { %7217 = vadd.xlane.f32.xlu1 %v7216_v37  ;;  %v7206_v43 = vpop.xlane.xlu0 %7205 }
0x2fb6   :  { %v7209_v55 = vmul.f32 0.03125, %v7206_v43  ;;  %v7214_v34 = vmul.f32 %v7211_v51, %v7211_v51 }
0x2fb8   :  { %v7212_v18 = vsub.f32 %v13360_v7, %v7209_v55  ;;  %v7219_v46 = vsel %vm277_vm4, %v7214_v34, 0.0 }
0x2fb9   :  { %7220 = vadd.xlane.f32.xlu0 %v7219_v46 }
0x2fba   :  { %v7215_v33 = vmul.f32 %v7212_v18, %v7212_v18 }
0x2fbc   :  { %v7222_v16 = vsel %vm284_vm2, %v7215_v33, 0.0 }
0x2fbd   :  { %7522 = vadd.xlane.f32.xlu0 %v7521_v4  ;;  %7223 = vadd.xlane.f32.xlu1 %v7222_v16 }
0x2fc1   :  { %7528 = vadd.xlane.f32.xlu0 %v7527_v8  ;;  %7525 = vadd.xlane.f32.xlu1 %v7524_v25 }
0x303e   :  { %v7218_v26 = vpop.xlane.xlu1 %7217 }
0x303f   :  { %v7225_v12 = vmul.f32 0.03125, %v7218_v26 }
0x3041   :  { %v7228_v59 = vadd.f32 1e-06, %v7225_v12 }
0x3042   :  { %v7221_v57 = vpop.xlane.xlu0 %7220 }
0x3043   :  { %10820 = vrsqrt.f32 %v7228_v59  ;;  %v7226_v58 = vmul.f32 0.03125, %v7221_v57 }
0x3045   :  { %v7229_v21 = vadd.f32 1e-06, %v7226_v58 }
0x3046   :  { %v7224_v11 = vpop.xlane.xlu1 %7223 }
0x3047   :  { %10822 = vrsqrt.f32 %v7229_v21  ;;  %v7227_v60 = vmul.f32 0.03125, %v7224_v11 }
0x3049   :  { %v7230_v19 = vadd.f32 1e-06, %v7227_v60 }
0x304b   :  { %10824 = vrsqrt.f32 %v7230_v19 }
0x3050   :  { %v10821_v44 = vpop.eup %10820 }
0x3051   :  { %v7234_v45 = vmul.f32 %v10821_v44, %v7210_v6 }
0x3053   :  { %v7237_v9 = vmul.f32 %v11069_v3, %v7234_v45 }
0x3054   :  { %v10823_v14 = vpop.eup %10822 }
0x3055   :  { %v7240_v39 = vadd.f32 %v11070_v5, %v7237_v9  ;;  %v7235_v23 = vmul.f32 %v10823_v14, %v7211_v51 }
0x3057   :  { %10479 = vmatmul.mubr.msk.f32.vlgmr.msra.gmra.mxu0 %vm277_vm4, %v7240_v39  ;;  %v7238_v42 = vmul.f32 %v11069_v3, %v7235_v23 }
0x3058   :  { %v10825_v10 = vpop.eup %10824  ;;  %10481 = vmatprep.mubr.msk.f32.mxu0 %vm11097_vm5, %v11096_v48 }
0x3059   :  { %v7241_v2 = vadd.f32 %v11070_v5, %v7238_v42  ;;  %v7236_v41 = vmul.f32 %v10825_v10, %v7212_v18 }
0x305b   :  { %10482 = vmatmul.mubr.msk.f32.gmra.mxu0 %vm277_vm4, %v7241_v2  ;;  %v7239_v28 = vmul.f32 %v11069_v3, %v7236_v41 }
0x305c   :  { %10484 = vmatprep.mubr.msk.f32.mxu0 %vm11097_vm5, %v11096_v48 }
0x305d   :  { %v7242_v62 = vadd.f32 %v11070_v5, %v7239_v28 }
0x305f   :  { %10485 = vmatmul.mubr.msk.f32.gmra.mxu0 %vm277_vm4, %v7242_v62 }
0x3060   :  { %7665 = vmatprep.mubr.f32.mxu0 %v11096_v48 }
0x3117   :  { %v7318_v50 = vpop.f32.mrf.mxu0 }
0x3118   :  { %v13413_v13 = vadd.f32 %v11071_v38, %v7318_v50 }
0x3119   :  { %v10480_v49 = vpop.f32.mrf.mxu0 }
0x311a   :  { %v13416_v31 = vmul.f32 0.70710677, %v13413_v13 }
0x311b   :  { %v7323_v40 = vpop.f32.mrf.mxu0 }
0x311c   :  { %v7344_v24 = vand.u32 2147483647, %v13416_v31  ;;  %v13419_v1 = vadd.f32 %v11071_v38, %v7323_v40  ;;  %vm7338_vm6 = vcmp.ge.f32.partialorder %v13416_v31, 0.0 }
0x311d   :  { %v10483_v61 = vpop.f32.mrf.mxu0 }
0x311e   :  { %v7347_v20 = vmul.f32 0.3275911, %v7344_v24  ;;  %v13422_v29 = vmul.f32 0.70710677, %v13419_v1  ;;  %v7386_v55 = vsub.f32 0.0, %v7344_v24 }
0x311f   :  { %v7328_v56 = vpop.f32.mrf.mxu0 }
0x3120   :  { %v7350_v54 = vadd.f32 1.0, %v7347_v20  ;;  %v7345_v6 = vand.u32 2147483647, %v13422_v29  ;;  %v13425_v30 = vadd.f32 %v11071_v38, %v7328_v56  ;;  %v7389_v17 = vmul.f32 %v7386_v55, %v7344_v24 }
0x3121   :  { %v10486_v53 = vpop.f32.mrf.mxu0  ;;  %v7341_v56 = vsel %vm7338_vm6, 1.0, %v11109_v22  ;;  %vm7339_vm7 = vcmp.ge.f32.partialorder %v13422_v29, 0.0 }
0x3122   :  { %10826 = vrcp.f32 %v7350_v54  ;;  %v7348_v32 = vmul.f32 0.3275911, %v7345_v6  ;;  %v13428_v15 = vmul.f32 0.70710677, %v13425_v30  ;;  %v7387_v35 = vsub.f32 0.0, %v7345_v6 }
0x3123   :  { %v7392_v33 = vmul.f32 1.442695, %v7389_v17  ;;  %v7342_v31 = vsel %vm7339_vm7, 1.0, %v11109_v22 }
0x3124   :  { %v7351_v51 = vadd.f32 1.0, %v7348_v32  ;;  %v7346_v37 = vand.u32 2147483647, %v13428_v15  ;;  %v7390_v4 = vmul.f32 %v7387_v35, %v7345_v6  ;;  %vm7340_vm8 = vcmp.ge.f32.partialorder %v13428_v15, 0.0 }
0x3126   :  { %10828 = vrcp.f32 %v7351_v51  ;;  %v7349_v43 = vmul.f32 0.3275911, %v7346_v37  ;;  %v7388_v16 = vsub.f32 0.0, %v7346_v37  ;;  %v7394_v59 = vmul.f32 1.442695, %v7390_v4 }
0x3127   :  { %v7332_v51 = vmul.f32 0.5, %v13413_v13  ;;  %v7343_v4 = vsel %vm7340_vm8, 1.0, %v11109_v22 }
0x3128   :  { %v7352_v34 = vadd.f32 1.0, %v7349_v43  ;;  %v7391_v57 = vmul.f32 %v7388_v16, %v7346_v37 }
0x312a   :  { %10830 = vrcp.f32 %v7352_v34  ;;  %v7396_v45 = vmul.f32 1.442695, %v7391_v57 }
0x312b   :  { %10832 = vpow2.f32 %v7392_v33 }
0x312c   :  { %10834 = vpow2.f32 %v7394_v59 }
0x312d   :  { %10836 = vpow2.f32 %v7396_v45 }
0x312f   :  { %v10827_v18 = vpop.eup %10826 }
0x3130   :  { %v7359_v46 = vmul.f32 1.0614054, %v10827_v18 }
0x3132   :  { %v7362_v8 = vadd.f32 -1.4531521, %v7359_v46  ;;  %v7333_v46 = vmul.f32 0.5, %v13419_v1  ;;  %v7523_v1 = vpop.xlane.xlu0 %7522 }
0x3133   :  { %v10829_v25 = vpop.eup %10828 }
0x3134   :  { %v7365_v26 = vmul.f32 %v10827_v18, %v7362_v8  ;;  %v7360_v12 = vmul.f32 1.0614054, %v10829_v25  ;;  %v7334_v8 = vmul.f32 0.5, %v13425_v30 }
0x3136   :  { %v7368_v58 = vadd.f32 1.4214138, %v7365_v26  ;;  %v7363_v21 = vadd.f32 -1.4531521, %v7360_v12  ;;  %v7530_v12 = vmul.f32 0.03125, %v7523_v1  ;;  %v7529_v57 = vpop.xlane.xlu0 %7528 }
0x3137   :  { %v10831_v11 = vpop.eup %10830  ;;  %v7532_v30 = vmul.f32 0.03125, %v7529_v57 }
0x3138   :  { %v7371_v60 = vmul.f32 %v10827_v18, %v7368_v58  ;;  %v7366_v19 = vmul.f32 %v10829_v25, %v7363_v21  ;;  %v7361_v44 = vmul.f32 1.0614054, %v10831_v11  ;;  %v10833_v62 = vpop.eup %10832  ;;  %v7526_v21 = vpop.xlane.xlu1 %7525 }
0x3139   :  { %v10835_v20 = vpop.eup %10834 }
0x313a   :  { %v7374_v3 = vadd.f32 -0.28449672, %v7371_v60  ;;  %v7369_v9 = vadd.f32 1.4214138, %v7366_v19  ;;  %v7364_v14 = vadd.f32 -1.4531521, %v7361_v44  ;;  %v10837_v34 = vpop.eup %10836  ;;  %v13447_v19 = vsub.f32 %v13375_v47, %v7530_v12 }
0x313c   :  { %v7377_v5 = vmul.f32 %v10827_v18, %v7374_v3  ;;  %v7372_v39 = vmul.f32 %v10829_v25, %v7369_v9  ;;  %v7367_v23 = vmul.f32 %v10831_v11, %v7364_v14  ;;  %v7531_v3 = vmul.f32 0.03125, %v7526_v21  ;;  %v9151_v21 = vld [vmem:[%s14176_s29] ss:$0 sm:$0xff] }
0x313d   :  { %v7536_v47 = vmul.f32 %v13447_v19, %v13447_v19 }
0x313e   :  { %v7380_v42 = vadd.f32 0.2548296, %v7377_v5  ;;  %v7375_v10 = vadd.f32 -0.28449672, %v7372_v39  ;;  %v7370_v2 = vadd.f32 1.4214138, %v7367_v23  ;;  %v13459_v23 = vsub.f32 %v13384_v52, %v7531_v3 }
0x3140   :  { %v7383_v41 = vmul.f32 %v10827_v18, %v7380_v42  ;;  %v7378_v28 = vmul.f32 %v10829_v25, %v7375_v10  ;;  %v7373_v50 = vmul.f32 %v10831_v11, %v7370_v2  ;;  %v7539_v2 = vsel %vm277_vm4, %v7536_v47, 0.0 }
0x3142   :  { %v7398_v38 = vmul.f32 %v10833_v62, %v7383_v41  ;;  %v7381_v49 = vadd.f32 0.2548296, %v7378_v28  ;;  %v7376_v40 = vadd.f32 -0.28449672, %v7373_v50  ;;  %v7537_v28 = vmul.f32 %v13459_v23, %v13459_v23  ;;  %v13477_v62 = vld [vmem:[%s14174_s28 + $0x30] sm:$0xff]  ;;  %v13482_v50 = vld [vmem:[%s14174_s28 + $0x28] sm:$0xff] }
0x3144   :  { %v7401_v24 = vsub.f32 1.0, %v7398_v38  ;;  %v7384_v61 = vmul.f32 %v10829_v25, %v7381_v49  ;;  %v7379_v54 = vmul.f32 %v10831_v11, %v7376_v40  ;;  %v13487_v38 = vld [vmem:[%s14174_s28 + $0x20] sm:$0xff]  ;;  %v13493_v49 = vld [vmem:[%s14174_s28 + $0x18] sm:$0xff]  ;;  %v13499_v40 = vld [vmem:[%s14174_s28 + $0x10] sm:$0xff] }
0x3146   :  { %v7404_v6 = vmul.f32 %v7401_v24, %v7341_v56  ;;  %v7399_v53 = vmul.f32 %v10835_v20, %v7384_v61  ;;  %v7382_v32 = vadd.f32 0.2548296, %v7379_v54  ;;  %v13505_v24 = vld [vmem:[%s14174_s28 + $0x8] sm:$0xff]  ;;  %v13511_v61 = vld [vmem:[%s14174_s28] sm:$0xff] }
0x3148   :  { %v7407_v37 = vadd.f32 1.0, %v7404_v6  ;;  %v7402_v43 = vsub.f32 1.0, %v7399_v53  ;;  %v7385_v55 = vmul.f32 %v10831_v11, %v7382_v32 }
0x314a   :  { %v7410_v17 = vmul.f32 %v7407_v37, %v7332_v51  ;;  %v7405_v35 = vmul.f32 %v7402_v43, %v7342_v31  ;;  %v7400_v18 = vmul.f32 %v10837_v34, %v7385_v55 }
0x314c   :  { %v7408_v33 = vadd.f32 1.0, %v7405_v35  ;;  %10520 = vmatmul.mubr.f32.vlgmr.msra.gmra.mxu1 %v7410_v17  ;;  %v7403_v29 = vsub.f32 1.0, %v7400_v18 }
0x314d   :  { %10522 = vmatprep.mubr.msk.f32.mxu1 %vm11097_vm5, %v11096_v48 }
0x314e   :  { %v7411_v13 = vmul.f32 %v7408_v33, %v7333_v46  ;;  %v7406_v16 = vmul.f32 %v7403_v29, %v7343_v4 }
0x3150   :  { %10523 = vmatmul.mubr.f32.gmra.mxu1 %v7411_v13  ;;  %v7409_v25 = vadd.f32 1.0, %v7406_v16 }
0x3151   :  { %10525 = vmatprep.mubr.msk.f32.mxu1 %vm11097_vm5, %v11096_v48 }
0x3152   :  { %v7412_v15 = vmul.f32 %v7409_v25, %v7334_v8 }
0x3154   :  { %10526 = vmatmul.mubr.f32.gmra.mxu1 %v7412_v15 }
0x320c   :  { %v7479_v26 = vpop.f32.mrf.mxu1 }
0x320d   :  { %v7493_v59 = vadd.f32 %v7479_v26, %v13348_v0  ;;  %v13453_v0 = vsub.f32 %v13387_v27, %v7532_v30  ;;  %v9150_v26 = vld [vmem:[%s14175_s2] ss:$0 sm:$0xff] }
0x320e   :  { %v10521_v58 = vpop.f32.mrf.mxu1 }
0x320f   :  { %v7496_v11 = vadd.f32 %v13370_v36, %v7493_v59  ;;  %v7538_v27 = vmul.f32 %v13453_v0, %v13453_v0 }
0x3210   :  { %v7484_v60 = vpop.f32.mrf.mxu1 }
0x3211   :  { %v7494_v44 = vadd.f32 %v7484_v60, %v13354_v63  ;;  %v8210_v45 = vsel %vm277_vm4, %v7496_v11, 0.0  ;;  %v7545_v52 = vsel %vm284_vm2, %v7538_v27, 0.0 }
0x3212   :  { %8211 = vadd.xlane.f32.xlu1 %v8210_v45  ;;  %v10524_v9 = vpop.f32.mrf.mxu1 }
0x3213   :  { %v7497_v14 = vadd.f32 %v13370_v36, %v7494_v44 }
0x3214   :  { %v7489_v5 = vpop.f32.mrf.mxu1 }
0x3215   :  { %v8213_v39 = vsel %vm277_vm4, %v7497_v14, 0.0  ;;  %v7495_v63 = vadd.f32 %v7489_v5, %v13360_v7  ;;  %v7542_v7 = vsel %vm277_vm4, %v7537_v28, 0.0 }
0x3216   :  { %8214 = vadd.xlane.f32.xlu0 %v8213_v39  ;;  %v10527_v42 = vpop.f32.mrf.mxu1 }
0x3217   :  { %v7498_v10 = vadd.f32 %v13370_v36, %v7495_v63  ;;  %v7508_v36 = vld [vmem:[%s14174_s28 + $0x38] sm:$0xff]  ;;  %s14179_s28 = sld [smem:[#allocation23_spill]] }
0x3218   :  { %7625 = vmatprep.subr.mxu0 %v7508_v36 }
0x3219   :  { %v8216_v41 = vsel %vm284_vm2, %v7498_v10, 0.0  ;;  %7626 = vmatpush1.msra.mxu0 %v13477_v62 }
0x321a   :  { %7540 = vadd.xlane.f32.xlu0 %v7539_v2  ;;  %8217 = vadd.xlane.f32.xlu1 %v8216_v41 }
0x321b   :  { %7627 = vmatprep.subr.mxu0 %v13482_v50 }
0x321c   :  { %7628 = vmatpush1.msra.mxu0 %v13487_v38 }
0x321d   :  { %7629 = vmatprep.subr.mxu0 %v13493_v49 }
0x321e   :  { %7546 = vadd.xlane.f32.xlu0 %v7545_v52  ;;  %7543 = vadd.xlane.f32.xlu1 %v7542_v7 }
0x321f   :  { %7630 = vmatpush1.msra.mxu0 %v13499_v40 }
0x3220   :  { %7631 = vmatprep.subr.mxu0 %v13505_v24 }
0x3221   :  { %7632 = vmatpush1.msra.mxu0 %v13511_v61 }
0x3222   :  { %8291 = vmatprep.subr.mxu0 %v7508_v36 }
0x329b   :  { %v8212_v20 = vpop.xlane.xlu1 %8211 }
0x329c   :  { %v8219_v56 = vmul.f32 0.03125, %v8212_v20 }
0x329e   :  { %v13516_v54 = vsub.f32 %v7496_v11, %v8219_v56 }
0x329f   :  { %v8215_v6 = vpop.xlane.xlu0 %8214 }
0x32a0   :  { %v8220_v53 = vmul.f32 0.03125, %v8215_v6  ;;  %v8225_v32 = vmul.f32 %v13516_v54, %v13516_v54 }
0x32a2   :  { %v13520_v51 = vsub.f32 %v7497_v14, %v8220_v53  ;;  %v8228_v37 = vsel %vm277_vm4, %v8225_v32, 0.0 }
0x32a3   :  { %v7541_v43 = vpop.xlane.xlu0 %7540  ;;  %8229 = vadd.xlane.f32.xlu1 %v8228_v37  ;;  %v8218_v55 = vpop.xlane.xlu1 %8217  ;;  %v7511_v37 = vld [vmem:[%s14177_s8] sm:$0x3] }
0x32a4   :  { %v7548_v31 = vmul.f32 0.03125, %v7541_v43  ;;  %v8226_v34 = vmul.f32 %v13520_v51, %v13520_v51  ;;  %v8221_v17 = vmul.f32 0.03125, %v8218_v55  ;;  %v7512_v43 = vadd.f32 1e-05, %v7511_v37 }
0x32a6   :  { %v7551_v35 = vadd.f32 1e-06, %v7548_v31  ;;  %v8231_v18 = vsel %vm277_vm4, %v8226_v34, 0.0  ;;  %v13526_v46 = vsub.f32 %v7498_v10, %v8221_v17  ;;  %v7579_v31 = vlaneseq  ;;  %v7510_v34 = vld [vmem:[%s14178_s0] sm:$0x3] }
0x32a7   :  { %8232 = vadd.xlane.f32.xlu0 %v8231_v18  ;;  %v7547_v33 = vpop.xlane.xlu0 %7546  ;;  %v7544_v13 = vpop.xlane.xlu1 %7543 }
0x32a8   :  { %10838 = vrsqrt.f32 %v7551_v35  ;;  %v7550_v29 = vmul.f32 0.03125, %v7547_v33  ;;  %v7549_v4 = vmul.f32 0.03125, %v7544_v13  ;;  %v8227_v16 = vmul.f32 %v13526_v46, %v13526_v46  ;;  %v7516_v35 = vld [vmem:[%s14179_s28] sm:$0x3] }
0x32a9   :  { %v13585_v33 = vld [vmem:[%s14180_s25] sm:$0x3] }
0x32aa   :  { %v7553_v8 = vadd.f32 1e-06, %v7550_v29  ;;  %v7552_v25 = vadd.f32 1e-06, %v7549_v4  ;;  %v8234_v15 = vsel %vm284_vm2, %v8227_v16, 0.0 }
0x32ab   :  { %8235 = vadd.xlane.f32.xlu1 %v8234_v15  ;;  %v7515_v29 = vld [vmem:[%s14181_s21] sm:$0x3] }
0x32ac   :  { %10840 = vrsqrt.f32 %v7553_v8 }
0x32ad   :  { %10842 = vrsqrt.f32 %v7552_v25 }
0x32b5   :  { %v10839_v1 = vpop.eup %10838 }
0x32b6   :  { %v7557_v12 = vmul.f32 %v10839_v1, %v13447_v19 }
0x32b8   :  { %v7566_v57 = vmul.f32 %v9150_v26, %v7557_v12 }
0x32b9   :  { %v10841_v59 = vpop.eup %10840 }
0x32ba   :  { %v10843_v58 = vpop.eup %10842  ;;  %v7559_v11 = vmul.f32 %v10841_v59, %v13453_v0  ;;  %v13540_v44 = vadd.f32 %v9151_v21, %v7566_v57 }
0x32bb   :  { %v7558_v60 = vmul.f32 %v10843_v58, %v13459_v23 }
0x32bc   :  { %v7568_v30 = vmul.f32 %v9150_v26, %v7559_v11  ;;  %v7592_v14 = vrot.slane %v13540_v44, 1 }
0x32bd   :  { %v7567_v45 = vmul.f32 %v9150_v26, %v7558_v60 }
0x32be   :  { %v7577_v9 = vadd.f32 %v9151_v21, %v7568_v30 }
0x32bf   :  { %v7576_v3 = vadd.f32 %v9151_v21, %v7567_v45 }
0x32c0   :  { %v7595_v39 = vrot.slane %v7577_v9, 1 }
0x32c1   :  { %v7593_v19 = vrot.slane %v7576_v3, 1 }
0x32c3   :  { %v7594_v5 = vsel %vm210_vm1, %v7592_v14, %v7593_v19  ;;  %v7596_v0 = vsel %vm210_vm1, %v7593_v19, %v7595_v39 }
0x32c4   :  { %9152 = vmatmul.mubr.msk.f32.vlgmr.msra.gmra.mxu0 %vm277_vm4, %v7594_v5 }
0x32c5   :  { %7671 = vmatprep.mubr.f32.mxu0 %v11096_v48  ;;  %8292 = vmatpush1.msra.mxu0 %v13477_v62 }
0x32c6   :  { %8293 = vmatprep.subr.mxu0 %v13482_v50 }
0x32c7   :  { %8294 = vmatpush1.msra.mxu0 %v13487_v38 }
0x32c8   :  { %9153 = vmatmul.mubr.msk.f32.gmra.mxu0 %vm277_vm4, %v7596_v0  ;;  %8295 = vmatprep.subr.mxu0 %v13493_v49 }
0x32c9   :  { %8296 = vmatpush1.msra.mxu0 %v13499_v40  ;;  %8331 = vmatprep.mubr.f32.mxu0 %v11096_v48 }
0x32ca   :  { %8297 = vmatprep.subr.mxu0 %v13505_v24 }
0x32cb   :  { %8298 = vmatpush1.msra.mxu0 %v13511_v61 }
0x332c   :  { %v8230_v47 = vpop.xlane.xlu1 %8229 }
0x332d   :  { %v8237_v23 = vmul.f32 0.03125, %v8230_v47 }
0x332f   :  { %v8240_v63 = vadd.f32 1e-06, %v8237_v23 }
0x3330   :  { %v8233_v42 = vpop.xlane.xlu0 %8232 }
0x3331   :  { %10844 = vrsqrt.f32 %v8240_v63  ;;  %v8238_v10 = vmul.f32 0.03125, %v8233_v42 }
0x3333   :  { %v8241_v2 = vadd.f32 1e-06, %v8238_v10 }
0x3334   :  { %v8236_v27 = vpop.xlane.xlu1 %8235 }
0x3335   :  { %10846 = vrsqrt.f32 %v8241_v2  ;;  %v8239_v41 = vmul.f32 0.03125, %v8236_v27 }
0x3337   :  { %v8242_v28 = vadd.f32 1e-06, %v8239_v41 }
0x3339   :  { %10848 = vrsqrt.f32 %v8242_v28 }
0x333a   :  { %10850 = vrsqrt.f32 %v7512_v43 }
0x333e   :  { %v10845_v52 = vpop.eup %10844 }
0x333f   :  { %v8246_v7 = vmul.f32 %v10845_v52, %v13516_v54 }
0x3341   :  { %v8249_v36 = vmul.f32 %v9150_v26, %v8246_v7 }
0x3342   :  { %v10847_v62 = vpop.eup %10846 }
0x3343   :  { %v8247_v50 = vmul.f32 %v10847_v62, %v13520_v51  ;;  %v13558_v38 = vadd.f32 %v9151_v21, %v8249_v36 }
0x3345   :  { %v8250_v49 = vmul.f32 %v9150_v26, %v8247_v50  ;;  %v8258_v20 = vrot.slane %v13558_v38, 1 }
0x3346   :  { %v10849_v40 = vpop.eup %10848 }
0x3347   :  { %v8253_v24 = vadd.f32 %v9151_v21, %v8250_v49  ;;  %v8248_v61 = vmul.f32 %v10849_v40, %v13526_v46  ;;  %v10851_v55 = vpop.eup %10850 }
0x3348   :  { %v13573_v17 = vmul.f32 %v10851_v55, %v7510_v34 }
0x3349   :  { %v8259_v56 = vrot.slane %v8253_v24, 1  ;;  %v8251_v6 = vmul.f32 %v9150_v26, %v8248_v61 }
0x334a   :  { %v7517_v18 = vmul.f32 %v7516_v35, %v13573_v17 }
0x334b   :  { %v8260_v53 = vsel %vm210_vm1, %v8258_v20, %v8259_v56  ;;  %v8254_v54 = vadd.f32 %v9151_v21, %v8251_v6 }
0x334c   :  { %9154 = vmatmul.mubr.msk.f32.vlgmr.msra.gmra.mxu0 %vm277_vm4, %v8260_v53  ;;  %v13590_v13 = vsub.f32 %v7515_v29, %v7517_v18 }
0x334d   :  { %8337 = vmatprep.mubr.f32.mxu0 %v11096_v48  ;;  %v8261_v32 = vrot.slane %v8254_v54, 1  ;;  %v13575_v48 = vshrl.u32 %v7579_v31, 7 }
0x334f   :  { %v8262_v51 = vsel %vm210_vm1, %v8259_v56, %v8261_v32  ;;  %v7581_v46 = vsub.s32 0, %v13575_v48 }
0x3350   :  { %9155 = vmatmul.mubr.msk.f32.gmra.mxu0 %vm277_vm4, %v8262_v51 }
0x3351   :  { %v13593_v4 = vrot.slane %v13585_v33, %v7581_v46  ;;  %v13596_v16 = vrot.slane %v13573_v17, %v7581_v46  ;;  %v13600_v15 = vrot.slane %v13590_v13, %v7581_v46 }
0x3384   :  { %v7667_v8 = vpop.f32.mrf.mxu0 }
0x3385   :  { %v7668_v25 = vadd.f32 %v7667_v8, %v13593_v4 }
0x3386   :  { %v13602_v1 = vpop.f32.mrf.mxu0 }
0x3387   :  { %v7689_v26 = vmul.f32 %v13596_v16, %v7668_v25 }
0x3388   :  { %v7673_v12 = vpop.f32.mrf.mxu0 }
0x3389   :  { %v7704_v59 = vadd.f32 %v13600_v15, %v7689_v26  ;;  %v7674_v57 = vadd.f32 %v7673_v12, %v13593_v4 }
0x338b   :  { %v7712_v58 = vmul.f32 0.70710677, %v7704_v59  ;;  %v7691_v21 = vmul.f32 %v13596_v16, %v7674_v57  ;;  %v7708_v8 = vmul.f32 0.5, %v7704_v59 }
0x338d   :  { %v7724_v11 = vand.u32 2147483647, %v7712_v58  ;;  %v7706_v60 = vadd.f32 %v13600_v15, %v7691_v21  ;;  %vm7716_vm1 = vcmp.ge.f32.partialorder %v7712_v58, 0.0 }
0x338e   :  { %v7720_v31 = vsel %vm7716_vm1, 1.0, %v11109_v22 }
0x338f   :  { %v7728_v30 = vmul.f32 0.3275911, %v7724_v11  ;;  %v7714_v45 = vmul.f32 0.70710677, %v7706_v60  ;;  %v7780_v5 = vsub.f32 0.0, %v7724_v11  ;;  %v7710_v25 = vmul.f32 0.5, %v7706_v60 }
0x3391   :  { %v7732_v3 = vadd.f32 1.0, %v7728_v30  ;;  %v7726_v9 = vand.u32 2147483647, %v7714_v45  ;;  %v7784_v39 = vmul.f32 %v7780_v5, %v7724_v11  ;;  %vm7718_vm5 = vcmp.ge.f32.partialorder %v7714_v45, 0.0 }
0x3392   :  { %v7722_v18 = vsel %vm7718_vm5, 1.0, %v11109_v22 }
0x3393   :  { %10852 = vrcp.f32 %v7732_v3  ;;  %v7730_v14 = vmul.f32 0.3275911, %v7726_v9  ;;  %v7782_v0 = vsub.f32 0.0, %v7726_v9  ;;  %v7788_v63 = vmul.f32 1.442695, %v7784_v39 }
0x3395   :  { %v7734_v19 = vadd.f32 1.0, %v7730_v14  ;;  %v7786_v42 = vmul.f32 %v7782_v0, %v7726_v9 }
0x3397   :  { %10854 = vrcp.f32 %v7734_v19  ;;  %v7792_v28 = vmul.f32 1.442695, %v7786_v42  ;;  %v13620_v42 = vld [vmem:[%s14182_s20] sm:$0x3] }
0x3398   :  { %10856 = vpow2.f32 %v7788_v63 }
0x3399   :  { %10858 = vpow2.f32 %v7792_v28 }
0x33a0   :  { %v10853_v47 = vpop.eup %10852 }
0x33a1   :  { %v7744_v23 = vmul.f32 1.0614054, %v10853_v47 }
0x33a3   :  { %v7748_v10 = vadd.f32 -1.4531521, %v7744_v23 }
0x33a4   :  { %v10855_v2 = vpop.eup %10854 }
0x33a5   :  { %v7752_v27 = vmul.f32 %v10853_v47, %v7748_v10  ;;  %v7746_v41 = vmul.f32 1.0614054, %v10855_v2  ;;  %v10857_v6 = vpop.eup %10856 }
0x33a6   :  { %v10859_v43 = vpop.eup %10858 }
0x33a7   :  { %v7756_v52 = vadd.f32 1.4214138, %v7752_v27  ;;  %v7750_v7 = vadd.f32 -1.4531521, %v7746_v41 }
0x33a9   :  { %v7760_v36 = vmul.f32 %v10853_v47, %v7756_v52  ;;  %v7754_v62 = vmul.f32 %v10855_v2, %v7750_v7 }
0x33ab   :  { %v7764_v50 = vadd.f32 -0.28449672, %v7760_v36  ;;  %v7758_v49 = vadd.f32 1.4214138, %v7754_v62 }
0x33ad   :  { %v7768_v40 = vmul.f32 %v10853_v47, %v7764_v50  ;;  %v7762_v24 = vmul.f32 %v10855_v2, %v7758_v49 }
0x33af   :  { %v7772_v61 = vadd.f32 0.2548296, %v7768_v40  ;;  %v7766_v20 = vadd.f32 -0.28449672, %v7762_v24  ;;  %v13647_v24 = vsub.s32 1, %v13575_v48 }
0x33b1   :  { %v7776_v56 = vmul.f32 %v10853_v47, %v7772_v61  ;;  %v7770_v53 = vmul.f32 %v10855_v2, %v7766_v20  ;;  %v7675_v61 = vpop.f32.mrf.mxu0  ;;  %v13651_v20 = vrot.slane %v13585_v33, %v13647_v24  ;;  %v13666_v33 = vrot.slane %v13590_v13, %v13647_v24 }
0x33b3   :  { %v7796_v54 = vmul.f32 %v10857_v6, %v7776_v56  ;;  %v7774_v32 = vadd.f32 0.2548296, %v7770_v53  ;;  %v7676_v56 = vadd.f32 %v7675_v61, %v13651_v20  ;;  %v7670_v6 = vadd.f32 %v13602_v1, %v13651_v20 }
0x33b4   :  { %v13658_v53 = vrot.slane %v13573_v17, %v13647_v24 }
0x33b5   :  { %v7800_v51 = vsub.f32 1.0, %v7796_v54  ;;  %v7778_v37 = vmul.f32 %v10855_v2, %v7774_v32  ;;  %v13625_v2 = vld [vmem:[%s14183_s5] sm:$0x3] }
0x33b6   :  { %v7692_v48 = vmul.f32 %v13658_v53, %v7676_v56  ;;  %v7690_v54 = vmul.f32 %v13658_v53, %v7670_v6 }
0x33b7   :  { %v7804_v55 = vmul.f32 %v7800_v51, %v7720_v31  ;;  %v7798_v34 = vmul.f32 %v10859_v43, %v7778_v37 }
0x33b8   :  { %v7707_v1 = vadd.f32 %v13666_v33, %v7692_v48  ;;  %v7705_v32 = vadd.f32 %v13666_v33, %v7690_v54 }
0x33b9   :  { %v7802_v35 = vsub.f32 1.0, %v7798_v34  ;;  %v7808_v46 = vadd.f32 1.0, %v7804_v55 }
0x33ba   :  { %v7715_v17 = vmul.f32 0.70710677, %v7707_v1  ;;  %v7713_v51 = vmul.f32 0.70710677, %v7705_v32 }
0x33bb   :  { %v7806_v29 = vmul.f32 %v7802_v35, %v7722_v18  ;;  %v7812_v12 = vmul.f32 %v7808_v46, %v7708_v8 }
0x33bc   :  { %v7727_v37 = vand.u32 2147483647, %v7715_v17  ;;  %v7725_v43 = vand.u32 2147483647, %v7713_v51  ;;  %vm7719_vm10 = vcmp.ge.f32.partialorder %v7715_v17, 0.0  ;;  %vm7717_vm11 = vcmp.ge.f32.partialorder %v7713_v51, 0.0 }
0x33bd   :  { %v7810_v26 = vadd.f32 1.0, %v7806_v29  ;;  %v7721_v56 = vsel %vm7717_vm11, 1.0, %v11109_v22 }
0x33be   :  { %v7731_v31 = vmul.f32 0.3275911, %v7727_v37  ;;  %v7729_v55 = vmul.f32 0.3275911, %v7725_v43 }
0x33bf   :  { %v7814_v57 = vmul.f32 %v7810_v26, %v7710_v25 }
0x33c0   :  { %v7735_v34 = vadd.f32 1.0, %v7731_v31  ;;  %v7733_v35 = vadd.f32 1.0, %v7729_v55 }
0x33c1   :  { %v7816_v58 = vmax.f32 %v7812_v12, %v7814_v57  ;;  %v7783_v57 = vsub.f32 0.0, %v7727_v37 }
0x33c3   :  { %v7817_v21 = vrot.slane %v7816_v58, 4 }
0x33c5   :  { %v7818_v11 = vmax.f32 %v7816_v58, %v7817_v21  ;;  %v7781_v58 = vsub.f32 0.0, %v7725_v43 }
0x33c7   :  { %v7819_v30 = vrot.slane %v7818_v11, 2 }
0x33c9   :  { %v7820_v3 = vmax.f32 %v7818_v11, %v7819_v30  ;;  %v7787_v30 = vmul.f32 %v7783_v57, %v7727_v37  ;;  %v7711_v37 = vmul.f32 0.5, %v7707_v1 }
0x33cb   :  { %v7821_v9 = vrot.slane %v7820_v3, 1 }
0x33cd   :  { %v13611_v14 = vmax.f32 %v7820_v3, %v7821_v9  ;;  %v7785_v3 = vmul.f32 %v7781_v58, %v7725_v43  ;;  %v7709_v43 = vmul.f32 0.5, %v7705_v32 }
0x33cf   :  { %v7833_v45 = vsel %vm277_vm4, %v13611_v14, 0.0 }
0x33d0   :  { %7834 = vadd.xlane.f32.xlu0 %v7833_v45 }
0x3459   :  { %v7835_v19 = vpop.xlane.xlu0 %7834 }
0x345a   :  { %v7836_v5 = vmul.f32 0.03125, %v7835_v19  ;;  %v7794_v19 = vmul.f32 1.442695, %v7787_v30 }
0x345c   :  { %v7837_v59 = vsub.f32 %v13611_v14, %v7836_v5  ;;  %v7790_v5 = vmul.f32 1.442695, %v7785_v3 }
0x345e   :  { %v7838_v60 = vmul.f32 %v7837_v59, %v7837_v59 }
0x3460   :  { %v7839_v39 = vsel %vm277_vm4, %v7838_v60, 0.0 }
0x3461   :  { %7840 = vadd.xlane.f32.xlu1 %v7839_v39 }
0x34ea   :  { %v7841_v0 = vpop.xlane.xlu1 %7840 }
0x34eb   :  { %v7842_v47 = vmul.f32 0.03125, %v7841_v0 }
0x34ed   :  { %v7843_v23 = vadd.f32 1e-05, %v7842_v47 }
0x34ef   :  { %10860 = vrsqrt.f32 %v7843_v23 }
0x34f0   :  { %10862 = vrcp.f32 %v7735_v34 }
0x34f1   :  { %10864 = vrcp.f32 %v7733_v35 }
0x34f2   :  { %10866 = vpow2.f32 %v7794_v19 }
0x34f3   :  { %10868 = vpow2.f32 %v7790_v5 }
0x34fc   :  { %v10861_v63 = vpop.eup %10860 }
0x34fd   :  { %v7845_v10 = vmul.f32 %v10861_v63, %v7837_v59  ;;  %v10863_v18 = vpop.eup %10862 }
0x34fe   :  { %v10865_v13 = vpop.eup %10864  ;;  %v7747_v46 = vmul.f32 1.0614054, %v10863_v18 }
0x34ff   :  { %v7846_v27 = vmul.f32 %v7845_v10, %v13620_v42  ;;  %v7745_v29 = vmul.f32 1.0614054, %v10865_v13 }
0x3500   :  { %v7751_v8 = vadd.f32 -1.4531521, %v7747_v46 }
0x3501   :  { %v13629_v41 = vadd.f32 %v7846_v27, %v13625_v2  ;;  %v7749_v25 = vadd.f32 -1.4531521, %v7745_v29  ;;  %v10867_v27 = vpop.eup %10866 }
0x3502   :  { %v7755_v26 = vmul.f32 %v10863_v18, %v7751_v8 }
0x3503   :  { %v7848_v28 = vmul.f32 %v13629_v41, %v13629_v41  ;;  %v7753_v12 = vmul.f32 %v10865_v13, %v7749_v25 }
0x3504   :  { %v7759_v21 = vadd.f32 1.4214138, %v7755_v26 }
0x3505   :  { %v7849_v52 = vsel %vm284_vm2, %v7848_v28, 0.0  ;;  %v7757_v11 = vadd.f32 1.4214138, %v7753_v12 }
0x3506   :  { %7850 = vadd.xlane.f32.xlu0 %v7849_v52  ;;  %v7763_v9 = vmul.f32 %v10863_v18, %v7759_v21  ;;  %v10869_v52 = vpop.eup %10868 }
0x3507   :  { %v7761_v45 = vmul.f32 %v10865_v13, %v7757_v11 }
0x3508   :  { %v7767_v59 = vadd.f32 -0.28449672, %v7763_v9 }
0x3509   :  { %v7765_v60 = vadd.f32 -0.28449672, %v7761_v45 }
0x350a   :  { %v7771_v39 = vmul.f32 %v10863_v18, %v7767_v59 }
0x350b   :  { %v7769_v0 = vmul.f32 %v10865_v13, %v7765_v60 }
0x350c   :  { %v7775_v47 = vadd.f32 0.2548296, %v7771_v39 }
0x350d   :  { %v7773_v23 = vadd.f32 0.2548296, %v7769_v0 }
0x350e   :  { %v7779_v63 = vmul.f32 %v10863_v18, %v7775_v47 }
0x350f   :  { %v7777_v10 = vmul.f32 %v10865_v13, %v7773_v23 }
0x3510   :  { %v7799_v28 = vmul.f32 %v10867_v27, %v7779_v63 }
0x351c   :  { %7867 = vrot.lane.b32.xlu0 %v13611_v14, %s14163_s6 }
0x3520   :  { %7907 = vrot.lane.b32.xlu0 %v13540_v44, %s11110_s7 }
0x3524   :  { %7918 = vrot.lane.b32.xlu0 %v13611_v14, %s14166_s30 }
0x358f   :  { %v13640_v7 = vpop.xlane.xlu0 %7850 }
0x3590   :  { %10870 = vrsqrt.f32 %v13640_v7  ;;  %vm7854_vm13 = vcmp.eq.f32.partialorder %v13640_v7, inf  ;;  %vm7856_vm14 = vcmp.eq.f32.partialorder %v13640_v7, 0.0 }
0x3593   :  { %v7868_v36 = vpop.permute.xlu0 %7867 }
0x3594   :  { %v7870_v62 = vsel %vm277_vm4, %v7868_v36, 0.0  ;;  %v7797_v36 = vmul.f32 %v10869_v52, %v7777_v10 }
0x3595   :  { %7871 = vadd.xlane.f32.xlu1 %v7870_v62  ;;  %v7803_v62 = vsub.f32 1.0, %v7799_v28  ;;  %v7857_v28 = vand.u32 2147483648, %v13640_v7 }
0x3597   :  { %v13643_v50 = vpop.permute.xlu0 %7907 }
0x359b   :  { %v7919_v49 = vpop.permute.xlu0 %7918 }
0x359c   :  { %v7921_v40 = vsel %vm277_vm4, %v7919_v49, 0.0  ;;  %v7801_v49 = vsub.f32 1.0, %v7797_v36 }
0x359d   :  { %7922 = vadd.xlane.f32.xlu0 %v7921_v40  ;;  %v7723_v40 = vsel %vm7719_vm10, 1.0, %v11109_v22  ;;  %v10871_v63 = vpop.eup %10870 }
0x359e   :  { %v7807_v61 = vmul.f32 %v7803_v62, %v7723_v40  ;;  %v7805_v6 = vmul.f32 %v7801_v49, %v7721_v56  ;;  %v7853_v10 = vmul.f32 %v10871_v63, %v13640_v7 }
0x35a0   :  { %v7811_v48 = vadd.f32 1.0, %v7807_v61  ;;  %v7809_v54 = vadd.f32 1.0, %v7805_v6  ;;  %v7855_v27 = vsel %vm7854_vm13, %v13640_v7, %v7853_v10 }
0x35a2   :  { %v7815_v31 = vmul.f32 %v7811_v48, %v7711_v37  ;;  %v7813_v55 = vmul.f32 %v7809_v54, %v7709_v43 }
0x35a4   :  { %v7825_v34 = vsel %vm7823_vm12, %v7815_v31, -inf  ;;  %v7824_v17 = vsel %vm7823_vm12, %v7813_v55, -inf }
0x35a5   :  { %v7826_v35 = vmax.f32 %v7824_v17, %v7825_v34 }
0x35a7   :  { %v7827_v51 = vrot.slane %v7826_v35, 4 }
0x35a9   :  { %v7828_v46 = vmax.f32 %v7826_v35, %v7827_v51 }
0x35ab   :  { %v7829_v25 = vrot.slane %v7828_v46, 2 }
0x35ad   :  { %v7830_v26 = vmax.f32 %v7828_v46, %v7829_v25 }
0x35af   :  { %v7831_v58 = vrot.slane %v7830_v26, 1 }
0x35b1   :  { %v13680_v21 = vmax.f32 %v7830_v26, %v7831_v58 }
0x35b3   :  { %7958 = vrot.lane.b32.xlu0 %v13540_v44, %s14166_s30 }
0x35b7   :  { %7969 = vrot.lane.b32.xlu0 %v13611_v14, %s11110_s7 }
0x361e   :  { %v7872_v18 = vpop.xlane.xlu1 %7871 }
0x361f   :  { %v7873_v13 = vmul.f32 0.03125, %v7872_v18 }
0x3621   :  { %v7874_v29 = vsub.f32 %v13611_v14, %v7873_v13 }
0x3623   :  { %v7875_v8 = vmul.f32 %v7874_v29, %v7874_v29 }
0x3625   :  { %7877 = vrot.lane.b32.xlu1 %v7875_v8, %s14163_s6 }
0x3626   :  { %v7923_v1 = vpop.xlane.xlu0 %7922 }
0x3627   :  { %v7924_v32 = vmul.f32 0.03125, %v7923_v1 }
0x3629   :  { %v7925_v12 = vsub.f32 %v13611_v14, %v7924_v32 }
0x362a   :  { %v13684_v11 = vpop.permute.xlu0 %7958 }
0x362b   :  { %v7926_v57 = vmul.f32 %v7925_v12, %v7925_v12 }
0x362d   :  { %7928 = vrot.lane.b32.xlu1 %v7926_v57, %s14166_s30 }
0x362e   :  { %v7970_v30 = vpop.permute.xlu0 %7969 }
0x362f   :  { %v7972_v3 = vsel %vm277_vm4, %v7970_v30, 0.0 }
0x3631   :  { %8066 = vrot.lane.b32.xlu1 %v13680_v21, %s14163_s6 }
0x3655   :  { %7973 = vadd.xlane.f32.xlu1 %v7972_v3 }
0x3697   :  { %v7878_v9 = vpop.permute.xlu1 %7877 }
0x3698   :  { %v7880_v59 = vsel %vm277_vm4, %v7878_v9, 0.0 }
0x369f   :  { %v7929_v45 = vpop.permute.xlu1 %7928 }
0x36a0   :  { %v7931_v23 = vsel %vm277_vm4, %v7929_v45, 0.0  ;;  %v8333_v45 = vpop.f32.mrf.mxu0 }
0x36a3   :  { %v8067_v19 = vpop.permute.xlu1 %8066 }
0x36a4   :  { %v8069_v5 = vsel %vm277_vm4, %v8067_v19, 0.0  ;;  %v8335_v19 = vpop.f32.mrf.mxu0 }
0x36a5   :  { %8070 = vadd.xlane.f32.xlu1 %v8069_v5 }
0x36a6   :  { %v8339_v5 = vpop.f32.mrf.mxu0 }
0x36b6   :  { %8009 = vrot.lane.b32.xlu1 %v13540_v44, %s14163_s6 }
0x36da   :  { %7881 = vadd.xlane.f32.xlu1 %v7880_v59  ;;  %v8340_v59 = vadd.f32 %v8339_v5, %v13593_v4 }
0x36de   :  { %v7974_v60 = vpop.xlane.xlu1 %7973 }
0x36df   :  { %v7975_v39 = vmul.f32 0.03125, %v7974_v60  ;;  %v8334_v60 = vadd.f32 %v8333_v45, %v13593_v4 }
0x36e1   :  { %v7976_v0 = vsub.f32 %v13611_v14, %v7975_v39  ;;  %v7858_v14 = vsel %vm7856_vm14, %v7857_v28, %v7855_v27  ;;  %v8346_v39 = vmul.f32 %v8340_v59, %v13596_v16  ;;  %v8336_v27 = vadd.f32 %v8335_v19, %v13651_v20 }
0x36e2   :  { %v7859_v52 = vmax.f32 %v7858_v14, 1e-12 }
0x36e3   :  { %v7977_v47 = vmul.f32 %v7976_v0, %v7976_v0 }
0x36e4   :  { %10872 = vrcp.f32 %v7859_v52 }
0x36e5   :  { %7979 = vrot.lane.b32.xlu0 %v7977_v47, %s11110_s7  ;;  %v8341_v47 = vpop.f32.mrf.mxu0 }
0x36e6   :  { %v8342_v63 = vadd.f32 %v8341_v47, %v13651_v20 }
0x36e8   :  { %v8347_v4 = vmul.f32 %v8342_v63, %v13658_v53 }
0x36f1   :  { %v10873_v36 = vpop.eup %10872 }
0x36f2   :  { %v13701_v62 = vmul.f32 %v10873_v36, %v13629_v41  ;;  %v13755_v36 = vadd.f32 %v8347_v4, %v13666_v33 }
0x36f4   :  { %v7862_v61 = vmul.f32 %v13701_v62, %v13540_v44 }
0x36f6   :  { %v7863_v6 = vsel %vm284_vm2, %v7862_v61, 0.0  ;;  %v13762_v61 = vmul.f32 0.70710677, %v13755_v36 }
0x36f8   :  { %vm8363_vm9 = vcmp.ge.f32.partialorder %v13762_v61, 0.0 }
0x3704   :  { %7932 = vadd.xlane.f32.xlu0 %v7931_v23  ;;  %v13738_v23 = vadd.f32 %v8346_v39, %v13600_v15 }
0x3706   :  { %v13746_v28 = vmul.f32 0.70710677, %v13738_v23 }
0x3708   :  { %v8370_v52 = vand.u32 2147483647, %v13746_v28  ;;  %vm8362_vm15 = vcmp.ge.f32.partialorder %v13746_v28, 0.0 }
0x370a   :  { %v8374_v20 = vmul.f32 0.3275911, %v8370_v52 }
0x372e   :  { %v13706_v56 = vpop.xlane.xlu1 %8070 }
0x3732   :  { %v13709_v7 = vpop.permute.xlu1 %8009 }
0x3757   :  { %v7980_v49 = vpop.permute.xlu0 %7979 }
0x3758   :  { %v7982_v40 = vsel %vm277_vm4, %v7980_v49, 0.0 }
0x3759   :  { %7983 = vadd.xlane.f32.xlu1 %v7982_v40 }
0x375d   :  { %7864 = vadd.xlane.f32.xlu1 %v7863_v6 }
0x3763   :  { %v7882_v48 = vpop.xlane.xlu1 %7881 }
0x3764   :  { %v7883_v54 = vmul.f32 0.03125, %v7882_v48 }
0x3766   :  { %v7884_v37 = vadd.f32 1e-05, %v7883_v54  ;;  %v8378_v54 = vadd.f32 1.0, %v8374_v20 }
0x3768   :  { %10874 = vrsqrt.f32 %v7884_v37  ;;  %v8371_v37 = vand.u32 2147483647, %v13762_v61 }
0x376a   :  { %v8427_v4 = vsub.f32 0.0, %v8371_v37 }
0x3775   :  { %v10875_v41 = vpop.eup %10874 }
0x3776   :  { %v7886_v43 = vmul.f32 %v10875_v41, %v7874_v29 }
0x3778   :  { %v7887_v31 = vmul.f32 %v7886_v43, %v13620_v42 }
0x377a   :  { %v13713_v55 = vadd.f32 %v7887_v31, %v13625_v2 }
0x377c   :  { %v7889_v34 = vmul.f32 %v13713_v55, %v13713_v55 }
0x377e   :  { %7891 = vrot.lane.b32.xlu0 %v7889_v34, %s14163_s6 }
0x378d   :  { %v7933_v17 = vpop.xlane.xlu0 %7932 }
0x378e   :  { %v7934_v35 = vmul.f32 0.03125, %v7933_v17 }
0x3790   :  { %v7935_v51 = vadd.f32 1e-05, %v7934_v35 }
0x3792   :  { %10876 = vrsqrt.f32 %v7935_v51 }
0x379f   :  { %v10877_v18 = vpop.eup %10876 }
0x37a0   :  { %v7937_v13 = vmul.f32 %v10877_v18, %v7925_v12 }
0x37a2   :  { %v7938_v46 = vmul.f32 %v7937_v13, %v13620_v42 }
0x37a4   :  { %v13720_v29 = vadd.f32 %v7938_v46, %v13625_v2 }
0x37a6   :  { %v7940_v8 = vmul.f32 %v13720_v29, %v13720_v29 }
0x37a8   :  { %7942 = vrot.lane.b32.xlu0 %v7940_v8, %s14166_s30 }
0x37e2   :  { %v7984_v25 = vpop.xlane.xlu1 %7983 }
0x37e3   :  { %v7985_v1 = vmul.f32 0.03125, %v7984_v25 }
0x37e5   :  { %v7986_v32 = vadd.f32 1e-05, %v7985_v1 }
0x37e7   :  { %10878 = vrsqrt.f32 %v7986_v32 }
0x37e8   :  { %10880 = vrcp.f32 %v8378_v54 }
0x37f0   :  { %v7892_v26 = vpop.permute.xlu0 %7891 }
0x37f1   :  { %v7894_v57 = vsel %vm284_vm2, %v7892_v26, 0.0 }
0x37f2   :  { %7895 = vadd.xlane.f32.xlu0 %v7894_v57 }
0x37f4   :  { %v10879_v58 = vpop.eup %10878 }
0x37f5   :  { %v7988_v12 = vmul.f32 %v10879_v58, %v7976_v0  ;;  %v8344_v0 = vmul.f32 %v8334_v60, %v13596_v16  ;;  %v8345_v16 = vmul.f32 %v8336_v27, %v13658_v53  ;;  %v10881_v35 = vpop.eup %10880  ;;  %v8426_v58 = vsub.f32 0.0, %v8370_v52 }
0x37f6   :  { %v8390_v18 = vmul.f32 1.0614054, %v10881_v35 }
0x37f7   :  { %v7989_v30 = vmul.f32 %v7988_v12, %v13620_v42  ;;  %v13742_v10 = vadd.f32 %v8344_v0, %v13600_v15  ;;  %v13759_v49 = vadd.f32 %v8345_v16, %v13666_v33  ;;  %v8375_v33 = vmul.f32 0.3275911, %v8371_v37 }
0x37f8   :  { %v8394_v46 = vadd.f32 -1.4531521, %v8390_v18  ;;  %v8430_v5 = vmul.f32 %v8426_v58, %v8370_v52 }
0x37f9   :  { %v13728_v3 = vadd.f32 %v7989_v30, %v13625_v2  ;;  %v13750_v14 = vmul.f32 0.70710677, %v13742_v10  ;;  %v13765_v48 = vmul.f32 0.70710677, %v13759_v49  ;;  %v8379_v34 = vadd.f32 1.0, %v8375_v33 }
0x37fa   :  { %v8398_v32 = vmul.f32 %v10881_v35, %v8394_v46  ;;  %v8436_v63 = vmul.f32 1.442695, %v8430_v5 }
0x37fb   :  { %v7991_v9 = vmul.f32 %v13728_v3, %v13728_v3  ;;  %v8368_v15 = vand.u32 2147483647, %v13750_v14  ;;  %v8369_v43 = vand.u32 2147483647, %v13765_v48  ;;  %vm8360_vm0 = vcmp.ge.f32.partialorder %v13750_v14, 0.0 }
0x37fc   :  { %vm8361_vm6 = vcmp.ge.f32.partialorder %v13765_v48, 0.0 }
0x37fd   :  { %7993 = vrot.lane.b32.xlu1 %v7991_v9, %s11110_s7  ;;  %v8372_v6 = vmul.f32 0.3275911, %v8368_v15  ;;  %v8373_v31 = vmul.f32 0.3275911, %v8369_v43  ;;  %v8424_v30 = vsub.f32 0.0, %v8368_v15 }
0x37fe   :  { %v8402_v9 = vadd.f32 1.4214138, %v8398_v32 }
0x37ff   :  { %v8376_v41 = vadd.f32 1.0, %v8372_v6  ;;  %v8377_v17 = vadd.f32 1.0, %v8373_v31  ;;  %v8428_v60 = vmul.f32 %v8424_v30, %v8368_v15 }
0x3800   :  { %v8406_v39 = vmul.f32 %v10881_v35, %v8402_v9 }
0x3801   :  { %10882 = vrcp.f32 %v8376_v41  ;;  %v8432_v16 = vmul.f32 1.442695, %v8428_v60  ;;  %v8431_v41 = vmul.f32 %v8427_v4, %v8371_v37 }
0x3802   :  { %10884 = vrcp.f32 %v8379_v34  ;;  %v8410_v20 = vadd.f32 -0.28449672, %v8406_v39 }
0x3803   :  { %10886 = vrcp.f32 %v8377_v17  ;;  %v8438_v17 = vmul.f32 1.442695, %v8431_v41 }
0x3804   :  { %10888 = vpow2.f32 %v8436_v63  ;;  %v8414_v33 = vmul.f32 %v10881_v35, %v8410_v20 }
0x3805   :  { %10890 = vpow2.f32 %v8432_v16 }
0x3806   :  { %v8418_v18 = vadd.f32 0.2548296, %v8414_v33  ;;  %10892 = vpow2.f32 %v8438_v17  ;;  %v8365_v33 = vsel %vm8361_vm6, 1.0, %v11109_v22 }
0x380e   :  { %v10883_v51 = vpop.eup %10882 }
0x380f   :  { %v8388_v13 = vmul.f32 1.0614054, %v10883_v51  ;;  %v10885_v8 = vpop.eup %10884 }
0x3810   :  { %v10887_v1 = vpop.eup %10886  ;;  %v8391_v26 = vmul.f32 1.0614054, %v10885_v8 }
0x3811   :  { %v8392_v25 = vadd.f32 -1.4531521, %v8388_v13  ;;  %v8389_v12 = vmul.f32 1.0614054, %v10887_v1 }
0x3812   :  { %v8395_v45 = vadd.f32 -1.4531521, %v8391_v26  ;;  %v8422_v26 = vmul.f32 %v10881_v35, %v8418_v18  ;;  %v8366_v35 = vsel %vm8362_vm15, 1.0, %v11109_v22 }
0x3813   :  { %v8396_v57 = vmul.f32 %v10883_v51, %v8392_v25  ;;  %v8393_v59 = vadd.f32 -1.4531521, %v8389_v12  ;;  %v10889_v12 = vpop.eup %10888 }
0x3814   :  { %v8399_v0 = vmul.f32 %v10885_v8, %v8395_v45  ;;  %v8442_v37 = vmul.f32 %v10889_v12, %v8422_v26  ;;  %v10891_v9 = vpop.eup %10890 }
0x3815   :  { %v8400_v19 = vadd.f32 1.4214138, %v8396_v57  ;;  %v8397_v27 = vmul.f32 %v10887_v1, %v8393_v59 }
0x3816   :  { %v8403_v6 = vadd.f32 1.4214138, %v8399_v0  ;;  %v8446_v5 = vsub.f32 1.0, %v8442_v37  ;;  %v10893_v0 = vpop.eup %10892 }
0x3817   :  { %v8404_v47 = vmul.f32 %v10883_v51, %v8400_v19  ;;  %v8401_v54 = vadd.f32 1.4214138, %v8397_v27 }
0x3818   :  { %v8407_v52 = vmul.f32 %v10885_v8, %v8403_v6 }
0x3819   :  { %v8405_v15 = vmul.f32 %v10887_v1, %v8401_v54 }
0x381a   :  { %v7943_v40 = vpop.permute.xlu0 %7942  ;;  %v8411_v46 = vadd.f32 -0.28449672, %v8407_v52 }
0x381b   :  { %v7945_v53 = vsel %vm284_vm2, %v7943_v40, 0.0  ;;  %v8425_v40 = vsub.f32 0.0, %v8369_v43  ;;  %v8409_v32 = vadd.f32 -0.28449672, %v8405_v15 }
0x381c   :  { %v8415_v57 = vmul.f32 %v10885_v8, %v8411_v46 }
0x381d   :  { %v8429_v31 = vmul.f32 %v8425_v40, %v8369_v43  ;;  %v8413_v30 = vmul.f32 %v10887_v1, %v8409_v32 }
0x381e   :  { %v8419_v45 = vadd.f32 0.2548296, %v8415_v57 }
0x381f   :  { %v8434_v13 = vmul.f32 1.442695, %v8429_v31  ;;  %v8417_v19 = vadd.f32 0.2548296, %v8413_v30  ;;  %v13780_v31 = vpop.xlane.xlu1 %7864 }
0x3820   :  { %v8423_v59 = vmul.f32 %v10885_v8, %v8419_v45  ;;  %v8354_v8 = vmul.f32 0.5, %v13738_v23  ;;  %v8355_v23 = vmul.f32 0.5, %v13755_v36 }
0x3821   :  { %7946 = vadd.xlane.f32.xlu1 %v7945_v53  ;;  %v8408_v53 = vadd.f32 -0.28449672, %v8404_v47  ;;  %10894 = vpow2.f32 %v8434_v13  ;;  %v8421_v39 = vmul.f32 %v10887_v1, %v8417_v19  ;;  %v8450_v47 = vmul.f32 %v8446_v5, %v8366_v35 }
0x3822   :  { %v8443_v63 = vmul.f32 %v10893_v0, %v8423_v59  ;;  %v8352_v1 = vmul.f32 0.5, %v13742_v10  ;;  %v8353_v10 = vmul.f32 0.5, %v13759_v49 }
0x3823   :  { %v8412_v34 = vmul.f32 %v10883_v51, %v8408_v53  ;;  %v8454_v20 = vadd.f32 1.0, %v8450_v47  ;;  %v8367_v53 = vsel %vm8363_vm9, 1.0, %v11109_v22 }
0x3824   :  { %v8447_v28 = vsub.f32 1.0, %v8443_v63 }
0x3825   :  { %v8416_v25 = vadd.f32 0.2548296, %v8412_v34  ;;  %v8458_v6 = vmul.f32 %v8454_v20, %v8354_v8 }
0x3826   :  { %v8451_v54 = vmul.f32 %v8447_v28, %v8367_v53 }
0x3827   :  { %v8420_v58 = vmul.f32 %v10883_v51, %v8416_v25  ;;  %v8364_v51 = vsel %vm8360_vm0, 1.0, %v11109_v22 }
0x3828   :  { %v8455_v34 = vadd.f32 1.0, %v8451_v54 }
0x3829   :  { %v8440_v43 = vmul.f32 %v10891_v9, %v8420_v58 }
0x382a   :  { %v8459_v13 = vmul.f32 %v8455_v34, %v8355_v23 }
0x382b   :  { %v8444_v60 = vsub.f32 1.0, %v8440_v43 }
0x382c   :  { %v8468_v22 = vsel %vm7823_vm12, %v8459_v13, -inf }
0x382d   :  { %v8448_v4 = vmul.f32 %v8444_v60, %v8364_v51 }
0x382e   :  { %v10895_v27 = vpop.eup %10894 }
0x382f   :  { %v8441_v16 = vmul.f32 %v10895_v27, %v8421_v39  ;;  %v8452_v40 = vadd.f32 1.0, %v8448_v4 }
0x3831   :  { %v8445_v14 = vsub.f32 1.0, %v8441_v16  ;;  %v8456_v41 = vmul.f32 %v8452_v40, %v8352_v1 }
0x3833   :  { %v8449_v52 = vmul.f32 %v8445_v14, %v8365_v33  ;;  %v8460_v61 = vmax.f32 %v8456_v41, %v8458_v6 }
0x3835   :  { %v8453_v17 = vadd.f32 1.0, %v8449_v52  ;;  %v8461_v18 = vrot.slane %v8460_v61, 4 }
0x3837   :  { %v8457_v46 = vmul.f32 %v8453_v17, %v8353_v10  ;;  %v8462_v25 = vmax.f32 %v8460_v61, %v8461_v18  ;;  %v8072_v10 = vmul.f32 0.03125, %v13706_v56  ;;  %v8020_v56 = vsel %vm277_vm4, %v13680_v21, 0.0 }
0x3839   :  { %v8467_v32 = vsel %vm7823_vm12, %v8457_v46, -inf  ;;  %v8463_v26 = vrot.slane %v8462_v25, 2  ;;  %v13817_v13 = vsub.f32 %v13680_v21, %v8072_v10 }
0x383a   :  { %v8469_v57 = vmax.f32 %v8467_v32, %v8468_v22 }
0x383b   :  { %v8464_v12 = vmax.f32 %v8462_v25, %v8463_v26  ;;  %v8074_v46 = vmul.f32 %v13817_v13, %v13817_v13 }
0x383c   :  { %v8470_v30 = vrot.slane %v8469_v57, 4 }
0x383d   :  { %v8465_v36 = vrot.slane %v8464_v12, 1 }
0x383e   :  { %v8471_v37 = vmax.f32 %v8469_v57, %v8470_v30 }
0x383f   :  { %v13787_v9 = vmax.f32 %v8464_v12, %v8465_v36 }
0x3840   :  { %v8472_v45 = vrot.slane %v8471_v37, 2 }
0x3842   :  { %v8473_v43 = vmax.f32 %v8471_v37, %v8472_v45 }
0x3844   :  { %v8474_v39 = vrot.slane %v8473_v43, 1 }
0x3846   :  { %v13795_v0 = vmax.f32 %v8473_v43, %v8474_v39 }
0x386f   :  { %v7994_v15 = vpop.permute.xlu1 %7993 }
0x3870   :  { %v7996_v48 = vsel %vm284_vm2, %v7994_v15, 0.0 }
0x3871   :  { %7997 = vadd.xlane.f32.xlu0 %v7996_v48 }
0x387b   :  { %v7896_v58 = vpop.xlane.xlu0 %7895 }
0x387c   :  { %10896 = vrsqrt.f32 %v7896_v58  ;;  %vm7899_vm7 = vcmp.eq.f32.partialorder %v7896_v58, inf  ;;  %v7902_v5 = vand.u32 2147483648, %v7896_v58  ;;  %vm7901_vm8 = vcmp.eq.f32.partialorder %v7896_v58, 0.0 }
0x3887   :  { %8510 = vrot.lane.b32.xlu0 %v13787_v9, %s14163_s6 }
0x3889   :  { %v10897_v49 = vpop.eup %10896 }
0x388a   :  { %v7898_v19 = vmul.f32 %v10897_v49, %v7896_v58 }
0x388b   :  { %8561 = vrot.lane.b32.xlu0 %v13787_v9, %s14166_s30 }
0x388c   :  { %v7900_v59 = vsel %vm7899_vm7, %v7896_v58, %v7898_v19 }
0x388d   :  { %v7903_v60 = vsel %vm7901_vm8, %v7902_v5, %v7900_v59 }
0x388e   :  { %v7904_v35 = vmax.f32 %v7903_v60, 1e-12 }
0x388f   :  { %8612 = vrot.lane.b32.xlu0 %v13787_v9, %s11110_s7 }
0x3890   :  { %10898 = vrcp.f32 %v7904_v35 }
0x3893   :  { %8697 = vrot.lane.b32.xlu0 %v13795_v0, %s14163_s6 }
0x389d   :  { %v10899_v47 = vpop.eup %10898 }
0x389e   :  { %v13800_v51 = vmul.f32 %v10899_v47, %v13713_v55 }
0x38a0   :  { %v7910_v63 = vmul.f32 %v13643_v50, %v13800_v51 }
0x38a2   :  { %7912 = vrot.lane.b32.xlu1 %v7910_v63, %s14163_s6 }
0x38aa   :  { %v7947_v27 = vpop.xlane.xlu1 %7946 }
0x38ab   :  { %10900 = vrsqrt.f32 %v7947_v27  ;;  %vm7950_vm1 = vcmp.eq.f32.partialorder %v7947_v27, inf  ;;  %v7953_v20 = vand.u32 2147483648, %v7947_v27  ;;  %vm7952_vm5 = vcmp.eq.f32.partialorder %v7947_v27, 0.0 }
0x38b8   :  { %v10901_v4 = vpop.eup %10900 }
0x38b9   :  { %v7949_v16 = vmul.f32 %v10901_v4, %v7947_v27 }
0x38bb   :  { %v7951_v28 = vsel %vm7950_vm1, %v7947_v27, %v7949_v16 }
0x38bc   :  { %v7954_v40 = vsel %vm7952_vm5, %v7953_v20, %v7951_v28 }
0x38bd   :  { %v7955_v8 = vmax.f32 %v7954_v40, 1e-12 }
0x38bf   :  { %10902 = vrcp.f32 %v7955_v8  ;;  %v13854_v8 = vrot.slane %v13620_v42, %v13647_v24 }
0x38cc   :  { %v10903_v14 = vpop.eup %10902 }
0x38cd   :  { %v13806_v55 = vmul.f32 %v10903_v14, %v13720_v29 }
0x38cf   :  { %v7961_v1 = vmul.f32 %v13684_v11, %v13806_v55 }
0x38d1   :  { %7963 = vrot.lane.b32.xlu0 %v7961_v1, %s14166_s30 }
0x38fa   :  { %v7998_v6 = vpop.xlane.xlu0 %7997 }
0x38fb   :  { %10904 = vrsqrt.f32 %v7998_v6  ;;  %vm8001_vm10 = vcmp.eq.f32.partialorder %v7998_v6, inf  ;;  %v8004_v11 = vand.u32 2147483648, %v7998_v6  ;;  %vm8003_vm11 = vcmp.eq.f32.partialorder %v7998_v6, 0.0 }
0x38fe   :  { %v8511_v53 = vpop.permute.xlu0 %8510 }
0x38ff   :  { %v8513_v54 = vsel %vm277_vm4, %v8511_v53, 0.0 }
0x3900   :  { %8514 = vadd.xlane.f32.xlu1 %v8513_v54 }
0x3902   :  { %v8562_v41 = vpop.permute.xlu0 %8561 }
0x3903   :  { %v8564_v33 = vsel %vm277_vm4, %v8562_v41, 0.0 }
0x3904   :  { %8565 = vadd.xlane.f32.xlu0 %v8564_v33 }
0x3906   :  { %v8613_v52 = vpop.permute.xlu0 %8612 }
0x3907   :  { %v8615_v61 = vsel %vm277_vm4, %v8613_v52, 0.0 }
0x3908   :  { %v10905_v29 = vpop.eup %10904  ;;  %8616 = vadd.xlane.f32.xlu1 %v8615_v61 }
0x3909   :  { %v8000_v34 = vmul.f32 %v10905_v29, %v7998_v6 }
0x390a   :  { %v8698_v15 = vpop.permute.xlu0 %8697 }
0x390b   :  { %v8002_v17 = vsel %vm8001_vm10, %v7998_v6, %v8000_v34  ;;  %v8700_v23 = vsel %vm277_vm4, %v8698_v15, 0.0  ;;  %v13858_v6 = vrot.slane %v13625_v2, %v13647_v24 }
0x390c   :  { %v8005_v48 = vsel %vm8003_vm11, %v8004_v11, %v8002_v17  ;;  %8701 = vadd.xlane.f32.xlu1 %v8700_v23 }
0x390d   :  { %v8006_v18 = vmax.f32 %v8005_v48, 1e-12 }
0x390f   :  { %10906 = vrcp.f32 %v8006_v18 }
0x3914   :  { %v7913_v45 = vpop.permute.xlu1 %7912 }
0x391c   :  { %v10907_v25 = vpop.eup %10906 }
0x391d   :  { %8076 = vrot.lane.b32.xlu1 %v8074_v46, %s14163_s6  ;;  %v13823_v22 = vmul.f32 %v10907_v25, %v13728_v3 }
0x391f   :  { %v8012_v32 = vmul.f32 %v13709_v7, %v13823_v22  ;;  %v7915_v7 = vsel %vm284_vm2, %v7913_v45, 0.0 }
0x3921   :  { %8014 = vrot.lane.b32.xlu0 %v8012_v32, %s11110_s7 }
0x3940   :  { %8021 = vadd.xlane.f32.xlu0 %v8020_v56 }
0x3943   :  { %v7964_v26 = vpop.permute.xlu0 %7963 }
0x3944   :  { %v7966_v52 = vsel %vm284_vm2, %v7964_v26, 0.0 }
0x3989   :  { %v8515_v43 = vpop.xlane.xlu1 %8514 }
0x398a   :  { %v8516_v5 = vmul.f32 0.03125, %v8515_v43 }
0x398c   :  { %v13835_v59 = vsub.f32 %v13787_v9, %v8516_v5 }
0x398d   :  { %v8566_v57 = vpop.xlane.xlu0 %8565 }
0x398e   :  { %v8567_v61 = vmul.f32 0.03125, %v8566_v57 }
0x3990   :  { %v13865_v42 = vsub.f32 %v13787_v9, %v8567_v61 }
0x3991   :  { %v8617_v19 = vpop.xlane.xlu1 %8616 }
0x3992   :  { %v8618_v60 = vmul.f32 0.03125, %v8617_v19  ;;  %v8569_v29 = vmul.f32 %v13865_v42, %v13865_v42 }
0x3993   :  { %v8015_v58 = vpop.permute.xlu0 %8014 }
0x3994   :  { %v8017_v49 = vsel %vm284_vm2, %v8015_v58, 0.0  ;;  %v13840_v35 = vsub.f32 %v13787_v9, %v8618_v60  ;;  %v8663_v60 = vsel %vm277_vm4, %v13795_v0, 0.0 }
0x3995   :  { %v8702_v39 = vpop.xlane.xlu1 %8701 }
0x3996   :  { %v8703_v47 = vmul.f32 0.03125, %v8702_v39  ;;  %v8620_v63 = vmul.f32 %v13840_v35, %v13840_v35  ;;  %v8177_v39 = vmul.f32 %v13540_v44, %v13540_v44 }
0x3998   :  { %v13846_v27 = vsub.f32 %v13795_v0, %v8703_v47 }
0x3999   :  { %v8077_v16 = vpop.permute.xlu1 %8076 }
0x399a   :  { %v8705_v4 = vmul.f32 %v13846_v27, %v13846_v27  ;;  %v8079_v2 = vsel %vm277_vm4, %v8077_v16, 0.0 }
0x39c9   :  { %v8022_v12 = vpop.xlane.xlu0 %8021 }
0x39ca   :  { %v8023_v30 = vmul.f32 0.03125, %v8022_v12 }
0x39cc   :  { %v8024_v36 = vsub.f32 %v13680_v21, %v8023_v30  ;;  %v8518_v21 = vmul.f32 %v13835_v59, %v13835_v59 }
0x39ce   :  { %v8025_v37 = vmul.f32 %v8024_v36, %v8024_v36 }
0x39d0   :  { %v8026_v3 = vsel %vm277_vm4, %v8025_v37, 0.0 }
0x39d1   :  { %8027 = vadd.xlane.f32.xlu1 %v8026_v3 }
0x39d5   :  { %7916 = vadd.xlane.f32.xlu1 %v7915_v7 }
0x39d9   :  { %8018 = vadd.xlane.f32.xlu1 %v8017_v49 }
0x39ea   :  { %8520 = vrot.lane.b32.xlu1 %v8518_v21, %s14163_s6  ;;  %v8178_v21 = vsel %vm284_vm2, %v8177_v39, 0.0 }
0x39ee   :  { %8622 = vrot.lane.b32.xlu1 %v8620_v63, %s11110_s7 }
0x39f2   :  { %8707 = vrot.lane.b32.xlu1 %v8705_v4, %s14163_s6 }
0x3a5a   :  { %v8028_v20 = vpop.xlane.xlu1 %8027 }
0x3a5b   :  { %v8029_v28 = vmul.f32 0.03125, %v8028_v20 }
0x3a5d   :  { %v8030_v40 = vadd.f32 1e-05, %v8029_v28 }
0x3a5e   :  { %v13882_v45 = vpop.xlane.xlu1 %7916 }
0x3a5f   :  { %10908 = vrsqrt.f32 %v8030_v40 }
0x3a62   :  { %v13884_v7 = vpop.xlane.xlu1 %8018 }
0x3a66   :  { %v8521_v49 = vpop.permute.xlu1 %8520 }
0x3a67   :  { %v8523_v16 = vsel %vm277_vm4, %v8521_v49, 0.0 }
0x3a6a   :  { %v8623_v43 = vpop.permute.xlu1 %8622 }
0x3a6b   :  { %v8625_v28 = vsel %vm277_vm4, %v8623_v43, 0.0 }
0x3a6c   :  { %v10909_v14 = vpop.eup %10908 }
0x3a6d   :  { %v8032_v1 = vmul.f32 %v10909_v14, %v8024_v36 }
0x3a6e   :  { %v8708_v19 = vpop.permute.xlu1 %8707 }
0x3a6f   :  { %v8039_v53 = vmul.f32 %v13854_v8, %v8032_v1  ;;  %v8710_v5 = vsel %vm277_vm4, %v8708_v19, 0.0 }
0x3a71   :  { %v8046_v54 = vadd.f32 %v13858_v6, %v8039_v53 }
0x3a73   :  { %v8047_v41 = vmul.f32 %v8046_v54, %v8046_v54 }
0x3a75   :  { %v8048_v33 = vsel %vm284_vm2, %v8047_v41, 0.0 }
0x3a76   :  { %8049 = vadd.xlane.f32.xlu0 %v8048_v33 }
0x3a7a   :  { %7967 = vadd.xlane.f32.xlu0 %v7966_v52 }
0x3a90   :  { %8571 = vrot.lane.b32.xlu0 %v8569_v29, %s14166_s30 }
0x3aaf   :  { %8080 = vadd.xlane.f32.xlu0 %v8079_v2 }
0x3aff   :  { %v8050_v24 = vpop.xlane.xlu0 %8049 }
0x3b00   :  { %10910 = vrsqrt.f32 %v8050_v24  ;;  %vm8053_vm12 = vcmp.eq.f32.partialorder %v8050_v24, inf  ;;  %v8056_v15 = vand.u32 2147483648, %v8050_v24  ;;  %vm8055_vm13 = vcmp.eq.f32.partialorder %v8050_v24, 0.0 }
0x3b03   :  { %v13876_v32 = vpop.xlane.xlu0 %7967 }
0x3b07   :  { %v8572_v56 = vpop.permute.xlu0 %8571 }
0x3b08   :  { %v8574_v20 = vsel %vm277_vm4, %v8572_v56, 0.0 }
0x3b0d   :  { %v10911_v34 = vpop.eup %10910 }
0x3b0e   :  { %v8052_v11 = vmul.f32 %v10911_v34, %v8050_v24 }
0x3b10   :  { %v8054_v17 = vsel %vm8053_vm12, %v8050_v24, %v8052_v11 }
0x3b11   :  { %v8057_v23 = vsel %vm8055_vm13, %v8056_v15, %v8054_v17 }
0x3b12   :  { %v8058_v48 = vmax.f32 %v8057_v23, 1e-12 }
0x3b14   :  { %10912 = vrcp.f32 %v8058_v48 }
0x3b21   :  { %v10913_v18 = vpop.eup %10912 }
0x3b22   :  { %v13871_v10 = vmul.f32 %v10913_v18, %v8046_v54 }
0x3b24   :  { %v8061_v46 = vmul.f32 %v13871_v10, %v13540_v44 }
0x3b26   :  { %v8062_v25 = vsel %vm284_vm2, %v8061_v46, 0.0 }
0x3b27   :  { %8063 = vadd.xlane.f32.xlu1 %v8062_v25  ;;  %v8114_v25 = vmax.f32 %v13780_v31, %v13882_v45 }
0x3b29   :  { %v8115_v56 = vmax.f32 %v8114_v25, %v13876_v32 }
0x3b38   :  { %v8081_v26 = vpop.xlane.xlu0 %8080 }
0x3b39   :  { %v8082_v57 = vmul.f32 0.03125, %v8081_v26  ;;  %v8116_v26 = vmax.f32 %v8115_v56, %v13884_v7  ;;  %v11072_v56 = vld [vmem:[%s14182_s20] sm:$0x3] }
0x3b3b   :  { %v8083_v58 = vadd.f32 1e-05, %v8082_v57 }
0x3b3d   :  { %10914 = vrsqrt.f32 %v8083_v58 }
0x3b4a   :  { %v10915_v12 = vpop.eup %10914 }
0x3b4b   :  { %v8085_v30 = vmul.f32 %v10915_v12, %v13817_v13  ;;  %v8476_v13 = vsel %vm277_vm4, %v13787_v9, 0.0 }
0x3b4d   :  { %v8086_v36 = vmul.f32 %v8085_v30, %v13854_v8 }
0x3b4f   :  { %v8087_v37 = vadd.f32 %v8086_v36, %v13858_v6 }
0x3b51   :  { %v8088_v3 = vmul.f32 %v8087_v37, %v8087_v37 }
0x3b53   :  { %8090 = vrot.lane.b32.xlu1 %v8088_v3, %s14163_s6 }
0x3b77   :  { %8711 = vadd.xlane.f32.xlu1 %v8710_v5 }
0x3b7b   :  { %8477 = vadd.xlane.f32.xlu1 %v8476_v13 }
0x3b7f   :  { %8664 = vadd.xlane.f32.xlu1 %v8663_v60 }
0x3b83   :  { %8179 = vadd.xlane.f32.xlu1 %v8178_v21 }
0x3bb0   :  { %v8064_v47 = vpop.xlane.xlu1 %8063 }
0x3bb1   :  { %v8117_v57 = vmax.f32 %v8116_v26, %v8064_v47 }
0x3bc5   :  { %v8091_v63 = vpop.permute.xlu1 %8090 }
0x3bc6   :  { %v8093_v4 = vsel %vm284_vm2, %v8091_v63, 0.0 }
0x3bc7   :  { %8094 = vadd.xlane.f32.xlu0 %v8093_v4 }
0x3bcb   :  { %8524 = vadd.xlane.f32.xlu0 %v8523_v16 }
0x3bcf   :  { %8575 = vadd.xlane.f32.xlu0 %v8574_v20 }
0x3bd3   :  { %8626 = vadd.xlane.f32.xlu0 %v8625_v28 }
0x3c00   :  { %v8712_v2 = vpop.xlane.xlu1 %8711 }
0x3c04   :  { %v8478_v34 = vpop.xlane.xlu1 %8477 }
0x3c05   :  { %v8479_v15 = vmul.f32 0.03125, %v8478_v34 }
0x3c07   :  { %v13906_v23 = vsub.f32 %v13787_v9, %v8479_v15 }
0x3c09   :  { %v8481_v46 = vmul.f32 %v13906_v23, %v13906_v23 }
0x3c50   :  { %v8095_v40 = vpop.xlane.xlu0 %8094 }
0x3c51   :  { %10916 = vrsqrt.f32 %v8095_v40  ;;  %vm8098_vm14 = vcmp.eq.f32.partialorder %v8095_v40, inf  ;;  %v8101_v53 = vand.u32 2147483648, %v8095_v40  ;;  %vm8100_vm15 = vcmp.eq.f32.partialorder %v8095_v40, 0.0 }
0x3c54   :  { %v13903_v24 = vpop.xlane.xlu0 %8524 }
0x3c58   :  { %v8576_v11 = vpop.xlane.xlu0 %8575 }
0x3c59   :  { %v8577_v63 = vmul.f32 0.03125, %v8576_v11 }
0x3c5c   :  { %v8627_v17 = vpop.xlane.xlu0 %8626 }
0x3c5d   :  { %v8628_v28 = vmul.f32 0.03125, %v8627_v17 }
0x3c5e   :  { %v10917_v14 = vpop.eup %10916 }
0x3c5f   :  { %v8097_v1 = vmul.f32 %v10917_v14, %v8095_v40 }
0x3c61   :  { %v8099_v54 = vsel %vm8098_vm14, %v8095_v40, %v8097_v1 }
0x3c62   :  { %v8102_v41 = vsel %vm8100_vm15, %v8101_v53, %v8099_v54  ;;  %v8713_v53 = vmul.f32 0.03125, %v8712_v2  ;;  %v8629_v54 = vadd.f32 1e-05, %v8628_v28 }
0x3c63   :  { %v8103_v33 = vmax.f32 %v8102_v41, 1e-12 }
0x3c64   :  { %v8714_v41 = vadd.f32 1e-05, %v8713_v53 }
0x3c65   :  { %10918 = vrcp.f32 %v8103_v33 }
0x3c72   :  { %v10919_v52 = vpop.eup %10918 }
0x3c73   :  { %v13898_v61 = vmul.f32 %v10919_v52, %v8087_v37 }
0x3c75   :  { %v8106_v29 = vmul.f32 %v13898_v61, %v13643_v50  ;;  %v8482_v50 = vsel %vm277_vm4, %v8481_v46, 0.0 }
0x3c77   :  { %8108 = vrot.lane.b32.xlu0 %v8106_v29, %s14163_s6 }
0x3ce9   :  { %v8109_v48 = vpop.permute.xlu0 %8108 }
0x3cea   :  { %v8111_v18 = vsel %vm284_vm2, %v8109_v48, 0.0 }
0x3ceb   :  { %8112 = vadd.xlane.f32.xlu0 %v8111_v18 }
0x3cef   :  { %8483 = vadd.xlane.f32.xlu0 %v8482_v50 }
0x3d74   :  { %v8113_v9 = vpop.xlane.xlu0 %8112 }
0x3d75   :  { %v8118_v58 = vmax.f32 %v8117_v57, %v8113_v9 }
0x3d77   :  { %v8119_v12 = vsub.f32 %v13780_v31, %v8118_v58  ;;  %v8122_v30 = vsub.f32 %v13882_v45, %v8118_v58  ;;  %v8125_v36 = vsub.f32 %v13876_v32, %v8118_v58  ;;  %v8128_v37 = vsub.f32 %v13884_v7, %v8118_v58 }
0x3d78   :  { %v8131_v19 = vsub.f32 %v8064_v47, %v8118_v58  ;;  %v8134_v13 = vsub.f32 %v8113_v9, %v8118_v58  ;;  %v8578_v47 = vadd.f32 1e-05, %v8577_v63 }
0x3d79   :  { %v8120_v3 = vmul.f32 1.442695, %v8119_v12  ;;  %v8123_v49 = vmul.f32 1.442695, %v8122_v30  ;;  %v8126_v43 = vmul.f32 1.442695, %v8125_v36 }
0x3d7a   :  { %v8129_v5 = vmul.f32 1.442695, %v8128_v37  ;;  %v8132_v60 = vmul.f32 1.442695, %v8131_v19  ;;  %v8135_v39 = vmul.f32 1.442695, %v8134_v13  ;;  %v8665_v37 = vpop.xlane.xlu1 %8664 }
0x3d7b   :  { %10920 = vpow2.f32 %v8120_v3  ;;  %v8666_v3 = vmul.f32 0.03125, %v8665_v37  ;;  %v8526_v13 = vmul.f32 0.03125, %v13903_v24 }
0x3d7c   :  { %10922 = vpow2.f32 %v8123_v49 }
0x3d7d   :  { %10924 = vpow2.f32 %v8126_v43  ;;  %v13955_v49 = vsub.f32 %v13795_v0, %v8666_v3  ;;  %v8527_v0 = vadd.f32 1e-05, %v8526_v13 }
0x3d7e   :  { %10926 = vpow2.f32 %v8129_v5  ;;  %v13962_v5 = vpop.xlane.xlu1 %8179 }
0x3d7f   :  { %10928 = vpow2.f32 %v8132_v60  ;;  %v8668_v43 = vmul.f32 %v13955_v49, %v13955_v49  ;;  %v8484_v60 = vpop.xlane.xlu0 %8483 }
0x3d80   :  { %10930 = vpow2.f32 %v8135_v39 }
0x3d81   :  { %10932 = vrsqrt.f32 %v8578_v47  ;;  %v8669_v19 = vsel %vm277_vm4, %v8668_v43, 0.0 }
0x3d88   :  { %v10921_v31 = vpop.eup %10920 }
0x3d89   :  { %v10923_v45 = vpop.eup %10922 }
0x3d8a   :  { %v8137_v21 = vadd.f32 %v10923_v45, %v10921_v31  ;;  %v10925_v32 = vpop.eup %10924 }
0x3d8b   :  { %v10927_v4 = vpop.eup %10926 }
0x3d8c   :  { %v8138_v7 = vadd.f32 %v10925_v32, %v8137_v21  ;;  %v10929_v20 = vpop.eup %10928 }
0x3d8d   :  { %v10931_v14 = vpop.eup %10930 }
0x3d8e   :  { %v8139_v16 = vadd.f32 %v10927_v4, %v8138_v7  ;;  %v10933_v33 = vpop.eup %10932 }
0x3d8f   :  { %v8580_v46 = vmul.f32 %v10933_v33, %v13865_v42  ;;  %v11073_v42 = vld [vmem:[%s14183_s5] sm:$0x3] }
0x3d90   :  { %v8140_v40 = vadd.f32 %v10929_v20, %v8139_v16 }
0x3d91   :  { %v8581_v26 = vmul.f32 %v11072_v56, %v8580_v46 }
0x3d92   :  { %v8141_v1 = vadd.f32 %v10931_v14, %v8140_v40 }
0x3d93   :  { %v13935_v9 = vadd.f32 %v11073_v42, %v8581_v26 }
0x3d94   :  { %10934 = vrcp.f32 %v8141_v1 }
0x3d95   :  { %10936 = vrsqrt.f32 %v8629_v54  ;;  %v8583_v12 = vmul.f32 %v13935_v9, %v13935_v9 }
0x3d96   :  { %10938 = vrsqrt.f32 %v8714_v41 }
0x3d97   :  { %10940 = vrsqrt.f32 %v8527_v0 }
0x3da1   :  { %v10935_v52 = vpop.eup %10934 }
0x3da2   :  { %v8146_v29 = vmul.f32 %v10935_v52, %v10923_v45  ;;  %v8153_v34 = vmul.f32 %v10935_v52, %v10925_v32  ;;  %v8144_v11 = vmul.f32 %v10935_v52, %v10921_v31  ;;  %v8167_v15 = vmul.f32 %v10935_v52, %v10929_v20  ;;  %v10937_v50 = vpop.eup %10936 }
0x3da3   :  { %v8160_v18 = vmul.f32 %v10935_v52, %v10927_v4  ;;  %v8170_v25 = vmul.f32 %v10935_v52, %v10931_v14  ;;  %v10939_v57 = vpop.eup %10938  ;;  %v8485_v14 = vmul.f32 0.03125, %v8484_v60 }
0x3da4   :  { %v8147_v48 = vmul.f32 %v8146_v29, %v13800_v51  ;;  %v8154_v17 = vmul.f32 %v8153_v34, %v13806_v55  ;;  %v8631_v51 = vmul.f32 %v10937_v50, %v13840_v35  ;;  %v8716_v58 = vmul.f32 %v10939_v57, %v13846_v27  ;;  %v10941_v24 = vpop.eup %10940 }
0x3da5   :  { %v8161_v2 = vmul.f32 %v8160_v18, %v13823_v22  ;;  %v8171_v55 = vmul.f32 %v8170_v25, %v13898_v61  ;;  %v8145_v39 = vmul.f32 %v8144_v11, %v13701_v62  ;;  %v8168_v4 = vmul.f32 %v8167_v15, %v13871_v10 }
0x3da6   :  { %8149 = vrot.lane.b32.xlu1 %v8147_v48, %s14163_s6  ;;  %8156 = vrot.lane.b32.xlu0 %v8154_v17, %s14166_s30  ;;  %v8632_v22 = vmul.f32 %v11072_v56, %v8631_v51  ;;  %v8717_v30 = vmul.f32 %v8716_v58, %v13854_v8  ;;  %v8529_v62 = vmul.f32 %v10941_v24, %v13835_v59  ;;  %v8486_v53 = vadd.f32 1e-05, %v8485_v14 }
0x3da8   :  { %v13941_v35 = vadd.f32 %v11073_v42, %v8632_v22  ;;  %v13948_v36 = vadd.f32 %v8717_v30, %v13858_v6  ;;  %v8530_v1 = vmul.f32 %v11072_v56, %v8529_v62  ;;  %10942 = vrsqrt.f32 %v8486_v53 }
0x3daa   :  { %8163 = vrot.lane.b32.xlu1 %v8161_v2, %s11110_s7  ;;  %v8634_v61 = vmul.f32 %v13941_v35, %v13941_v35  ;;  %v8719_v27 = vmul.f32 %v13948_v36, %v13948_v36  ;;  %v13969_v54 = vadd.f32 %v11073_v42, %v8530_v1 }
0x3dac   :  { %v8532_v10 = vmul.f32 %v13969_v54, %v13969_v54 }
0x3dae   :  { %8173 = vrot.lane.b32.xlu1 %v8171_v55, %s14163_s6 }
0x3db2   :  { %8585 = vrot.lane.b32.xlu1 %v8583_v12, %s14166_s30 }
0x3db5   :  { %v10943_v41 = vpop.eup %10942 }
0x3db6   :  { %8636 = vrot.lane.b32.xlu1 %v8634_v61, %s11110_s7  ;;  %v8488_v33 = vmul.f32 %v10943_v41, %v13906_v23 }
0x3db8   :  { %v8489_v52 = vmul.f32 %v11072_v56, %v8488_v33 }
0x3dba   :  { %8721 = vrot.lane.b32.xlu1 %v8719_v27, %s14163_s6  ;;  %v8490_v29 = vadd.f32 %v11073_v42, %v8489_v52 }
0x3dbc   :  { %v8491_v34 = vmul.f32 %v8490_v29, %v8490_v29 }
0x3dbe   :  { %v8492_v11 = vsel %vm284_vm2, %v8491_v34, 0.0 }
0x3dde   :  { %8670 = vadd.xlane.f32.xlu1 %v8669_v19 }
0x3def   :  { %8550 = vrot.lane.b32.xlu1 %v13558_v38, %s11110_s7 }
0x3e18   :  { %v8150_v31 = vpop.permute.xlu1 %8149  ;;  %v8157_v21 = vpop.permute.xlu0 %8156 }
0x3e19   :  { %v8152_v45 = vadd.f32 %v8150_v31, %v8145_v39 }
0x3e1b   :  { %v8159_v32 = vadd.f32 %v8157_v21, %v8152_v45 }
0x3e1c   :  { %v8164_v63 = vpop.permute.xlu1 %8163 }
0x3e1d   :  { %v8166_v7 = vadd.f32 %v8164_v63, %v8159_v32 }
0x3e1f   :  { %v8169_v16 = vadd.f32 %v8168_v4, %v8166_v7 }
0x3e20   :  { %v8174_v20 = vpop.permute.xlu1 %8173 }
0x3e21   :  { %v8176_v47 = vadd.f32 %v8174_v20, %v8169_v16 }
0x3e23   :  { %v8191_v28 = vmul.f32 %v8176_v47, %v8176_v47 }
0x3e24   :  { %v8586_v27 = vpop.permute.xlu1 %8585 }
0x3e25   :  { %v8192_v40 = vsel %vm284_vm2, %v8191_v28, 0.0  ;;  %v8588_v43 = vsel %vm284_vm2, %v8586_v27, 0.0 }
0x3e26   :  { %8193 = vadd.xlane.f32.xlu0 %v8192_v40 }
0x3e28   :  { %v8637_v3 = vpop.permute.xlu1 %8636 }
0x3e29   :  { %v8639_v19 = vsel %vm284_vm2, %v8637_v3, 0.0 }
0x3e2c   :  { %v8722_v13 = vpop.permute.xlu1 %8721 }
0x3e2d   :  { %v8724_v60 = vsel %vm284_vm2, %v8722_v13, 0.0 }
0x3e3c   :  { %8534 = vrot.lane.b32.xlu0 %v8532_v10, %s14163_s6 }
0x3e5b   :  { %8493 = vadd.xlane.f32.xlu0 %v8492_v11 }
0x3e67   :  { %v8671_v39 = vpop.xlane.xlu1 %8670 }
0x3e68   :  { %v8672_v31 = vmul.f32 0.03125, %v8671_v39 }
0x3e6a   :  { %v8673_v45 = vadd.f32 1e-05, %v8672_v31 }
0x3eaf   :  { %v8194_v59 = vpop.xlane.xlu0 %8193 }
0x3eb0   :  { %10944 = vrsqrt.f32 %v8194_v59  ;;  %vm8197_vm0 = vcmp.eq.f32.partialorder %v8194_v59, inf  ;;  %v8200_v17 = vand.u32 2147483648, %v8194_v59  ;;  %vm8199_vm9 = vcmp.eq.f32.partialorder %v8194_v59, 0.0 }
0x3eb3   :  { %v8535_v23 = vpop.permute.xlu0 %8534 }
0x3eb4   :  { %v8537_v37 = vsel %vm284_vm2, %v8535_v23, 0.0 }
0x3ebd   :  { %v10945_v15 = vpop.eup %10944 }
0x3ebe   :  { %v8196_v48 = vmul.f32 %v10945_v15, %v8194_v59 }
0x3ec0   :  { %v8198_v18 = vsel %vm8197_vm0, %v8194_v59, %v8196_v48 }
0x3ec1   :  { %v8201_v46 = vsel %vm8199_vm9, %v8200_v17, %v8198_v18 }
0x3ec2   :  { %v8202_v50 = vmax.f32 %v8201_v46, 1e-12 }
0x3ec4   :  { %10946 = vrcp.f32 %v8202_v50 }
0x3ed1   :  { %v10947_v2 = vpop.eup %10946 }
0x3ed2   :  { %v8204_v25 = vmul.f32 %v10947_v2, %v8176_v47 }
0x3ed4   :  { %8206 = vrot.lane.b32.xlu1 %v8204_v25, %s11110_s7 }
0x3ee4   :  { %v8494_v56 = vpop.xlane.xlu0 %8493 }
0x3ee5   :  { %10948 = vrsqrt.f32 %v8494_v56  ;;  %vm8497_vm6 = vcmp.eq.f32.partialorder %v8494_v56, inf  ;;  %v8500_v57 = vand.u32 2147483648, %v8494_v56  ;;  %vm8499_vm7 = vcmp.eq.f32.partialorder %v8494_v56, 0.0 }
0x3ef2   :  { %v10949_v26 = vpop.eup %10948 }
0x3ef3   :  { %v8496_v51 = vmul.f32 %v10949_v26, %v8494_v56  ;;  %v8551_v26 = vpop.permute.xlu1 %8550 }
0x3ef5   :  { %v8498_v55 = vsel %vm8497_vm6, %v8494_v56, %v8496_v51 }
0x3ef6   :  { %v8501_v42 = vsel %vm8499_vm7, %v8500_v57, %v8498_v55  ;;  %vm8183_vm7 = vcmp.eq.f32.partialorder %v13962_v5, inf }
0x3ef7   :  { %v8502_v22 = vmax.f32 %v8501_v42, 1e-12 }
0x3ef9   :  { %10950 = vrcp.f32 %v8502_v22 }
0x3efa   :  { %10952 = vrsqrt.f32 %v8673_v45 }
0x3f06   :  { %v10951_v58 = vpop.eup %10950 }
0x3f07   :  { %v13977_v12 = vmul.f32 %v10951_v58, %v8490_v29  ;;  %v10953_v0 = vpop.eup %10952 }
0x3f08   :  { %v8675_v21 = vmul.f32 %v10953_v0, %v13955_v49 }
0x3f09   :  { %v8505_v30 = vmul.f32 %v13977_v12, %v13558_v38 }
0x3f0a   :  { %v8676_v32 = vmul.f32 %v8675_v21, %v13854_v8 }
0x3f0b   :  { %v8506_v61 = vsel %vm284_vm2, %v8505_v30, 0.0 }
0x3f0c   :  { %8507 = vadd.xlane.f32.xlu0 %v8506_v61  ;;  %v13993_v63 = vadd.f32 %v8676_v32, %v13858_v6 }
0x3f0e   :  { %v8678_v7 = vmul.f32 %v13993_v63, %v13993_v63 }
0x3f10   :  { %8538 = vadd.xlane.f32.xlu0 %v8537_v37  ;;  %v8679_v4 = vsel %vm284_vm2, %v8678_v7, 0.0 }
0x3f14   :  { %8589 = vadd.xlane.f32.xlu0 %v8588_v43 }
0x3f18   :  { %8640 = vadd.xlane.f32.xlu0 %v8639_v19 }
0x3f1c   :  { %8725 = vadd.xlane.f32.xlu0 %v8724_v60 }
0x3f32   :  { %8601 = vrot.lane.b32.xlu0 %v13558_v38, %s14166_s30 }
0x3f36   :  { %8652 = vrot.lane.b32.xlu0 %v13558_v38, %s14163_s6 }
0x3f46   :  { %v14020_v45 = vpop.permute.xlu1 %8206 }
0x3f55   :  { %8680 = vadd.xlane.f32.xlu0 %v8679_v4 }
0x3f95   :  { %v13998_v16 = vpop.xlane.xlu0 %8507 }
0x3f99   :  { %v8539_v20 = vpop.xlane.xlu0 %8538 }
0x3f9a   :  { %10954 = vrsqrt.f32 %v8539_v20  ;;  %vm8542_vm8 = vcmp.eq.f32.partialorder %v8539_v20, inf  ;;  %v8545_v6 = vand.u32 2147483648, %v8539_v20  ;;  %vm8544_vm1 = vcmp.eq.f32.partialorder %v8539_v20, 0.0 }
0x3f9d   :  { %v8590_v47 = vpop.xlane.xlu0 %8589 }
0x3f9e   :  { %10956 = vrsqrt.f32 %v8590_v47  ;;  %vm8593_vm5 = vcmp.eq.f32.partialorder %v8590_v47, inf  ;;  %v8596_v10 = vand.u32 2147483648, %v8590_v47  ;;  %vm8595_vm10 = vcmp.eq.f32.partialorder %v8590_v47, 0.0 }
0x3fa1   :  { %v8641_v28 = vpop.xlane.xlu0 %8640 }
0x3fa2   :  { %10958 = vrsqrt.f32 %v8641_v28  ;;  %vm8644_vm11 = vcmp.eq.f32.partialorder %v8641_v28, inf  ;;  %v8647_v11 = vand.u32 2147483648, %v8641_v28  ;;  %vm8646_vm12 = vcmp.eq.f32.partialorder %v8641_v28, 0.0 }
0x3fa5   :  { %v8726_v49 = vpop.xlane.xlu0 %8725 }
0x3fa6   :  { %10960 = vrsqrt.f32 %v8726_v49  ;;  %vm8729_vm13 = vcmp.eq.f32.partialorder %v8726_v49, inf  ;;  %v8732_v46 = vand.u32 2147483648, %v8726_v49  ;;  %vm8731_vm14 = vcmp.eq.f32.partialorder %v8726_v49, 0.0 }
0x3fa7   :  { %v10955_v8 = vpop.eup %10954 }
0x3fa8   :  { %v8541_v40 = vmul.f32 %v10955_v8, %v8539_v20 }
0x3fa9   :  { %v8602_v55 = vpop.permute.xlu0 %8601 }
0x3faa   :  { %v8543_v24 = vsel %vm8542_vm8, %v8539_v20, %v8541_v40 }
0x3fab   :  { %v10957_v62 = vpop.eup %10956  ;;  %v8546_v14 = vsel %vm8544_vm1, %v8545_v6, %v8543_v24  ;;  %vm8185_vm1 = vcmp.eq.f32.partialorder %v13962_v5, 0.0 }
0x3fac   :  { %v8547_v1 = vmax.f32 %v8546_v14, 1e-12  ;;  %v8592_v53 = vmul.f32 %v10957_v62, %v8590_v47 }
0x3fae   :  { %10962 = vrcp.f32 %v8547_v1  ;;  %v8594_v41 = vsel %vm8593_vm5, %v8590_v47, %v8592_v53  ;;  %vm8845_vm5 = vcmask 517120  }
0x3faf   :  { %v10959_v33 = vpop.eup %10958  ;;  %v8597_v52 = vsel %vm8595_vm10, %v8596_v10, %v8594_v41 }
0x3fb0   :  { %v8598_v29 = vmax.f32 %v8597_v52, 1e-12  ;;  %v8643_v34 = vmul.f32 %v10959_v33, %v8641_v28 }
0x3fb2   :  { %10964 = vrcp.f32 %v8598_v29  ;;  %v8645_v59 = vsel %vm8644_vm11, %v8641_v28, %v8643_v34 }
0x3fb3   :  { %v10961_v15 = vpop.eup %10960  ;;  %v8648_v48 = vsel %vm8646_vm12, %v8647_v11, %v8645_v59 }
0x3fb4   :  { %v8649_v17 = vmax.f32 %v8648_v48, 1e-12  ;;  %v8728_v18 = vmul.f32 %v10961_v15, %v8726_v49 }
0x3fb6   :  { %10966 = vrcp.f32 %v8649_v17  ;;  %v8730_v50 = vsel %vm8729_vm13, %v8726_v49, %v8728_v18 }
0x3fb7   :  { %v8733_v2 = vsel %vm8731_vm14, %v8732_v46, %v8730_v50 }
0x3fb8   :  { %v8734_v25 = vmax.f32 %v8733_v2, 1e-12 }
0x3fba   :  { %10968 = vrcp.f32 %v8734_v25 }
0x3fbb   :  { %v10963_v23 = vpop.eup %10962 }
0x3fbc   :  { %v14001_v56 = vmul.f32 %v10963_v23, %v13969_v54  ;;  %v8653_v54 = vpop.permute.xlu0 %8652 }
0x3fbe   :  { %v8553_v51 = vmul.f32 %v8551_v26, %v14001_v56 }
0x3fbf   :  { %v10965_v57 = vpop.eup %10964 }
0x3fc0   :  { %v14005_v42 = vmul.f32 %v10965_v57, %v13935_v9  ;;  %8555 = vrot.lane.b32.xlu0 %v8553_v51, %s14163_s6 }
0x3fc2   :  { %v8604_v22 = vmul.f32 %v8602_v55, %v14005_v42 }
0x3fc3   :  { %v10967_v58 = vpop.eup %10966 }
0x3fc4   :  { %v14010_v30 = vmul.f32 %v10967_v58, %v13941_v35  ;;  %8606 = vrot.lane.b32.xlu1 %v8604_v22, %s14166_s30 }
0x3fc6   :  { %v8655_v61 = vmul.f32 %v8653_v54, %v14010_v30 }
0x3fc7   :  { %v10969_v27 = vpop.eup %10968 }
0x3fc8   :  { %8657 = vrot.lane.b32.xlu0 %v8655_v61, %s11110_s7  ;;  %v14016_v37 = vmul.f32 %v10969_v27, %v13948_v36 }
0x3fca   :  { %v8737_v9 = vmul.f32 %v14016_v37, %v8551_v26 }
0x3fcc   :  { %8739 = vrot.lane.b32.xlu0 %v8737_v9, %s14163_s6 }
0x3fde   :  { %v8681_v3 = vpop.xlane.xlu0 %8680 }
0x3fdf   :  { %10970 = vrsqrt.f32 %v8681_v3  ;;  %vm8684_vm15 = vcmp.eq.f32.partialorder %v8681_v3, inf  ;;  %v8687_v13 = vand.u32 2147483648, %v8681_v3  ;;  %vm8686_vm0 = vcmp.eq.f32.partialorder %v8681_v3, 0.0 }
0x3fec   :  { %v10971_v43 = vpop.eup %10970 }
0x3fed   :  { %v8683_v35 = vmul.f32 %v10971_v43, %v8681_v3 }
0x3fef   :  { %v8685_v19 = vsel %vm8684_vm15, %v8681_v3, %v8683_v35 }
0x3ff0   :  { %v8688_v60 = vsel %vm8686_vm0, %v8687_v13, %v8685_v19 }
0x3ff1   :  { %v8689_v39 = vmax.f32 %v8688_v60, 1e-12 }
0x3ff3   :  { %10972 = vrcp.f32 %v8689_v39 }
0x4000   :  { %v10973_v31 = vpop.eup %10972 }
0x4001   :  { %v14024_v21 = vmul.f32 %v10973_v31, %v13993_v63 }
0x4003   :  { %v8692_v4 = vmul.f32 %v14024_v21, %v13558_v38 }
0x4005   :  { %v8693_v28 = vsel %vm284_vm2, %v8692_v4, 0.0 }
0x4032   :  { %v8556_v36 = vpop.permute.xlu0 %8555 }
0x4033   :  { %v8558_v0 = vsel %vm284_vm2, %v8556_v36, 0.0  ;;  %v8808_v36 = vmul.f32 %v13558_v38, %v13558_v38 }
0x4034   :  { %8559 = vadd.xlane.f32.xlu1 %v8558_v0 }
0x4036   :  { %v8607_v32 = vpop.permute.xlu1 %8606 }
0x4037   :  { %v8609_v7 = vsel %vm284_vm2, %v8607_v32, 0.0 }
0x4038   :  { %8610 = vadd.xlane.f32.xlu1 %v8609_v7 }
0x403a   :  { %v8658_v20 = vpop.permute.xlu0 %8657 }
0x403b   :  { %v8660_v47 = vsel %vm284_vm2, %v8658_v20, 0.0 }
0x403c   :  { %8661 = vadd.xlane.f32.xlu0 %v8660_v47  ;;  %8694 = vadd.xlane.f32.xlu1 %v8693_v28 }
0x403e   :  { %v8740_v49 = vpop.permute.xlu0 %8739 }
0x403f   :  { %v8742_v8 = vsel %vm284_vm2, %v8740_v49, 0.0 }
0x4040   :  { %8743 = vadd.xlane.f32.xlu1 %v8742_v8 }
0x40bd   :  { %v8560_v63 = vpop.xlane.xlu1 %8559 }
0x40be   :  { %v8745_v6 = vmax.f32 %v13998_v16, %v8560_v63 }
0x40c1   :  { %v8611_v40 = vpop.xlane.xlu1 %8610 }
0x40c2   :  { %v8746_v24 = vmax.f32 %v8745_v6, %v8611_v40 }
0x40c5   :  { %v8662_v62 = vpop.xlane.xlu0 %8661  ;;  %v8695_v14 = vpop.xlane.xlu1 %8694 }
0x40c6   :  { %v8747_v1 = vmax.f32 %v8746_v24, %v8662_v62 }
0x40c8   :  { %v8748_v53 = vmax.f32 %v8747_v1, %v8695_v14 }
0x40c9   :  { %v8744_v10 = vpop.xlane.xlu1 %8743 }
0x40ca   :  { %v8749_v41 = vmax.f32 %v8748_v53, %v8744_v10 }
0x40cc   :  { %v8750_v33 = vsub.f32 %v13998_v16, %v8749_v41  ;;  %v8753_v52 = vsub.f32 %v8560_v63, %v8749_v41  ;;  %v8756_v29 = vsub.f32 %v8611_v40, %v8749_v41  ;;  %v8759_v34 = vsub.f32 %v8662_v62, %v8749_v41 }
0x40cd   :  { %v8762_v48 = vsub.f32 %v8695_v14, %v8749_v41  ;;  %v8765_v18 = vsub.f32 %v8744_v10, %v8749_v41 }
0x40ce   :  { %v8751_v11 = vmul.f32 1.442695, %v8750_v33  ;;  %v8754_v59 = vmul.f32 1.442695, %v8753_v52  ;;  %v8757_v15 = vmul.f32 1.442695, %v8756_v29 }
0x40cf   :  { %v8760_v17 = vmul.f32 1.442695, %v8759_v34  ;;  %v8763_v46 = vmul.f32 1.442695, %v8762_v48  ;;  %v8766_v50 = vmul.f32 1.442695, %v8765_v18 }
0x40d0   :  { %10974 = vpow2.f32 %v8751_v11 }
0x40d1   :  { %10976 = vpow2.f32 %v8754_v59 }
0x40d2   :  { %10978 = vpow2.f32 %v8757_v15  ;;  %v8186_v15 = vand.u32 2147483648, %v13962_v5 }
0x40d3   :  { %10980 = vpow2.f32 %v8760_v17 }
0x40d4   :  { %10982 = vpow2.f32 %v8763_v46 }
0x40d5   :  { %10984 = vpow2.f32 %v8766_v50 }
0x40dd   :  { %v10975_v2 = vpop.eup %10974 }
0x40de   :  { %v10977_v25 = vpop.eup %10976 }
0x40df   :  { %v8768_v16 = vadd.f32 %v10977_v25, %v10975_v2  ;;  %v10979_v23 = vpop.eup %10978 }
0x40e0   :  { %v10981_v51 = vpop.eup %10980 }
0x40e1   :  { %v8769_v26 = vadd.f32 %v10979_v23, %v8768_v16  ;;  %v10983_v55 = vpop.eup %10982 }
0x40e2   :  { %v10985_v58 = vpop.eup %10984 }
0x40e3   :  { %v8770_v57 = vadd.f32 %v10981_v51, %v8769_v26 }
0x40e5   :  { %v8771_v22 = vadd.f32 %v10983_v55, %v8770_v57 }
0x40e7   :  { %v8772_v54 = vadd.f32 %v10985_v58, %v8771_v22 }
0x40e9   :  { %10986 = vrcp.f32 %v8772_v54 }
0x40f6   :  { %v10987_v61 = vpop.eup %10986 }
0x40f7   :  { %v8791_v27 = vmul.f32 %v10987_v61, %v10981_v51  ;;  %v8777_v9 = vmul.f32 %v10987_v61, %v10977_v25  ;;  %v8775_v3 = vmul.f32 %v10987_v61, %v10975_v2  ;;  %v8798_v43 = vmul.f32 %v10987_v61, %v10983_v55 }
0x40f8   :  { %v8784_v13 = vmul.f32 %v10987_v61, %v10979_v23  ;;  %v8801_v39 = vmul.f32 %v10987_v61, %v10985_v58 }
0x40f9   :  { %v8792_v35 = vmul.f32 %v8791_v27, %v14010_v30  ;;  %v8778_v19 = vmul.f32 %v8777_v9, %v14001_v56  ;;  %v8809_v30 = vsel %vm284_vm2, %v8808_v36, 0.0  ;;  %v8776_v0 = vmul.f32 %v8775_v3, %v13977_v12 }
0x40fa   :  { %v8785_v60 = vmul.f32 %v8784_v13, %v14005_v42  ;;  %v8802_v31 = vmul.f32 %v8801_v39, %v14016_v37  ;;  %v8799_v47 = vmul.f32 %v8798_v43, %v14024_v21 }
0x40fb   :  { %8794 = vrot.lane.b32.xlu0 %v8792_v35, %s11110_s7  ;;  %8780 = vrot.lane.b32.xlu1 %v8778_v19, %s14163_s6 }
0x40ff   :  { %8787 = vrot.lane.b32.xlu1 %v8785_v60, %s14166_s30 }
0x4103   :  { %8804 = vrot.lane.b32.xlu1 %v8802_v31, %s14163_s6  ;;  %s11111_s6 = smov [#allocation2]  }
0x4104   :  { %s8853_s30 = sshll.u32 %s11111_s6, 4  ;;  %s8854_s30 = int_to_ptr.vmem [resolvable:$true] %s8853_s30 }
0x4105   :  { %s11074_s1 = scalar_lea.vmem %s8854_s30, 32  ;;  %p11079_p1 = scmp.lt.s32.totalorder %s8854_s30, %s8854_s30 }
0x4106   :  { %p11075_p0 = scmp.ne.s32.totalorder %s8854_s30, %s11074_s1  ;;  %p11080_p2 = scmp.lt.s32.totalorder %s11074_s1, %s11074_s1 }
0x4108   :  { %p11081_p3 = por %p11080_p2, %p11079_p1 }
0x410a   :  { %p11082_p4 = pnand %p11081_p3, %p11075_p0 }
0x4127   :  { %8810 = vadd.xlane.f32.xlu1 %v8809_v30 }
0x416d   :  { %v8781_v56 = vpop.permute.xlu1 %8780  ;;  %v8795_v42 = vpop.permute.xlu0 %8794 }
0x416e   :  { %v8783_v32 = vadd.f32 %v8781_v56, %v8776_v0 }
0x4171   :  { %v8788_v7 = vpop.permute.xlu1 %8787 }
0x4172   :  { %v8790_v4 = vadd.f32 %v8788_v7, %v8783_v32 }
0x4174   :  { %v8797_v20 = vadd.f32 %v8795_v42, %v8790_v4 }
0x4175   :  { %v8805_v37 = vpop.permute.xlu1 %8804 }
0x4176   :  { %v8800_v28 = vadd.f32 %v8799_v47, %v8797_v20 }
0x4178   :  { %v8807_v49 = vadd.f32 %v8805_v37, %v8800_v28 }
0x417a   :  { %v8822_v8 = vmul.f32 %v8807_v49, %v8807_v49 }
0x417c   :  { %v8823_v63 = vsel %vm284_vm2, %v8822_v8, 0.0 }
0x417d   :  { %8824 = vadd.xlane.f32.xlu0 %v8823_v63 }
0x41b0   :  { %v8811_v10 = vpop.xlane.xlu1 %8810 }
0x41b1   :  { %vm8814_vm2 = vcmp.eq.f32.partialorder %v8811_v10, inf  ;;  %v8817_v11 = vand.u32 2147483648, %v8811_v10  ;;  %vm8816_vm8 = vcmp.eq.f32.partialorder %v8811_v10, 0.0 }
0x4206   :  { %v8825_v40 = vpop.xlane.xlu0 %8824 }
0x4207   :  { %10988 = vrsqrt.f32 %v8825_v40  ;;  %vm8828_vm9 = vcmp.eq.f32.partialorder %v8825_v40, inf  ;;  %v8831_v12 = vand.u32 2147483648, %v8825_v40  ;;  %vm8830_vm6 = vcmp.eq.f32.partialorder %v8825_v40, 0.0 }
0x4214   :  { %v10989_v6 = vpop.eup %10988 }
0x4215   :  { %v8827_v24 = vmul.f32 %v10989_v6, %v8825_v40 }
0x4217   :  { %v8829_v62 = vsel %vm8828_vm9, %v8825_v40, %v8827_v24 }
0x4218   :  { %v8832_v14 = vsel %vm8830_vm6, %v8831_v12, %v8829_v62 }
0x4219   :  { %v8833_v1 = vmax.f32 %v8832_v14, 1e-12 }
0x421b   :  { %10990 = vrcp.f32 %v8833_v1 }
0x421c   :  { %10992 = vrsqrt.f32 %v8811_v10 }
0x421d   :  { %10994 = vrsqrt.f32 %v13962_v5 }
0x4228   :  { %v10991_v53 = vpop.eup %10990 }
0x4229   :  { %v8835_v21 = vmul.f32 %v10991_v53, %v8807_v49  ;;  %v10993_v41 = vpop.eup %10992 }
0x422a   :  { %v10995_v33 = vpop.eup %10994  ;;  %v8813_v52 = vmul.f32 %v10993_v41, %v8811_v10 }
0x422b   :  { %8837 = vrot.lane.b32.xlu1 %v8835_v21, %s11110_s7  ;;  %v8182_v29 = vmul.f32 %v10995_v33, %v13962_v5 }
0x422c   :  { %v8815_v34 = vsel %vm8814_vm2, %v8811_v10, %v8813_v52 }
0x422d   :  { %v8184_v59 = vsel %vm8183_vm7, %v13962_v5, %v8182_v29  ;;  %v8818_v48 = vsel %vm8816_vm8, %v8817_v11, %v8815_v34 }
0x422e   :  { %v8187_v17 = vsel %vm8185_vm1, %v8186_v15, %v8184_v59  ;;  %v8819_v18 = vmax.f32 %v8818_v48, 1e-12 }
0x422f   :  { %v8188_v46 = vmax.f32 %v8187_v17, 1e-12 }
0x4230   :  { %10996 = vrcp.f32 %v8819_v18 }
0x4231   :  { %10998 = vrcp.f32 %v8188_v46 }
0x423d   :  { %v10997_v50 = vpop.eup %10996 }
0x423e   :  { %v10999_v2 = vpop.eup %10998  ;;  %v8821_v25 = vmul.f32 %v10997_v50, %v13558_v38 }
0x423f   :  { %v8190_v23 = vmul.f32 %v10999_v2, %v13540_v44 }
0x4241   :  { %v8209_v5 = vsel %vm277_vm4, %v8190_v23, %v14020_v45 }
0x429d   :  { %v8838_v16 = vpop.permute.xlu1 %8837 }
0x429e   :  { %v8840_v26 = vsel %vm277_vm4, %v8821_v25, %v8838_v16 }
0x429f   :  { %v8842_v51 = vrot.slane %v8840_v26, 7 }
0x42a1   :  { %v8844_v57 = vsel %vm222_vm3, %v8209_v5, %v8842_v51 }
0x42a2   :  { %8846 = vst.msk [vmem:[#allocation2] sm:$0x3] %vm8845_vm5, %v8844_v57 }
0x42a3   :  { %11085 = shalt.err (!%p11082_p4)
}
0x42a4   :  { %s14184_s16 = sld [smem:[#allocation27_spill]] }
0x42aa   :  { %8856 = dma.vmem_to_hbm [thread:$0]  %s8854_s30, 32, %s14184_s16, [#allocation3]  }
0x42ab   :  { %11094 = dma.done.wait [#allocation3], 32  }
0x42ac   :  { %11095 = vsyncadd [#allocation3], 4294967264 }
0x42ad   :  { %8860 = vsyncpa [#allocation3], 1 }

</bundles_post_ra>
